<compile_context>
chip_gen: v7x
topology: tpu7x:2x2x1
jax: 0.10.0
libtpu: 0.0.40
codegen_flags: <defaults>
</compile_context>

<pallas_src>
import numpy as np
import jax
import jax.numpy as jnp
from jax import lax
from jax.experimental import pallas as pl
from jax.experimental.pallas import tpu as pltpu

# MXU operand / intermediate dtype (accumulation is always f32 via
# preferred_element_type).  Set to jnp.float32 for bit-closer parity runs.
MATMUL_DTYPE = jnp.bfloat16
BN_EPS = 1e-5

_VMEM_LIMIT = None


def _vmem_limit_bytes():
    """Per-generation scoped-VMEM limit (don't penalize v5e/v6e for v7x)."""
    global _VMEM_LIMIT
    if _VMEM_LIMIT is None:
        try:
            cap = pltpu.get_tpu_info().vmem_capacity_bytes
        except Exception:  # pragma: no cover - defensive fallback
            cap = 64 * 1024 * 1024
        _VMEM_LIMIT = (96 * 1024 * 1024 if cap >= 128 * 1024 * 1024
                       else 48 * 1024 * 1024)
    return _VMEM_LIMIT


def _compiler_params(dimension_semantics):
    return pltpu.CompilerParams(
        dimension_semantics=dimension_semantics,
        vmem_limit_bytes=_vmem_limit_bytes())


def _zero_pad_frame(ref, top, bottom, left, right):
    """Zero only the border/pad frame of a (Hp, Wp, C) halo scratch.

    Cheap thin strips instead of a full-buffer zero-fill.  Done every grid
    step (interiors are fully rewritten each step), so every grid iteration is
    self-contained -> safe when the batch axis is split across TensorCores.
    """
    Hp, Wp, C = ref.shape
    dt = ref.dtype
    ref[0:top, :, :] = jnp.zeros((top, Wp, C), dt)
    ref[Hp - bottom:Hp, :, :] = jnp.zeros((bottom, Wp, C), dt)
    ref[:, 0:left, :] = jnp.zeros((Hp, left, C), dt)
    ref[:, Wp - right:Wp, :] = jnp.zeros((Hp, right, C), dt)


# ----------------------------------------------------------------------------
# kernel 1: upsample + pad + concat + conv1 (+ BN1 partial stats), lane-dense
# ----------------------------------------------------------------------------
def conv1_fused(x2, x1_flat, up_mat, w1, Ho, Wo, pad_top, pad_left):
    """z1[n] = conv3x3(cat([x2[n], pad(up2(x1[n]))], ch)) stored as (Cout,HW)."""
    N, H, W, C2 = x2.shape
    _, hw1, C1 = x1_flat.shape
    Cout, K = w1.shape
    C = C2 + C1
    assert K == 9 * C
    HW = H * W
    HoWo = Ho * Wo
    pad_bot = H - Ho - pad_top
    pad_right = W - Wo - pad_left
    assert pad_top >= 0 and pad_bot >= 0 and pad_left >= 0 and pad_right >= 0

    def kernel(x2_ref, x1_ref, u_ref, w_ref, z_ref, st_ref, xp2, xp1, pat):
        # Fused bilinear 2x upsample (align_corners=True): one constant f32
        # interpolation matmul, never round-tripping the upsampled map to HBM.
        xu = jnp.dot(u_ref[...], x1_ref[0],
                     preferred_element_type=jnp.float32)          # (HoWo, C1)
        xu = xu.reshape(Ho, Wo, C1)
        # Zero only the halo/pad frames (thin strips), then write interiors:
        # pad + channel-concat fused in VMEM, never materialized in HBM.
        _zero_pad_frame(xp2, 1, 1, 1, 1)
        _zero_pad_frame(xp1, 1 + pad_top, 1 + pad_bot,
                        1 + pad_left, 1 + pad_right)
        xp2[1:1 + H, 1:1 + W, :] = x2_ref[0].astype(xp2.dtype)
        xp1[1 + pad_top:1 + pad_top + Ho,
            1 + pad_left:1 + pad_left + Wo, :] = xu.astype(xp1.dtype)
        # im2col into a preallocated (H, W, 9*C) bf16 scratch (no 18-way
        # concatenate); per-tap channel order = [x2 | x1] = torch.cat order.
        for t in range(9):
            dy, dx = t // 3, t % 3
            base = t * C
            pat[:, :, base:base + C2] = xp2[dy:dy + H, dx:dx + W, :]
            pat[:, :, base + C2:base + C] = xp1[dy:dy + H, dx:dx + W, :]
        patches = pat[...].reshape(HW, K)                         # bf16
        # w (Cout, K) contracted with patches (HW, K) on the last dims:
        # (Cout, HW) result -> lane-dense, unmasked stores.
        z = lax.dot_general(w_ref[...], patches,
                            dimension_numbers=(((1,), (1,)), ((), ())),
                            preferred_element_type=jnp.float32)   # (Cout, HW)
        z_ref[0] = z.astype(z_ref.dtype)                          # bf16 to HBM
        # One-pass per-image BN1 partials in f32 (global stats reduced in JAX).
        s = jnp.sum(z, axis=1, keepdims=True)
        sq = jnp.sum(z * z, axis=1, keepdims=True)
        st_ref[0] = jnp.concatenate([s, sq], axis=1)              # (Cout, 2)

    return pl.pallas_call(
        kernel,
        grid=(N,),
        in_specs=[
            pl.BlockSpec((1, H, W, C2), lambda n: (n, 0, 0, 0)),
            pl.BlockSpec((1, hw1, C1), lambda n: (n, 0, 0)),
            pl.BlockSpec((HoWo, hw1), lambda n: (0, 0)),
            pl.BlockSpec((Cout, K), lambda n: (0, 0)),
        ],
        out_specs=(
            pl.BlockSpec((1, Cout, HW), lambda n: (n, 0, 0)),
            pl.BlockSpec((1, Cout, 2), lambda n: (n, 0, 0)),
        ),
        out_shape=(
            jax.ShapeDtypeStruct((N, Cout, HW), MATMUL_DTYPE),
            jax.ShapeDtypeStruct((N, Cout, 2), jnp.float32),
        ),
        scratch_shapes=[
            pltpu.VMEM((H + 2, W + 2, C2), MATMUL_DTYPE),
            pltpu.VMEM((H + 2, W + 2, C1), MATMUL_DTYPE),
            pltpu.VMEM((H, W, K), MATMUL_DTYPE),
        ],
        compiler_params=_compiler_params(("parallel",)),
    )(x2, x1_flat, up_mat, w1)


# ----------------------------------------------------------------------------
# kernel 2: BN1 apply + ReLU + conv2 (+ BN2 partial stats), lane-dense output
# ----------------------------------------------------------------------------
def bn_relu_conv2_fused(z1, scale1, shift1, w2, H, W):
    N, Cin, HW = z1.shape
    Cout, K = w2.shape
    assert K == 9 * Cin and HW == H * W

    def kernel(z_ref, sc_ref, sh_ref, w_ref, z2_ref, st_ref, yp, pat):
        # BN1 (precomputed global scale/shift) + ReLU on the lane-dense z1.
        y = jnp.maximum(z_ref[0].astype(jnp.float32) * sc_ref[...]
                        + sh_ref[...], 0.0)                       # (Cin, HW)
        # Small XLU transpose to the HWC layout used for im2col (the price of
        # the lane-dense z1 store in kernel 1).
        yhwc = jnp.transpose(y).reshape(H, W, Cin)
        _zero_pad_frame(yp, 1, 1, 1, 1)
        yp[1:1 + H, 1:1 + W, :] = yhwc.astype(yp.dtype)
        for t in range(9):
            dy, dx = t // 3, t % 3
            pat[:, :, t * Cin:(t + 1) * Cin] = yp[dy:dy + H, dx:dx + W, :]
        patches = pat[...].reshape(HW, K)
        z2 = lax.dot_general(w_ref[...], patches,
                             dimension_numbers=(((1,), (1,)), ((), ())),
                             preferred_element_type=jnp.float32)  # (Cout, HW)
        z2_ref[0] = z2
        s = jnp.sum(z2, axis=1, keepdims=True)
        sq = jnp.sum(z2 * z2, axis=1, keepdims=True)
        st_ref[0] = jnp.concatenate([s, sq], axis=1)              # (Cout, 2)

    return pl.pallas_call(
        kernel,
        grid=(N,),
        in_specs=[
            pl.BlockSpec((1, Cin, HW), lambda n: (n, 0, 0)),
            pl.BlockSpec((Cin, 1), lambda n: (0, 0)),
            pl.BlockSpec((Cin, 1), lambda n: (0, 0)),
            pl.BlockSpec((Cout, K), lambda n: (0, 0)),
        ],
        out_specs=(
            pl.BlockSpec((1, Cout, HW), lambda n: (n, 0, 0)),
            pl.BlockSpec((1, Cout, 2), lambda n: (n, 0, 0)),
        ),
        out_shape=(
            jax.ShapeDtypeStruct((N, Cout, HW), jnp.float32),
            jax.ShapeDtypeStruct((N, Cout, 2), jnp.float32),
        ),
        scratch_shapes=[
            pltpu.VMEM((H + 2, W + 2, Cin), MATMUL_DTYPE),
            pltpu.VMEM((H, W, K), MATMUL_DTYPE),
        ],
        compiler_params=_compiler_params(("parallel",)),
    )(z1, scale1, shift1, w2)


# ----------------------------------------------------------------------------
# kernel 3: BN2 apply + ReLU, whole slab in one step, in-place over z2
# ----------------------------------------------------------------------------
def bn_relu_apply(z2, scale2, shift2):
    N, Cout, HW = z2.shape

    def kernel(z_ref, sc_ref, sh_ref, o_ref):
        o_ref[...] = jnp.maximum(z_ref[...] * sc_ref[...] + sh_ref[...], 0.0)

    return pl.pallas_call(
        kernel,
        grid=(1,),
        in_specs=[
            pl.BlockSpec((N, Cout, HW), lambda i: (0, 0, 0)),
            pl.BlockSpec((Cout, 1), lambda i: (0, 0)),
            pl.BlockSpec((Cout, 1), lambda i: (0, 0)),
        ],
        out_specs=pl.BlockSpec((N, Cout, HW), lambda i: (0, 0, 0)),
        out_shape=jax.ShapeDtypeStruct((N, Cout, HW), jnp.float32),
        input_output_aliases={0: 0},
        compiler_params=_compiler_params(("arbitrary",)),
    )(z2, scale2, shift2)


# ----------------------------------------------------------------------------
# glue (plain JAX / trace-time constants)
# ----------------------------------------------------------------------------
def _interp_matrix_1d(n_in, n_out):
    """Rows of bilinear (align_corners=True) interpolation weights."""
    m = np.zeros((n_out, n_in), np.float32)
    if n_in == 1 or n_out == 1:
        m[:, 0] = 1.0
        return m
    src = np.arange(n_out, dtype=np.float64) * (n_in - 1) / (n_out - 1)
    i0 = np.clip(np.floor(src).astype(np.int64), 0, n_in - 1)
    i1 = np.minimum(i0 + 1, n_in - 1)
    f = src - i0
    for o in range(n_out):
        m[o, i0[o]] += 1.0 - f[o]
        m[o, i1[o]] += f[o]
    return m


def _bilinear_matrix(h1, w1, Ho, Wo):
    """(Ho*Wo, h1*w1) separable bilinear upsample operator (trace-time const).

    TODO(synk): at large tiled sizes use the separable two-matmul form instead
    of the Kronecker operator to keep the constant small.
    """
    return np.kron(_interp_matrix_1d(h1, Ho), _interp_matrix_1d(w1, Wo))


def _bn_scale_shift(sum_c, sumsq_c, count, gamma, beta):
    """Fold global batch stats + affine params into per-channel scale/shift."""
    mean = sum_c / count
    var = jnp.maximum(sumsq_c / count - mean * mean, 0.0)
    scale = gamma * lax.rsqrt(var + BN_EPS)
    shift = beta - mean * scale
    return scale, shift


@jax.jit
def up_layer_forward(x1_nchw, x2_nchw, params):
    """UpLayer.forward(x1, x2) with bilinear=True. Returns NCHW output."""
    N, C2, H, W = x2_nchw.shape
    _, C1, h1, w1 = x1_nchw.shape
    Ho, Wo = 2 * h1, 2 * w1
    pad_top, pad_left = (H - Ho) // 2, (W - Wo) // 2  # F.pad split convention
    # TODO(synk): negative pads (upsampled x1 larger than x2) are not handled.

    # Boundary layout changes only (cheap XLA transpose/reshape of the inputs;
    # the output side needs none - kernel 3's result is already NCHW-flat).
    x2 = jnp.transpose(x2_nchw, (0, 2, 3, 1)).astype(MATMUL_DTYPE)      # NHWC
    x1_flat = jnp.transpose(x1_nchw, (0, 2, 3, 1)) \
                 .reshape(N, h1 * w1, C1).astype(jnp.float32)
    up_mat = jnp.asarray(_bilinear_matrix(h1, w1, Ho, Wo))  # (HoWo, h1w1) f32

    Cout = params["w1"].shape[0]
    HW = H * W
    count = float(N * HW)

    # conv1 with upsample + concat + both zero-pads fused in-kernel.
    z1, st1 = conv1_fused(x2, x1_flat, up_mat, params["w1"],
                          Ho, Wo, pad_top, pad_left)

    # Global BN1 statistics from the per-image partials (tiny reduction).
    scale1, shift1 = _bn_scale_shift(
        jnp.sum(st1[:, :, 0], axis=0), jnp.sum(st1[:, :, 1], axis=0),
        count, params["g1"], params["be1"])

    # BN1 apply + ReLU + conv2 + BN2 partials, one fused kernel.
    z2, st2 = bn_relu_conv2_fused(
        z1, scale1.reshape(Cout, 1), shift1.reshape(Cout, 1),
        params["w2"], H, W)

    scale2, shift2 = _bn_scale_shift(
        jnp.sum(st2[:, :, 0], axis=0), jnp.sum(st2[:, :, 1], axis=0),
        count, params["g2"], params["be2"])

    # BN2 apply + ReLU in place; (N, Cout, H*W) -> NCHW reshape is free.
    y = bn_relu_apply(z2, scale2.reshape(Cout, 1), shift2.reshape(Cout, 1))
    return y.reshape(N, Cout, H, W)


# ----------------------------------------------------------------------------
# parameter preparation (PyTorch OIHW conv weights -> kernel layouts)
# ----------------------------------------------------------------------------
def prep_conv_weight(w_oihw):
    """(Cout, Cin, 3, 3) -> (Cout, 9*Cin), tap-major / channel-minor."""
    co, ci = w_oihw.shape[0], w_oihw.shape[1]
    return jnp.transpose(w_oihw, (0, 2, 3, 1)).reshape(co, 9 * ci).astype(
        MATMUL_DTYPE)


def make_params(in_ch, out_ch, key):
    k1, k2 = jax.random.split(key, 2)
    w1_oihw = 0.1 * jax.random.normal(k1, (out_ch, in_ch, 3, 3), jnp.float32)
    w2_oihw = 0.1 * jax.random.normal(k2, (out_ch, out_ch, 3, 3), jnp.float32)
    # Conv biases omitted: training-mode BatchNorm subtracts the batch mean
    # right after the conv, which cancels a per-channel bias exactly.
    return {
        "w1": prep_conv_weight(w1_oihw),
        "g1": jnp.ones((out_ch,), jnp.float32),
        "be1": jnp.zeros((out_ch,), jnp.float32),
        "w2": prep_conv_weight(w2_oihw),
        "g2": jnp.ones((out_ch,), jnp.float32),
        "be2": jnp.zeros((out_ch,), jnp.float32),
    }


if __name__ == "__main__":
    key = jax.random.PRNGKey(0)
    k_x1, k_x2, k_p = jax.random.split(key, 3)

    # UpLayer(in_ch=8, out_ch=4, bilinear=True)
    in_ch, out_ch = 8, 4
    N = 2
    # x1: low-res feature map (to be upsampled); x2: skip connection (NCHW).
    x1 = jax.random.normal(k_x1, (N, in_ch // 2, 8, 8), jnp.float32)
    x2 = jax.random.normal(k_x2, (N, in_ch // 2, 16, 16), jnp.float32)

    params = make_params(in_ch, out_ch, k_p)

    out = up_layer_forward(x1, x2, params)
    out = jax.block_until_ready(out)
    assert out.shape == (N, out_ch, 16, 16)
    assert bool(jnp.all(jnp.isfinite(out)))
    print("KERNEL_OK")
</pallas_src>

<mosaic_0001>
module attributes {stable_mosaic.version = 11 : i64} {
  func.func @kernel(%arg0: i32, %arg1: memref<1x16x16x4xbf16, #tpu.memory_space<vmem>>, %arg2: memref<1x64x4xf32, #tpu.memory_space<vmem>>, %arg3: memref<256x64xf32, #tpu.memory_space<vmem>>, %arg4: memref<4x72xbf16, #tpu.memory_space<vmem>>, %arg5: memref<1x4x256xbf16, #tpu.memory_space<vmem>>, %arg6: memref<1x4x2xf32, #tpu.memory_space<vmem>>, %arg7: memref<18x18x4xbf16, #tpu.memory_space<vmem>>, %arg8: memref<18x18x4xbf16, #tpu.memory_space<vmem>>, %arg9: memref<16x16x72xbf16, #tpu.memory_space<vmem>>) attributes {dimension_semantics = [#tpu.dimension_semantics<parallel>], iteration_bounds = array<i64: 2>, scalar_prefetch = 0 : i64, scratch_operands = 3 : i64, tpu.core_type = #tpu.core_type<tc>, window_params = [{transform_indices = @transform_0, window_bounds = array<i64: 1, 16, 16, 4>}, {transform_indices = @transform_1, window_bounds = array<i64: 1, 64, 4>}, {pipeline_mode = #tpu.pipeline_mode<synchronous>, transform_indices = @transform_2, window_bounds = array<i64: 256, 64>}, {pipeline_mode = #tpu.pipeline_mode<synchronous>, transform_indices = @transform_3, window_bounds = array<i64: 4, 72>}, {transform_indices = @transform_4, window_bounds = array<i64: 1, 4, 256>}, {transform_indices = @transform_5, window_bounds = array<i64: 1, 4, 2>}]} {
    %c0 = arith.constant 0 : index
    %c0_0 = arith.constant 0 : index
    %0 = vector.load %arg3[%c0, %c0_0] : memref<256x64xf32, #tpu.memory_space<vmem>>, vector<256x64xf32>
    %c0_1 = arith.constant 0 : index
    %c0_2 = arith.constant 0 : index
    %c0_3 = arith.constant 0 : index
    %1 = vector.load %arg2[%c0_1, %c0_2, %c0_3] : memref<1x64x4xf32, #tpu.memory_space<vmem>>, vector<1x64x4xf32>
    %2 = vector.shape_cast %1 : vector<1x64x4xf32> to vector<64x4xf32>
    %cst = arith.constant dense<0.000000e+00> : vector<256x4xf32>
    %3 = tpu.matmul %0, %2, %cst {dimension_numbers = #tpu.dot_dimension_numbers<[1], [0], [0], [1], [0, 0, 1, 1], [], []>} : vector<256x64xf32>, vector<64x4xf32>, vector<256x4xf32> -> vector<256x4xf32>
    %4 = vector.shape_cast %3 : vector<256x4xf32> to vector<16x16x4xf32>
    %cst_4 = arith.constant 0.000000e+00 : bf16
    %5 = vector.broadcast %cst_4 : bf16 to vector<1x18x4xbf16>
    %c0_5 = arith.constant 0 : index
    %c0_6 = arith.constant 0 : index
    %c0_7 = arith.constant 0 : index
    %6 = vector.load %arg7[%c0_5, %c0_6, %c0_7] : memref<18x18x4xbf16, #tpu.memory_space<vmem>>, vector<1x18x4xbf16>
    tpu.vector_store %arg7[%c0_5, %c0_6, %c0_7], %5 {strides = array<i32>} : memref<18x18x4xbf16, #tpu.memory_space<vmem>>, vector<1x18x4xbf16>,
    %cst_8 = arith.constant 0.000000e+00 : bf16
    %7 = vector.broadcast %cst_8 : bf16 to vector<1x18x4xbf16>
    %c17 = arith.constant 17 : index
    %c0_9 = arith.constant 0 : index
    %c0_10 = arith.constant 0 : index
    %8 = vector.load %arg7[%c17, %c0_9, %c0_10] : memref<18x18x4xbf16, #tpu.memory_space<vmem>>, vector<1x18x4xbf16>
    tpu.vector_store %arg7[%c17, %c0_9, %c0_10], %7 {strides = array<i32>} : memref<18x18x4xbf16, #tpu.memory_space<vmem>>, vector<1x18x4xbf16>,
    %cst_11 = arith.constant 0.000000e+00 : bf16
    %9 = vector.broadcast %cst_11 : bf16 to vector<18x1x4xbf16>
    %c0_12 = arith.constant 0 : index
    %c0_13 = arith.constant 0 : index
    %c0_14 = arith.constant 0 : index
    %10 = vector.load %arg7[%c0_12, %c0_13, %c0_14] : memref<18x18x4xbf16, #tpu.memory_space<vmem>>, vector<18x1x4xbf16>
    tpu.vector_store %arg7[%c0_12, %c0_13, %c0_14], %9 {strides = array<i32>} : memref<18x18x4xbf16, #tpu.memory_space<vmem>>, vector<18x1x4xbf16>,
    %cst_15 = arith.constant 0.000000e+00 : bf16
    %11 = vector.broadcast %cst_15 : bf16 to vector<18x1x4xbf16>
    %c0_16 = arith.constant 0 : index
    %c17_17 = arith.constant 17 : index
    %c0_18 = arith.constant 0 : index
    %12 = vector.load %arg7[%c0_16, %c17_17, %c0_18] : memref<18x18x4xbf16, #tpu.memory_space<vmem>>, vector<18x1x4xbf16>
    tpu.vector_store %arg7[%c0_16, %c17_17, %c0_18], %11 {strides = array<i32>} : memref<18x18x4xbf16, #tpu.memory_space<vmem>>, vector<18x1x4xbf16>,
    %cst_19 = arith.constant 0.000000e+00 : bf16
    %13 = vector.broadcast %cst_19 : bf16 to vector<1x18x4xbf16>
    %c0_20 = arith.constant 0 : index
    %c0_21 = arith.constant 0 : index
    %c0_22 = arith.constant 0 : index
    %14 = vector.load %arg8[%c0_20, %c0_21, %c0_22] : memref<18x18x4xbf16, #tpu.memory_space<vmem>>, vector<1x18x4xbf16>
    tpu.vector_store %arg8[%c0_20, %c0_21, %c0_22], %13 {strides = array<i32>} : memref<18x18x4xbf16, #tpu.memory_space<vmem>>, vector<1x18x4xbf16>,
    %cst_23 = arith.constant 0.000000e+00 : bf16
    %15 = vector.broadcast %cst_23 : bf16 to vector<1x18x4xbf16>
    %c17_24 = arith.constant 17 : index
    %c0_25 = arith.constant 0 : index
    %c0_26 = arith.constant 0 : index
    %16 = vector.load %arg8[%c17_24, %c0_25, %c0_26] : memref<18x18x4xbf16, #tpu.memory_space<vmem>>, vector<1x18x4xbf16>
    tpu.vector_store %arg8[%c17_24, %c0_25, %c0_26], %15 {strides = array<i32>} : memref<18x18x4xbf16, #tpu.memory_space<vmem>>, vector<1x18x4xbf16>,
    %cst_27 = arith.constant 0.000000e+00 : bf16
    %17 = vector.broadcast %cst_27 : bf16 to vector<18x1x4xbf16>
    %c0_28 = arith.constant 0 : index
    %c0_29 = arith.constant 0 : index
    %c0_30 = arith.constant 0 : index
    %18 = vector.load %arg8[%c0_28, %c0_29, %c0_30] : memref<18x18x4xbf16, #tpu.memory_space<vmem>>, vector<18x1x4xbf16>
    tpu.vector_store %arg8[%c0_28, %c0_29, %c0_30], %17 {strides = array<i32>} : memref<18x18x4xbf16, #tpu.memory_space<vmem>>, vector<18x1x4xbf16>,
    %cst_31 = arith.constant 0.000000e+00 : bf16
    %19 = vector.broadcast %cst_31 : bf16 to vector<18x1x4xbf16>
    %c0_32 = arith.constant 0 : index
    %c17_33 = arith.constant 17 : index
    %c0_34 = arith.constant 0 : index
    %20 = vector.load %arg8[%c0_32, %c17_33, %c0_34] : memref<18x18x4xbf16, #tpu.memory_space<vmem>>, vector<18x1x4xbf16>
    tpu.vector_store %arg8[%c0_32, %c17_33, %c0_34], %19 {strides = array<i32>} : memref<18x18x4xbf16, #tpu.memory_space<vmem>>, vector<18x1x4xbf16>,
    %c0_35 = arith.constant 0 : index
    %c0_36 = arith.constant 0 : index
    %c0_37 = arith.constant 0 : index
    %c0_38 = arith.constant 0 : index
    %21 = vector.load %arg1[%c0_35, %c0_36, %c0_37, %c0_38] : memref<1x16x16x4xbf16, #tpu.memory_space<vmem>>, vector<1x16x16x4xbf16>
    %22 = vector.shape_cast %21 : vector<1x16x16x4xbf16> to vector<16x16x4xbf16>
    %c1 = arith.constant 1 : index
    %c1_39 = arith.constant 1 : index
    %c0_40 = arith.constant 0 : index
    %23 = vector.load %arg7[%c1, %c1_39, %c0_40] : memref<18x18x4xbf16, #tpu.memory_space<vmem>>, vector<16x16x4xbf16>
    tpu.vector_store %arg7[%c1, %c1_39, %c0_40], %22 {strides = array<i32>} : memref<18x18x4xbf16, #tpu.memory_space<vmem>>, vector<16x16x4xbf16>,
    %24 = arith.truncf %4 : vector<16x16x4xf32> to vector<16x16x4xbf16>
    %c1_41 = arith.constant 1 : index
    %c1_42 = arith.constant 1 : index
    %c0_43 = arith.constant 0 : index
    %25 = vector.load %arg8[%c1_41, %c1_42, %c0_43] : memref<18x18x4xbf16, #tpu.memory_space<vmem>>, vector<16x16x4xbf16>
    tpu.vector_store %arg8[%c1_41, %c1_42, %c0_43], %24 {strides = array<i32>} : memref<18x18x4xbf16, #tpu.memory_space<vmem>>, vector<16x16x4xbf16>,
    %c0_44 = arith.constant 0 : index
    %c0_45 = arith.constant 0 : index
    %c0_46 = arith.constant 0 : index
    %26 = vector.load %arg7[%c0_44, %c0_45, %c0_46] : memref<18x18x4xbf16, #tpu.memory_space<vmem>>, vector<16x16x4xbf16>
    %c0_47 = arith.constant 0 : index
    %c0_48 = arith.constant 0 : index
    %c0_49 = arith.constant 0 : index
    %27 = vector.load %arg9[%c0_47, %c0_48, %c0_49] : memref<16x16x72xbf16, #tpu.memory_space<vmem>>, vector<16x16x4xbf16>
    tpu.vector_store %arg9[%c0_47, %c0_48, %c0_49], %26 {strides = array<i32>} : memref<16x16x72xbf16, #tpu.memory_space<vmem>>, vector<16x16x4xbf16>,
    %c0_50 = arith.constant 0 : index
    %c0_51 = arith.constant 0 : index
    %c0_52 = arith.constant 0 : index
    %28 = vector.load %arg8[%c0_50, %c0_51, %c0_52] : memref<18x18x4xbf16, #tpu.memory_space<vmem>>, vector<16x16x4xbf16>
    %c0_53 = arith.constant 0 : index
    %c0_54 = arith.constant 0 : index
    %c4 = arith.constant 4 : index
    %29 = vector.load %arg9[%c0_53, %c0_54, %c4] : memref<16x16x72xbf16, #tpu.memory_space<vmem>>, vector<16x16x4xbf16>
    tpu.vector_store %arg9[%c0_53, %c0_54, %c4], %28 {strides = array<i32>} : memref<16x16x72xbf16, #tpu.memory_space<vmem>>, vector<16x16x4xbf16>,
    %c0_55 = arith.constant 0 : index
    %c1_56 = arith.constant 1 : index
    %c0_57 = arith.constant 0 : index
    %30 = vector.load %arg7[%c0_55, %c1_56, %c0_57] : memref<18x18x4xbf16, #tpu.memory_space<vmem>>, vector<16x16x4xbf16>
    %c0_58 = arith.constant 0 : index
    %c0_59 = arith.constant 0 : index
    %c8 = arith.constant 8 : index
    %31 = vector.load %arg9[%c0_58, %c0_59, %c8] : memref<16x16x72xbf16, #tpu.memory_space<vmem>>, vector<16x16x4xbf16>
    tpu.vector_store %arg9[%c0_58, %c0_59, %c8], %30 {strides = array<i32>} : memref<16x16x72xbf16, #tpu.memory_space<vmem>>, vector<16x16x4xbf16>,
    %c0_60 = arith.constant 0 : index
    %c1_61 = arith.constant 1 : index
    %c0_62 = arith.constant 0 : index
    %32 = vector.load %arg8[%c0_60, %c1_61, %c0_62] : memref<18x18x4xbf16, #tpu.memory_space<vmem>>, vector<16x16x4xbf16>
    %c0_63 = arith.constant 0 : index
    %c0_64 = arith.constant 0 : index
    %c12 = arith.constant 12 : index
    %33 = vector.load %arg9[%c0_63, %c0_64, %c12] : memref<16x16x72xbf16, #tpu.memory_space<vmem>>, vector<16x16x4xbf16>
    tpu.vector_store %arg9[%c0_63, %c0_64, %c12], %32 {strides = array<i32>} : memref<16x16x72xbf16, #tpu.memory_space<vmem>>, vector<16x16x4xbf16>,
    %c0_65 = arith.constant 0 : index
    %c2 = arith.constant 2 : index
    %c0_66 = arith.constant 0 : index
    %34 = vector.load %arg7[%c0_65, %c2, %c0_66] : memref<18x18x4xbf16, #tpu.memory_space<vmem>>, vector<16x16x4xbf16>
    %c0_67 = arith.constant 0 : index
    %c0_68 = arith.constant 0 : index
    %c16 = arith.constant 16 : index
    %35 = vector.load %arg9[%c0_67, %c0_68, %c16] : memref<16x16x72xbf16, #tpu.memory_space<vmem>>, vector<16x16x4xbf16>
    tpu.vector_store %arg9[%c0_67, %c0_68, %c16], %34 {strides = array<i32>} : memref<16x16x72xbf16, #tpu.memory_space<vmem>>, vector<16x16x4xbf16>,
    %c0_69 = arith.constant 0 : index
    %c2_70 = arith.constant 2 : index
    %c0_71 = arith.constant 0 : index
    %36 = vector.load %arg8[%c0_69, %c2_70, %c0_71] : memref<18x18x4xbf16, #tpu.memory_space<vmem>>, vector<16x16x4xbf16>
    %c0_72 = arith.constant 0 : index
    %c0_73 = arith.constant 0 : index
    %c20 = arith.constant 20 : index
    %37 = vector.load %arg9[%c0_72, %c0_73, %c20] : memref<16x16x72xbf16, #tpu.memory_space<vmem>>, vector<16x16x4xbf16>
    tpu.vector_store %arg9[%c0_72, %c0_73, %c20], %36 {strides = array<i32>} : memref<16x16x72xbf16, #tpu.memory_space<vmem>>, vector<16x16x4xbf16>,
    %c1_74 = arith.constant 1 : index
    %c0_75 = arith.constant 0 : index
    %c0_76 = arith.constant 0 : index
    %38 = vector.load %arg7[%c1_74, %c0_75, %c0_76] : memref<18x18x4xbf16, #tpu.memory_space<vmem>>, vector<16x16x4xbf16>
    %c0_77 = arith.constant 0 : index
    %c0_78 = arith.constant 0 : index
    %c24 = arith.constant 24 : index
    %39 = vector.load %arg9[%c0_77, %c0_78, %c24] : memref<16x16x72xbf16, #tpu.memory_space<vmem>>, vector<16x16x4xbf16>
    tpu.vector_store %arg9[%c0_77, %c0_78, %c24], %38 {strides = array<i32>} : memref<16x16x72xbf16, #tpu.memory_space<vmem>>, vector<16x16x4xbf16>,
    %c1_79 = arith.constant 1 : index
    %c0_80 = arith.constant 0 : index
    %c0_81 = arith.constant 0 : index
    %40 = vector.load %arg8[%c1_79, %c0_80, %c0_81] : memref<18x18x4xbf16, #tpu.memory_space<vmem>>, vector<16x16x4xbf16>
    %c0_82 = arith.constant 0 : index
    %c0_83 = arith.constant 0 : index
    %c28 = arith.constant 28 : index
    %41 = vector.load %arg9[%c0_82, %c0_83, %c28] : memref<16x16x72xbf16, #tpu.memory_space<vmem>>, vector<16x16x4xbf16>
    tpu.vector_store %arg9[%c0_82, %c0_83, %c28], %40 {strides = array<i32>} : memref<16x16x72xbf16, #tpu.memory_space<vmem>>, vector<16x16x4xbf16>,
    %c1_84 = arith.constant 1 : index
    %c1_85 = arith.constant 1 : index
    %c0_86 = arith.constant 0 : index
    %42 = vector.load %arg7[%c1_84, %c1_85, %c0_86] : memref<18x18x4xbf16, #tpu.memory_space<vmem>>, vector<16x16x4xbf16>
    %c0_87 = arith.constant 0 : index
    %c0_88 = arith.constant 0 : index
    %c32 = arith.constant 32 : index
    %43 = vector.load %arg9[%c0_87, %c0_88, %c32] : memref<16x16x72xbf16, #tpu.memory_space<vmem>>, vector<16x16x4xbf16>
    tpu.vector_store %arg9[%c0_87, %c0_88, %c32], %42 {strides = array<i32>} : memref<16x16x72xbf16, #tpu.memory_space<vmem>>, vector<16x16x4xbf16>,
    %c1_89 = arith.constant 1 : index
    %c1_90 = arith.constant 1 : index
    %c0_91 = arith.constant 0 : index
    %44 = vector.load %arg8[%c1_89, %c1_90, %c0_91] : memref<18x18x4xbf16, #tpu.memory_space<vmem>>, vector<16x16x4xbf16>
    %c0_92 = arith.constant 0 : index
    %c0_93 = arith.constant 0 : index
    %c36 = arith.constant 36 : index
    %45 = vector.load %arg9[%c0_92, %c0_93, %c36] : memref<16x16x72xbf16, #tpu.memory_space<vmem>>, vector<16x16x4xbf16>
    tpu.vector_store %arg9[%c0_92, %c0_93, %c36], %44 {strides = array<i32>} : memref<16x16x72xbf16, #tpu.memory_space<vmem>>, vector<16x16x4xbf16>,
    %c1_94 = arith.constant 1 : index
    %c2_95 = arith.constant 2 : index
    %c0_96 = arith.constant 0 : index
    %46 = vector.load %arg7[%c1_94, %c2_95, %c0_96] : memref<18x18x4xbf16, #tpu.memory_space<vmem>>, vector<16x16x4xbf16>
    %c0_97 = arith.constant 0 : index
    %c0_98 = arith.constant 0 : index
    %c40 = arith.constant 40 : index
    %47 = vector.load %arg9[%c0_97, %c0_98, %c40] : memref<16x16x72xbf16, #tpu.memory_space<vmem>>, vector<16x16x4xbf16>
    tpu.vector_store %arg9[%c0_97, %c0_98, %c40], %46 {strides = array<i32>} : memref<16x16x72xbf16, #tpu.memory_space<vmem>>, vector<16x16x4xbf16>,
    %c1_99 = arith.constant 1 : index
    %c2_100 = arith.constant 2 : index
    %c0_101 = arith.constant 0 : index
    %48 = vector.load %arg8[%c1_99, %c2_100, %c0_101] : memref<18x18x4xbf16, #tpu.memory_space<vmem>>, vector<16x16x4xbf16>
    %c0_102 = arith.constant 0 : index
    %c0_103 = arith.constant 0 : index
    %c44 = arith.constant 44 : index
    %49 = vector.load %arg9[%c0_102, %c0_103, %c44] : memref<16x16x72xbf16, #tpu.memory_space<vmem>>, vector<16x16x4xbf16>
    tpu.vector_store %arg9[%c0_102, %c0_103, %c44], %48 {strides = array<i32>} : memref<16x16x72xbf16, #tpu.memory_space<vmem>>, vector<16x16x4xbf16>,
    %c2_104 = arith.constant 2 : index
    %c0_105 = arith.constant 0 : index
    %c0_106 = arith.constant 0 : index
    %50 = vector.load %arg7[%c2_104, %c0_105, %c0_106] : memref<18x18x4xbf16, #tpu.memory_space<vmem>>, vector<16x16x4xbf16>
    %c0_107 = arith.constant 0 : index
    %c0_108 = arith.constant 0 : index
    %c48 = arith.constant 48 : index
    %51 = vector.load %arg9[%c0_107, %c0_108, %c48] : memref<16x16x72xbf16, #tpu.memory_space<vmem>>, vector<16x16x4xbf16>
    tpu.vector_store %arg9[%c0_107, %c0_108, %c48], %50 {strides = array<i32>} : memref<16x16x72xbf16, #tpu.memory_space<vmem>>, vector<16x16x4xbf16>,
    %c2_109 = arith.constant 2 : index
    %c0_110 = arith.constant 0 : index
    %c0_111 = arith.constant 0 : index
    %52 = vector.load %arg8[%c2_109, %c0_110, %c0_111] : memref<18x18x4xbf16, #tpu.memory_space<vmem>>, vector<16x16x4xbf16>
    %c0_112 = arith.constant 0 : index
    %c0_113 = arith.constant 0 : index
    %c52 = arith.constant 52 : index
    %53 = vector.load %arg9[%c0_112, %c0_113, %c52] : memref<16x16x72xbf16, #tpu.memory_space<vmem>>, vector<16x16x4xbf16>
    tpu.vector_store %arg9[%c0_112, %c0_113, %c52], %52 {strides = array<i32>} : memref<16x16x72xbf16, #tpu.memory_space<vmem>>, vector<16x16x4xbf16>,
    %c2_114 = arith.constant 2 : index
    %c1_115 = arith.constant 1 : index
    %c0_116 = arith.constant 0 : index
    %54 = vector.load %arg7[%c2_114, %c1_115, %c0_116] : memref<18x18x4xbf16, #tpu.memory_space<vmem>>, vector<16x16x4xbf16>
    %c0_117 = arith.constant 0 : index
    %c0_118 = arith.constant 0 : index
    %c56 = arith.constant 56 : index
    %55 = vector.load %arg9[%c0_117, %c0_118, %c56] : memref<16x16x72xbf16, #tpu.memory_space<vmem>>, vector<16x16x4xbf16>
    tpu.vector_store %arg9[%c0_117, %c0_118, %c56], %54 {strides = array<i32>} : memref<16x16x72xbf16, #tpu.memory_space<vmem>>, vector<16x16x4xbf16>,
    %c2_119 = arith.constant 2 : index
    %c1_120 = arith.constant 1 : index
    %c0_121 = arith.constant 0 : index
    %56 = vector.load %arg8[%c2_119, %c1_120, %c0_121] : memref<18x18x4xbf16, #tpu.memory_space<vmem>>, vector<16x16x4xbf16>
    %c0_122 = arith.constant 0 : index
    %c0_123 = arith.constant 0 : index
    %c60 = arith.constant 60 : index
    %57 = vector.load %arg9[%c0_122, %c0_123, %c60] : memref<16x16x72xbf16, #tpu.memory_space<vmem>>, vector<16x16x4xbf16>
    tpu.vector_store %arg9[%c0_122, %c0_123, %c60], %56 {strides = array<i32>} : memref<16x16x72xbf16, #tpu.memory_space<vmem>>, vector<16x16x4xbf16>,
    %c2_124 = arith.constant 2 : index
    %c2_125 = arith.constant 2 : index
    %c0_126 = arith.constant 0 : index
    %58 = vector.load %arg7[%c2_124, %c2_125, %c0_126] : memref<18x18x4xbf16, #tpu.memory_space<vmem>>, vector<16x16x4xbf16>
    %c0_127 = arith.constant 0 : index
    %c0_128 = arith.constant 0 : index
    %c64 = arith.constant 64 : index
    %59 = vector.load %arg9[%c0_127, %c0_128, %c64] : memref<16x16x72xbf16, #tpu.memory_space<vmem>>, vector<16x16x4xbf16>
    tpu.vector_store %arg9[%c0_127, %c0_128, %c64], %58 {strides = array<i32>} : memref<16x16x72xbf16, #tpu.memory_space<vmem>>, vector<16x16x4xbf16>,
    %c2_129 = arith.constant 2 : index
    %c2_130 = arith.constant 2 : index
    %c0_131 = arith.constant 0 : index
    %60 = vector.load %arg8[%c2_129, %c2_130, %c0_131] : memref<18x18x4xbf16, #tpu.memory_space<vmem>>, vector<16x16x4xbf16>
    %c0_132 = arith.constant 0 : index
    %c0_133 = arith.constant 0 : index
    %c68 = arith.constant 68 : index
    %61 = vector.load %arg9[%c0_132, %c0_133, %c68] : memref<16x16x72xbf16, #tpu.memory_space<vmem>>, vector<16x16x4xbf16>
    tpu.vector_store %arg9[%c0_132, %c0_133, %c68], %60 {strides = array<i32>} : memref<16x16x72xbf16, #tpu.memory_space<vmem>>, vector<16x16x4xbf16>,
    %c0_134 = arith.constant 0 : index
    %c0_135 = arith.constant 0 : index
    %c0_136 = arith.constant 0 : index
    %62 = vector.load %arg9[%c0_134, %c0_135, %c0_136] : memref<16x16x72xbf16, #tpu.memory_space<vmem>>, vector<16x16x72xbf16>
    %63 = vector.shape_cast %62 : vector<16x16x72xbf16> to vector<256x72xbf16>
    %c0_137 = arith.constant 0 : index
    %c0_138 = arith.constant 0 : index
    %64 = vector.load %arg4[%c0_137, %c0_138] : memref<4x72xbf16, #tpu.memory_space<vmem>>, vector<4x72xbf16>
    %cst_139 = arith.constant dense<0.000000e+00> : vector<4x256xf32>
    %65 = tpu.matmul %64, %63, %cst_139 {dimension_numbers = #tpu.dot_dimension_numbers<[1], [1], [0], [0], [0, 0, 1, 0], [], []>} : vector<4x72xbf16>, vector<256x72xbf16>, vector<4x256xf32> -> vector<4x256xf32>
    %66 = arith.truncf %65 : vector<4x256xf32> to vector<4x256xbf16>
    %c0_140 = arith.constant 0 : index
    %c0_141 = arith.constant 0 : index
    %c0_142 = arith.constant 0 : index
    %67 = vector.load %arg5[%c0_140, %c0_141, %c0_142] : memref<1x4x256xbf16, #tpu.memory_space<vmem>>, vector<1x4x256xbf16>
    %68 = vector.shape_cast %67 : vector<1x4x256xbf16> to vector<4x256xbf16>
    %69 = vector.shape_cast %66 : vector<4x256xbf16> to vector<1x4x256xbf16>
    tpu.vector_store %arg5[%c0_140, %c0_141, %c0_142], %69 {strides = array<i32>} : memref<1x4x256xbf16, #tpu.memory_space<vmem>>, vector<1x4x256xbf16>,
    %cst_143 = arith.constant dense<0.000000e+00> : vector<4xf32>
    %70 = vector.multi_reduction <add>, %65, %cst_143 [1] : vector<4x256xf32> to vector<4xf32>
    %71 = vector.shape_cast %70 : vector<4xf32> to vector<4x1xf32>
    %72 = arith.mulf %65, %65 : vector<4x256xf32>
    %cst_144 = arith.constant dense<0.000000e+00> : vector<4xf32>
    %73 = vector.multi_reduction <add>, %72, %cst_144 [1] : vector<4x256xf32> to vector<4xf32>
    %74 = vector.shape_cast %73 : vector<4xf32> to vector<4x1xf32>
    %75 = tpu.concatenate %71, %74 in 1 : vector<4x1xf32>, vector<4x1xf32> -> vector<4x2xf32>
    %c0_145 = arith.constant 0 : index
    %c0_146 = arith.constant 0 : index
    %c0_147 = arith.constant 0 : index
    %76 = vector.load %arg6[%c0_145, %c0_146, %c0_147] : memref<1x4x2xf32, #tpu.memory_space<vmem>>, vector<1x4x2xf32>
    %77 = vector.shape_cast %76 : vector<1x4x2xf32> to vector<4x2xf32>
    %78 = vector.shape_cast %75 : vector<4x2xf32> to vector<1x4x2xf32>
    tpu.vector_store %arg6[%c0_145, %c0_146, %c0_147], %78 {strides = array<i32>} : memref<1x4x2xf32, #tpu.memory_space<vmem>>, vector<1x4x2xf32>,
    return
  }
  func.func @transform_0(%arg0: i32) -> (i32, i32, i32, i32) {
    %c0_i32 = arith.constant 0 : i32
    %c0_i32_0 = arith.constant 0 : i32
    %c0_i32_1 = arith.constant 0 : i32
    %c0_i32_2 = arith.constant 0 : i32
    return %arg0, %c0_i32, %c0_i32_0, %c0_i32_1 : i32, i32, i32, i32
  }
  func.func @transform_1(%arg0: i32) -> (i32, i32, i32) {
    %c0_i32 = arith.constant 0 : i32
    %c0_i32_0 = arith.constant 0 : i32
    %c0_i32_1 = arith.constant 0 : i32
    return %arg0, %c0_i32, %c0_i32_0 : i32, i32, i32
  }
  func.func @transform_2(%arg0: i32) -> (i32, i32) {
    %c0_i32 = arith.constant 0 : i32
    %c0_i32_0 = arith.constant 0 : i32
    %c0_i32_1 = arith.constant 0 : i32
    return %c0_i32, %c0_i32_0 : i32, i32
  }
  func.func @transform_3(%arg0: i32) -> (i32, i32) {
    %c0_i32 = arith.constant 0 : i32
    %c0_i32_0 = arith.constant 0 : i32
    %c0_i32_1 = arith.constant 0 : i32
    return %c0_i32, %c0_i32_0 : i32, i32
  }
  func.func @transform_4(%arg0: i32) -> (i32, i32, i32) {
    %c0_i32 = arith.constant 0 : i32
    %c0_i32_0 = arith.constant 0 : i32
    %c0_i32_1 = arith.constant 0 : i32
    return %arg0, %c0_i32, %c0_i32_0 : i32, i32, i32
  }
  func.func @transform_5(%arg0: i32) -> (i32, i32, i32) {
    %c0_i32 = arith.constant 0 : i32
    %c0_i32_0 = arith.constant 0 : i32
    %c0_i32_1 = arith.constant 0 : i32
    return %arg0, %c0_i32, %c0_i32_0 : i32, i32, i32
  }
}

module attributes {stable_mosaic.version = 11 : i64} {
  func.func @kernel(%arg0: i32, %arg1: memref<2x4x256xf32, #tpu.memory_space<vmem>>, %arg2: memref<4x1xf32, #tpu.memory_space<vmem>>, %arg3: memref<4x1xf32, #tpu.memory_space<vmem>>, %arg4: memref<2x4x256xf32, #tpu.memory_space<vmem>>) attributes {dimension_semantics = [#tpu.dimension_semantics<arbitrary>], iteration_bounds = array<i64: 1>, scalar_prefetch = 0 : i64, scratch_operands = 0 : i64, tpu.core_type = #tpu.core_type<tc>, window_params = [{pipeline_mode = #tpu.pipeline_mode<synchronous>, transform_indices = @transform_0, window_bounds = array<i64: 2, 4, 256>}, {pipeline_mode = #tpu.pipeline_mode<synchronous>, transform_indices = @transform_1, window_bounds = array<i64: 4, 1>}, {pipeline_mode = #tpu.pipeline_mode<synchronous>, transform_indices = @transform_2, window_bounds = array<i64: 4, 1>}, {pipeline_mode = #tpu.pipeline_mode<synchronous>, transform_indices = @transform_3, window_bounds = array<i64: 2, 4, 256>}]} {
    %c0 = arith.constant 0 : index
    %c0_0 = arith.constant 0 : index
    %c0_1 = arith.constant 0 : index
    %0 = vector.load %arg1[%c0, %c0_0, %c0_1] : memref<2x4x256xf32, #tpu.memory_space<vmem>>, vector<2x4x256xf32>
    %c0_2 = arith.constant 0 : index
    %c0_3 = arith.constant 0 : index
    %1 = vector.load %arg2[%c0_2, %c0_3] : memref<4x1xf32, #tpu.memory_space<vmem>>, vector<4x1xf32>
    %2 = vector.shape_cast %1 : vector<4x1xf32> to vector<1x4x1xf32>
    %3 = vector.broadcast %2 : vector<1x4x1xf32> to vector<2x4x256xf32>
    %4 = arith.mulf %0, %3 : vector<2x4x256xf32>
    %c0_4 = arith.constant 0 : index
    %c0_5 = arith.constant 0 : index
    %5 = vector.load %arg3[%c0_4, %c0_5] : memref<4x1xf32, #tpu.memory_space<vmem>>, vector<4x1xf32>
    %6 = vector.shape_cast %5 : vector<4x1xf32> to vector<1x4x1xf32>
    %7 = vector.broadcast %6 : vector<1x4x1xf32> to vector<2x4x256xf32>
    %8 = arith.addf %4, %7 : vector<2x4x256xf32>
    %cst = arith.constant 0.000000e+00 : f32
    %9 = vector.broadcast %cst : f32 to vector<2x4x256xf32>
    %10 = arith.maximumf %8, %9 : vector<2x4x256xf32>
    %c0_6 = arith.constant 0 : index
    %c0_7 = arith.constant 0 : index
    %c0_8 = arith.constant 0 : index
    %11 = vector.load %arg4[%c0_6, %c0_7, %c0_8] : memref<2x4x256xf32, #tpu.memory_space<vmem>>, vector<2x4x256xf32>
    tpu.vector_store %arg4[%c0_6, %c0_7, %c0_8], %10 {strides = array<i32>} : memref<2x4x256xf32, #tpu.memory_space<vmem>>, vector<2x4x256xf32>,
    return
  }
  func.func @transform_0(%arg0: i32) -> (i32, i32, i32) {
    %c0_i32 = arith.constant 0 : i32
    %c0_i32_0 = arith.constant 0 : i32
    %c0_i32_1 = arith.constant 0 : i32
    %c0_i32_2 = arith.constant 0 : i32
    return %c0_i32, %c0_i32_0, %c0_i32_1 : i32, i32, i32
  }
  func.func @transform_1(%arg0: i32) -> (i32, i32) {
    %c0_i32 = arith.constant 0 : i32
    %c0_i32_0 = arith.constant 0 : i32
    %c0_i32_1 = arith.constant 0 : i32
    return %c0_i32, %c0_i32_0 : i32, i32
  }
  func.func @transform_2(%arg0: i32) -> (i32, i32) {
    %c0_i32 = arith.constant 0 : i32
    %c0_i32_0 = arith.constant 0 : i32
    %c0_i32_1 = arith.constant 0 : i32
    return %c0_i32, %c0_i32_0 : i32, i32
  }
  func.func @transform_3(%arg0: i32) -> (i32, i32, i32) {
    %c0_i32 = arith.constant 0 : i32
    %c0_i32_0 = arith.constant 0 : i32
    %c0_i32_1 = arith.constant 0 : i32
    %c0_i32_2 = arith.constant 0 : i32
    return %c0_i32, %c0_i32_0, %c0_i32_1 : i32, i32, i32
  }
}

module attributes {stable_mosaic.version = 11 : i64} {
  func.func @kernel(%arg0: i32, %arg1: memref<1x4x256xbf16, #tpu.memory_space<vmem>>, %arg2: memref<4x1xf32, #tpu.memory_space<vmem>>, %arg3: memref<4x1xf32, #tpu.memory_space<vmem>>, %arg4: memref<4x36xbf16, #tpu.memory_space<vmem>>, %arg5: memref<1x4x256xf32, #tpu.memory_space<vmem>>, %arg6: memref<1x4x2xf32, #tpu.memory_space<vmem>>, %arg7: memref<18x18x4xbf16, #tpu.memory_space<vmem>>, %arg8: memref<16x16x36xbf16, #tpu.memory_space<vmem>>) attributes {dimension_semantics = [#tpu.dimension_semantics<parallel>], iteration_bounds = array<i64: 2>, scalar_prefetch = 0 : i64, scratch_operands = 2 : i64, tpu.core_type = #tpu.core_type<tc>, window_params = [{transform_indices = @transform_0, window_bounds = array<i64: 1, 4, 256>}, {pipeline_mode = #tpu.pipeline_mode<synchronous>, transform_indices = @transform_1, window_bounds = array<i64: 4, 1>}, {pipeline_mode = #tpu.pipeline_mode<synchronous>, transform_indices = @transform_2, window_bounds = array<i64: 4, 1>}, {pipeline_mode = #tpu.pipeline_mode<synchronous>, transform_indices = @transform_3, window_bounds = array<i64: 4, 36>}, {transform_indices = @transform_4, window_bounds = array<i64: 1, 4, 256>}, {transform_indices = @transform_5, window_bounds = array<i64: 1, 4, 2>}]} {
    %c0 = arith.constant 0 : index
    %c0_0 = arith.constant 0 : index
    %c0_1 = arith.constant 0 : index
    %0 = vector.load %arg1[%c0, %c0_0, %c0_1] : memref<1x4x256xbf16, #tpu.memory_space<vmem>>, vector<1x4x256xbf16>
    %1 = vector.shape_cast %0 : vector<1x4x256xbf16> to vector<4x256xbf16>
    %2 = arith.extf %1 : vector<4x256xbf16> to vector<4x256xf32>
    %c0_2 = arith.constant 0 : index
    %c0_3 = arith.constant 0 : index
    %3 = vector.load %arg2[%c0_2, %c0_3] : memref<4x1xf32, #tpu.memory_space<vmem>>, vector<4x1xf32>
    %4 = vector.broadcast %3 : vector<4x1xf32> to vector<4x256xf32>
    %5 = arith.mulf %2, %4 : vector<4x256xf32>
    %c0_4 = arith.constant 0 : index
    %c0_5 = arith.constant 0 : index
    %6 = vector.load %arg3[%c0_4, %c0_5] : memref<4x1xf32, #tpu.memory_space<vmem>>, vector<4x1xf32>
    %7 = vector.broadcast %6 : vector<4x1xf32> to vector<4x256xf32>
    %8 = arith.addf %5, %7 : vector<4x256xf32>
    %cst = arith.constant 0.000000e+00 : f32
    %9 = vector.broadcast %cst : f32 to vector<4x256xf32>
    %10 = arith.maximumf %8, %9 : vector<4x256xf32>
    %11 = tpu.transpose %10, [1, 0] : vector<4x256xf32> -> vector<256x4xf32>
    %12 = vector.shape_cast %11 : vector<256x4xf32> to vector<16x16x4xf32>
    %cst_6 = arith.constant 0.000000e+00 : bf16
    %13 = vector.broadcast %cst_6 : bf16 to vector<1x18x4xbf16>
    %c0_7 = arith.constant 0 : index
    %c0_8 = arith.constant 0 : index
    %c0_9 = arith.constant 0 : index
    %14 = vector.load %arg7[%c0_7, %c0_8, %c0_9] : memref<18x18x4xbf16, #tpu.memory_space<vmem>>, vector<1x18x4xbf16>
    tpu.vector_store %arg7[%c0_7, %c0_8, %c0_9], %13 {strides = array<i32>} : memref<18x18x4xbf16, #tpu.memory_space<vmem>>, vector<1x18x4xbf16>,
    %cst_10 = arith.constant 0.000000e+00 : bf16
    %15 = vector.broadcast %cst_10 : bf16 to vector<1x18x4xbf16>
    %c17 = arith.constant 17 : index
    %c0_11 = arith.constant 0 : index
    %c0_12 = arith.constant 0 : index
    %16 = vector.load %arg7[%c17, %c0_11, %c0_12] : memref<18x18x4xbf16, #tpu.memory_space<vmem>>, vector<1x18x4xbf16>
    tpu.vector_store %arg7[%c17, %c0_11, %c0_12], %15 {strides = array<i32>} : memref<18x18x4xbf16, #tpu.memory_space<vmem>>, vector<1x18x4xbf16>,
    %cst_13 = arith.constant 0.000000e+00 : bf16
    %17 = vector.broadcast %cst_13 : bf16 to vector<18x1x4xbf16>
    %c0_14 = arith.constant 0 : index
    %c0_15 = arith.constant 0 : index
    %c0_16 = arith.constant 0 : index
    %18 = vector.load %arg7[%c0_14, %c0_15, %c0_16] : memref<18x18x4xbf16, #tpu.memory_space<vmem>>, vector<18x1x4xbf16>
    tpu.vector_store %arg7[%c0_14, %c0_15, %c0_16], %17 {strides = array<i32>} : memref<18x18x4xbf16, #tpu.memory_space<vmem>>, vector<18x1x4xbf16>,
    %cst_17 = arith.constant 0.000000e+00 : bf16
    %19 = vector.broadcast %cst_17 : bf16 to vector<18x1x4xbf16>
    %c0_18 = arith.constant 0 : index
    %c17_19 = arith.constant 17 : index
    %c0_20 = arith.constant 0 : index
    %20 = vector.load %arg7[%c0_18, %c17_19, %c0_20] : memref<18x18x4xbf16, #tpu.memory_space<vmem>>, vector<18x1x4xbf16>
    tpu.vector_store %arg7[%c0_18, %c17_19, %c0_20], %19 {strides = array<i32>} : memref<18x18x4xbf16, #tpu.memory_space<vmem>>, vector<18x1x4xbf16>,
    %21 = arith.truncf %12 : vector<16x16x4xf32> to vector<16x16x4xbf16>
    %c1 = arith.constant 1 : index
    %c1_21 = arith.constant 1 : index
    %c0_22 = arith.constant 0 : index
    %22 = vector.load %arg7[%c1, %c1_21, %c0_22] : memref<18x18x4xbf16, #tpu.memory_space<vmem>>, vector<16x16x4xbf16>
    tpu.vector_store %arg7[%c1, %c1_21, %c0_22], %21 {strides = array<i32>} : memref<18x18x4xbf16, #tpu.memory_space<vmem>>, vector<16x16x4xbf16>,
    %c0_23 = arith.constant 0 : index
    %c0_24 = arith.constant 0 : index
    %c0_25 = arith.constant 0 : index
    %23 = vector.load %arg7[%c0_23, %c0_24, %c0_25] : memref<18x18x4xbf16, #tpu.memory_space<vmem>>, vector<16x16x4xbf16>
    %c0_26 = arith.constant 0 : index
    %c0_27 = arith.constant 0 : index
    %c0_28 = arith.constant 0 : index
    %24 = vector.load %arg8[%c0_26, %c0_27, %c0_28] : memref<16x16x36xbf16, #tpu.memory_space<vmem>>, vector<16x16x4xbf16>
    tpu.vector_store %arg8[%c0_26, %c0_27, %c0_28], %23 {strides = array<i32>} : memref<16x16x36xbf16, #tpu.memory_space<vmem>>, vector<16x16x4xbf16>,
    %c0_29 = arith.constant 0 : index
    %c1_30 = arith.constant 1 : index
    %c0_31 = arith.constant 0 : index
    %25 = vector.load %arg7[%c0_29, %c1_30, %c0_31] : memref<18x18x4xbf16, #tpu.memory_space<vmem>>, vector<16x16x4xbf16>
    %c0_32 = arith.constant 0 : index
    %c0_33 = arith.constant 0 : index
    %c4 = arith.constant 4 : index
    %26 = vector.load %arg8[%c0_32, %c0_33, %c4] : memref<16x16x36xbf16, #tpu.memory_space<vmem>>, vector<16x16x4xbf16>
    tpu.vector_store %arg8[%c0_32, %c0_33, %c4], %25 {strides = array<i32>} : memref<16x16x36xbf16, #tpu.memory_space<vmem>>, vector<16x16x4xbf16>,
    %c0_34 = arith.constant 0 : index
    %c2 = arith.constant 2 : index
    %c0_35 = arith.constant 0 : index
    %27 = vector.load %arg7[%c0_34, %c2, %c0_35] : memref<18x18x4xbf16, #tpu.memory_space<vmem>>, vector<16x16x4xbf16>
    %c0_36 = arith.constant 0 : index
    %c0_37 = arith.constant 0 : index
    %c8 = arith.constant 8 : index
    %28 = vector.load %arg8[%c0_36, %c0_37, %c8] : memref<16x16x36xbf16, #tpu.memory_space<vmem>>, vector<16x16x4xbf16>
    tpu.vector_store %arg8[%c0_36, %c0_37, %c8], %27 {strides = array<i32>} : memref<16x16x36xbf16, #tpu.memory_space<vmem>>, vector<16x16x4xbf16>,
    %c1_38 = arith.constant 1 : index
    %c0_39 = arith.constant 0 : index
    %c0_40 = arith.constant 0 : index
    %29 = vector.load %arg7[%c1_38, %c0_39, %c0_40] : memref<18x18x4xbf16, #tpu.memory_space<vmem>>, vector<16x16x4xbf16>
    %c0_41 = arith.constant 0 : index
    %c0_42 = arith.constant 0 : index
    %c12 = arith.constant 12 : index
    %30 = vector.load %arg8[%c0_41, %c0_42, %c12] : memref<16x16x36xbf16, #tpu.memory_space<vmem>>, vector<16x16x4xbf16>
    tpu.vector_store %arg8[%c0_41, %c0_42, %c12], %29 {strides = array<i32>} : memref<16x16x36xbf16, #tpu.memory_space<vmem>>, vector<16x16x4xbf16>,
    %c1_43 = arith.constant 1 : index
    %c1_44 = arith.constant 1 : index
    %c0_45 = arith.constant 0 : index
    %31 = vector.load %arg7[%c1_43, %c1_44, %c0_45] : memref<18x18x4xbf16, #tpu.memory_space<vmem>>, vector<16x16x4xbf16>
    %c0_46 = arith.constant 0 : index
    %c0_47 = arith.constant 0 : index
    %c16 = arith.constant 16 : index
    %32 = vector.load %arg8[%c0_46, %c0_47, %c16] : memref<16x16x36xbf16, #tpu.memory_space<vmem>>, vector<16x16x4xbf16>
    tpu.vector_store %arg8[%c0_46, %c0_47, %c16], %31 {strides = array<i32>} : memref<16x16x36xbf16, #tpu.memory_space<vmem>>, vector<16x16x4xbf16>,
    %c1_48 = arith.constant 1 : index
    %c2_49 = arith.constant 2 : index
    %c0_50 = arith.constant 0 : index
    %33 = vector.load %arg7[%c1_48, %c2_49, %c0_50] : memref<18x18x4xbf16, #tpu.memory_space<vmem>>, vector<16x16x4xbf16>
    %c0_51 = arith.constant 0 : index
    %c0_52 = arith.constant 0 : index
    %c20 = arith.constant 20 : index
    %34 = vector.load %arg8[%c0_51, %c0_52, %c20] : memref<16x16x36xbf16, #tpu.memory_space<vmem>>, vector<16x16x4xbf16>
    tpu.vector_store %arg8[%c0_51, %c0_52, %c20], %33 {strides = array<i32>} : memref<16x16x36xbf16, #tpu.memory_space<vmem>>, vector<16x16x4xbf16>,
    %c2_53 = arith.constant 2 : index
    %c0_54 = arith.constant 0 : index
    %c0_55 = arith.constant 0 : index
    %35 = vector.load %arg7[%c2_53, %c0_54, %c0_55] : memref<18x18x4xbf16, #tpu.memory_space<vmem>>, vector<16x16x4xbf16>
    %c0_56 = arith.constant 0 : index
    %c0_57 = arith.constant 0 : index
    %c24 = arith.constant 24 : index
    %36 = vector.load %arg8[%c0_56, %c0_57, %c24] : memref<16x16x36xbf16, #tpu.memory_space<vmem>>, vector<16x16x4xbf16>
    tpu.vector_store %arg8[%c0_56, %c0_57, %c24], %35 {strides = array<i32>} : memref<16x16x36xbf16, #tpu.memory_space<vmem>>, vector<16x16x4xbf16>,
    %c2_58 = arith.constant 2 : index
    %c1_59 = arith.constant 1 : index
    %c0_60 = arith.constant 0 : index
    %37 = vector.load %arg7[%c2_58, %c1_59, %c0_60] : memref<18x18x4xbf16, #tpu.memory_space<vmem>>, vector<16x16x4xbf16>
    %c0_61 = arith.constant 0 : index
    %c0_62 = arith.constant 0 : index
    %c28 = arith.constant 28 : index
    %38 = vector.load %arg8[%c0_61, %c0_62, %c28] : memref<16x16x36xbf16, #tpu.memory_space<vmem>>, vector<16x16x4xbf16>
    tpu.vector_store %arg8[%c0_61, %c0_62, %c28], %37 {strides = array<i32>} : memref<16x16x36xbf16, #tpu.memory_space<vmem>>, vector<16x16x4xbf16>,
    %c2_63 = arith.constant 2 : index
    %c2_64 = arith.constant 2 : index
    %c0_65 = arith.constant 0 : index
    %39 = vector.load %arg7[%c2_63, %c2_64, %c0_65] : memref<18x18x4xbf16, #tpu.memory_space<vmem>>, vector<16x16x4xbf16>
    %c0_66 = arith.constant 0 : index
    %c0_67 = arith.constant 0 : index
    %c32 = arith.constant 32 : index
    %40 = vector.load %arg8[%c0_66, %c0_67, %c32] : memref<16x16x36xbf16, #tpu.memory_space<vmem>>, vector<16x16x4xbf16>
    tpu.vector_store %arg8[%c0_66, %c0_67, %c32], %39 {strides = array<i32>} : memref<16x16x36xbf16, #tpu.memory_space<vmem>>, vector<16x16x4xbf16>,
    %c0_68 = arith.constant 0 : index
    %c0_69 = arith.constant 0 : index
    %c0_70 = arith.constant 0 : index
    %41 = vector.load %arg8[%c0_68, %c0_69, %c0_70] : memref<16x16x36xbf16, #tpu.memory_space<vmem>>, vector<16x16x36xbf16>
    %42 = vector.shape_cast %41 : vector<16x16x36xbf16> to vector<256x36xbf16>
    %c0_71 = arith.constant 0 : index
    %c0_72 = arith.constant 0 : index
    %43 = vector.load %arg4[%c0_71, %c0_72] : memref<4x36xbf16, #tpu.memory_space<vmem>>, vector<4x36xbf16>
    %cst_73 = arith.constant dense<0.000000e+00> : vector<4x256xf32>
    %44 = tpu.matmul %43, %42, %cst_73 {dimension_numbers = #tpu.dot_dimension_numbers<[1], [1], [0], [0], [0, 0, 1, 0], [], []>} : vector<4x36xbf16>, vector<256x36xbf16>, vector<4x256xf32> -> vector<4x256xf32>
    %c0_74 = arith.constant 0 : index
    %c0_75 = arith.constant 0 : index
    %c0_76 = arith.constant 0 : index
    %45 = vector.load %arg5[%c0_74, %c0_75, %c0_76] : memref<1x4x256xf32, #tpu.memory_space<vmem>>, vector<1x4x256xf32>
    %46 = vector.shape_cast %45 : vector<1x4x256xf32> to vector<4x256xf32>
    %47 = vector.shape_cast %44 : vector<4x256xf32> to vector<1x4x256xf32>
    tpu.vector_store %arg5[%c0_74, %c0_75, %c0_76], %47 {strides = array<i32>} : memref<1x4x256xf32, #tpu.memory_space<vmem>>, vector<1x4x256xf32>,
    %cst_77 = arith.constant dense<0.000000e+00> : vector<4xf32>
    %48 = vector.multi_reduction <add>, %44, %cst_77 [1] : vector<4x256xf32> to vector<4xf32>
    %49 = vector.shape_cast %48 : vector<4xf32> to vector<4x1xf32>
    %50 = arith.mulf %44, %44 : vector<4x256xf32>
    %cst_78 = arith.constant dense<0.000000e+00> : vector<4xf32>
    %51 = vector.multi_reduction <add>, %50, %cst_78 [1] : vector<4x256xf32> to vector<4xf32>
    %52 = vector.shape_cast %51 : vector<4xf32> to vector<4x1xf32>
    %53 = tpu.concatenate %49, %52 in 1 : vector<4x1xf32>, vector<4x1xf32> -> vector<4x2xf32>
    %c0_79 = arith.constant 0 : index
    %c0_80 = arith.constant 0 : index
    %c0_81 = arith.constant 0 : index
    %54 = vector.load %arg6[%c0_79, %c0_80, %c0_81] : memref<1x4x2xf32, #tpu.memory_space<vmem>>, vector<1x4x2xf32>
    %55 = vector.shape_cast %54 : vector<1x4x2xf32> to vector<4x2xf32>
    %56 = vector.shape_cast %53 : vector<4x2xf32> to vector<1x4x2xf32>
    tpu.vector_store %arg6[%c0_79, %c0_80, %c0_81], %56 {strides = array<i32>} : memref<1x4x2xf32, #tpu.memory_space<vmem>>, vector<1x4x2xf32>,
    return
  }
  func.func @transform_0(%arg0: i32) -> (i32, i32, i32) {
    %c0_i32 = arith.constant 0 : i32
    %c0_i32_0 = arith.constant 0 : i32
    %c0_i32_1 = arith.constant 0 : i32
    return %arg0, %c0_i32, %c0_i32_0 : i32, i32, i32
  }
  func.func @transform_1(%arg0: i32) -> (i32, i32) {
    %c0_i32 = arith.constant 0 : i32
    %c0_i32_0 = arith.constant 0 : i32
    %c0_i32_1 = arith.constant 0 : i32
    return %c0_i32, %c0_i32_0 : i32, i32
  }
  func.func @transform_2(%arg0: i32) -> (i32, i32) {
    %c0_i32 = arith.constant 0 : i32
    %c0_i32_0 = arith.constant 0 : i32
    %c0_i32_1 = arith.constant 0 : i32
    return %c0_i32, %c0_i32_0 : i32, i32
  }
  func.func @transform_3(%arg0: i32) -> (i32, i32) {
    %c0_i32 = arith.constant 0 : i32
    %c0_i32_0 = arith.constant 0 : i32
    %c0_i32_1 = arith.constant 0 : i32
    return %c0_i32, %c0_i32_0 : i32, i32
  }
  func.func @transform_4(%arg0: i32) -> (i32, i32, i32) {
    %c0_i32 = arith.constant 0 : i32
    %c0_i32_0 = arith.constant 0 : i32
    %c0_i32_1 = arith.constant 0 : i32
    return %arg0, %c0_i32, %c0_i32_0 : i32, i32, i32
  }
  func.func @transform_5(%arg0: i32) -> (i32, i32, i32) {
    %c0_i32 = arith.constant 0 : i32
    %c0_i32_0 = arith.constant 0 : i32
    %c0_i32_1 = arith.constant 0 : i32
    return %arg0, %c0_i32, %c0_i32_0 : i32, i32, i32
  }
}

</mosaic_0001>

<bundles_post_ra>
// kernel: up_layer_forward.5
= control target key start
LH: loop header
LB: loop body
LE: loop exit
PB: predicated region body
PF: predicated region fallthrough
CT: control target
= control target key end

     0   :  { %v57_v0 = vmov 0   ;;  %v58_v3 = vmov 839922192   ;;  %v24_v5 = vlaneseq  ;;  %s97_s1 = inlined_call_operand.vmem [shape: f32[4,1], index: 1, kind: input, shape index: {}]   ;;  %s98_s2 = inlined_call_operand.vmem [shape: f32[4,1], index: 2, kind: input, shape index: {}]   ;;  %s99_s0 = inlined_call_operand.vmem [shape: f32[2,4,256], index: 0, kind: input, shape index: {}, may-alias: {0,3}]   ;;  %s100_s3 = inlined_call_operand.vmem [shape: f32[2,4,256], index: 3, kind: output, shape index: {}, may-alias: {0,3}]  }
   0x1   :  { %56 = vset.pattern.permute.xlu0 %v57_v0  ;;  %v16_v1 = vld [vmem:[%s97_s1] sm:$0xf]  ;;  %v22_v4 = vunpack.c.l.s4 %v58_v3  ;;  %v15_v12 = vld [vmem:[%s99_s0 + $0x8] sm:$0xff] }
   0x2   :  { %19 = vperm.xlu0 %56, %v16_v1   ;;  %v31_v2 = vld [vmem:[%s98_s2] sm:$0xf]  ;;  %v25_v7 = vshrl.u32 %v24_v5, 7 }
   0x3   :  { %v23_v6 = vunpack.c.0.s8 %v22_v4  ;;  %v14_v11 = vld [vmem:[%s99_s0] sm:$0xff] }
   0x5   :  { %v26_v8 = vsub.s32 %v23_v6, %v25_v7 }
   0x6   :  { %34 = vperm.xlu0 %56, %v31_v2  }
  0x81   :  { %v20_v9 = vpop.permute.xlu0 %19 }
  0x82   :  { %v27_v10 = vrot.slane %v20_v9, %v26_v8 }
  0x84   :  { %v29_v14 = vmul.f32 %v27_v10, %v14_v11  ;;  %v30_v15 = vmul.f32 %v27_v10, %v15_v12 }
  0x85   :  { %v35_v13 = vpop.permute.xlu0 %34 }
  0x86   :  { %v42_v16 = vrot.slane %v35_v13, %v26_v8 }
  0x88   :  { %v44_v17 = vadd.f32 %v42_v16, %v29_v14  ;;  %v45_v18 = vadd.f32 %v42_v16, %v30_v15 }
  0x8a   :  { %v46_v19 = vmax.f32 %v44_v17, 0.0  ;;  %v47_v20 = vmax.f32 %v45_v18, 0.0 }
  0x8c   :  { %48 = vst [vmem:[%s100_s3] sm:$0xff] %v46_v19  ;;  %49 = vst [vmem:[%s100_s3 + $0x8] sm:$0xff] %v47_v20 }

// kernel: up_layer_forward.4
= control target key start
LH: loop header
LB: loop body
LE: loop exit
PB: predicated region body
PF: predicated region fallthrough
CT: control target
= control target key end

     0   :  { %s4611_s18 = smov 0   ;;  %s5432_s0 = inlined_call_operand.vmem [shape: bf16[2,4,256], index: 0, kind: input, shape index: {}]   ;;  %s5433_s1 = inlined_call_operand.vmem [shape: f32[4,1], index: 1, kind: input, shape index: {}]   ;;  %s5434_s2 = inlined_call_operand.vmem [shape: f32[4,1], index: 2, kind: input, shape index: {}]   ;;  %s5435_s3 = inlined_call_operand.vmem [shape: bf16[4,36], index: 3, kind: input, shape index: {}]   ;;  %s5436_s4 = inlined_call_operand.vmem [shape: f32[2,4,256], index: 4, kind: output, shape index: {0}]   ;;  %s5437_s5 = inlined_call_operand.vmem [shape: f32[2,4,2], index: 5, kind: output, shape index: {1}]  }
   0x1 LB: > { %s3876_s19 = sadd.s32 4294967295, %s4569_s18   ;;  %p3880_p0 = scmp.ge.s32.totalorder %s4569_s18, 1  ;;  %s4569_s18 = sphi %s4611_s18, %s16_s18  }
   0x2   : > { %p190_p1 = scmp.lt.s32.totalorder %s4569_s18, 3 }
   0x4   : > { %p191_p2 = pnand %p3880_p0, %p190_p1 }
   0x5   : > { %vm335_vm0 = vcmask (!%p191_p2), 27648   ;;  %vm338_vm1 = vcmask (!%p191_p2), 24576   ;;  %v4571_v0 = vmov (!%p191_p2), 0   ;;  %v239_v1 = vld [vmem:[%s5433_s1] sm:$0xf] (!%p191_p2)  ;;  %vm1118_vm6 = vcmask (!%p191_p2), 31744  }
   0x6   : > { %194 = sbr.rel (%p191_p2) target bundleno = 1098 (0x44a), region = 36  ;;  %4240 = vset.pattern.permute.xlu0 (!%p191_p2), %v4571_v0  ;;  %336 = vst.msk [vmem:[#allocation2] sm:$0xf] (!%p191_p2), %vm335_vm0, %v4571_v0  ;;  %337 = vst.msk [vmem:[#allocation2 + $0x4] sm:$0xf] (!%p191_p2), %vm335_vm0, %v4571_v0  ;;  %s4572_s24 = smov (!%p191_p2), 4   ;;  %v247_v29 = vlaneseq (!%p191_p2) }
   0x7   : > { %339 = vst.msk [vmem:[#allocation2 + $0x8] sm:$0x1] (!%p191_p2), %vm338_vm1, %v4571_v0  ;;  %343 = vst.msk [vmem:[#allocation2 + $0xd4] sm:$0x1] (!%p191_p2), %vm338_vm1, %v4571_v0  ;;  %vm345_vm2 = vsmask.f32 (!%p191_p2), 256  ;;  %242 = vperm.xlu0 (!%p191_p2), %4240, %v239_v1  }
   0x8   : > { %341 = vst.msk [vmem:[#allocation2 + $0xcc] sm:$0xf] (!%p191_p2), %vm335_vm0, %v4571_v0  ;;  %342 = vst.msk [vmem:[#allocation2 + $0xd0] sm:$0xf] (!%p191_p2), %vm335_vm0, %v4571_v0  ;;  %vm401_vm3 = vsmask.f32 (!%p191_p2), 7938 }
   0x9   : > { %v253_v2 = vld [vmem:[%s5434_s2] sm:$0xf] (!%p191_p2)  ;;  %vm4633_vm4 = vmand (!%p191_p2), %vm338_vm1, %vm345_vm2  ;;  %v350_v13 = vld [vmem:[#allocation2 + $0xc] sm:$0x1] (!%p191_p2)  ;;  %vm1311_vm7 = vsmask.f32 (!%p191_p2), 7424 }
   0xa   : > { %vm4639_vm5 = vmand (!%p191_p2), %vm338_vm1, %vm401_vm3  ;;  %v374_v14 = vld [vmem:[#allocation2 + $0x6c] sm:$0x1] (!%p191_p2)  ;;  %v351_v16 = vsel (!%p191_p2), %vm4633_vm4, 0, %v350_v13  ;;  %p222_p3 = scmp.lt.s32.totalorder (!%p191_p2), %s3876_s19, 1  ;;  %v4573_v27 = vmov (!%p191_p2), 839922192  }
   0xb   : > { %256 = vperm.xlu0 (!%p191_p2), %4240, %v253_v2   ;;  %352 = vst [vmem:[#allocation2 + $0xc] sm:$0x1] (!%p191_p2), %v351_v16  ;;  %v375_v21 = vsel (!%p191_p2), %vm4633_vm4, 0, %v374_v14  ;;  %v245_v28 = vunpack.c.l.s4 (!%p191_p2), %v4573_v27  ;;  %v248_v31 = vshrl.u32 (!%p191_p2), %v247_v29, 7  ;;  %vm1552_vm8 = vcmask (!%p191_p2), 64544   ;;  %s4574_s29 = smov (!%p191_p2), 8   ;;  %vm4719_vm10 = vmand (!%p191_p2), %vm335_vm0, %vm401_vm3 }
   0xc   : > { %376 = vst [vmem:[#allocation2 + $0x6c] sm:$0x1] (!%p191_p2), %v375_v21  ;;  %v406_v45 = vld [vmem:[#allocation2 + $0x14] sm:$0x1] (!%p191_p2)  ;;  %v377_v49 = vld [vmem:[#allocation2 + $0x78] sm:$0x1] (!%p191_p2) }
   0xd   : > { %v347_v5 = vld [vmem:[#allocation2] sm:$0x1]  ;;  %s5447_s19 = smov (!%p222_p3, %s3876_s19), 1  ;;  %v246_v30 = vunpack.c.0.s8 %v245_v28  ;;  %v430_v46 = vld [vmem:[#allocation2 + $0x74] sm:$0x1]  ;;  %v407_v47 = vsel %vm4639_vm5, 0, %v406_v45 }
   0xe   : > { %v403_v7 = vld [vmem:[#allocation2 + $0x8] sm:$0x1]  ;;  %v348_v8 = vsel %vm4633_vm4, 0, %v347_v5  ;;  %v454_v11 = vld [vmem:[#allocation2 + $0xd4] sm:$0x1]  ;;  %s4161_s25 = sshll.u32 %s5447_s19, 2 }
   0xf   : > { %v398_v6 = vld [vmem:[#allocation2 + $0xcc] sm:$0x1]  ;;  %v404_v10 = vsel %vm4639_vm5, 0, %v403_v7  ;;  %349 = vst [vmem:[#allocation2] sm:$0x1] %v348_v8  ;;  %v455_v12 = vsel %vm4639_vm5, 0, %v454_v11  ;;  %s226_s28 = scalar_lea.vmem %s5432_s0, %s4161_s25  ;;  %v249_v32 = vsub.s32 %v246_v30, %v248_v31  ;;  %s235_s21 = scalar_lea.vmem %s5437_s5, %s4161_s25 }
  0x10   : > { %v399_v9 = vsel %vm4633_vm4, 0, %v398_v6  ;;  %405 = vst [vmem:[#allocation2 + $0x8] sm:$0x1] %v404_v10  ;;  %456 = vst [vmem:[#allocation2 + $0xd4] sm:$0x1] %v455_v12  ;;  %v431_v48 = vsel %vm4639_vm5, 0, %v430_v46 }
  0x11   : > { %400 = vst [vmem:[#allocation2 + $0xcc] sm:$0x1] %v399_v9  ;;  %v237_v33 = vld [vmem:[%s226_s28] sm:$0xf]  ;;  %408 = vst [vmem:[#allocation2 + $0x14] sm:$0x1] %v407_v47 }
  0x12   : > { %v238_v35 = vunpack.c.l.bf16 %v237_v33  ;;  %432 = vst [vmem:[#allocation2 + $0x74] sm:$0x1] %v431_v48  ;;  %v378_v50 = vsel %vm4633_vm4, 0, %v377_v49  ;;  %v433_v51 = vld [vmem:[#allocation2 + $0x80] sm:$0x1]  ;;  %vm1745_vm9 = vcmask 1046528  }
  0x13   : > { %379 = vst [vmem:[#allocation2 + $0x78] sm:$0x1] %v378_v50  ;;  %v434_v52 = vsel %vm4639_vm5, 0, %v433_v51  ;;  %v353_v53 = vld [vmem:[#allocation2 + $0x18] sm:$0x1]  ;;  %s4575_s30 = smov 12  }
  0x14   : > { %435 = vst [vmem:[#allocation2 + $0x80] sm:$0x1] %v434_v52  ;;  %v4326_v54 = vld [vmem:[#allocation2] sm:$0xfe]   ;;  %v354_v55 = vsel %vm4633_vm4, 0, %v353_v53  ;;  %s4576_s6 = smov 20  }
  0x15   : > { %355 = vst [vmem:[#allocation2 + $0x18] sm:$0x1] %v354_v55  ;;  %v1746_v57 = vrot.slane %v4326_v54, 1  ;;  %v409_v60 = vld [vmem:[#allocation2 + $0x20] sm:$0x1]  ;;  %s4577_s7 = smov 16  }
  0x16   : > { %v4323_v15 = vld [vmem:[#allocation2] sm:$0xff]   ;;  %v410_v61 = vsel %vm4639_vm5, 0, %v409_v60  ;;  %v412_v2 = vld [vmem:[#allocation2 + $0x2c] sm:$0x1]  ;;  %v359_v8 = vld [vmem:[#allocation2 + $0x30] sm:$0x1] }
  0x17   : > { %v4324_v17 = vld [vmem:[#allocation2 + $0x8] ss:$0 sps:$4 sm:$0x11]   ;;  %v4325_v18 = vld [vmem:[#allocation2] sm:$0xff]   ;;  %v1313_v19 = vshrl.u32 %v4323_v15, 16  ;;  %v1315_v20 = vshll.u32 %v4323_v15, 16 }
  0x18   : > { %v1320_v22 = vshll.u32 %v4324_v17, 16  ;;  %1119 = vst.msk [vmem:[#allocation3] sm:$0xff] %vm1118_vm6, %v4325_v18  ;;  %v4327_v56 = vld [vmem:[#allocation2 + $0x8] ss:$0 sps:$4 sm:$0x11]   ;;  %v413_v6 = vsel %vm4639_vm5, 0, %v412_v2 }
  0x19   : > { %v1317_v23 = vrot.slane %v1315_v20, 1  ;;  %v1747_v58 = vrot.slane %v4327_v56, 1  ;;  %411 = vst [vmem:[#allocation2 + $0x20] sm:$0x1] %v410_v61  ;;  %v356_v62 = vld [vmem:[#allocation2 + $0x24] sm:$0x1] }
  0x1a   : > { %v1322_v24 = vrot.slane %v1320_v22, 1  ;;  %v380_v63 = vld [vmem:[#allocation2 + $0x84] sm:$0x1]  ;;  %v357_v0 = vsel %vm4633_vm4, 0, %v356_v62  ;;  %v436_v5 = vld [vmem:[#allocation2 + $0x8c] sm:$0x1] }
  0x1b   : > { %v1318_v25 = vor.u32 %v1317_v23, %v1313_v19  ;;  %v1748_v59 = vsel %vm1745_vm9, %v1746_v57, %v1747_v58  ;;  %v381_v1 = vsel %vm4633_vm4, 0, %v380_v63  ;;  %358 = vst [vmem:[#allocation2 + $0x24] sm:$0x1] %v357_v0  ;;  %v437_v7 = vsel %vm4639_vm5, 0, %v436_v5  ;;  %414 = vst [vmem:[#allocation2 + $0x2c] sm:$0x1] %v413_v6 }
  0x1c   : > { %1794 = vrot.lane.b32.xlu0 %v1748_v59, %s4574_s29  ;;  %382 = vst [vmem:[#allocation2 + $0x84] sm:$0x1] %v381_v1  ;;  %438 = vst [vmem:[#allocation2 + $0x8c] sm:$0x1] %v437_v7  ;;  %v383_v9 = vld [vmem:[#allocation2 + $0x90] sm:$0x1] }
  0x1d   : > { %v1323_v26 = vsel %vm1311_vm7, %v1318_v25, %v1322_v24  ;;  %v360_v10 = vsel %vm4633_vm4, 0, %v359_v8  ;;  %v384_v11 = vsel %vm4633_vm4, 0, %v383_v9  ;;  %v415_v12 = vld [vmem:[#allocation2 + $0x38] sm:$0x1]  ;;  %v362_v16 = vld [vmem:[#allocation2 + $0x3c] sm:$0x1] }
  0x1e   : > { %1504 = vrot.lane.b32.xlu1 %v1323_v26, %s4572_s24  ;;  %361 = vst [vmem:[#allocation2 + $0x30] sm:$0x1] %v360_v10  ;;  %385 = vst [vmem:[#allocation2 + $0x90] sm:$0x1] %v384_v11  ;;  %v439_v13 = vld [vmem:[#allocation2 + $0x98] sm:$0x1] }
  0x1f   : > { %v416_v14 = vsel %vm4639_vm5, 0, %v415_v12  ;;  %v440_v15 = vsel %vm4639_vm5, 0, %v439_v13  ;;  %v386_v17 = vld [vmem:[#allocation2 + $0x9c] sm:$0x1]  ;;  %v363_v18 = vsel %vm4633_vm4, 0, %v362_v16  ;;  %s4578_s8 = smov 24  }
  0x20   : > { %417 = vst [vmem:[#allocation2 + $0x38] sm:$0x1] %v416_v14  ;;  %441 = vst [vmem:[#allocation2 + $0x98] sm:$0x1] %v440_v15  ;;  %v387_v19 = vsel %vm4633_vm4, 0, %v386_v17  ;;  %s4579_s9 = smov 32  }
  0x21   : > { %364 = vst [vmem:[#allocation2 + $0x3c] sm:$0x1] %v363_v18  ;;  %388 = vst [vmem:[#allocation2 + $0x9c] sm:$0x1] %v387_v19  ;;  %v418_v20 = vld [vmem:[#allocation2 + $0x44] sm:$0x1] }
  0x22   : > { %v442_v21 = vld [vmem:[#allocation2 + $0xa4] sm:$0x1]  ;;  %v419_v22 = vsel %vm4639_vm5, 0, %v418_v20  ;;  %v365_v24 = vld [vmem:[#allocation2 + $0x48] sm:$0x1]  ;;  %s4580_s10 = smov 28  }
  0x23   : > { %v443_v23 = vsel %vm4639_vm5, 0, %v442_v21  ;;  %420 = vst [vmem:[#allocation2 + $0x44] sm:$0x1] %v419_v22  ;;  %v389_v25 = vld [vmem:[#allocation2 + $0xa8] sm:$0x1]  ;;  %v366_v27 = vsel %vm4633_vm4, 0, %v365_v24 }
  0x24   : > { %444 = vst [vmem:[#allocation2 + $0xa4] sm:$0x1] %v443_v23  ;;  %v390_v28 = vsel %vm4633_vm4, 0, %v389_v25  ;;  %367 = vst [vmem:[#allocation2 + $0x48] sm:$0x1] %v366_v27  ;;  %vm1842_vm13 = vcmask 97344  }
  0x25   : > { %391 = vst [vmem:[#allocation2 + $0xa8] sm:$0x1] %v390_v28  ;;  %v421_v33 = vld [vmem:[#allocation2 + $0x50] sm:$0x1]  ;;  %v878_v47 = vld [vmem:[#allocation2 + $0xc] sm:$0xf] }
  0x26   : > { %v934_v48 = vld [vmem:[#allocation2 + $0x6c] sm:$0xf]  ;;  %vm553_vm11 = vsmask.f32 4368  ;;  %v882_v6 = vld [vmem:[#allocation2 + $0x14] sm:$0x1] }
  0x27   : > { %vm4729_vm12 = vmor %vm345_vm2, %vm553_vm11  ;;  %v938_v7 = vld [vmem:[#allocation2 + $0x74] sm:$0x1]  ;;  %v885_v27 = vld [vmem:[#allocation2 + $0x18] sm:$0xf]  ;;  %vm2019_vm14 = vcmask 130144   ;;  %vm2452_vm15 = vcmask 162944  }
  0x28   : > { %v941_v28 = vld [vmem:[#allocation2 + $0x78] sm:$0xf]  ;;  %vm2919_vm1 = vcmask 228544   ;;  %vm3352_vm2 = vcmask 261344   ;;  %vm3641_vm3 = vcmask 294144   ;;  %s4162_s13 = sshll.u32 %s5447_s19, 3 }
  0x29   : > { %s231_s16 = scalar_lea.vmem %s5436_s4, %s4162_s13 }
  0x86   : > { %v243_v34 = vpop.permute.xlu0 %242 }
  0x87   : > { %v250_v36 = vrot.slane %v243_v34, %v249_v32  ;;  %v445_v34 = vld [vmem:[#allocation2 + $0xb0] sm:$0x1] }
  0x89   : > { %v252_v38 = vmul.f32 %v250_v36, %v238_v35  ;;  %v422_v36 = vsel %vm4639_vm5, 0, %v421_v33 }
  0x8a   : > { %v257_v37 = vpop.permute.xlu0 %256  ;;  %423 = vst [vmem:[#allocation2 + $0x50] sm:$0x1] %v422_v36 }
  0x8b   : > { %v264_v39 = vrot.slane %v257_v37, %v249_v32  ;;  %v446_v37 = vsel %vm4639_vm5, 0, %v445_v34 }
  0x8c   : > { %447 = vst [vmem:[#allocation2 + $0xb0] sm:$0x1] %v446_v37 }
  0x8d   : > { %v266_v40 = vadd.f32 %v264_v39, %v252_v38 }
  0x8f   : > { %v267_v41 = vmax.f32 %v266_v40, 0.0 }
  0x90   : > { %v1505_v43 = vpop.permute.xlu1 %1504 }
  0x91   : > { %v269_v42 = vcombine.high %v267_v41, %v267_v41  ;;  %1553 = vst.msk [vmem:[#allocation3] sm:$0xff] %vm1552_vm8, %v1505_v43 }
  0x93   : > { %v4241_v44 = vpack.i.bf16 %v269_v42, %v267_v41 }
  0x95   : > { %4242 = vxpose.xlu1.b32.start.end [1/1] (short) %v4241_v44, 128 }
 0x115   : > { %v4243_v26 = vpop.trf.xlu1 }
 0x116   : > { %v4247_v29 = vunpack.i.h.bf16 %v4243_v26  ;;  %v4244_v30 = vunpack.i.l.bf16 %v4243_v26 }
 0x118   : > { %v4179_v31 = vpack.c.bf16 %v4247_v29, %v4247_v29  ;;  %v4163_v32 = vpack.c.bf16 %v4244_v30, %v4244_v30 }
 0x119   : > { %v4248_v35 = vpop.trf.xlu1 }
 0x11a   : > { %v692_v38 = vshrl.u32 %v4179_v31, 16  ;;  %v556_v39 = vshrl.u32 %v4163_v32, 16  ;;  %v4252_v40 = vunpack.i.h.bf16 %v4248_v35  ;;  %v4249_v41 = vunpack.i.l.bf16 %v4248_v35  ;;  %v945_v35 = vld [vmem:[#allocation2 + $0x80] sm:$0x1] }
 0x11b   : > { %v695_v43 = vshll.u32 %v4179_v31, 16  ;;  %v559_v45 = vshll.u32 %v4163_v32, 16 }
 0x11c   : > { %v694_v42 = vrot.slane %v692_v38, 7  ;;  %v558_v44 = vrot.slane %v556_v39, 7  ;;  %v4180_v49 = vpack.c.bf16 %v4252_v40, %v4252_v40  ;;  %v4164_v50 = vpack.c.bf16 %v4249_v41, %v4249_v41 }
 0x11d   : > { %v4253_v51 = vpop.trf.xlu1 }
 0x11e   : > { %v697_v52 = vor.u32 %v695_v43, %v694_v42  ;;  %v698_v53 = vrot.slane %v694_v42, 4  ;;  %v561_v54 = vor.u32 %v559_v45, %v558_v44  ;;  %v562_v55 = vrot.slane %v558_v44, 4 }
 0x11f   : > { %v700_v56 = vshrl.u32 %v4180_v49, 16  ;;  %v703_v57 = vshll.u32 %v4180_v49, 16  ;;  %v564_v58 = vshrl.u32 %v4164_v50, 16  ;;  %v567_v59 = vshll.u32 %v4164_v50, 16 }
 0x120   : > { %v935_v60 = vsel %vm4719_vm10, %v697_v52, %v934_v48  ;;  %v879_v61 = vsel %vm4719_vm10, %v561_v54, %v878_v47  ;;  %v4257_v62 = vunpack.i.h.bf16 %v4253_v51  ;;  %v4254_v1 = vunpack.i.l.bf16 %v4253_v51  ;;  %v889_v51 = vld [vmem:[#allocation2 + $0x20] sm:$0x1] }
 0x121   : > { %936 = vst [vmem:[#allocation2 + $0x6c] sm:$0xf] %v935_v60  ;;  %880 = vst [vmem:[#allocation2 + $0xc] sm:$0xf] %v879_v61  ;;  %v702_v63 = vrot.slane %v700_v56, 7  ;;  %v566_v0 = vrot.slane %v564_v58, 7  ;;  %v4258_v2 = vpop.trf.xlu1 }
 0x122   : > { %v4181_v8 = vpack.c.bf16 %v4257_v62, %v4257_v62  ;;  %v4262_v9 = vunpack.i.h.bf16 %v4258_v2  ;;  %v4165_v16 = vpack.c.bf16 %v4254_v1, %v4254_v1  ;;  %v4259_v30 = vunpack.i.l.bf16 %v4258_v2  ;;  %v892_v2 = vld [vmem:[#allocation2 + $0x24] sm:$0xf] }
 0x123   : > { %v705_v10 = vor.u32 %v703_v57, %v702_v63  ;;  %v707_v11 = vrot.slane %v702_v63, 4  ;;  %v569_v12 = vor.u32 %v567_v59, %v566_v0  ;;  %v571_v13 = vrot.slane %v566_v0, 4 }
 0x124   : > { %v709_v14 = vshrl.u32 %v4181_v8, 16  ;;  %v712_v15 = vshll.u32 %v4181_v8, 16  ;;  %v4182_v17 = vpack.c.bf16 %v4262_v9, %v4262_v9  ;;  %v573_v24 = vshrl.u32 %v4165_v16, 16 }
 0x125   : > { %v939_v18 = vsel %vm4633_vm4, %v707_v11, %v938_v7  ;;  %v570_v19 = vsel %vm4729_vm12, %v562_v55, %v569_v12  ;;  %v706_v20 = vsel %vm4729_vm12, %v698_v53, %v705_v10  ;;  %v883_v21 = vsel %vm4633_vm4, %v571_v13, %v882_v6  ;;  %v4263_v22 = vpop.trf.xlu1  ;;  %v948_v53 = vld [vmem:[#allocation2 + $0x84] sm:$0xf] }
 0x126   : > { %940 = vst [vmem:[#allocation2 + $0x74] sm:$0x1] %v939_v18  ;;  %881 = vst.msk [vmem:[#allocation2 + $0x10] sm:$0xf] %vm335_vm0, %v570_v19  ;;  %v711_v23 = vrot.slane %v709_v14, 7  ;;  %v576_v25 = vshll.u32 %v4165_v16, 16  ;;  %v4267_v31 = vunpack.i.h.bf16 %v4263_v22  ;;  %v4166_v37 = vpack.c.bf16 %v4259_v30, %v4259_v30 }
 0x127   : > { %884 = vst [vmem:[#allocation2 + $0x14] sm:$0x1] %v883_v21  ;;  %937 = vst.msk [vmem:[#allocation2 + $0x70] sm:$0xf] %vm335_vm0, %v706_v20  ;;  %v717_v26 = vshrl.u32 %v4182_v17, 16  ;;  %v720_v29 = vshll.u32 %v4182_v17, 16  ;;  %v4264_v39 = vunpack.i.l.bf16 %v4263_v22 }
 0x128   : > { %v714_v32 = vor.u32 %v712_v15, %v711_v23  ;;  %v715_v33 = vrot.slane %v711_v23, 4  ;;  %v575_v34 = vrot.slane %v573_v24, 7  ;;  %v4183_v38 = vpack.c.bf16 %v4267_v31, %v4267_v31 }
 0x129   : > { %v719_v36 = vrot.slane %v717_v26, 7  ;;  %v4268_v40 = vpop.trf.xlu1  ;;  %v581_v47 = vshrl.u32 %v4166_v37, 16  ;;  %v584_v48 = vshll.u32 %v4166_v37, 16  ;;  %v4167_v55 = vpack.c.bf16 %v4264_v39, %v4264_v39 }
 0x12a   : > { %v942_v41 = vsel %vm4719_vm10, %v714_v32, %v941_v28  ;;  %v578_v42 = vor.u32 %v576_v25, %v575_v34  ;;  %v579_v43 = vrot.slane %v575_v34, 4  ;;  %v726_v49 = vshrl.u32 %v4183_v38, 16  ;;  %v952_v25 = vld [vmem:[#allocation2 + $0x8c] sm:$0x1] }
 0x12b   : > { %v722_v44 = vor.u32 %v720_v29, %v719_v36  ;;  %943 = vst [vmem:[#allocation2 + $0x78] sm:$0xf] %v942_v41  ;;  %v724_v45 = vrot.slane %v719_v36, 4  ;;  %v729_v54 = vshll.u32 %v4183_v38, 16  ;;  %v583_v57 = vrot.slane %v581_v47, 7 }
 0x12c   : > { %v886_v50 = vsel %vm4719_vm10, %v578_v42, %v885_v27  ;;  %v4752_v59 = vrot.slane %v726_v49, 7  ;;  %v4272_v60 = vunpack.i.h.bf16 %v4268_v40  ;;  %v590_v62 = vshrl.u32 %v4167_v55, 16  ;;  %v896_v41 = vld [vmem:[#allocation2 + $0x2c] sm:$0x1] }
 0x12d   : > { %v723_v52 = vsel %vm4729_vm12, %v715_v33, %v722_v44  ;;  %887 = vst [vmem:[#allocation2 + $0x18] sm:$0xf] %v886_v50  ;;  %v946_v56 = vsel %vm4633_vm4, %v724_v45, %v945_v35  ;;  %v4328_v58 = vld [vmem:[#allocation2 + $0xc] sm:$0xff]   ;;  %v4754_v61 = vpop.trf.xlu1  ;;  %v593_v63 = vshll.u32 %v4167_v55, 16  ;;  %v586_v0 = vor.u32 %v584_v48, %v583_v57 }
 0x12e   : > { %944 = vst.msk [vmem:[#allocation2 + $0x7c] sm:$0xf] %vm335_vm0, %v723_v52  ;;  %947 = vst [vmem:[#allocation2 + $0x80] sm:$0x1] %v946_v56  ;;  %v588_v1 = vrot.slane %v583_v57, 4  ;;  %1971 = vrot.lane.b32.xlu0 %v4328_v58, %s4575_s30  ;;  %v731_v6 = vor.u32 %v729_v54, %v4752_v59  ;;  %v732_v7 = vrot.slane %v4752_v59, 4  ;;  %v4184_v11 = vpack.c.bf16 %v4272_v60, %v4272_v60 }
 0x12f   : > { %v4329_v8 = vld [vmem:[#allocation2 + $0x6c] sm:$0xff]   ;;  %v4759_v10 = vrot.slane %v590_v62, 7  ;;  %v4269_v12 = vunpack.i.l.bf16 %v4268_v40  ;;  %v4331_v13 = vld [vmem:[#allocation2 + $0x14] ss:$0 sps:$4 sm:$0x11]   ;;  %v587_v14 = vsel %vm4729_vm12, %v579_v43, %v586_v0 }
 0x130   : > { %v4330_v9 = vld [vmem:[#allocation2 + $0xc] sm:$0xfe]   ;;  %v890_v15 = vsel %vm4633_vm4, %v588_v1, %v889_v51  ;;  %v949_v16 = vsel %vm4719_vm10, %v731_v6, %v948_v53  ;;  %888 = vst.msk [vmem:[#allocation2 + $0x1c] sm:$0xf] %vm335_vm0, %v587_v14  ;;  %v734_v23 = vshrl.u32 %v4184_v11, 16  ;;  %v737_v24 = vshll.u32 %v4184_v11, 16 }
 0x131   : > { %v2645_v17 = vrot.slane %v4330_v9, 1  ;;  %v4334_v18 = vld [vmem:[#allocation2 + $0xc] sm:$0xfe]   ;;  %v4769_v20 = vpop.trf.xlu1  ;;  %891 = vst [vmem:[#allocation2 + $0x20] sm:$0x1] %v890_v15  ;;  %v595_v21 = vor.u32 %v593_v63, %v4759_v10  ;;  %v596_v22 = vrot.slane %v4759_v10, 4  ;;  %v4168_v26 = vpack.c.bf16 %v4269_v12, %v4269_v12 }
 0x132   : > { %v4767_v19 = vld [vmem:[#allocation2 + $0xc] sm:$0xff]   ;;  %950 = vst [vmem:[#allocation2 + $0x84] sm:$0xf] %v949_v16  ;;  %1987 = vrot.lane.b32.xlu0 %v4329_v8, %s4575_s30  ;;  %v2646_v27 = vrot.slane %v4331_v13, 1  ;;  %v1749_v29 = vrot.slane %v4334_v18, 1  ;;  %v736_v32 = vrot.slane %v734_v23, 7 }
 0x133   : > { %v4335_v28 = vld [vmem:[#allocation2 + $0x14] ss:$0 sps:$4 sm:$0x11]   ;;  %v2213_v30 = vshrl.u32 %v4767_v19, 16  ;;  %v893_v31 = vsel %vm4719_vm10, %v595_v21, %v892_v2  ;;  %v598_v35 = vshrl.u32 %v4168_v26, 16  ;;  %v601_v36 = vshll.u32 %v4168_v26, 16 }
 0x134   : > { %894 = vst [vmem:[#allocation2 + $0x24] sm:$0xf] %v893_v31  ;;  %v2647_v37 = vsel %vm1745_vm9, %v2645_v17, %v2646_v27  ;;  %v1750_v38 = vrot.slane %v4335_v28, 1  ;;  %v739_v42 = vor.u32 %v737_v24, %v736_v32  ;;  %v741_v43 = vrot.slane %v736_v32, 4  ;;  %v4338_v62 = vld [vmem:[#allocation2 + $0x6c] sm:$0xfe]  }
 0x135   : > { %v4332_v33 = vld [vmem:[#allocation2 + $0x78] sm:$0xfe]   ;;  %v4781_v40 = vpop.trf.xlu1  ;;  %v4333_v44 = vld [vmem:[#allocation2 + $0x80] ss:$0 sps:$4 sm:$0x11]   ;;  %v600_v48 = vrot.slane %v598_v35, 7  ;;  %v4277_v24 = vunpack.i.h.bf16 %v4754_v61 }
 0x136   : > { %v4340_v34 = vld [vmem:[#allocation2 + $0x78] sm:$0xff]   ;;  %v2672_v45 = vrot.slane %v4332_v33, 1  ;;  %2693 = vrot.lane.b32.xlu0 %v2647_v37, %s4576_s6  ;;  %v953_v50 = vsel %vm4633_vm4, %v741_v43, %v952_v25  ;;  %v740_v51 = vsel %vm4729_vm12, %v732_v7, %v739_v42  ;;  %v2673_v52 = vrot.slane %v4333_v44, 1  ;;  %v4337_v58 = vld [vmem:[#allocation2 + $0x80] ss:$0 sps:$4 sm:$0x11]  }
 0x137   : > { %v4779_v39 = vld [vmem:[#allocation2 + $0x78] sm:$0xff]   ;;  %v2321_v47 = vshrl.u32 %v4340_v34, 16  ;;  %v2323_v49 = vshll.u32 %v4340_v34, 16  ;;  %954 = vst [vmem:[#allocation2 + $0x8c] sm:$0x1] %v953_v50  ;;  %v603_v55 = vor.u32 %v601_v36, %v600_v48  ;;  %v605_v56 = vrot.slane %v600_v48, 4 }
 0x138   : > { %v4336_v53 = vld [vmem:[#allocation2 + $0x78] sm:$0xfe]   ;;  %v1433_v54 = vshrl.u32 %v4779_v39, 16  ;;  %951 = vst.msk [vmem:[#allocation2 + $0x88] sm:$0xf] %vm335_vm0, %v740_v51  ;;  %v1751_v57 = vsel %vm1745_vm9, %v1749_v29, %v1750_v38  ;;  %v2674_v59 = vsel %vm1745_vm9, %v2672_v45, %v2673_v52  ;;  %v1777_v2 = vrot.slane %v4337_v58, 1 }
 0x139   : > { %v1776_v60 = vrot.slane %v4336_v53, 1  ;;  %v2325_v63 = vrot.slane %v2323_v49, 1  ;;  %v604_v0 = vsel %vm4729_vm12, %v596_v22, %v603_v55  ;;  %v897_v1 = vsel %vm4633_vm4, %v605_v56, %v896_v41  ;;  %2711 = vrot.lane.b32.xlu1 %v2674_v59, %s4576_s6  ;;  %v4339_v6 = vld [vmem:[#allocation2 + $0x74] ss:$0 sps:$4 sm:$0x11]   ;;  %v4798_v7 = vpop.trf.xlu1  ;;  %v4349_v18 = vld [vmem:[#allocation2 + $0xc] sm:$0xff]  }
 0x13a   : > { %1796 = vrot.lane.b32.xlu0 %v1751_v57, %s4574_s29  ;;  %895 = vst.msk [vmem:[#allocation2 + $0x28] sm:$0xf] %vm335_vm0, %v604_v0  ;;  %898 = vst [vmem:[#allocation2 + $0x2c] sm:$0x1] %v897_v1  ;;  %v2669_v8 = vrot.slane %v4338_v62, 1  ;;  %v1435_v9 = vshll.u32 %v4779_v39, 16  ;;  %v4274_v25 = vunpack.i.l.bf16 %v4754_v61  ;;  %v4282_v33 = vunpack.i.h.bf16 %v4769_v20 }
 0x13b   : > { %v1778_v10 = vsel %vm1745_vm9, %v1776_v60, %v1777_v2  ;;  %v2670_v11 = vrot.slane %v4339_v6, 1  ;;  %v4341_v12 = vld [vmem:[#allocation2 + $0x80] ss:$0 sps:$4 sm:$0x11]   ;;  %v4342_v13 = vld [vmem:[#allocation2 + $0x6c] sm:$0xfe]   ;;  %v2326_v15 = vor.u32 %v2325_v63, %v2321_v47  ;;  %v4185_v39 = vpack.c.bf16 %v4277_v24, %v4277_v24 }
 0x13c   : > { %v2328_v16 = vshll.u32 %v4341_v12, 16  ;;  %v4343_v17 = vld [vmem:[#allocation2 + $0x74] ss:$0 sps:$4 sm:$0x11]   ;;  %v1773_v22 = vrot.slane %v4342_v13, 1  ;;  %v1437_v28 = vrot.slane %v1435_v9, 1  ;;  %v4169_v41 = vpack.c.bf16 %v4274_v25, %v4274_v25 }
 0x13d   : > { %1814 = vrot.lane.b32.xlu1 %v1778_v10, %s4574_s29  ;;  %v2671_v14 = vsel %vm1745_vm9, %v2669_v8, %v2670_v11  ;;  %v4805_v21 = vpop.trf.xlu1  ;;  %v4345_v23 = vld [vmem:[#allocation2 + $0x80] ss:$0 sps:$4 sm:$0x11]   ;;  %v1774_v27 = vrot.slane %v4343_v17, 1  ;;  %v2215_v29 = vshll.u32 %v4767_v19, 16  ;;  %v1327_v44 = vshll.u32 %v4349_v18, 16 }
 0x13e   : > { %2709 = vrot.lane.b32.xlu0 %v2671_v14, %s4576_s6  ;;  %v2330_v26 = vrot.slane %v2328_v16, 1  ;;  %v1440_v31 = vshll.u32 %v4345_v23, 16  ;;  %v4347_v32 = vld [vmem:[#allocation2 + $0x14] ss:$0 sps:$4 sm:$0x11]   ;;  %v1438_v36 = vor.u32 %v1437_v28, %v1433_v54  ;;  %v4279_v45 = vunpack.i.l.bf16 %v4769_v20  ;;  %v4352_v16 = vld [vmem:[#allocation2 + $0x18] sm:$0xff]  }
 0x13f   : > { %v1775_v35 = vsel %vm1745_vm9, %v1773_v22, %v1774_v27  ;;  %v2217_v37 = vrot.slane %v2215_v29, 1  ;;  %v2220_v38 = vshll.u32 %v4347_v32, 16  ;;  %v4350_v43 = vld [vmem:[#allocation2 + $0x14] ss:$0 sps:$4 sm:$0x11]   ;;  %v1325_v50 = vshrl.u32 %v4349_v18, 16 }
 0x140   : > { %v2331_v34 = vsel %vm1311_vm7, %v2326_v15, %v2330_v26  ;;  %v1442_v61 = vrot.slane %v1440_v31, 1  ;;  %v1329_v51 = vrot.slane %v1327_v44, 1  ;;  %v1332_v52 = vshll.u32 %v4350_v43, 16  ;;  %v4348_v55 = vld [vmem:[#allocation2 + $0x84] sm:$0xff]   ;;  %v899_v58 = vld [vmem:[#allocation2 + $0x30] sm:$0xf] }
 0x141   : > { %2422 = vrot.lane.b32.xlu1 %v2331_v34, %s4577_s7  ;;  %v2218_v42 = vor.u32 %v2217_v37, %v2213_v30  ;;  %v4819_v47 = vpop.trf.xlu1  ;;  %v2222_v49 = vrot.slane %v2220_v38, 1  ;;  %v4186_v53 = vpack.c.bf16 %v4282_v33, %v4282_v33  ;;  %v743_v19 = vshrl.u32 %v4185_v39, 16  ;;  %v955_v59 = vld [vmem:[#allocation2 + $0x90] sm:$0xf]  ;;  %v4351_v63 = vld [vmem:[#allocation2 + $0x84] sm:$0xff]  }
 0x142   : > { %1812 = vrot.lane.b32.xlu0 %v1775_v35, %s4574_s29  ;;  %v1443_v48 = vsel %vm1311_vm7, %v1438_v36, %v1442_v61  ;;  %v746_v30 = vshll.u32 %v4185_v39, 16  ;;  %v607_v56 = vshrl.u32 %v4169_v41, 16  ;;  %v1330_v20 = vor.u32 %v1329_v51, %v1325_v50  ;;  %v4353_v2 = vld [vmem:[#allocation2 + $0x84] sm:$0xfe]   ;;  %v959_v15 = vld [vmem:[#allocation2 + $0x98] sm:$0x1] }
 0x143   : > { %v2223_v54 = vsel %vm1311_vm7, %v2218_v42, %v2222_v49  ;;  %v1334_v57 = vrot.slane %v1332_v52, 1  ;;  %v610_v60 = vshll.u32 %v4169_v41, 16  ;;  %v745_v0 = vrot.slane %v743_v19, 7  ;;  %v4354_v9 = vld [vmem:[#allocation2 + $0x8c] ss:$0 sps:$4 sm:$0x11]  }
 0x144   : > { %v609_v1 = vrot.slane %v607_v56, 7  ;;  %v4170_v6 = vpack.c.bf16 %v4279_v45, %v4279_v45  ;;  %v751_v10 = vshrl.u32 %v4186_v53, 16  ;;  %v3572_v17 = vrot.slane %v4353_v2, 1  ;;  %v4356_v28 = vld [vmem:[#allocation2 + $0x84] sm:$0xfe]   ;;  %v4358_v61 = vld [vmem:[#allocation2 + $0x6c] sm:$0xff]  }
 0x145   : > { %1524 = vrot.lane.b32.xlu1 %v1443_v48, %s4572_s24  ;;  %v4825_v62 = vpop.trf.xlu1  ;;  %v1335_v8 = vsel %vm1311_vm7, %v1330_v20, %v1334_v57  ;;  %v748_v11 = vor.u32 %v746_v30, %v745_v0  ;;  %v749_v12 = vrot.slane %v745_v0, 4  ;;  %v3573_v18 = vrot.slane %v4354_v9, 1  ;;  %v903_v29 = vld [vmem:[#allocation2 + $0x38] sm:$0x1]  ;;  %v4362_v44 = vld [vmem:[#allocation2 + $0x6c] sm:$0xff]   ;;  %v4364_v51 = vld [vmem:[#allocation2 + $0x84] sm:$0xff]  }
 0x146   : > { %2404 = vrot.lane.b32.xlu0 %v2223_v54, %s4577_s7  ;;  %v612_v13 = vor.u32 %v610_v60, %v609_v1  ;;  %v613_v14 = vrot.slane %v609_v1, 4  ;;  %v753_v22 = vrot.slane %v751_v10, 7  ;;  %v754_v23 = vshll.u32 %v4186_v53, 16  ;;  %v4357_v33 = vld [vmem:[#allocation2 + $0x8c] ss:$0 sps:$4 sm:$0x11]  }
 0x147   : > { %v956_v24 = vsel %vm4719_vm10, %v748_v11, %v955_v59  ;;  %v615_v26 = vshrl.u32 %v4170_v6, 16  ;;  %v618_v27 = vshll.u32 %v4170_v6, 16  ;;  %v3574_v35 = vsel %vm1745_vm9, %v3572_v17, %v3573_v18  ;;  %v4359_v38 = vld [vmem:[#allocation2 + $0x74] ss:$0 sps:$4 sm:$0x11]   ;;  %v4355_v39 = vld [vmem:[#allocation2 + $0x18] sm:$0xff]  }
 0x148   : > { %v900_v25 = vsel %vm4719_vm10, %v612_v13, %v899_v58  ;;  %957 = vst [vmem:[#allocation2 + $0x90] sm:$0xf] %v956_v24  ;;  %v756_v31 = vor.u32 %v754_v23, %v753_v22  ;;  %v758_v32 = vrot.slane %v753_v22, 4  ;;  %v2675_v37 = vrot.slane %v4356_v28, 1  ;;  %v4360_v54 = vld [vmem:[#allocation2 + $0x84] sm:$0xfe]  }
 0x149   : > { %2889 = vrot.lane.b32.xlu1 %v4348_v55, %s4578_s8  ;;  %901 = vst [vmem:[#allocation2 + $0x30] sm:$0xf] %v900_v25  ;;  %v4834_v34 = vpop.trf.xlu1  ;;  %v617_v36 = vrot.slane %v615_v26, 7  ;;  %v2676_v43 = vrot.slane %v4357_v33, 1  ;;  %v2309_v49 = vshrl.u32 %v4358_v61, 16  ;;  %v2311_v50 = vshll.u32 %v4358_v61, 16 }
 0x14a   : > { %1506 = vrot.lane.b32.xlu0 %v1335_v8, %s4572_s24  ;;  %v960_v41 = vsel %vm4633_vm4, %v758_v32, %v959_v15  ;;  %v757_v42 = vsel %vm4729_vm12, %v749_v12, %v756_v31  ;;  %v2316_v53 = vshll.u32 %v4359_v38, 16  ;;  %v4361_v55 = vld [vmem:[#allocation2 + $0x8c] ss:$0 sps:$4 sm:$0x11]   ;;  %v1421_v20 = vshrl.u32 %v4362_v44, 16  ;;  %v4367_v22 = vld [vmem:[#allocation2 + $0x84] sm:$0xff]  }
 0x14b   : > { %961 = vst [vmem:[#allocation2 + $0x98] sm:$0x1] %v960_v41  ;;  %v620_v45 = vor.u32 %v618_v27, %v617_v36  ;;  %v622_v48 = vrot.slane %v617_v36, 4  ;;  %958 = vst.msk [vmem:[#allocation2 + $0x94] sm:$0xf] %vm335_vm0, %v757_v42  ;;  %v2677_v52 = vsel %vm1745_vm9, %v2675_v37, %v2676_v43  ;;  %v2313_v56 = vrot.slane %v2311_v50, 1 }
 0x14c   : > { %v2318_v57 = vrot.slane %v2316_v53, 1  ;;  %v1779_v58 = vrot.slane %v4360_v54, 1  ;;  %v1780_v59 = vrot.slane %v4361_v55, 1  ;;  %v1423_v60 = vshll.u32 %v4362_v44, 16  ;;  %v4370_v31 = vld [vmem:[#allocation2 + $0x84] sm:$0xff]   ;;  %v4366_v33 = vld [vmem:[#allocation2 + $0x78] sm:$0xff]  }
 0x14d   : > { %1991 = vrot.lane.b32.xlu1 %v4351_v63, %s4575_s30  ;;  %v621_v19 = vsel %vm4729_vm12, %v613_v14, %v620_v45  ;;  %v904_v30 = vsel %vm4633_vm4, %v622_v48, %v903_v29  ;;  %v4852_v63 = vpop.trf.xlu1  ;;  %v2314_v0 = vor.u32 %v2313_v56, %v2309_v49  ;;  %v4363_v1 = vld [vmem:[#allocation2 + $0x74] ss:$0 sps:$4 sm:$0x11]   ;;  %v3221_v2 = vshrl.u32 %v4364_v51, 16  ;;  %v4369_v45 = vld [vmem:[#allocation2 + $0x78] sm:$0xff]  }
 0x14e   : > { %2871 = vrot.lane.b32.xlu0 %v4352_v16, %s4578_s8  ;;  %902 = vst.msk [vmem:[#allocation2 + $0x34] sm:$0xf] %vm335_vm0, %v621_v19  ;;  %905 = vst [vmem:[#allocation2 + $0x38] sm:$0x1] %v904_v30  ;;  %v1425_v6 = vrot.slane %v1423_v60, 1  ;;  %v3223_v8 = vshll.u32 %v4364_v51, 16  ;;  %v1781_v12 = vsel %vm1745_vm9, %v1779_v58, %v1780_v59  ;;  %v4287_v15 = vunpack.i.h.bf16 %v4781_v40 }
 0x14f   : > { %v2319_v9 = vsel %vm1311_vm7, %v2314_v0, %v2318_v57  ;;  %v1428_v10 = vshll.u32 %v4363_v1, 16  ;;  %v4365_v11 = vld [vmem:[#allocation2 + $0x8c] ss:$0 sps:$4 sm:$0x11]   ;;  %v2333_v27 = vshrl.u32 %v4367_v22, 16  ;;  %v2335_v28 = vshll.u32 %v4367_v22, 16 }
 0x150   : > { %v1426_v13 = vor.u32 %v1425_v6, %v1421_v20  ;;  %v3225_v14 = vrot.slane %v3223_v8, 1  ;;  %v3228_v17 = vshll.u32 %v4365_v11, 16  ;;  %v4368_v23 = vld [vmem:[#allocation2 + $0x8c] ss:$0 sps:$4 sm:$0x11]   ;;  %v4187_v36 = vpack.c.bf16 %v4287_v15, %v4287_v15 }
 0x151   : > { %3611 = vrot.lane.b32.xlu1 %v3574_v35, %s4579_s9  ;;  %v1430_v16 = vrot.slane %v1428_v10, 1  ;;  %v4859_v24 = vpop.trf.xlu1  ;;  %v2340_v29 = vshll.u32 %v4368_v23, 16  ;;  %v4371_v35 = vld [vmem:[#allocation2 + $0x8c] ss:$0 sps:$4 sm:$0x11]   ;;  %v2337_v37 = vrot.slane %v2335_v28, 1  ;;  %v4284_v42 = vunpack.i.l.bf16 %v4781_v40 }
 0x152   : > { %1973 = vrot.lane.b32.xlu0 %v4355_v39, %s4575_s30  ;;  %v3226_v18 = vor.u32 %v3225_v14, %v3221_v2  ;;  %v3230_v26 = vrot.slane %v3228_v17, 1  ;;  %v1445_v38 = vshrl.u32 %v4370_v31, 16  ;;  %v1447_v39 = vshll.u32 %v4370_v31, 16  ;;  %v4372_v49 = vld [vmem:[#allocation2 + $0x18] sm:$0xfe]   ;;  %v4374_v60 = vld [vmem:[#allocation2 + $0x90] sm:$0xff]  }
 0x153   : > { %v1431_v25 = vsel %vm1311_vm7, %v1426_v13, %v1430_v16  ;;  %v2342_v61 = vrot.slane %v2340_v29, 1  ;;  %v1452_v41 = vshll.u32 %v4371_v35, 16  ;;  %v4292_v43 = vunpack.i.h.bf16 %v4798_v7  ;;  %v4373_v50 = vld [vmem:[#allocation2 + $0x20] ss:$0 sps:$4 sm:$0x11]   ;;  %v4377_v22 = vld [vmem:[#allocation2 + $0x90] sm:$0xff]  }
 0x154   : > { %v3231_v32 = vsel %vm1311_vm7, %v3226_v18, %v3230_v26  ;;  %v2338_v44 = vor.u32 %v2337_v37, %v2333_v27  ;;  %v1449_v48 = vrot.slane %v1447_v39, 1  ;;  %v3545_v55 = vrot.slane %v4372_v49, 1  ;;  %v4375_v30 = vld [vmem:[#allocation2 + $0x18] sm:$0xfe]   ;;  %v4380_v26 = vld [vmem:[#allocation2 + $0x90] sm:$0xfe]  }
 0x155   : > { %2713 = vrot.lane.b32.xlu1 %v2677_v52, %s4576_s6  ;;  %v1454_v51 = vrot.slane %v1452_v41, 1  ;;  %v760_v52 = vshrl.u32 %v4187_v36, 16  ;;  %v3546_v19 = vrot.slane %v4373_v50, 1  ;;  %v4171_v40 = vpack.c.bf16 %v4284_v42, %v4284_v42  ;;  %v4376_v57 = vld [vmem:[#allocation2 + $0x20] ss:$0 sps:$4 sm:$0x11]  }
 0x156   : > { %2420 = vrot.lane.b32.xlu0 %v2319_v9, %s4577_s7  ;;  %v2343_v53 = vsel %vm1311_vm7, %v2338_v44, %v2342_v61  ;;  %v1450_v54 = vor.u32 %v1449_v48, %v1445_v38  ;;  %v4188_v56 = vpack.c.bf16 %v4292_v43, %v4292_v43  ;;  %v962_v58 = vld [vmem:[#allocation2 + $0x9c] sm:$0xf]  ;;  %v2648_v0 = vrot.slane %v4375_v30, 1  ;;  %v4379_v11 = vld [vmem:[#allocation2 + $0x20] ss:$0 sps:$4 sm:$0x11]  }
 0x157   : > { %v762_v59 = vrot.slane %v760_v52, 7  ;;  %v763_v1 = vshll.u32 %v4187_v36, 16  ;;  %v4289_v2 = vunpack.i.l.bf16 %v4798_v7  ;;  %v3547_v6 = vsel %vm1745_vm9, %v3545_v55, %v3546_v19  ;;  %v4378_v9 = vld [vmem:[#allocation2 + $0x18] sm:$0xfe]   ;;  %v966_v29 = vld [vmem:[#allocation2 + $0xa4] sm:$0x1] }
 0x158   : > { %v1455_v20 = vsel %vm1311_vm7, %v1450_v54, %v1454_v51  ;;  %v2649_v8 = vrot.slane %v4376_v57, 1  ;;  %v624_v13 = vshrl.u32 %v4171_v40, 16  ;;  %v627_v14 = vshll.u32 %v4171_v40, 16  ;;  %v906_v17 = vld [vmem:[#allocation2 + $0x3c] sm:$0xf] }
 0x159   : > { %1816 = vrot.lane.b32.xlu1 %v1781_v12, %s4574_s29  ;;  %v766_v10 = vrot.slane %v762_v59, 4  ;;  %v765_v12 = vor.u32 %v763_v1, %v762_v59  ;;  %v768_v15 = vshrl.u32 %v4188_v56, 16  ;;  %v1752_v16 = vrot.slane %v4378_v9, 1  ;;  %v4381_v28 = vld [vmem:[#allocation2 + $0x98] ss:$0 sps:$4 sm:$0x11]  }
 0x15a   : > { %1522 = vrot.lane.b32.xlu0 %v1431_v25, %s4572_s24  ;;  %v771_v18 = vshll.u32 %v4188_v56, 16  ;;  %v1753_v23 = vrot.slane %v4379_v11, 1  ;;  %v626_v25 = vrot.slane %v624_v13, 7  ;;  %v4172_v27 = vpack.c.bf16 %v4289_v2, %v4289_v2  ;;  %v4382_v61 = vld [vmem:[#allocation2 + $0x78] sm:$0xfe]  }
 0x15b   : > { %v963_v7 = vsel %vm4719_vm10, %v765_v12, %v962_v58  ;;  %v770_v31 = vrot.slane %v768_v15, 7  ;;  %v3575_v36 = vrot.slane %v4380_v26, 1  ;;  %v3576_v37 = vrot.slane %v4381_v28, 1  ;;  %v4383_v38 = vld [vmem:[#allocation2 + $0x80] ss:$0 sps:$4 sm:$0x11]  }
 0x15c   : > { %964 = vst [vmem:[#allocation2 + $0x9c] sm:$0xf] %v963_v7  ;;  %v630_v35 = vrot.slane %v626_v25, 4  ;;  %v632_v43 = vshrl.u32 %v4172_v27, 16  ;;  %v635_v44 = vshll.u32 %v4172_v27, 16  ;;  %v3569_v48 = vrot.slane %v4382_v61, 1 }
 0x15d   : > { %3322 = vrot.lane.b32.xlu1 %v3231_v32, %s4580_s10  ;;  %v2650_v32 = vsel %vm1745_vm9, %v2648_v0, %v2649_v8  ;;  %v773_v39 = vor.u32 %v771_v18, %v770_v31  ;;  %v775_v42 = vrot.slane %v770_v31, 4  ;;  %v3570_v49 = vrot.slane %v4383_v38, 1  ;;  %v910_v50 = vld [vmem:[#allocation2 + $0x44] sm:$0x1]  ;;  %v4384_v55 = vld [vmem:[#allocation2 + $0x90] sm:$0xfe]  }
 0x15e   : > { %2887 = vrot.lane.b32.xlu0 %v4366_v33, %s4578_s8  ;;  %v629_v33 = vor.u32 %v627_v14, %v626_v25  ;;  %v1754_v52 = vsel %vm1745_vm9, %v1752_v16, %v1753_v23  ;;  %v634_v54 = vrot.slane %v632_v43, 7  ;;  %v4385_v19 = vld [vmem:[#allocation2 + $0x98] ss:$0 sps:$4 sm:$0x11]   ;;  %v3577_v30 = vsel %vm1745_vm9, %v3575_v36, %v3576_v37  ;;  %v4388_v8 = vld [vmem:[#allocation2 + $0x90] sm:$0xfe]  }
 0x15f   : > { %v774_v51 = vsel %vm4729_vm12, %v766_v10, %v773_v39  ;;  %v2679_v57 = vrot.slane %v4385_v19, 1  ;;  %v4387_v58 = vld [vmem:[#allocation2 + $0x20] ss:$0 sps:$4 sm:$0x11]   ;;  %v3571_v0 = vsel %vm1745_vm9, %v3569_v48, %v3570_v49  ;;  %v4390_v9 = vld [vmem:[#allocation2 + $0x18] sm:$0xff]   ;;  %v1782_v14 = vrot.slane %v4388_v8, 1 }
 0x160   : > { %v907_v41 = vsel %vm4719_vm10, %v629_v33, %v906_v17  ;;  %965 = vst.msk [vmem:[#allocation2 + $0xa0] sm:$0xf] %vm335_vm0, %v774_v51  ;;  %v637_v40 = vor.u32 %v635_v44, %v634_v54  ;;  %v639_v56 = vrot.slane %v634_v54, 4  ;;  %v4389_v12 = vld [vmem:[#allocation2 + $0x98] ss:$0 sps:$4 sm:$0x11]   ;;  %v4297_v48 = vunpack.i.h.bf16 %v4805_v21 }
 0x161   : > { %2424 = vrot.lane.b32.xlu1 %v2343_v53, %s4577_s7  ;;  %908 = vst [vmem:[#allocation2 + $0x3c] sm:$0xf] %v907_v41  ;;  %v967_v53 = vsel %vm4633_vm4, %v775_v42, %v966_v29  ;;  %v1783_v16 = vrot.slane %v4389_v12, 1  ;;  %v4391_v17 = vld [vmem:[#allocation2 + $0x20] ss:$0 sps:$4 sm:$0x11]  }
 0x162   : > { %1989 = vrot.lane.b32.xlu0 %v4369_v45, %s4575_s30  ;;  %v4386_v45 = vld [vmem:[#allocation2 + $0x18] sm:$0xff]   ;;  %968 = vst [vmem:[#allocation2 + $0xa4] sm:$0x1] %v967_v53  ;;  %v638_v1 = vsel %vm4729_vm12, %v630_v35, %v637_v40  ;;  %v911_v2 = vsel %vm4633_vm4, %v639_v56, %v910_v50  ;;  %v2225_v18 = vshrl.u32 %v4390_v9, 16  ;;  %v2232_v26 = vshll.u32 %v4391_v17, 16  ;;  %v4392_v27 = vld [vmem:[#allocation2 + $0x90] sm:$0xff]  }
 0x163   : > { %v3113_v59 = vshrl.u32 %v4386_v45, 16  ;;  %909 = vst.msk [vmem:[#allocation2 + $0x40] sm:$0xf] %vm335_vm0, %v638_v1  ;;  %912 = vst [vmem:[#allocation2 + $0x44] sm:$0x1] %v911_v2  ;;  %v1784_v7 = vsel %vm1745_vm9, %v1782_v14, %v1783_v16  ;;  %v3235_v33 = vshll.u32 %v4392_v27, 16  ;;  %v4189_v1 = vpack.c.bf16 %v4297_v48, %v4297_v48 }
 0x164   : > { %v4393_v28 = vld [vmem:[#allocation2 + $0x98] ss:$0 sps:$4 sm:$0x11]   ;;  %v2234_v31 = vrot.slane %v2232_v26, 1  ;;  %v4396_v42 = vld [vmem:[#allocation2 + $0x90] sm:$0xff]  }
 0x165   : > { %1526 = vrot.lane.b32.xlu1 %v1455_v20, %s4572_s24  ;;  %v2678_v20 = vrot.slane %v4384_v55, 1  ;;  %v4394_v35 = vld [vmem:[#allocation2 + $0x18] sm:$0xff]   ;;  %v3240_v36 = vshll.u32 %v4393_v28, 16  ;;  %v4395_v37 = vld [vmem:[#allocation2 + $0x20] ss:$0 sps:$4 sm:$0x11]  }
 0x166   : > { %3593 = vrot.lane.b32.xlu0 %v3547_v6, %s4579_s9  ;;  %v3120_v6 = vshll.u32 %v4387_v58, 16  ;;  %v3237_v38 = vrot.slane %v3235_v33, 1  ;;  %v1337_v39 = vshrl.u32 %v4394_v35, 16  ;;  %v1339_v41 = vshll.u32 %v4394_v35, 16  ;;  %v4399_v53 = vld [vmem:[#allocation2 + $0x90] sm:$0xff]   ;;  %v4403_v8 = vld [vmem:[#allocation2 + $0x78] sm:$0xff]  }
 0x167   : > { %v2680_v10 = vsel %vm1745_vm9, %v2678_v20, %v2679_v57  ;;  %v3242_v43 = vrot.slane %v3240_v36, 1  ;;  %v1344_v44 = vshll.u32 %v4395_v37, 16  ;;  %v2345_v51 = vshrl.u32 %v4396_v42, 16  ;;  %v4400_v20 = vld [vmem:[#allocation2 + $0x98] ss:$0 sps:$4 sm:$0x11]  }
 0x168   : > { %v3122_v13 = vrot.slane %v3120_v6, 1  ;;  %v1341_v50 = vrot.slane %v1339_v41, 1  ;;  %v1457_v57 = vshrl.u32 %v4399_v53, 16  ;;  %v1459_v58 = vshll.u32 %v4399_v53, 16  ;;  %v969_v26 = vld [vmem:[#allocation2 + $0xa8] sm:$0xf] }
 0x169   : > { %2891 = vrot.lane.b32.xlu1 %v4374_v60, %s4578_s8  ;;  %v3115_v60 = vshll.u32 %v4386_v45, 16  ;;  %v4397_v45 = vld [vmem:[#allocation2 + $0x98] ss:$0 sps:$4 sm:$0x11]   ;;  %v1346_v54 = vrot.slane %v1344_v44, 1  ;;  %v1464_v6 = vshll.u32 %v4400_v20, 16 }
 0x16a   : > { %2695 = vrot.lane.b32.xlu0 %v2650_v32, %s4576_s6  ;;  %v3233_v32 = vshrl.u32 %v4392_v27, 16  ;;  %v2352_v55 = vshll.u32 %v4397_v45, 16  ;;  %v1461_v2 = vrot.slane %v1459_v58, 1  ;;  %v4404_v14 = vld [vmem:[#allocation2 + $0x80] ss:$0 sps:$4 sm:$0x11]   ;;  %v4299_v27 = vunpack.i.l.bf16 %v4819_v47 }
 0x16b   : > { %v3117_v11 = vrot.slane %v3115_v60, 1  ;;  %v3209_v16 = vshrl.u32 %v4403_v8, 16  ;;  %v777_v17 = vshrl.u32 %v4189_v1, 16  ;;  %v4406_v28 = vld [vmem:[#allocation2 + $0x24] sm:$0xfe]  }
 0x16c   : > { %v3238_v49 = vor.u32 %v3237_v38, %v3233_v32  ;;  %v2354_v56 = vrot.slane %v2352_v55, 1  ;;  %v1462_v12 = vor.u32 %v1461_v2, %v1457_v57  ;;  %v4407_v35 = vld [vmem:[#allocation2 + $0x2c] ss:$0 sps:$4 sm:$0x11]   ;;  %v3548_v38 = vrot.slane %v4406_v28, 1 }
 0x16d   : > { %1993 = vrot.lane.b32.xlu1 %v4377_v22, %s4575_s30  ;;  %v3118_v15 = vor.u32 %v3117_v11, %v3113_v59  ;;  %v2227_v22 = vshll.u32 %v4390_v9, 16  ;;  %v4294_v59 = vunpack.i.l.bf16 %v4805_v21  ;;  %v4398_v11 = vld [vmem:[#allocation2 + $0x24] sm:$0xff]   ;;  %v3211_v21 = vshll.u32 %v4403_v8, 16  ;;  %v4408_v45 = vld [vmem:[#allocation2 + $0x9c] sm:$0xfe]  }
 0x16e   : > { %1798 = vrot.lane.b32.xlu0 %v1754_v52, %s4574_s29  ;;  %v2347_v52 = vshll.u32 %v4396_v42, 16  ;;  %v3243_v19 = vsel %vm1311_vm7, %v3238_v49, %v3242_v43  ;;  %v4405_v43 = vld [vmem:[#allocation2 + $0x9c] sm:$0xff]   ;;  %v3549_v44 = vrot.slane %v4407_v35, 1  ;;  %v4174_v48 = vpack.c.bf16 %v4299_v27, %v4299_v27  ;;  %v392_v27 = vld [vmem:[#allocation2 + $0xb4] sm:$0x1] }
 0x16f   : > { %v3123_v23 = vsel %vm1311_vm7, %v3118_v15, %v3122_v13  ;;  %v2229_v25 = vrot.slane %v2227_v22, 1  ;;  %v1466_v13 = vrot.slane %v1464_v6, 1  ;;  %v4173_v15 = vpack.c.bf16 %v4294_v59, %v4294_v59  ;;  %v4401_v22 = vld [vmem:[#allocation2 + $0x24] sm:$0xff]  }
 0x170   : > { %v2349_v40 = vrot.slane %v2347_v52, 1  ;;  %v649_v59 = vshrl.u32 %v4174_v48, 16  ;;  %v652_v2 = vshll.u32 %v4174_v48, 16  ;;  %v4418_v6 = vld [vmem:[#allocation2 + $0x24] sm:$0xff]   ;;  %v4307_v8 = vunpack.i.h.bf16 %v4825_v62 }
 0x171   : > { %3613 = vrot.lane.b32.xlu1 %v3577_v30, %s4579_s9  ;;  %v2230_v29 = vor.u32 %v2229_v25, %v2225_v18  ;;  %v1342_v30 = vor.u32 %v1341_v50, %v1337_v39  ;;  %v1467_v18 = vsel %vm1311_vm7, %v1462_v12, %v1466_v13  ;;  %v3216_v25 = vshll.u32 %v4404_v14, 16  ;;  %v913_v39 = vld [vmem:[#allocation2 + $0x48] sm:$0xf]  ;;  %v4409_v50 = vld [vmem:[#allocation2 + $0xa4] ss:$0 sps:$4 sm:$0x11]  }
 0x172   : > { %3609 = vrot.lane.b32.xlu0 %v3571_v0, %s4579_s9  ;;  %v2350_v0 = vor.u32 %v2349_v40, %v2345_v51  ;;  %v641_v36 = vshrl.u32 %v4173_v15, 16  ;;  %v644_v37 = vshll.u32 %v4173_v15, 16  ;;  %v4411_v40 = vld [vmem:[#allocation2 + $0x2c] ss:$0 sps:$4 sm:$0x11]   ;;  %v4304_v14 = vunpack.i.l.bf16 %v4825_v62 }
 0x173   : > { %v2235_v61 = vsel %vm1311_vm7, %v2230_v29, %v2234_v31  ;;  %v1347_v60 = vsel %vm1311_vm7, %v1342_v30, %v1346_v54  ;;  %v779_v29 = vrot.slane %v777_v17, 7  ;;  %v780_v31 = vshll.u32 %v4189_v1, 16  ;;  %v4410_v30 = vld [vmem:[#allocation2 + $0x24] sm:$0xfe]   ;;  %v917_v1 = vld [vmem:[#allocation2 + $0x50] sm:$0x1] }
 0x174   : > { %v2355_v9 = vsel %vm1311_vm7, %v2350_v0, %v2354_v56  ;;  %v3218_v33 = vrot.slane %v3216_v25, 1  ;;  %v3578_v54 = vrot.slane %v4408_v45, 1  ;;  %v973_v56 = vld [vmem:[#allocation2 + $0xb0] sm:$0x1]  ;;  %v2652_v0 = vrot.slane %v4411_v40, 1 }
 0x175   : > { %2715 = vrot.lane.b32.xlu1 %v2680_v10, %s4576_s6  ;;  %v4302_v10 = vunpack.i.h.bf16 %v4819_v47  ;;  %v782_v41 = vor.u32 %v780_v31, %v779_v29  ;;  %v783_v42 = vrot.slane %v779_v29, 4  ;;  %v643_v47 = vrot.slane %v641_v36, 7  ;;  %v4412_v12 = vld [vmem:[#allocation2 + $0x9c] sm:$0xfe]   ;;  %v368_v13 = vld [vmem:[#allocation2 + $0x54] sm:$0x1] }
 0x176   : > { %3304 = vrot.lane.b32.xlu0 %v3123_v23, %s4580_s10  ;;  %v4402_v23 = vld [vmem:[#allocation2 + $0x9c] sm:$0xff]   ;;  %v3125_v17 = vshrl.u32 %v4418_v6, 16  ;;  %v2681_v62 = vrot.slane %v4412_v12, 1  ;;  %v4191_v28 = vpack.c.bf16 %v4307_v8, %v4307_v8  ;;  %v4175_v35 = vpack.c.bf16 %v4304_v14, %v4304_v14 }
 0x177   : > { %v4190_v32 = vpack.c.bf16 %v4302_v10, %v4302_v10  ;;  %v970_v49 = vsel %vm4719_vm10, %v782_v41, %v969_v26  ;;  %v646_v52 = vor.u32 %v644_v37, %v643_v47  ;;  %v647_v53 = vrot.slane %v643_v47, 4  ;;  %v4414_v26 = vld [vmem:[#allocation2 + $0x24] sm:$0xfe]  }
 0x178   : > { %971 = vst [vmem:[#allocation2 + $0xa8] sm:$0xf] %v970_v49  ;;  %v4309_v45 = vunpack.i.l.bf16 %v4834_v34  ;;  %v4317_v48 = vunpack.i.h.bf16 %v4852_v63  ;;  %v661_v40 = vshll.u32 %v4175_v35, 16 }
 0x179   : > { %1818 = vrot.lane.b32.xlu1 %v1784_v7, %s4574_s29  ;;  %v3213_v7 = vrot.slane %v3211_v21, 1  ;;  %v785_v51 = vshrl.u32 %v4190_v32, 16  ;;  %v914_v20 = vsel %vm4719_vm10, %v646_v52, %v913_v39  ;;  %v788_v58 = vshll.u32 %v4190_v32, 16  ;;  %v4415_v32 = vld [vmem:[#allocation2 + $0x2c] ss:$0 sps:$4 sm:$0x11]  }
 0x17a   : > { %2406 = vrot.lane.b32.xlu0 %v2235_v61, %s4577_s7  ;;  %915 = vst [vmem:[#allocation2 + $0x48] sm:$0xf] %v914_v20  ;;  %v3550_v21 = vsel %vm1745_vm9, %v3548_v38, %v3549_v44  ;;  %v4416_v38 = vld [vmem:[#allocation2 + $0x9c] sm:$0xfe]   ;;  %v369_v39 = vsel %vm4633_vm4, 0, %v368_v13  ;;  %v1756_v41 = vrot.slane %v4415_v32, 1 }
 0x17b   : > { %v3214_v61 = vor.u32 %v3213_v7, %v3209_v16  ;;  %v787_v57 = vrot.slane %v785_v51, 7  ;;  %v4413_v16 = vld [vmem:[#allocation2 + $0xa4] ss:$0 sps:$4 sm:$0x11]   ;;  %370 = vst [vmem:[#allocation2 + $0x54] sm:$0x1] %v369_v39 }
 0x17c   : > { %v2682_v25 = vrot.slane %v4413_v16, 1  ;;  %v1785_v44 = vrot.slane %v4416_v38, 1  ;;  %v4419_v51 = vld [vmem:[#allocation2 + $0x2c] ss:$0 sps:$4 sm:$0x11]   ;;  %v393_v52 = vsel %vm4633_vm4, 0, %v392_v27 }
 0x17d   : > { %3324 = vrot.lane.b32.xlu1 %v3243_v19, %s4580_s10  ;;  %v3219_v55 = vsel %vm1311_vm7, %v3214_v61, %v3218_v33  ;;  %v3579_v19 = vrot.slane %v4409_v50, 1  ;;  %v792_v10 = vrot.slane %v787_v57, 4  ;;  %v3127_v33 = vshll.u32 %v4418_v6, 16  ;;  %394 = vst [vmem:[#allocation2 + $0xb4] sm:$0x1] %v393_v52 }
 0x17e   : > { %1508 = vrot.lane.b32.xlu0 %v1347_v60, %s4572_s24  ;;  %v2651_v60 = vrot.slane %v4410_v30, 1  ;;  %v2683_v37 = vsel %vm1745_vm9, %v2681_v62, %v2682_v25  ;;  %v1755_v61 = vrot.slane %v4414_v26, 1  ;;  %v658_v30 = vshrl.u32 %v4175_v35, 16  ;;  %v4424_v26 = vld [vmem:[#allocation2 + $0x9c] sm:$0xff]  }
 0x17f   : > { %v3580_v15 = vsel %vm1745_vm9, %v3578_v54, %v3579_v19  ;;  %v3129_v47 = vrot.slane %v3127_v33, 1  ;;  %v1795_v54 = vpop.permute.xlu0 %1794  ;;  %v797_v19 = vshll.u32 %v4191_v28, 16  ;;  %v3132_v20 = vshll.u32 %v4419_v51, 16  ;;  %v448_v38 = vld [vmem:[#allocation2 + $0xbc] sm:$0x1] }
 0x180   : > { %v2653_v36 = vsel %vm1745_vm9, %v2651_v60, %v2652_v0  ;;  %v1757_v49 = vsel %vm1745_vm9, %v1755_v61, %v1756_v41  ;;  %1843 = vst.msk [vmem:[#allocation3] sm:$0xff] %vm1842_vm13, %v1795_v54  ;;  %v4421_v60 = vld [vmem:[#allocation2 + $0xa4] ss:$0 sps:$4 sm:$0x11]   ;;  %v4322_v33 = vunpack.i.h.bf16 %v4859_v24  ;;  %v449_v41 = vsel %vm4639_vm5, 0, %v448_v38 }
 0x181   : > { %2426 = vrot.lane.b32.xlu1 %v2355_v9, %s4577_s7  ;;  %v790_v9 = vor.u32 %v788_v58, %v787_v57  ;;  %v4422_v58 = vld [vmem:[#allocation2 + $0x24] sm:$0xff]   ;;  %v3134_v6 = vrot.slane %v3132_v20, 1  ;;  %450 = vst [vmem:[#allocation2 + $0xbc] sm:$0x1] %v449_v41  ;;  %v2357_v54 = vshrl.u32 %v4424_v26, 16 }
 0x182   : > { %2873 = vrot.lane.b32.xlu0 %v4398_v11, %s4578_s8  ;;  %v651_v11 = vrot.slane %v649_v59, 7  ;;  %v4963_v59 = vrot.slane %v658_v30, 7  ;;  %v2237_v16 = vshrl.u32 %v4422_v58, 16 }
 0x183   : > { %v791_v7 = vsel %vm4729_vm12, %v783_v42, %v790_v9  ;;  %v4417_v42 = vld [vmem:[#allocation2 + $0xa4] ss:$0 sps:$4 sm:$0x11]  }
 0x184   : > { %972 = vst.msk [vmem:[#allocation2 + $0xac] sm:$0xf] %vm335_vm0, %v791_v7  ;;  %v1786_v50 = vrot.slane %v4417_v42, 1  ;;  %v663_v12 = vor.u32 %v661_v40, %v4963_v59  ;;  %v664_v13 = vrot.slane %v4963_v59, 4  ;;  %v976_v27 = vld [vmem:[#allocation2 + $0xb4] sm:$0xf]  ;;  %v4993_v40 = vpack.c.bf16 %v4322_v33, %v4322_v33 }
 0x185   : > { %1528 = vrot.lane.b32.xlu1 %v1467_v18, %s4572_s24  ;;  %v974_v18 = vsel %vm4633_vm4, %v792_v10, %v973_v56  ;;  %v4420_v56 = vld [vmem:[#allocation2 + $0x9c] sm:$0xff]   ;;  %v4423_v7 = vld [vmem:[#allocation2 + $0x2c] ss:$0 sps:$4 sm:$0x11]  }
 0x186   : > { %1975 = vrot.lane.b32.xlu0 %v4401_v22, %s4575_s30  ;;  %v654_v22 = vor.u32 %v652_v2, %v651_v11  ;;  %975 = vst [vmem:[#allocation2 + $0xb0] sm:$0x1] %v974_v18  ;;  %v4314_v2 = vunpack.i.l.bf16 %v4852_v63  ;;  %v3245_v10 = vshrl.u32 %v4420_v56, 16  ;;  %v3247_v14 = vshll.u32 %v4420_v56, 16 }
 0x187   : > { %v4973_v63 = vpack.c.bf16 %v4317_v48, %v4317_v48  ;;  %v4426_v48 = vld [vmem:[#allocation2 + $0x24] sm:$0xff]  }
 0x188   : > { %v655_v29 = vsel %vm4729_vm12, %v647_v53, %v654_v22  ;;  %v794_v53 = vshrl.u32 %v4191_v28, 16  ;;  %v3249_v22 = vrot.slane %v3247_v14, 1  ;;  %v4978_v32 = vpack.c.bf16 %v4314_v2, %v4314_v2 }
 0x189   : > { %2893 = vrot.lane.b32.xlu1 %v4402_v23, %s4578_s8  ;;  %v656_v23 = vrot.slane %v651_v11, 4  ;;  %916 = vst.msk [vmem:[#allocation2 + $0x4c] sm:$0xf] %vm335_vm0, %v655_v29  ;;  %v920_v11 = vld [vmem:[#allocation2 + $0x54] sm:$0xf]  ;;  %v1349_v30 = vshrl.u32 %v4426_v48, 16 }
 0x18a   : > { %3320 = vrot.lane.b32.xlu0 %v3219_v55, %s4580_s10  ;;  %v3130_v55 = vor.u32 %v3129_v47, %v3125_v17  ;;  %v4961_v57 = vrot.slane %v794_v53, 7  ;;  %v2239_v17 = vshll.u32 %v4422_v58, 16  ;;  %v921_v18 = vsel %vm4719_vm10, %v663_v12, %v920_v11  ;;  %v424_v29 = vld [vmem:[#allocation2 + $0x5c] sm:$0x1]  ;;  %v371_v58 = vld [vmem:[#allocation2 + $0x60] sm:$0x1] }
 0x18b   : > { %v918_v31 = vsel %vm4633_vm4, %v656_v23, %v917_v1  ;;  %v4176_v1 = vpack.c.bf16 %v4309_v45, %v4309_v45  ;;  %922 = vst [vmem:[#allocation2 + $0x54] sm:$0xf] %v921_v18  ;;  %v425_v61 = vsel %vm4639_vm5, 0, %v424_v29  ;;  %v4425_v53 = vld [vmem:[#allocation2 + $0xa4] ss:$0 sps:$4 sm:$0x11]  }
 0x18c   : > { %919 = vst [vmem:[#allocation2 + $0x50] sm:$0x1] %v918_v31  ;;  %v799_v8 = vor.u32 %v797_v19, %v4961_v57  ;;  %v800_v9 = vrot.slane %v4961_v57, 4  ;;  %v2241_v28 = vrot.slane %v2239_v17, 1  ;;  %426 = vst [vmem:[#allocation2 + $0x5c] sm:$0x1] %v425_v61 }
 0x18d   : > { %1995 = vrot.lane.b32.xlu1 %v4405_v43, %s4575_s30  ;;  %v4312_v43 = vunpack.i.h.bf16 %v4834_v34  ;;  %v1787_v34 = vsel %vm1745_vm9, %v1785_v44, %v1786_v50  ;;  %v669_v45 = vshll.u32 %v4176_v1, 16  ;;  %v2359_v19 = vshll.u32 %v4424_v26, 16  ;;  %v395_v11 = vld [vmem:[#allocation2 + $0xc0] sm:$0x1]  ;;  %v4444_v18 = vld [vmem:[#allocation2 + $0x78] sm:$0xff]  }
 0x18e   : > { %3595 = vrot.lane.b32.xlu0 %v3550_v21, %s4579_s9  ;;  %v3252_v21 = vshll.u32 %v4421_v60, 16  ;;  %v977_v35 = vsel %vm4719_vm10, %v799_v8, %v976_v27  ;;  %v2242_v39 = vor.u32 %v2241_v28, %v2237_v16  ;;  %v2364_v57 = vshll.u32 %v4425_v53, 16  ;;  %1129 = vst.msk [vmem:[#allocation3 + $0x50] sm:$0xff] %vm1118_vm6, %v4444_v18  ;;  %v4429_v61 = vld [vmem:[#allocation2 + $0xa4] ss:$0 sps:$4 sm:$0x11]  }
 0x18f   : > { %v4192_v0 = vpack.c.bf16 %v4312_v43, %v4312_v43  ;;  %978 = vst [vmem:[#allocation2 + $0xb4] sm:$0xf] %v977_v35  ;;  %v666_v43 = vshrl.u32 %v4176_v1, 16  ;;  %v2361_v60 = vrot.slane %v2359_v19, 1  ;;  %v1351_v1 = vshll.u32 %v4426_v48, 16 }
 0x190   : > { %v3254_v23 = vrot.slane %v3252_v21, 1  ;;  %v372_v2 = vsel %vm4633_vm4, 0, %v371_v58  ;;  %v811_v12 = vshrl.u32 %v4973_v63, 16  ;;  %v814_v14 = vshll.u32 %v4973_v63, 16  ;;  %v4428_v21 = vld [vmem:[#allocation2 + $0x9c] sm:$0xff]  }
 0x191   : > { %3615 = vrot.lane.b32.xlu1 %v3580_v15, %s4579_s9  ;;  %v3135_v15 = vsel %vm1311_vm7, %v3130_v55, %v3134_v6  ;;  %v802_v62 = vshrl.u32 %v4192_v0, 16  ;;  %v805_v31 = vshll.u32 %v4192_v0, 16  ;;  %v668_v52 = vrot.slane %v666_v43, 7  ;;  %v4427_v0 = vld [vmem:[#allocation2 + $0x2c] ss:$0 sps:$4 sm:$0x11]  }
 0x192   : > { %2697 = vrot.lane.b32.xlu0 %v2653_v36, %s4576_s6  ;;  %v3250_v36 = vor.u32 %v3249_v22, %v3245_v10  ;;  %v4319_v6 = vunpack.i.l.bf16 %v4859_v24  ;;  %373 = vst [vmem:[#allocation2 + $0x60] sm:$0x1] %v372_v2  ;;  %v2362_v16 = vor.u32 %v2361_v60, %v2357_v54  ;;  %v1353_v24 = vrot.slane %v1351_v1, 1  ;;  %v980_v22 = vld [vmem:[#allocation2 + $0xbc] sm:$0x1]  ;;  %v4430_v54 = vld [vmem:[#allocation2 + $0x30] sm:$0xff]  }
 0x193   : > { %v804_v42 = vrot.slane %v802_v62, 7  ;;  %v671_v56 = vor.u32 %v669_v45, %v668_v52  ;;  %v1356_v17 = vshll.u32 %v4427_v0, 16  ;;  %v396_v59 = vsel %vm4633_vm4, 0, %v395_v11  ;;  %v427_v43 = vld [vmem:[#allocation2 + $0x68] sm:$0x1] }
 0x194   : > { %v3255_v44 = vsel %vm1311_vm7, %v3250_v36, %v3254_v23  ;;  %397 = vst [vmem:[#allocation2 + $0xc0] sm:$0x1] %v396_v59  ;;  %v5015_v23 = vrot.slane %v811_v12, 7  ;;  %v675_v63 = vshrl.u32 %v4978_v32, 16  ;;  %v1354_v26 = vor.u32 %v1353_v24, %v1349_v30  ;;  %v4449_v36 = vld [vmem:[#allocation2 + $0xc] sm:$0xff]  }
 0x195   : > { %2717 = vrot.lane.b32.xlu1 %v2683_v37, %s4576_s6  ;;  %v2244_v37 = vshll.u32 %v4423_v7, 16  ;;  %v807_v50 = vor.u32 %v805_v31, %v804_v42  ;;  %v809_v51 = vrot.slane %v804_v42, 4  ;;  %v672_v10 = vsel %vm4729_vm12, %v664_v13, %v671_v56  ;;  %1120 = vst.msk [vmem:[#allocation3 + $0x8] sm:$0xff] %vm1118_vm6, %v4449_v36  ;;  %v4433_v24 = vld [vmem:[#allocation2 + $0xa8] sm:$0xff]   ;;  %v4438_v36 = vld [vmem:[#allocation2 + $0x30] sm:$0xfe]  }
 0x196   : > { %1800 = vrot.lane.b32.xlu0 %v1757_v49, %s4574_s29  ;;  %923 = vst.msk [vmem:[#allocation2 + $0x58] sm:$0xf] %vm335_vm0, %v672_v10  ;;  %v678_v7 = vshll.u32 %v4978_v32, 16  ;;  %v1358_v27 = vrot.slane %v1356_v17, 1  ;;  %v817_v31 = vrot.slane %v5015_v23, 4  ;;  %v677_v32 = vrot.slane %v675_v63, 7 }
 0x197   : > { %v2246_v47 = vrot.slane %v2244_v37, 1  ;;  %v808_v20 = vsel %vm4729_vm12, %v800_v9, %v807_v50  ;;  %v2366_v9 = vrot.slane %v2364_v57, 1  ;;  %v981_v62 = vsel %vm4633_vm4, %v809_v51, %v980_v22  ;;  %v4431_v10 = vld [vmem:[#allocation2 + $0xa8] sm:$0xff]   ;;  %v4435_v17 = vld [vmem:[#allocation2 + $0x38] ss:$0 sps:$4 sm:$0x11]  }
 0x198   : > { %979 = vst.msk [vmem:[#allocation2 + $0xb8] sm:$0xf] %vm335_vm0, %v808_v20  ;;  %982 = vst [vmem:[#allocation2 + $0xbc] sm:$0x1] %v981_v62  ;;  %v1469_v33 = vshrl.u32 %v4428_v21, 16  ;;  %v4178_v35 = vpack.c.bf16 %v4319_v6, %v4319_v6  ;;  %v1359_v37 = vsel %vm1311_vm7, %v1354_v26, %v1358_v27  ;;  %v1471_v38 = vshll.u32 %v4428_v21, 16 }
 0x199   : > { %1820 = vrot.lane.b32.xlu1 %v1787_v34, %s4574_s29  ;;  %v2247_v55 = vsel %vm1311_vm7, %v2242_v39, %v2246_v47  ;;  %v673_v34 = vrot.slane %v668_v52, 4  ;;  %v816_v39 = vor.u32 %v814_v14, %v5015_v23  ;;  %v680_v41 = vor.u32 %v678_v7, %v677_v32  ;;  %v927_v47 = vld [vmem:[#allocation2 + $0x60] sm:$0xf]  ;;  %v4436_v5 = vld [vmem:[#allocation2 + $0xa8] sm:$0xfe]  }
 0x19a   : > { %3306 = vrot.lane.b32.xlu0 %v3135_v15, %s4580_s10  ;;  %v924_v15 = vld [vmem:[#allocation2 + $0x5c] sm:$0x1]  ;;  %v681_v42 = vrot.slane %v677_v32, 4  ;;  %v1473_v45 = vrot.slane %v1471_v38, 1  ;;  %v1476_v48 = vshll.u32 %v4429_v61, 16  ;;  %v428_v50 = vsel %vm4639_vm5, 0, %v427_v43 }
 0x19b   : > { %v925_v13 = vsel %vm4633_vm4, %v673_v34, %v924_v15  ;;  %v822_v51 = vshll.u32 %v4993_v40, 16  ;;  %v928_v53 = vsel %vm4719_vm10, %v680_v41, %v927_v47  ;;  %429 = vst [vmem:[#allocation2 + $0x68] sm:$0x1] %v428_v50  ;;  %v683_v30 = vshrl.u32 %v4178_v35, 16  ;;  %v983_v20 = vld [vmem:[#allocation2 + $0xc0] sm:$0xf] }
 0x19c   : > { %926 = vst [vmem:[#allocation2 + $0x5c] sm:$0x1] %v925_v13  ;;  %v686_v56 = vshll.u32 %v4178_v35, 16  ;;  %929 = vst [vmem:[#allocation2 + $0x60] sm:$0xf] %v928_v53  ;;  %v1474_v57 = vor.u32 %v1473_v45, %v1469_v33  ;;  %v1478_v58 = vrot.slane %v1476_v48, 1  ;;  %v984_v0 = vsel %vm4719_vm10, %v816_v39, %v983_v20 }
 0x19d   : > { %3326 = vrot.lane.b32.xlu1 %v3255_v44, %s4580_s10  ;;  %v819_v44 = vshrl.u32 %v4993_v40, 16  ;;  %v5043_v40 = vld [vmem:[#allocation2 + $0xa8] sm:$0xff]   ;;  %v685_v6 = vrot.slane %v683_v30, 7  ;;  %985 = vst [vmem:[#allocation2 + $0xc0] sm:$0xf] %v984_v0  ;;  %v3552_v63 = vrot.slane %v4435_v17, 1 }
 0x19e   : > { %2408 = vrot.lane.b32.xlu0 %v2247_v55, %s4577_s7  ;;  %v451_v55 = vld [vmem:[#allocation2 + $0xc8] sm:$0x1]  ;;  %v1479_v11 = vsel %vm1311_vm7, %v1474_v57, %v1478_v58  ;;  %v4434_v15 = vld [vmem:[#allocation2 + $0x30] sm:$0xfe]   ;;  %v3257_v59 = vshrl.u32 %v5043_v40, 16  ;;  %v3259_v13 = vshll.u32 %v5043_v40, 16 }
 0x19f   : > { %v821_v19 = vrot.slane %v819_v44, 7  ;;  %v452_v60 = vsel %vm4639_vm5, 0, %v451_v55  ;;  %v688_v4 = vor.u32 %v686_v56, %v685_v6  ;;  %v690_v12 = vrot.slane %v685_v6, 4  ;;  %v4437_v7 = vld [vmem:[#allocation2 + $0xb0] ss:$0 sps:$4 sm:$0x11]  }
 0x1a0   : > { %v1972_v25 = vpop.permute.xlu0 %1971  ;;  %453 = vst [vmem:[#allocation2 + $0xc8] sm:$0x1] %v452_v60  ;;  %v3551_v22 = vrot.slane %v4434_v15, 1  ;;  %v3581_v33 = vrot.slane %v4436_v5, 1  ;;  %v3582_v35 = vrot.slane %v4437_v7, 1  ;;  %v3261_v61 = vrot.slane %v3259_v13, 1 }
 0x1a1   : > { %2020 = vst.msk [vmem:[#allocation3] sm:$0xff] %vm2019_vm14, %v1972_v25  ;;  %v2367_v25 = vsel %vm1311_vm7, %v2362_v16, %v2366_v9  ;;  %v824_v1 = vor.u32 %v822_v51, %v821_v19  ;;  %v826_v2 = vrot.slane %v821_v19, 4  ;;  %v4432_v9 = vld [vmem:[#allocation2 + $0x30] sm:$0xff]   ;;  %v689_v16 = vsel %vm4729_vm12, %v681_v42, %v688_v4  ;;  %v4440_v43 = vld [vmem:[#allocation2 + $0xa8] sm:$0xfe]  }
 0x1a2   : > { %2428 = vrot.lane.b32.xlu1 %v2367_v25, %s4577_s7  ;;  %1510 = vrot.lane.b32.xlu0 %v1359_v37, %s4572_s24  ;;  %v931_v18 = vld [vmem:[#allocation2 + $0x68] sm:$0x1]  ;;  %930 = vst.msk [vmem:[#allocation2 + $0x64] sm:$0xf] %vm335_vm0, %v689_v16  ;;  %v4447_v25 = vld [vmem:[#allocation2 + $0x30] sm:$0xff]   ;;  %v3553_v32 = vsel %vm1745_vm9, %v3551_v22, %v3552_v63  ;;  %v2654_v38 = vrot.slane %v4438_v36, 1  ;;  %v3583_v41 = vsel %vm1745_vm9, %v3581_v33, %v3582_v35 }
 0x1a3   : > { %v825_v14 = vsel %vm4729_vm12, %v817_v31, %v824_v1  ;;  %v932_v23 = vsel %vm4633_vm4, %v690_v12, %v931_v18  ;;  %v4439_v37 = vld [vmem:[#allocation2 + $0x38] ss:$0 sps:$4 sm:$0x11]   ;;  %v3137_v39 = vshrl.u32 %v4447_v25, 16  ;;  %v4450_v45 = vld [vmem:[#allocation2 + $0xa8] sm:$0xff]   ;;  %v2684_v50 = vrot.slane %v4440_v43, 1 }
 0x1a4   : > { %v4988_v49 = vpop.permute.xlu0 %1987  ;;  %986 = vst.msk [vmem:[#allocation2 + $0xc4] sm:$0xf] %vm335_vm0, %v825_v14  ;;  %933 = vst [vmem:[#allocation2 + $0x68] sm:$0x1] %v932_v23  ;;  %v2655_v42 = vrot.slane %v4439_v37, 1  ;;  %v2369_v56 = vshrl.u32 %v4450_v45, 16  ;;  %v3262_v60 = vor.u32 %v3261_v61, %v3257_v59 }
 0x1a5   : > { %v4441_v44 = vld [vmem:[#allocation2 + $0xb0] ss:$0 sps:$4 sm:$0x11]   ;;  %v4443_v53 = vld [vmem:[#allocation2 + $0x38] ss:$0 sps:$4 sm:$0x11]  }
 0x1a6   : > { %2875 = vrot.lane.b32.xlu0 %v4430_v54, %s4578_s8  ;;  %1530 = vrot.lane.b32.xlu1 %v1479_v11, %s4572_s24  ;;  %v2656_v48 = vsel %vm1745_vm9, %v2654_v38, %v2655_v42  ;;  %v2685_v51 = vrot.slane %v4441_v44, 1  ;;  %v3139_v54 = vshll.u32 %v4447_v25, 16  ;;  %v1759_v57 = vrot.slane %v4443_v53, 1  ;;  %v4446_v58 = vld [vmem:[#allocation2 + $0xb0] ss:$0 sps:$4 sm:$0x11]  }
 0x1a7   : > { %v987_v26 = vld [vmem:[#allocation2 + $0xc8] sm:$0x1]  ;;  %v3264_v40 = vshll.u32 %v4446_v58, 16  ;;  %v4448_v0 = vld [vmem:[#allocation2 + $0x38] ss:$0 sps:$4 sm:$0x11]  }
 0x1a8   : > { %v5002_v8 = vpop.permute.xlu0 %2693  ;;  %v988_v31 = vsel %vm4633_vm4, %v826_v2, %v987_v26  ;;  %v2686_v19 = vsel %vm1745_vm9, %v2684_v50, %v2685_v51  ;;  %v3141_v1 = vrot.slane %v3139_v54, 1  ;;  %v2371_v2 = vshll.u32 %v4450_v45, 16  ;;  %v4451_v12 = vld [vmem:[#allocation2 + $0xb0] ss:$0 sps:$4 sm:$0x11]   ;;  %v4460_v44 = vld [vmem:[#allocation2 + $0xb4] sm:$0xff]  }
 0x1a9   : > { %989 = vst [vmem:[#allocation2 + $0xc8] sm:$0x1] %v988_v31  ;;  %v3144_v4 = vshll.u32 %v4448_v0, 16  ;;  %v2376_v18 = vshll.u32 %v4451_v12, 16  ;;  %vm2741_vm0 = vcmask 195744   ;;  %v4455_v25 = vld [vmem:[#allocation2 + $0x30] sm:$0xff]  }
 0x1aa   : > { %1977 = vrot.lane.b32.xlu0 %v4432_v9, %s4575_s30  ;;  %2895 = vrot.lane.b32.xlu1 %v4431_v10, %s4578_s8  ;;  %v3266_v9 = vrot.slane %v3264_v40, 1  ;;  %v3142_v11 = vor.u32 %v3141_v1, %v3137_v39  ;;  %v2373_v14 = vrot.slane %v2371_v2, 1  ;;  %v4453_v22 = vld [vmem:[#allocation2 + $0x38] ss:$0 sps:$4 sm:$0x11]   ;;  %v1361_v36 = vshrl.u32 %v4455_v25, 16 }
 0x1ab   : > { %v5022_v28 = vpop.permute.xlu1 %2711  ;;  %v3146_v16 = vrot.slane %v3144_v4, 1  ;;  %v2378_v7 = vrot.slane %v2376_v18, 1  ;;  %v4456_v35 = vld [vmem:[#allocation2 + $0x38] ss:$0 sps:$4 sm:$0x11]   ;;  %v1363_v37 = vshll.u32 %v4455_v25, 16 }
 0x1ac   : > { %v5024_v29 = vpop.permute.xlu0 %1796  ;;  %v3267_v15 = vsel %vm1311_vm7, %v3262_v60, %v3266_v9  ;;  %v2374_v59 = vor.u32 %v2373_v14, %v2369_v56  ;;  %v1368_v39 = vshll.u32 %v4456_v35, 16  ;;  %v4458_v43 = vld [vmem:[#allocation2 + $0xbc] ss:$0 sps:$4 sm:$0x11]   ;;  %v3269_v54 = vshrl.u32 %v4460_v44, 16  ;;  %v4463_v58 = vld [vmem:[#allocation2 + $0x6c] sm:$0xff]  }
 0x1ad   : > { %v3147_v23 = vsel %vm1311_vm7, %v3142_v11, %v3146_v16  ;;  %v1365_v38 = vrot.slane %v1363_v37, 1  ;;  %v4461_v53 = vld [vmem:[#allocation2 + $0xbc] ss:$0 sps:$4 sm:$0x11]   ;;  %v4464_v40 = vld [vmem:[#allocation2 + $0xa8] sm:$0xff]   ;;  %1128 = vst.msk [vmem:[#allocation3 + $0x48] sm:$0xff] %vm1118_vm6, %v4463_v58 }
 0x1ae   : > { %3597 = vrot.lane.b32.xlu0 %v3553_v32, %s4579_s9  ;;  %1997 = vrot.lane.b32.xlu1 %v4433_v24, %s4575_s30  ;;  %v4452_v24 = vld [vmem:[#allocation2 + $0x30] sm:$0xff]   ;;  %v2379_v32 = vsel %vm1311_vm7, %v2374_v59, %v2378_v7  ;;  %v3276_v56 = vshll.u32 %v4461_v53, 16  ;;  %v4459_v0 = vld [vmem:[#allocation2 + $0x3c] sm:$0xff]   ;;  %v1483_v9 = vshll.u32 %v4464_v40, 16  ;;  %vm3675_vm4 = vcmask 293888  }
 0x1af   : > { %v1815_v52 = vpop.permute.xlu1 %1814  ;;  %v2249_v63 = vshrl.u32 %v4452_v24, 16  ;;  %v2251_v5 = vshll.u32 %v4452_v24, 16  ;;  %v1366_v45 = vor.u32 %v1365_v38, %v1361_v36  ;;  %v4465_v2 = vld [vmem:[#allocation2 + $0xb0] ss:$0 sps:$4 sm:$0x11]   ;;  %v4462_v14 = vld [vmem:[#allocation2 + $0x3c] sm:$0xff]  }
 0x1b0   : > { %v5039_v34 = vpop.permute.xlu0 %2709  ;;  %v4466_v11 = vld [vmem:[#allocation2 + $0x3c] sm:$0xfe]   ;;  %v4467_v16 = vld [vmem:[#allocation2 + $0x44] ss:$0 sps:$4 sm:$0x11]   ;;  %v4476_v36 = vld [vmem:[#allocation2 + $0xb4] sm:$0xff]  }
 0x1b1   : > { %v2253_v26 = vrot.slane %v2251_v5, 1  ;;  %v3554_v18 = vrot.slane %v4466_v11, 1  ;;  %v4469_v5 = vld [vmem:[#allocation2 + $0xb0] ss:$0 sps:$4 sm:$0x11]   ;;  %vm3773_vm5 = vcmask 1043456  }
 0x1b2   : > { %3617 = vrot.lane.b32.xlu1 %v3583_v41, %s4579_s9  ;;  %2699 = vrot.lane.b32.xlu0 %v2656_v48, %s4576_s6  ;;  %v4457_v41 = vld [vmem:[#allocation2 + $0xb4] sm:$0xfe]   ;;  %v1370_v48 = vrot.slane %v1368_v39, 1  ;;  %v4474_v38 = vld [vmem:[#allocation2 + $0x44] ss:$0 sps:$4 sm:$0x11]  }
 0x1b3   : > { %v5052_v46 = vpop.permute.xlu1 %2422  ;;  %v3584_v50 = vrot.slane %v4457_v41, 1  ;;  %v4478_v39 = vld [vmem:[#allocation2 + $0x3c] sm:$0xff]   ;;  %v4480_v58 = vld [vmem:[#allocation2 + $0xb4] sm:$0xfe]  }
 0x1b4   : > { %v5054_v21 = vpop.permute.xlu0 %1812 }
 0x1b6   : > { %2719 = vrot.lane.b32.xlu1 %v2686_v19, %s4576_s6  ;;  %v1371_v19 = vsel %vm1311_vm7, %v1366_v45, %v1370_v48  ;;  %v2383_v45 = vshll.u32 %v4476_v36, 16  ;;  %v3149_v48 = vshrl.u32 %v4478_v39, 16 }
 0x1b7   : > { %v1525_v62 = vpop.permute.xlu1 %1524 }
 0x1b8   : > { %1563 = vst.msk [vmem:[#allocation3 + $0x50] sm:$0xff] %vm1552_vm8, %v1525_v62  ;;  %v2405_v27 = vpop.permute.xlu0 %2404  ;;  %v2256_v62 = vshll.u32 %v4453_v22, 16  ;;  %v4468_v22 = vld [vmem:[#allocation2 + $0xa8] sm:$0xfe]   ;;  %v2385_v53 = vrot.slane %v2383_v45, 1 }
 0x1b9   : > { %1853 = vst.msk [vmem:[#allocation3 + $0x50] sm:$0xff] %vm1842_vm13, %v1815_v52  ;;  %v4442_v52 = vld [vmem:[#allocation2 + $0x30] sm:$0xfe]   ;;  %v1788_v7 = vrot.slane %v4468_v22, 1  ;;  %v4485_v22 = vld [vmem:[#allocation2 + $0x3c] sm:$0xff]  }
 0x1ba   : > { %2453 = vst.msk [vmem:[#allocation3] sm:$0xff] %vm2452_vm15, %v2405_v27  ;;  %v1758_v30 = vrot.slane %v4442_v52, 1  ;;  %3328 = vrot.lane.b32.xlu1 %v3267_v15, %s4580_s10  ;;  %v4454_v27 = vld [vmem:[#allocation2 + $0xb4] sm:$0xff]   ;;  %v2258_v33 = vrot.slane %v2256_v62, 1  ;;  %v3585_v52 = vrot.slane %v4458_v43, 1  ;;  %v1488_v15 = vshll.u32 %v4465_v2, 16 }
 0x1bb   : > { %v5074_v3 = vpop.permute.xlu1 %2889  ;;  %2742 = vst.msk [vmem:[#allocation3] sm:$0xff] %vm2741_vm0, %v5002_v8  ;;  %v2254_v8 = vor.u32 %v2253_v26, %v2249_v63  ;;  %v3555_v63 = vrot.slane %v4467_v16, 1  ;;  %v4470_v62 = vld [vmem:[#allocation2 + $0x3c] sm:$0xfe]   ;;  %v1789_v26 = vrot.slane %v4469_v5, 1 }
 0x1bc   : > { %v1507_v47 = vpop.permute.xlu0 %1506  ;;  %v1490_v59 = vrot.slane %v1488_v15, 1 }
 0x1bd   : > { %1554 = vst.msk [vmem:[#allocation3 + $0x8] sm:$0xff] %vm1552_vm8, %v1507_v47  ;;  %v2259_v42 = vsel %vm1311_vm7, %v2254_v8, %v2258_v33  ;;  %v1790_v33 = vsel %vm1745_vm9, %v1788_v7, %v1789_v26  ;;  %v4473_v8 = vld [vmem:[#allocation2 + $0x3c] sm:$0xfe]  }
 0x1be   : > { %1844 = vst.msk [vmem:[#allocation3 + $0x8] sm:$0xff] %vm1842_vm13, %v5024_v29  ;;  %v1760_v29 = vsel %vm1745_vm9, %v1758_v30, %v1759_v57  ;;  %2430 = vrot.lane.b32.xlu1 %v2379_v32, %s4577_s7  ;;  %v3586_v30 = vsel %vm1745_vm9, %v3584_v50, %v3585_v52  ;;  %v4475_v32 = vld [vmem:[#allocation2 + $0x84] sm:$0xff]  }
 0x1bf   : > { %v1992_v55 = vpop.permute.xlu1 %1991  ;;  %1802 = vrot.lane.b32.xlu0 %v1760_v29, %s4574_s29  ;;  %v3278_v29 = vrot.slane %v3276_v56, 1  ;;  %1130 = vst.msk [vmem:[#allocation3 + $0x58] sm:$0xff] %vm1118_vm6, %v4475_v32  ;;  %v4484_v7 = vld [vmem:[#allocation2 + $0xc0] sm:$0xff]   ;;  %v4488_v32 = vld [vmem:[#allocation2 + $0xc8] ss:$0 sps:$4 sm:$0x11]  }
 0x1c0   : > { %2030 = vst.msk [vmem:[#allocation3 + $0x50] sm:$0xff] %vm2019_vm14, %v1992_v55  ;;  %v2872_v20 = vpop.permute.xlu0 %2871  ;;  %v3271_v55 = vshll.u32 %v4460_v44, 16  ;;  %v4477_v44 = vld [vmem:[#allocation2 + $0xbc] ss:$0 sps:$4 sm:$0x11]  }
 0x1c1   : > { %2920 = vst.msk [vmem:[#allocation3] sm:$0xff] %vm2919_vm1, %v2872_v20  ;;  %v4487_v26 = vld [vmem:[#allocation2 + $0xc0] sm:$0xfe]  }
 0x1c2   : > { %2897 = vrot.lane.b32.xlu1 %v4454_v27, %s4578_s8  ;;  %v3273_v57 = vrot.slane %v3271_v55, 1  ;;  %v4471_v27 = vld [vmem:[#allocation2 + $0x44] ss:$0 sps:$4 sm:$0x11]  }
 0x1c3   : > { %v5087_v6 = vpop.permute.xlu1 %3611  ;;  %3308 = vrot.lane.b32.xlu0 %v3147_v23, %s4580_s10  ;;  %v2658_v35 = vrot.slane %v4471_v27, 1  ;;  %v4479_v55 = vld [vmem:[#allocation2 + $0x44] ss:$0 sps:$4 sm:$0x11]   ;;  %v4490_v27 = vld [vmem:[#allocation2 + $0xb4] sm:$0xff]  }
 0x1c4   : > { %v1974_v10 = vpop.permute.xlu0 %1973  ;;  %v3274_v1 = vor.u32 %v3273_v57, %v3269_v54  ;;  %v2388_v54 = vshll.u32 %v4477_v44, 16  ;;  %v3156_v57 = vshll.u32 %v4479_v55, 16  ;;  %v4494_v55 = vld [vmem:[#allocation2 + $0xbc] ss:$0 sps:$4 sm:$0x11]  }
 0x1c5   : > { %2021 = vst.msk [vmem:[#allocation3 + $0x8] sm:$0xff] %vm2019_vm14, %v1974_v10  ;;  %v1481_v10 = vshrl.u32 %v4464_v40, 16  ;;  %v4481_v40 = vld [vmem:[#allocation2 + $0xbc] ss:$0 sps:$4 sm:$0x11]  }
 0x1c6   : > { %3619 = vrot.lane.b32.xlu1 %v3586_v30, %s4579_s9  ;;  %v3279_v12 = vsel %vm1311_vm7, %v3274_v1, %v3278_v29  ;;  %v2390_v56 = vrot.slane %v2388_v54, 1  ;;  %v3158_v2 = vrot.slane %v3156_v57, 1  ;;  %v2688_v11 = vrot.slane %v4481_v40, 1  ;;  %v4493_v54 = vld [vmem:[#allocation2 + $0xb4] sm:$0xfe]   ;;  %v4492_v40 = vld [vmem:[#allocation2 + $0x48] sm:$0xff]  }
 0x1c7   : > { %v2714_v17 = vpop.permute.xlu1 %2713  ;;  %2410 = vrot.lane.b32.xlu0 %v2259_v42, %s4577_s7  ;;  %v1762_v42 = vrot.slane %v4474_v38, 1  ;;  %v1792_v57 = vrot.slane %v4494_v55, 1  ;;  %v4513_v55 = vld [vmem:[#allocation2 + $0xc8] ss:$0 sps:$4 sm:$0x11]  }
 0x1c8   : > { %v5093_v13 = vpop.permute.xlu0 %2420 }
 0x1ca   : > { %3330 = vrot.lane.b32.xlu1 %v3279_v12, %s4580_s10 }
 0x1cb   : > { %v5100_v31 = vpop.permute.xlu1 %1816  ;;  %1512 = vrot.lane.b32.xlu0 %v1371_v19, %s4572_s24  ;;  %v3151_v19 = vshll.u32 %v4478_v39, 16  ;;  %v4491_v39 = vld [vmem:[#allocation2 + $0xbc] ss:$0 sps:$4 sm:$0x11]  }
 0x1cc   : > { %v1523_v61 = vpop.permute.xlu0 %1522 }
 0x1cd   : > { %1562 = vst.msk [vmem:[#allocation3 + $0x48] sm:$0xff] %vm1552_vm8, %v1523_v61  ;;  %v4472_v61 = vld [vmem:[#allocation2 + $0xb4] sm:$0xff]  }
 0x1ce   : > { %1852 = vst.msk [vmem:[#allocation3 + $0x48] sm:$0xff] %vm1842_vm13, %v5054_v21 }
 0x1cf   : > { %v5105_v47 = vpop.permute.xlu1 %3322  ;;  %2877 = vrot.lane.b32.xlu0 %v4459_v0, %s4578_s8 }
 0x1d0   : > { %v5108_v51 = vpop.permute.xlu0 %2887 }
 0x1d3   : > { %v2425_v20 = vpop.permute.xlu1 %2424  ;;  %1979 = vrot.lane.b32.xlu0 %v4462_v14, %s4575_s30 }
 0x1d4   : > { %2463 = vst.msk [vmem:[#allocation3 + $0x50] sm:$0xff] %vm2452_vm15, %v2425_v20  ;;  %v1990_v60 = vpop.permute.xlu0 %1989  ;;  %v3153_v20 = vrot.slane %v3151_v19, 1 }
 0x1d5   : > { %2752 = vst.msk [vmem:[#allocation3 + $0x50] sm:$0xff] %vm2741_vm0, %v2714_v17  ;;  %v1485_v17 = vrot.slane %v1483_v9, 1 }
 0x1d6   : > { %2029 = vst.msk [vmem:[#allocation3 + $0x48] sm:$0xff] %vm2019_vm14, %v1990_v60  ;;  %v4482_v60 = vld [vmem:[#allocation2 + $0x3c] sm:$0xff]   ;;  %v3154_v1 = vor.u32 %v3153_v20, %v3149_v48  ;;  %v5188_v48 = vld [vmem:[#allocation2 + $0x48] sm:$0xff]  }
 0x1d7   : > { %v1527_v4 = vpop.permute.xlu1 %1526  ;;  %2462 = vst.msk [vmem:[#allocation3 + $0x48] sm:$0xff] %vm2452_vm15, %v5052_v46  ;;  %v1486_v23 = vor.u32 %v1485_v17, %v1481_v10  ;;  %v2687_v10 = vrot.slane %v4480_v58, 1  ;;  %v2261_v12 = vshrl.u32 %v4482_v60, 16  ;;  %v2263_v14 = vshll.u32 %v4482_v60, 16 }
 0x1d8   : > { %v5123_v24 = vpop.permute.xlu0 %3593  ;;  %2751 = vst.msk [vmem:[#allocation3 + $0x48] sm:$0xff] %vm2741_vm0, %v5022_v28  ;;  %v2657_v28 = vrot.slane %v4470_v62, 1  ;;  %v3159_v15 = vsel %vm1311_vm7, %v3154_v1, %v3158_v2  ;;  %v1373_v62 = vshrl.u32 %v4485_v22, 16  ;;  %v4496_v58 = vld [vmem:[#allocation2 + $0x50] ss:$0 sps:$4 sm:$0x11]  }
 0x1d9   : > { %2929 = vst.msk [vmem:[#allocation3 + $0x48] sm:$0xff] %vm2919_vm1, %v5074_v3  ;;  %v1491_v46 = vsel %vm1311_vm7, %v1486_v23, %v1490_v59  ;;  %v3556_v3 = vsel %vm1745_vm9, %v3554_v18, %v3555_v63  ;;  %v2689_v17 = vsel %vm1745_vm9, %v2687_v10, %v2688_v11  ;;  %v2265_v59 = vrot.slane %v2263_v14, 1  ;;  %v4486_v23 = vld [vmem:[#allocation2 + $0x44] ss:$0 sps:$4 sm:$0x11]   ;;  %v4505_v2 = vld [vmem:[#allocation2 + $0x90] sm:$0xff]  }
 0x1da   : > { %3362 = vst.msk [vmem:[#allocation3 + $0x48] sm:$0xff] %vm3352_vm2, %v5105_v47  ;;  %1532 = vrot.lane.b32.xlu1 %v1491_v46, %s4572_s24  ;;  %3599 = vrot.lane.b32.xlu0 %v3556_v3, %s4579_s9  ;;  %v2659_v43 = vsel %vm1745_vm9, %v2657_v28, %v2658_v35  ;;  %v2381_v47 = vshrl.u32 %v4476_v36, 16  ;;  %v1380_v46 = vshll.u32 %v4486_v23, 16  ;;  %v3587_v35 = vrot.slane %v4487_v26, 1  ;;  %v4499_v11 = vld [vmem:[#allocation2 + $0x48] sm:$0xfe]  }
 0x1db   : > { %v2892_v21 = vpop.permute.xlu1 %2891  ;;  %3651 = vst.msk [vmem:[#allocation3 + $0x48] sm:$0xff] %vm3641_vm3, %v5087_v6  ;;  %v1761_v6 = vrot.slane %v4473_v8, 1  ;;  %v2266_v5 = vor.u32 %v2265_v59, %v2261_v12  ;;  %v1493_v36 = vshrl.u32 %v4490_v27, 16  ;;  %v1495_v8 = vshll.u32 %v4490_v27, 16 }
 0x1dc   : > { %2930 = vst.msk [vmem:[#allocation3 + $0x50] sm:$0xff] %vm2919_vm1, %v2892_v21  ;;  %v5135_v25 = vpop.permute.xlu0 %2695  ;;  %v2386_v30 = vor.u32 %v2385_v53, %v2381_v47  ;;  %v1500_v47 = vshll.u32 %v4491_v39, 16  ;;  %v4500_v12 = vld [vmem:[#allocation2 + $0x50] ss:$0 sps:$4 sm:$0x11]  }
 0x1dd   : > { %1564 = vst.msk [vmem:[#allocation3 + $0x58] sm:$0xff] %vm1552_vm8, %v1527_v4  ;;  %v4483_v4 = vld [vmem:[#allocation2 + $0x44] ss:$0 sps:$4 sm:$0x11]   ;;  %v2661_v59 = vrot.slane %v4500_v12, 1 }
 0x1de   : > { %1822 = vrot.lane.b32.xlu1 %v1790_v33, %s4574_s29  ;;  %1854 = vst.msk [vmem:[#allocation3 + $0x58] sm:$0xff] %vm1842_vm13, %v5100_v31  ;;  %2701 = vrot.lane.b32.xlu0 %v2659_v43, %s4576_s6  ;;  %v1763_v31 = vsel %vm1745_vm9, %v1761_v6, %v1762_v42  ;;  %v2391_v0 = vsel %vm1311_vm7, %v2386_v30, %v2390_v56  ;;  %v2268_v18 = vshll.u32 %v4483_v4, 16  ;;  %v1382_v33 = vrot.slane %v1380_v46, 1  ;;  %v4495_v56 = vld [vmem:[#allocation2 + $0x48] sm:$0xfe]  }
 0x1df   : > { %v1994_v37 = vpop.permute.xlu1 %1993  ;;  %v1497_v43 = vrot.slane %v1495_v8, 1  ;;  %v1791_v30 = vrot.slane %v4493_v54, 1  ;;  %v3557_v1 = vrot.slane %v4495_v56, 1  ;;  %v3558_v4 = vrot.slane %v4496_v58, 1  ;;  %1131 = vst.msk [vmem:[#allocation3 + $0x60] sm:$0xff] %vm1118_vm6, %v4505_v2 }
 0x1e0   : > { %v5147_v41 = vpop.permute.xlu0 %1798  ;;  %2031 = vst.msk [vmem:[#allocation3 + $0x58] sm:$0xff] %vm2019_vm14, %v1994_v37  ;;  %v2270_v21 = vrot.slane %v2268_v18, 1  ;;  %v4501_v18 = vld [vmem:[#allocation2 + $0xc0] sm:$0xfe]   ;;  %v4514_v56 = vld [vmem:[#allocation2 + $0x54] sm:$0xfe]  }
 0x1e1   : > { %v1498_v53 = vor.u32 %v1497_v43, %v1493_v36  ;;  %v4509_v36 = vld [vmem:[#allocation2 + $0xc0] sm:$0xff]   ;;  %v4510_v39 = vld [vmem:[#allocation2 + $0xc8] ss:$0 sps:$4 sm:$0x11]  }
 0x1e2   : > { %1999 = vrot.lane.b32.xlu1 %v4472_v61, %s4575_s30  ;;  %1804 = vrot.lane.b32.xlu0 %v1763_v31, %s4574_s29  ;;  %v2271_v28 = vsel %vm1311_vm7, %v2266_v5, %v2270_v21  ;;  %v3588_v61 = vrot.slane %v4488_v32, 1  ;;  %v4489_v31 = vld [vmem:[#allocation2 + $0x48] sm:$0xff]   ;;  %v2690_v5 = vrot.slane %v4501_v18, 1  ;;  %v4515_v58 = vld [vmem:[#allocation2 + $0x5c] ss:$0 sps:$4 sm:$0x11]  }
 0x1e3   : > { %v5155_v50 = vpop.permute.xlu1 %3613  ;;  %v4520_v18 = vld [vmem:[#allocation2 + $0x60] sm:$0xff]  }
 0x1e4   : > { %v5158_v52 = vpop.permute.xlu0 %3609  ;;  %v3589_v42 = vsel %vm1745_vm9, %v3587_v35, %v3588_v61  ;;  %v4506_v61 = vld [vmem:[#allocation2 + $0xcc] sm:$0xff]  }
 0x1e6   : > { %2432 = vrot.lane.b32.xlu1 %v2391_v0, %s4577_s7  ;;  %3310 = vrot.lane.b32.xlu0 %v3159_v15, %s4580_s10  ;;  %v1793_v0 = vsel %vm1745_vm9, %v1791_v30, %v1792_v57  ;;  %v2660_v15 = vrot.slane %v4499_v11, 1  ;;  %v2400_v57 = vshll.u32 %v4513_v55, 16 }
 0x1e7   : > { %v5162_v29 = vpop.permute.xlu1 %2715 }
 0x1e8   : > { %v3305_v9 = vpop.permute.xlu0 %3304 }
 0x1e9   : > { %3353 = vst.msk [vmem:[#allocation3] sm:$0xff] %vm3352_vm2, %v3305_v9  ;;  %v4498_v9 = vld [vmem:[#allocation2 + $0xc0] sm:$0xff]  }
 0x1ea   : > { %3642 = vst.msk [vmem:[#allocation3] sm:$0xff] %vm3641_vm3, %v5123_v24  ;;  %2721 = vrot.lane.b32.xlu1 %v2689_v17, %s4576_s6  ;;  %v1375_v24 = vshll.u32 %v4485_v22, 16  ;;  %2412 = vrot.lane.b32.xlu0 %v2271_v28, %s4577_s7  ;;  %v4502_v22 = vld [vmem:[#allocation2 + $0xc8] ss:$0 sps:$4 sm:$0x11]  }
 0x1eb   : > { %v5171_v16 = vpop.permute.xlu1 %1818  ;;  %v2691_v21 = vrot.slane %v4502_v22, 1  ;;  %v4508_v28 = vld [vmem:[#allocation2 + $0x50] ss:$0 sps:$4 sm:$0x11]  }
 0x1ec   : > { %v2407_v63 = vpop.permute.xlu0 %2406  ;;  %v1377_v3 = vrot.slane %v1375_v24, 1 }
 0x1ed   : > { %2454 = vst.msk [vmem:[#allocation3 + $0x8] sm:$0xff] %vm2452_vm15, %v2407_v63  ;;  %v3559_v63 = vsel %vm1745_vm9, %v3557_v1, %v3558_v4  ;;  %v2692_v46 = vsel %vm1745_vm9, %v2690_v5, %v2691_v21  ;;  %v4517_v1 = vld [vmem:[#allocation2 + $0x5c] ss:$0 sps:$4 sm:$0x11]  }
 0x1ee   : > { %2743 = vst.msk [vmem:[#allocation3 + $0x8] sm:$0xff] %vm2741_vm0, %v5135_v25  ;;  %2899 = vrot.lane.b32.xlu1 %v4484_v7, %s4578_s8  ;;  %v1378_v38 = vor.u32 %v1377_v3, %v1373_v62  ;;  %v4497_v25 = vld [vmem:[#allocation2 + $0x18] sm:$0xff]   ;;  %v4504_v7 = vld [vmem:[#allocation2 + $0x50] ss:$0 sps:$4 sm:$0x11]   ;;  %v4507_v62 = vld [vmem:[#allocation2 + $0x48] sm:$0xff]   ;;  %v2662_v3 = vsel %vm1745_vm9, %v2660_v15, %v2661_v59 }
 0x1ef   : > { %v3325_v37 = vpop.permute.xlu1 %3324  ;;  %1121 = vst.msk [vmem:[#allocation3 + $0x10] sm:$0xff] %vm1118_vm6, %v4497_v25  ;;  %v3168_v26 = vshll.u32 %v4504_v7, 16  ;;  %v2273_v27 = vshrl.u32 %v4507_v62, 16  ;;  %v2275_v32 = vshll.u32 %v4507_v62, 16  ;;  %v3281_v25 = vshrl.u32 %v4509_v36, 16  ;;  %v4522_v7 = vld [vmem:[#allocation2 + $0x48] sm:$0xff]  }
 0x1f0   : > { %3363 = vst.msk [vmem:[#allocation3 + $0x50] sm:$0xff] %vm3352_vm2, %v3325_v37  ;;  %v1509_v6 = vpop.permute.xlu0 %1508  ;;  %v1383_v44 = vsel %vm1311_vm7, %v1378_v38, %v1382_v33  ;;  %v2280_v38 = vshll.u32 %v4508_v28, 16  ;;  %v3180_v4 = vshll.u32 %v4517_v1, 16  ;;  %v3560_v15 = vrot.slane %v4514_v56, 1 }
 0x1f1   : > { %3652 = vst.msk [vmem:[#allocation3 + $0x50] sm:$0xff] %vm3641_vm3, %v5155_v50  ;;  %1514 = vrot.lane.b32.xlu0 %v1383_v44, %s4572_s24  ;;  %v1502_v50 = vrot.slane %v1500_v47, 1  ;;  %v3170_v35 = vrot.slane %v3168_v26, 1  ;;  %v2277_v8 = vrot.slane %v2275_v32, 1  ;;  %v3288_v44 = vshll.u32 %v4510_v39, 16 }
 0x1f2   : > { %3621 = vrot.lane.b32.xlu1 %v3589_v42, %s4579_s9  ;;  %1555 = vst.msk [vmem:[#allocation3 + $0x10] sm:$0xff] %vm1552_vm8, %v1509_v6  ;;  %v3283_v6 = vshll.u32 %v4509_v36, 16  ;;  %v2282_v43 = vrot.slane %v2280_v38, 1  ;;  %v4519_v5 = vld [vmem:[#allocation2 + $0x68] ss:$0 sps:$4 sm:$0x11]  }
 0x1f3   : > { %v2427_v45 = vpop.permute.xlu1 %2426  ;;  %1845 = vst.msk [vmem:[#allocation3 + $0x10] sm:$0xff] %vm1842_vm13, %v5147_v41  ;;  %v1503_v20 = vsel %vm1311_vm7, %v1498_v53, %v1502_v50  ;;  %v3161_v41 = vshrl.u32 %v5188_v48, 16  ;;  %v4512_v53 = vld [vmem:[#allocation2 + $0xc0] sm:$0xff]   ;;  %v3290_v50 = vrot.slane %v3288_v44, 1  ;;  %v3182_v21 = vrot.slane %v3180_v4, 1 }
 0x1f4   : > { %2464 = vst.msk [vmem:[#allocation3 + $0x58] sm:$0xff] %vm2452_vm15, %v2427_v45  ;;  %v2874_v19 = vpop.permute.xlu0 %2873  ;;  %v2278_v45 = vor.u32 %v2277_v8, %v2273_v27  ;;  %v2395_v30 = vshll.u32 %v4512_v53, 16  ;;  %v1411_v26 = vshll.u32 %v4520_v18, 16  ;;  %v4523_v38 = vld [vmem:[#allocation2 + $0x50] ss:$0 sps:$4 sm:$0x11]  }
 0x1f5   : > { %2753 = vst.msk [vmem:[#allocation3 + $0x58] sm:$0xff] %vm2741_vm0, %v5162_v29  ;;  %2879 = vrot.lane.b32.xlu0 %v4489_v31, %s4578_s8  ;;  %v3163_v29 = vshll.u32 %v5188_v48, 16  ;;  %v3285_v48 = vrot.slane %v3283_v6, 1  ;;  %v2393_v31 = vshrl.u32 %v4512_v53, 16  ;;  %v1387_v39 = vshll.u32 %v4522_v7, 16 }
 0x1f6   : > { %2921 = vst.msk [vmem:[#allocation3 + $0x8] sm:$0xff] %vm2919_vm1, %v2874_v19  ;;  %1534 = vrot.lane.b32.xlu1 %v1503_v20, %s4572_s24  ;;  %v4525_v53 = vld [vmem:[#allocation2 + $0x48] sm:$0xfe]   ;;  %v4531_v4 = vld [vmem:[#allocation2 + $0x54] sm:$0xfe]  }
 0x1f7   : > { %v1529_v60 = vpop.permute.xlu1 %1528  ;;  %v3165_v17 = vrot.slane %v3163_v29, 1  ;;  %v3286_v19 = vor.u32 %v3285_v48, %v3281_v25  ;;  %v2402_v29 = vrot.slane %v2400_v57, 1  ;;  %v1385_v25 = vshrl.u32 %v4522_v7, 16  ;;  %v4526_v48 = vld [vmem:[#allocation2 + $0x50] ss:$0 sps:$4 sm:$0x11]  }
 0x1f8   : > { %v1976_v10 = vpop.permute.xlu0 %1975  ;;  %1565 = vst.msk [vmem:[#allocation3 + $0x60] sm:$0xff] %vm1552_vm8, %v1529_v60  ;;  %v2283_v60 = vsel %vm1311_vm7, %v2278_v45, %v2282_v43  ;;  %v1389_v44 = vrot.slane %v1387_v39, 1  ;;  %v1765_v57 = vrot.slane %v4526_v48, 1  ;;  %v4536_v7 = vld [vmem:[#allocation2 + $0x54] sm:$0xff]  }
 0x1f9   : > { %2022 = vst.msk [vmem:[#allocation3 + $0x10] sm:$0xff] %vm2019_vm14, %v1976_v10  ;;  %1981 = vrot.lane.b32.xlu0 %v4492_v40, %s4575_s30  ;;  %v3166_v33 = vor.u32 %v3165_v17, %v3161_v41  ;;  %v3291_v40 = vsel %vm1311_vm7, %v3286_v19, %v3290_v50  ;;  %v2397_v41 = vrot.slane %v2395_v30, 1  ;;  %v3561_v17 = vrot.slane %v4515_v58, 1  ;;  %v4540_v30 = vld [vmem:[#allocation2 + $0x30] sm:$0xff]  }
 0x1fa   : > { %1824 = vrot.lane.b32.xlu1 %v1793_v0, %s4574_s29  ;;  %1855 = vst.msk [vmem:[#allocation3 + $0x60] sm:$0xff] %vm1842_vm13, %v5171_v16  ;;  %v4516_v0 = vld [vmem:[#allocation2 + $0x54] sm:$0xff]   ;;  %v1390_v55 = vor.u32 %v1389_v44, %v1385_v25  ;;  %v4560_v25 = vld [vmem:[#allocation2 + $0x60] sm:$0xff]  }
 0x1fb   : > { %v2894_v14 = vpop.permute.xlu1 %2893  ;;  %v3171_v47 = vsel %vm1311_vm7, %v3166_v33, %v3170_v35  ;;  %v2398_v2 = vor.u32 %v2397_v41, %v2393_v31  ;;  %v3175_v11 = vshll.u32 %v4516_v0, 16  ;;  %v3173_v59 = vshrl.u32 %v4516_v0, 16  ;;  %v4529_v31 = vld [vmem:[#allocation2 + $0x54] sm:$0xff]   ;;  %1123 = vst.msk [vmem:[#allocation3 + $0x20] sm:$0xff] %vm1118_vm6, %v4540_v30  ;;  %1127 = vst.msk [vmem:[#allocation3 + $0x40] sm:$0xff] %vm1118_vm6, %v4560_v25 }
 0x1fc   : > { %2931 = vst.msk [vmem:[#allocation3 + $0x58] sm:$0xff] %vm2919_vm1, %v2894_v14  ;;  %v5213_v23 = vpop.permute.xlu0 %3320  ;;  %v3562_v62 = vsel %vm1745_vm9, %v3560_v15, %v3561_v17  ;;  %v1771_v33 = vrot.slane %v4519_v5, 1  ;;  %v1409_v35 = vshrl.u32 %v4520_v18, 16  ;;  %v2287_v41 = vshll.u32 %v4529_v31, 16 }
 0x1fd   : > { %3601 = vrot.lane.b32.xlu0 %v3559_v63, %s4579_s9  ;;  %v2403_v14 = vsel %vm1311_vm7, %v2398_v2, %v2402_v29  ;;  %v3177_v22 = vrot.slane %v3175_v11, 1  ;;  %v4518_v63 = vld [vmem:[#allocation2 + $0x60] sm:$0xfe]   ;;  %v2285_v1 = vshrl.u32 %v4529_v31, 16  ;;  %v4528_v11 = vld [vmem:[#allocation2 + $0x54] sm:$0xff]  }
 0x1fe   : > { %2001 = vrot.lane.b32.xlu1 %v4498_v9, %s4575_s30  ;;  %v4511_v9 = vld [vmem:[#allocation2 + $0x54] sm:$0xff]   ;;  %v1770_v28 = vrot.slane %v4518_v63, 1  ;;  %v2289_v2 = vrot.slane %v2287_v41, 1 }
 0x1ff   : > { %v1996_v24 = vpop.permute.xlu1 %1995  ;;  %v4555_v44 = vld [vmem:[#allocation2 + $0xd4] ss:$0 sps:$4 sm:$0x11]  }
 0x200   : > { %2032 = vst.msk [vmem:[#allocation3 + $0x60] sm:$0xff] %vm2019_vm14, %v1996_v24  ;;  %v3596_v16 = vpop.permute.xlu0 %3595  ;;  %v3178_v24 = vor.u32 %v3177_v22, %v3173_v59  ;;  %v2663_v22 = vrot.slane %v4531_v4, 1 }
 0x201   : > { %2703 = vrot.lane.b32.xlu0 %v2662_v3, %s4576_s6  ;;  %v4524_v3 = vld [vmem:[#allocation2 + $0x24] sm:$0xff]  }
 0x202   : > { %2723 = vrot.lane.b32.xlu1 %v2692_v46, %s4576_s6  ;;  %v4521_v46 = vld [vmem:[#allocation2 + $0x68] ss:$0 sps:$4 sm:$0x11]   ;;  %v3183_v36 = vsel %vm1311_vm7, %v3178_v24, %v3182_v21  ;;  %1122 = vst.msk [vmem:[#allocation3 + $0x18] sm:$0xff] %vm1118_vm6, %v4524_v3 }
 0x203   : > { %v5221_v37 = vpop.permute.xlu1 %3615  ;;  %v1416_v8 = vshll.u32 %v4521_v46, 16  ;;  %v4551_v24 = vld [vmem:[#allocation2 + $0xd4] ss:$0 sps:$4 sm:$0x11]   ;;  %v4534_v46 = vld [vmem:[#allocation2 + $0x60] sm:$0xfe]  }
 0x204   : > { %v5225_v42 = vpop.permute.xlu0 %2697  ;;  %v3300_v3 = vshll.u32 %v4551_v24, 16 }
 0x205   : > { %3312 = vrot.lane.b32.xlu0 %v3171_v47, %s4580_s10  ;;  %v1418_v43 = vrot.slane %v1416_v8, 1  ;;  %v1392_v47 = vshll.u32 %v4523_v38, 16 }
 0x206   : > { %2901 = vrot.lane.b32.xlu1 %v4506_v61, %s4578_s8  ;;  %v1413_v61 = vrot.slane %v1411_v26, 1  ;;  %v4537_v26 = vld [vmem:[#allocation2 + $0x5c] ss:$0 sps:$4 sm:$0x11]   ;;  %v3302_v39 = vrot.slane %v3300_v3, 1  ;;  %v4552_v3 = vld [vmem:[#allocation2 + $0x6c] sm:$0xff]  }
 0x207   : > { %v5228_v54 = vpop.permute.xlu1 %2717  ;;  %v1394_v19 = vrot.slane %v1392_v47, 1  ;;  %v4561_v47 = vld [vmem:[#allocation2 + $0x48] sm:$0xff]  }
 0x208   : > { %v5232_v20 = vpop.permute.xlu0 %1800  ;;  %v1414_v6 = vor.u32 %v1413_v61, %v1409_v35  ;;  %v1399_v61 = vshll.u32 %v4536_v7, 16  ;;  %1125 = vst.msk [vmem:[#allocation3 + $0x30] sm:$0xff] %vm1118_vm6, %v4561_v47 }
 0x209   : > { %2414 = vrot.lane.b32.xlu0 %v2283_v60, %s4577_s7  ;;  %v1395_v58 = vsel %vm1311_vm7, %v1390_v55, %v1394_v19  ;;  %v3591_v19 = vrot.slane %v4555_v44, 1 }
 0x20a   : > { %3332 = vrot.lane.b32.xlu1 %v3291_v40, %s4580_s10  ;;  %v1419_v50 = vsel %vm1311_vm7, %v1414_v6, %v1418_v43  ;;  %v4530_v40 = vld [vmem:[#allocation2 + $0x5c] ss:$0 sps:$4 sm:$0x11]   ;;  %v4533_v6 = vld [vmem:[#allocation2 + $0x60] sm:$0xff]   ;;  %v1397_v43 = vshrl.u32 %v4536_v7, 16  ;;  %v1401_v55 = vrot.slane %v1399_v61, 1 }
 0x20b   : > { %v5238_v10 = vpop.permute.xlu1 %1820 }
 0x20c   : > { %v3307_v12 = vpop.permute.xlu0 %3306  ;;  %v1402_v41 = vor.u32 %v1401_v55, %v1397_v43 }
 0x20d   : > { %3354 = vst.msk [vmem:[#allocation3 + $0x8] sm:$0xff] %vm3352_vm2, %v3307_v12  ;;  %2881 = vrot.lane.b32.xlu0 %v4511_v9, %s4578_s8  ;;  %v2292_v9 = vshll.u32 %v4530_v40, 16  ;;  %v4532_v12 = vld [vmem:[#allocation2 + $0x5c] ss:$0 sps:$4 sm:$0x11]  }
 0x20e   : > { %2434 = vrot.lane.b32.xlu1 %v2403_v14, %s4577_s7  ;;  %3643 = vst.msk [vmem:[#allocation3 + $0x8] sm:$0xff] %vm3641_vm3, %v3596_v16  ;;  %v4527_v16 = vld [vmem:[#allocation2 + $0x9c] sm:$0xff]   ;;  %v4545_v14 = vld [vmem:[#allocation2 + $0xa8] sm:$0xff]   ;;  %v2664_v63 = vrot.slane %v4532_v12, 1 }
 0x20f   : > { %v3327_v27 = vpop.permute.xlu1 %3326  ;;  %1132 = vst.msk [vmem:[#allocation3 + $0x68] sm:$0xff] %vm1118_vm6, %v4527_v16  ;;  %v2294_v17 = vrot.slane %v2292_v9, 1  ;;  %1133 = vst.msk [vmem:[#allocation3 + $0x70] sm:$0xff] %vm1118_vm6, %v4545_v14  ;;  %v4559_v16 = vld [vmem:[#allocation2 + $0xb4] sm:$0xff]   ;;  %v4542_v12 = vld [vmem:[#allocation2 + $0x60] sm:$0xfe]  }
 0x210   : > { %3364 = vst.msk [vmem:[#allocation3 + $0x58] sm:$0xff] %vm3352_vm2, %v3327_v27  ;;  %v2409_v32 = vpop.permute.xlu0 %2408  ;;  %v4558_v27 = vld [vmem:[#allocation2 + $0x3c] sm:$0xff]   ;;  %v4543_v14 = vld [vmem:[#allocation2 + $0x68] ss:$0 sps:$4 sm:$0x11]  }
 0x211   : > { %3603 = vrot.lane.b32.xlu0 %v3562_v62, %s4579_s9  ;;  %3653 = vst.msk [vmem:[#allocation3 + $0x58] sm:$0xff] %vm3641_vm3, %v5221_v37  ;;  %v1772_v37 = vsel %vm1745_vm9, %v1770_v28, %v1771_v33  ;;  %v4550_v62 = vld [vmem:[#allocation2 + $0xcc] sm:$0xff]   ;;  %v2665_v33 = vsel %vm1745_vm9, %v2663_v22, %v2664_v63  ;;  %v2666_v22 = vrot.slane %v4542_v12, 1  ;;  %v2667_v63 = vrot.slane %v4543_v14, 1 }
 0x212   : > { %2455 = vst.msk [vmem:[#allocation3 + $0x10] sm:$0xff] %vm2452_vm15, %v2409_v32  ;;  %v3293_v28 = vshrl.u32 %v4550_v62, 16  ;;  %v3295_v32 = vshll.u32 %v4550_v62, 16 }
 0x213   : > { %2744 = vst.msk [vmem:[#allocation3 + $0x10] sm:$0xff] %vm2741_vm0, %v5225_v42 }
 0x214   : > { %v2429_v45 = vpop.permute.xlu1 %2428  ;;  %v1511_v42 = vpop.permute.xlu0 %1510  ;;  %1124 = vst.msk [vmem:[#allocation3 + $0x28] sm:$0xff] %vm1118_vm6, %v4558_v27  ;;  %v3297_v38 = vrot.slane %v3295_v32, 1  ;;  %1134 = vst.msk [vmem:[#allocation3 + $0x78] sm:$0xff] %vm1118_vm6, %v4559_v16 }
 0x215   : > { %3314 = vrot.lane.b32.xlu0 %v3183_v36, %s4580_s10  ;;  %2465 = vst.msk [vmem:[#allocation3 + $0x60] sm:$0xff] %vm2452_vm15, %v2429_v45  ;;  %v4535_v36 = vld [vmem:[#allocation2 + $0x68] ss:$0 sps:$4 sm:$0x11]   ;;  %v1404_v45 = vshll.u32 %v4537_v26, 16  ;;  %v2668_v26 = vsel %vm1745_vm9, %v2666_v22, %v2667_v63 }
 0x216   : > { %2754 = vst.msk [vmem:[#allocation3 + $0x60] sm:$0xff] %vm2741_vm0, %v5228_v54  ;;  %v1764_v54 = vrot.slane %v4525_v53, 1  ;;  %v3563_v53 = vrot.slane %v4534_v46, 1 }
 0x217   : > { %1556 = vst.msk [vmem:[#allocation3 + $0x18] sm:$0xff] %vm1552_vm8, %v1511_v42  ;;  %v3298_v42 = vor.u32 %v3297_v38, %v3293_v28  ;;  %v4549_v28 = vld [vmem:[#allocation2 + $0x68] ss:$0 sps:$4 sm:$0x11]  }
 0x218   : > { %1846 = vst.msk [vmem:[#allocation3 + $0x18] sm:$0xff] %vm1842_vm13, %v5232_v20  ;;  %v2876_v56 = vpop.permute.xlu0 %2875  ;;  %v1531_v60 = vpop.permute.xlu1 %1530  ;;  %v1766_v29 = vsel %vm1745_vm9, %v1764_v54, %v1765_v57  ;;  %v4539_v54 = vld [vmem:[#allocation2 + $0x5c] ss:$0 sps:$4 sm:$0x11]  }
 0x219   : > { %1810 = vrot.lane.b32.xlu0 %v1772_v37, %s4574_s29  ;;  %2922 = vst.msk [vmem:[#allocation3 + $0x10] sm:$0xff] %vm2919_vm1, %v2876_v56  ;;  %v4554_v37 = vld [vmem:[#allocation2 + $0xcc] sm:$0xfe]   ;;  %v3303_v30 = vsel %vm1311_vm7, %v3298_v42, %v3302_v39  ;;  %v4538_v56 = vld [vmem:[#allocation2 + $0x54] sm:$0xfe]   ;;  %v2304_v39 = vshll.u32 %v4549_v28, 16 }
 0x21a   : > { %1566 = vst.msk [vmem:[#allocation3 + $0x68] sm:$0xff] %vm1552_vm8, %v1531_v60  ;;  %v3590_v48 = vrot.slane %v4554_v37, 1  ;;  %3334 = vrot.lane.b32.xlu1 %v3303_v30, %s4580_s10  ;;  %v3199_v37 = vshll.u32 %v4552_v3, 16  ;;  %v4556_v30 = vld [vmem:[#allocation2 + $0x6c] sm:$0xfe]  }
 0x21b   : > { %1856 = vst.msk [vmem:[#allocation3 + $0x68] sm:$0xff] %vm1842_vm13, %v5238_v10  ;;  %v2290_v10 = vor.u32 %v2289_v2, %v2285_v1  ;;  %v1767_v1 = vrot.slane %v4538_v56, 1  ;;  %v1768_v2 = vrot.slane %v4539_v54, 1  ;;  %v4557_v56 = vld [vmem:[#allocation2 + $0x74] ss:$0 sps:$4 sm:$0x11]  }
 0x21c   : > { %v1978_v20 = vpop.permute.xlu0 %1977  ;;  %v2896_v0 = vpop.permute.xlu1 %2895  ;;  %v3592_v60 = vsel %vm1745_vm9, %v3590_v48, %v3591_v19  ;;  %v3201_v42 = vrot.slane %v3199_v37, 1 }
 0x21d   : > { %1520 = vrot.lane.b32.xlu0 %v1419_v50, %s4572_s24  ;;  %2023 = vst.msk [vmem:[#allocation3 + $0x18] sm:$0xff] %vm2019_vm14, %v1978_v20  ;;  %v2295_v18 = vsel %vm1311_vm7, %v2290_v10, %v2294_v17  ;;  %v3564_v50 = vrot.slane %v4535_v36, 1  ;;  %v1769_v4 = vsel %vm1745_vm9, %v1767_v1, %v1768_v2 }
 0x21e   : > { %2932 = vst.msk [vmem:[#allocation3 + $0x60] sm:$0xff] %vm2919_vm1, %v2896_v0  ;;  %3623 = vrot.lane.b32.xlu1 %v3592_v60, %s4579_s9 }
 0x21f   : > { %v3565_v40 = vsel %vm1745_vm9, %v3563_v53, %v3564_v50  ;;  %v3197_v53 = vshrl.u32 %v4552_v3, 16 }
 0x220   : > { %v5278_v15 = vpop.permute.xlu0 %3597  ;;  %v1998_v59 = vpop.permute.xlu1 %1997 }
 0x221   : > { %1516 = vrot.lane.b32.xlu0 %v1395_v58, %s4572_s24  ;;  %2033 = vst.msk [vmem:[#allocation3 + $0x68] sm:$0xff] %vm2019_vm14, %v1998_v59  ;;  %v1406_v58 = vrot.slane %v1404_v45, 1  ;;  %v4541_v59 = vld [vmem:[#allocation2 + $0x60] sm:$0xff]   ;;  %v2306_v45 = vrot.slane %v2304_v39, 1 }
 0x223   : > { %v1407_v0 = vsel %vm1311_vm7, %v1402_v41, %v1406_v58  ;;  %v3567_v41 = vrot.slane %v4557_v56, 1 }
 0x224   : > { %v3618_v5 = vpop.permute.xlu1 %3617  ;;  %v5284_v21 = vpop.permute.xlu0 %2699 }
 0x225   : > { %1806 = vrot.lane.b32.xlu0 %v1766_v29, %s4574_s29  ;;  %v4562_v29 = vld [vmem:[#allocation2 + $0x54] sm:$0xff]  }
 0x226   : > { %1126 = vst.msk [vmem:[#allocation3 + $0x38] sm:$0xff] %vm1118_vm6, %v4562_v29  ;;  %v5339_v29 = vld [vmem:[%s5435_s3] sm:$0x3]  ;;  %vm3786_vm6 = vcmask 7168  }
 0x227   : > { %4211 = vmatprep.mubr.msk.bf16.mxu0 %vm3675_vm4, %v5339_v29 }
 0x228   : > { %v2720_v35 = vpop.permute.xlu1 %2719 }
 0x229   : > { %1983 = vrot.lane.b32.xlu0 %v4528_v11, %s4575_s30 }
 0x22c   : > { %v3329_v31 = vpop.permute.xlu1 %3328 }
 0x22d   : > { %2416 = vrot.lane.b32.xlu0 %v2295_v18, %s4577_s7  ;;  %3365 = vst.msk [vmem:[#allocation3 + $0x60] sm:$0xff] %vm3352_vm2, %v3329_v31  ;;  %v4547_v18 = vld [vmem:[#allocation2 + $0x68] ss:$0 sps:$4 sm:$0x11]   ;;  %v3202_v31 = vor.u32 %v3201_v42, %v3197_v53 }
 0x22e   : > { %3654 = vst.msk [vmem:[#allocation3 + $0x60] sm:$0xff] %vm3641_vm3, %v3618_v5  ;;  %v3192_v46 = vshll.u32 %v4547_v18, 16 }
 0x230   : > { %v2431_v20 = vpop.permute.xlu1 %2430  ;;  %v3194_v36 = vrot.slane %v3192_v46, 1 }
 0x231   : > { %2705 = vrot.lane.b32.xlu0 %v2665_v33, %s4576_s6  ;;  %v1803_v8 = vpop.permute.xlu0 %1802  ;;  %2466 = vst.msk [vmem:[#allocation3 + $0x68] sm:$0xff] %vm2452_vm15, %v2431_v20  ;;  %v4544_v33 = vld [vmem:[#allocation2 + $0x6c] sm:$0xff]  }
 0x232   : > { %2755 = vst.msk [vmem:[#allocation3 + $0x68] sm:$0xff] %vm2741_vm0, %v2720_v35 }
 0x234   : > { %v2898_v11 = vpop.permute.xlu1 %2897 }
 0x235   : > { %2883 = vrot.lane.b32.xlu0 %v4533_v6, %s4578_s8  ;;  %v3309_v57 = vpop.permute.xlu0 %3308  ;;  %2933 = vst.msk [vmem:[#allocation3 + $0x68] sm:$0xff] %vm2919_vm1, %v2898_v11  ;;  %v4553_v6 = vld [vmem:[#allocation2 + $0x74] ss:$0 sps:$4 sm:$0x11]  }
 0x236   : > { %3355 = vst.msk [vmem:[#allocation3 + $0x10] sm:$0xff] %vm3352_vm2, %v3309_v57  ;;  %v3204_v50 = vshll.u32 %v4553_v6, 16 }
 0x237   : > { %3644 = vst.msk [vmem:[#allocation3 + $0x10] sm:$0xff] %vm3641_vm3, %v5278_v15  ;;  %v4546_v15 = vld [vmem:[#allocation2 + $0x60] sm:$0xff]  }
 0x238   : > { %v3620_v17 = vpop.permute.xlu1 %3619  ;;  %v3187_v5 = vshll.u32 %v4546_v15, 16  ;;  %v3185_v24 = vshrl.u32 %v4546_v15, 16  ;;  %v3206_v57 = vrot.slane %v3204_v50, 1 }
 0x239   : > { %3605 = vrot.lane.b32.xlu0 %v3565_v40, %s4579_s9  ;;  %v2411_v9 = vpop.permute.xlu0 %2410  ;;  %v3566_v40 = vrot.slane %v4556_v30, 1 }
 0x23a   : > { %2456 = vst.msk [vmem:[#allocation3 + $0x18] sm:$0xff] %vm2452_vm15, %v2411_v9  ;;  %v3189_v27 = vrot.slane %v3187_v5, 1  ;;  %v3207_v60 = vsel %vm1311_vm7, %v3202_v31, %v3206_v57 }
 0x23b   : > { %2745 = vst.msk [vmem:[#allocation3 + $0x18] sm:$0xff] %vm2741_vm0, %v5284_v21  ;;  %v4548_v21 = vld [vmem:[#allocation2 + $0x60] sm:$0xff]   ;;  %v3568_v1 = vsel %vm1745_vm9, %v3566_v40, %v3567_v41 }
 0x23c   : > { %v3331_v62 = vpop.permute.xlu1 %3330  ;;  %v2299_v32 = vshll.u32 %v4548_v21, 16  ;;  %v2297_v61 = vshrl.u32 %v4548_v21, 16 }
 0x23d   : > { %1518 = vrot.lane.b32.xlu0 %v1407_v0, %s4572_s24  ;;  %v1513_v10 = vpop.permute.xlu0 %1512  ;;  %3366 = vst.msk [vmem:[#allocation3 + $0x68] sm:$0xff] %vm3352_vm2, %v3331_v62 }
 0x23e   : > { %1557 = vst.msk [vmem:[#allocation3 + $0x20] sm:$0xff] %vm1552_vm8, %v1513_v10  ;;  %v2301_v38 = vrot.slane %v2299_v32, 1  ;;  %v3660_v39 = vld [vmem:[#allocation3 + $0x10] sm:$0xff] }
 0x23f   : > { %1847 = vst.msk [vmem:[#allocation3 + $0x20] sm:$0xff] %vm1842_vm13, %v1803_v8  ;;  %v3190_v8 = vor.u32 %v3189_v27, %v3185_v24  ;;  %v3686_v6 = vsel %vm3675_vm4, %v3660_v39, 0 }
 0x240   : > { %3655 = vst.msk [vmem:[#allocation3 + $0x68] sm:$0xff] %vm3641_vm3, %v3620_v17  ;;  %v2302_v47 = vor.u32 %v2301_v38, %v2297_v61  ;;  %v3668_v61 = vld [vmem:[#allocation3 + $0x50] sm:$0xff] }
 0x241   : > { %1808 = vrot.lane.b32.xlu0 %v1769_v4, %s4574_s29  ;;  %v2878_v7 = vpop.permute.xlu0 %2877  ;;  %v3195_v44 = vsel %vm1311_vm7, %v3190_v8, %v3194_v36 }
 0x242   : > { %2923 = vst.msk [vmem:[#allocation3 + $0x18] sm:$0xff] %vm2919_vm1, %v2878_v7  ;;  %v2307_v19 = vsel %vm1311_vm7, %v2302_v47, %v2306_v45  ;;  %vm3788_vm7 = vcmask 11264  }
 0x245   : > { %1985 = vrot.lane.b32.xlu0 %v4541_v59, %s4575_s30  ;;  %v1980_v16 = vpop.permute.xlu0 %1979 }
 0x246   : > { %2024 = vst.msk [vmem:[#allocation3 + $0x20] sm:$0xff] %vm2019_vm14, %v1980_v16 }
 0x247   : > { %v3671_v31 = vld [vmem:[#allocation3 + $0x68] sm:$0xff] }
 0x249   : > { %2707 = vrot.lane.b32.xlu0 %v2668_v26, %s4576_s6 }
 0x24c   : > { %v1533_v35 = vpop.permute.xlu1 %1532  ;;  %v3600_v25 = vpop.permute.xlu0 %3599 }
 0x24d   : > { %1567 = vst.msk [vmem:[#allocation3 + $0x70] sm:$0xff] %vm1552_vm8, %v1533_v35  ;;  %2885 = vrot.lane.b32.xlu0 %v4544_v33, %s4578_s8 }
 0x250   : > { %v1823_v43 = vpop.permute.xlu1 %1822  ;;  %v2702_v48 = vpop.permute.xlu0 %2701 }
 0x251   : > { %1857 = vst.msk [vmem:[#allocation3 + $0x70] sm:$0xff] %vm1842_vm13, %v1823_v43  ;;  %3316 = vrot.lane.b32.xlu0 %v3195_v44, %s4580_s10  ;;  %v3669_v43 = vld [vmem:[#allocation3 + $0x58] sm:$0xff] }
 0x254   : > { %v2000_v55 = vpop.permute.xlu1 %1999  ;;  %v1805_v54 = vpop.permute.xlu0 %1804 }
 0x255   : > { %2034 = vst.msk [vmem:[#allocation3 + $0x70] sm:$0xff] %vm2019_vm14, %v2000_v55  ;;  %2418 = vrot.lane.b32.xlu0 %v2307_v19, %s4577_s7 }
 0x258   : > { %v2433_v58 = vpop.permute.xlu1 %2432  ;;  %v3311_v20 = vpop.permute.xlu0 %3310 }
 0x259   : > { %2467 = vst.msk [vmem:[#allocation3 + $0x70] sm:$0xff] %vm2452_vm15, %v2433_v58  ;;  %3318 = vrot.lane.b32.xlu0 %v3207_v60, %s4580_s10 }
 0x25a   : > { %3356 = vst.msk [vmem:[#allocation3 + $0x18] sm:$0xff] %vm3352_vm2, %v3311_v20 }
 0x25b   : > { %3645 = vst.msk [vmem:[#allocation3 + $0x18] sm:$0xff] %vm3641_vm3, %v3600_v25 }
 0x25c   : > { %v2722_v0 = vpop.permute.xlu1 %2721  ;;  %v2413_v2 = vpop.permute.xlu0 %2412 }
 0x25d   : > { %2756 = vst.msk [vmem:[#allocation3 + $0x70] sm:$0xff] %vm2741_vm0, %v2722_v0  ;;  %3607 = vrot.lane.b32.xlu0 %v3568_v1, %s4579_s9 }
 0x25e   : > { %2457 = vst.msk [vmem:[#allocation3 + $0x20] sm:$0xff] %vm2452_vm15, %v2413_v2 }
 0x25f   : > { %2746 = vst.msk [vmem:[#allocation3 + $0x20] sm:$0xff] %vm2741_vm0, %v2702_v48  ;;  %v3670_v48 = vld [vmem:[#allocation3 + $0x60] sm:$0xff] }
 0x260   : > { %v2900_v9 = vpop.permute.xlu1 %2899 }
 0x261   : > { %2934 = vst.msk [vmem:[#allocation3 + $0x70] sm:$0xff] %vm2919_vm1, %v2900_v9 }
 0x262   : > { %v3661_v47 = vld [vmem:[#allocation3 + $0x18] sm:$0xff] }
 0x263   : > { %v1515_v11 = vpop.permute.xlu0 %1514  ;;  %v3689_v42 = vsel %vm3675_vm4, %v3661_v47, 0 }
 0x264   : > { %v3622_v4 = vpop.permute.xlu1 %3621  ;;  %1558 = vst.msk [vmem:[#allocation3 + $0x28] sm:$0xff] %vm1552_vm8, %v1515_v11 }
 0x265   : > { %1848 = vst.msk [vmem:[#allocation3 + $0x28] sm:$0xff] %vm1842_vm13, %v1805_v54 }
 0x267   : > { %v2880_v12 = vpop.permute.xlu0 %2879 }
 0x268   : > { %v1535_v14 = vpop.permute.xlu1 %1534  ;;  %2924 = vst.msk [vmem:[#allocation3 + $0x20] sm:$0xff] %vm2919_vm1, %v2880_v12 }
 0x269   : > { %1568 = vst.msk [vmem:[#allocation3 + $0x78] sm:$0xff] %vm1552_vm8, %v1535_v14 }
 0x26b   : > { %v1982_v15 = vpop.permute.xlu0 %1981 }
 0x26c   : > { %v1825_v10 = vpop.permute.xlu1 %1824  ;;  %2025 = vst.msk [vmem:[#allocation3 + $0x28] sm:$0xff] %vm2019_vm14, %v1982_v15 }
 0x26d   : > { %1858 = vst.msk [vmem:[#allocation3 + $0x78] sm:$0xff] %vm1842_vm13, %v1825_v10 }
 0x26f   : > { %v3602_v17 = vpop.permute.xlu0 %3601 }
 0x270   : > { %v2002_v59 = vpop.permute.xlu1 %2001 }
 0x271   : > { %2035 = vst.msk [vmem:[#allocation3 + $0x78] sm:$0xff] %vm2019_vm14, %v2002_v59 }
 0x273   : > { %v2704_v18 = vpop.permute.xlu0 %2703 }
 0x274   : > { %v2724_v22 = vpop.permute.xlu1 %2723 }
 0x277   : > { %v3313_v63 = vpop.permute.xlu0 %3312 }
 0x278   : > { %v2902_v5 = vpop.permute.xlu1 %2901  ;;  %3357 = vst.msk [vmem:[#allocation3 + $0x20] sm:$0xff] %vm3352_vm2, %v3313_v63 }
 0x279   : > { %3646 = vst.msk [vmem:[#allocation3 + $0x20] sm:$0xff] %vm3641_vm3, %v3602_v17 }
 0x27b   : > { %v2415_v21 = vpop.permute.xlu0 %2414 }
 0x27c   : > { %v3333_v7 = vpop.permute.xlu1 %3332  ;;  %2458 = vst.msk [vmem:[#allocation3 + $0x28] sm:$0xff] %vm2452_vm15, %v2415_v21 }
 0x27d   : > { %3367 = vst.msk [vmem:[#allocation3 + $0x70] sm:$0xff] %vm3352_vm2, %v3333_v7 }
 0x27e   : > { %2747 = vst.msk [vmem:[#allocation3 + $0x28] sm:$0xff] %vm2741_vm0, %v2704_v18 }
 0x27f   : > { %3656 = vst.msk [vmem:[#allocation3 + $0x70] sm:$0xff] %vm3641_vm3, %v3622_v4  ;;  %v2882_v62 = vpop.permute.xlu0 %2881 }
 0x280   : > { %v2435_v24 = vpop.permute.xlu1 %2434  ;;  %2925 = vst.msk [vmem:[#allocation3 + $0x28] sm:$0xff] %vm2919_vm1, %v2882_v62  ;;  %v3662_v50 = vld [vmem:[#allocation3 + $0x20] sm:$0xff] }
 0x281   : > { %2468 = vst.msk [vmem:[#allocation3 + $0x78] sm:$0xff] %vm2452_vm15, %v2435_v24  ;;  %v3692_v19 = vsel %vm3675_vm4, %v3662_v50, 0 }
 0x282   : > { %2757 = vst.msk [vmem:[#allocation3 + $0x78] sm:$0xff] %vm2741_vm0, %v2724_v22 }
 0x283   : > { %2935 = vst.msk [vmem:[#allocation3 + $0x78] sm:$0xff] %vm2919_vm1, %v2902_v5  ;;  %v3604_v46 = vpop.permute.xlu0 %3603 }
 0x286   : > { %v3672_v58 = vld [vmem:[#allocation3 + $0x70] sm:$0xff] }
 0x287   : > { %v3315_v26 = vpop.permute.xlu0 %3314 }
 0x288   : > { %3358 = vst.msk [vmem:[#allocation3 + $0x28] sm:$0xff] %vm3352_vm2, %v3315_v26 }
 0x289   : > { %3647 = vst.msk [vmem:[#allocation3 + $0x28] sm:$0xff] %vm3641_vm3, %v3604_v46 }
 0x28b   : > { %v1811_v27 = vpop.permute.xlu0 %1810 }
 0x28c   : > { %v3335_v8 = vpop.permute.xlu1 %3334 }
 0x28d   : > { %3368 = vst.msk [vmem:[#allocation3 + $0x78] sm:$0xff] %vm3352_vm2, %v3335_v8 }
 0x28f   : > { %v1521_v28 = vpop.permute.xlu0 %1520 }
 0x290   : > { %1561 = vst.msk [vmem:[#allocation3 + $0x40] sm:$0xff] %vm1552_vm8, %v1521_v28  ;;  %v3624_v37 = vpop.permute.xlu1 %3623  ;;  %v3663_v56 = vld [vmem:[#allocation3 + $0x28] sm:$0xff] }
 0x291   : > { %1851 = vst.msk [vmem:[#allocation3 + $0x40] sm:$0xff] %vm1842_vm13, %v1811_v27  ;;  %v3695_v57 = vsel %vm3675_vm4, %v3663_v56, 0 }
 0x292   : > { %2028 = vst.msk [vmem:[#allocation3 + $0x40] sm:$0xff] %vm2019_vm14, %v4988_v49 }
 0x293   : > { %2461 = vst.msk [vmem:[#allocation3 + $0x40] sm:$0xff] %vm2452_vm15, %v5093_v13  ;;  %v1517_v32 = vpop.permute.xlu0 %1516  ;;  %v3658_v13 = vld [vmem:[#allocation3] sm:$0xff] }
 0x294   : > { %2750 = vst.msk [vmem:[#allocation3 + $0x40] sm:$0xff] %vm2741_vm0, %v5039_v34  ;;  %v3680_v33 = vsel %vm3675_vm4, %v3658_v13, 0 }
 0x295   : > { %1559 = vst.msk [vmem:[#allocation3 + $0x30] sm:$0xff] %vm1552_vm8, %v1517_v32 }
 0x296   : > { %2928 = vst.msk [vmem:[#allocation3 + $0x40] sm:$0xff] %vm2919_vm1, %v5108_v51  ;;  %v3667_v51 = vld [vmem:[#allocation3 + $0x48] sm:$0xff] }
 0x297   : > { %3361 = vst.msk [vmem:[#allocation3 + $0x40] sm:$0xff] %vm3352_vm2, %v5213_v23  ;;  %v1807_v3 = vpop.permute.xlu0 %1806  ;;  %v3659_v23 = vld [vmem:[#allocation3 + $0x8] sm:$0xff] }
 0x298   : > { %3650 = vst.msk [vmem:[#allocation3 + $0x40] sm:$0xff] %vm3641_vm3, %v5158_v52  ;;  %v3683_v36 = vsel %vm3675_vm4, %v3659_v23, 0  ;;  %3657 = vst.msk [vmem:[#allocation3 + $0x78] sm:$0xff] %vm3641_vm3, %v3624_v37 }
 0x299   : > { %1849 = vst.msk [vmem:[#allocation3 + $0x30] sm:$0xff] %vm1842_vm13, %v1807_v3 }
 0x29b   : > { %v1984_v49 = vpop.permute.xlu0 %1983 }
 0x29c   : > { %2026 = vst.msk [vmem:[#allocation3 + $0x30] sm:$0xff] %vm2019_vm14, %v1984_v49 }
 0x29f   : > { %v3666_v16 = vld [vmem:[#allocation3 + $0x40] sm:$0xff]  ;;  %v2417_v34 = vpop.permute.xlu0 %2416  ;;  %v3673_v41 = vld [vmem:[#allocation3 + $0x78] sm:$0xff] }
 0x2a0   : > { %4213 = vmatprep.subr.msk.bf16.mxu0 %vm3675_vm4, %v3666_v16  ;;  %2459 = vst.msk [vmem:[#allocation3 + $0x30] sm:$0xff] %vm2452_vm15, %v2417_v34 }
 0x2a1   : > { %4196 = vmatpush3.bf16.xpose.msra.mxu0 %v3680_v33 }
 0x2a2   : > { %4214 = vmatprep.subr.msk.bf16.mxu0 %vm3675_vm4, %v3667_v51 }
 0x2a3   : > { %v2706_v52 = vpop.permute.xlu0 %2705 }
 0x2a4   : > { %2748 = vst.msk [vmem:[#allocation3 + $0x30] sm:$0xff] %vm2741_vm0, %v2706_v52 }
 0x2a7   : > { %v2884_v35 = vpop.permute.xlu0 %2883 }
 0x2a8   : > { %2926 = vst.msk [vmem:[#allocation3 + $0x30] sm:$0xff] %vm2919_vm1, %v2884_v35 }
 0x2a9   : > { %4198 = vmatpush3.bf16.xpose.msra.mxu0 %v3683_v36 }
 0x2aa   : > { %4215 = vmatprep.subr.msk.bf16.mxu0 %vm3675_vm4, %v3668_v61 }
 0x2ab   : > { %v3606_v38 = vpop.permute.xlu0 %3605 }
 0x2af   : > { %v1519_v25 = vpop.permute.xlu0 %1518 }
 0x2b0   : > { %1560 = vst.msk [vmem:[#allocation3 + $0x38] sm:$0xff] %vm1552_vm8, %v1519_v25 }
 0x2b1   : > { %4200 = vmatpush3.bf16.xpose.msra.mxu0 %v3686_v6 }
 0x2b2   : > { %4216 = vmatprep.subr.msk.bf16.mxu0 %vm3675_vm4, %v3669_v43 }
 0x2b3   : > { %v1809_v44 = vpop.permute.xlu0 %1808 }
 0x2b4   : > { %1850 = vst.msk [vmem:[#allocation3 + $0x38] sm:$0xff] %vm1842_vm13, %v1809_v44 }
 0x2b7   : > { %v1986_v45 = vpop.permute.xlu0 %1985 }
 0x2b8   : > { %2027 = vst.msk [vmem:[#allocation3 + $0x38] sm:$0xff] %vm2019_vm14, %v1986_v45 }
 0x2b9   : > { %4202 = vmatpush3.bf16.xpose.msra.mxu0 %v3689_v42 }
 0x2ba   : > { %4217 = vmatprep.subr.msk.bf16.mxu0 %vm3675_vm4, %v3670_v48 }
 0x2bb   : > { %v2708_v53 = vpop.permute.xlu0 %2707 }
 0x2bf   : > { %v2886_v55 = vpop.permute.xlu0 %2885 }
 0x2c1   : > { %4204 = vmatpush3.bf16.xpose.msra.mxu0 %v3692_v19 }
 0x2c2   : > { %4218 = vmatprep.subr.msk.bf16.mxu0 %vm3675_vm4, %v3671_v31 }
 0x2c3   : > { %v3317_v30 = vpop.permute.xlu0 %3316 }
 0x2c4   : > { %3359 = vst.msk [vmem:[#allocation3 + $0x30] sm:$0xff] %vm3352_vm2, %v3317_v30 }
 0x2c5   : > { %3648 = vst.msk [vmem:[#allocation3 + $0x30] sm:$0xff] %vm3641_vm3, %v3606_v38 }
 0x2c7   : > { %v2419_v54 = vpop.permute.xlu0 %2418 }
 0x2c8   : > { %2460 = vst.msk [vmem:[#allocation3 + $0x38] sm:$0xff] %vm2452_vm15, %v2419_v54 }
 0x2c9   : > { %4206 = vmatpush3.bf16.xpose.msra.mxu0 %v3695_v57  ;;  %2749 = vst.msk [vmem:[#allocation3 + $0x38] sm:$0xff] %vm2741_vm0, %v2708_v53 }
 0x2ca   : > { %4219 = vmatprep.subr.msk.bf16.mxu0 %vm3675_vm4, %v3672_v58  ;;  %2927 = vst.msk [vmem:[#allocation3 + $0x38] sm:$0xff] %vm2919_vm1, %v2886_v55 }
 0x2cb   : > { %v3319_v60 = vpop.permute.xlu0 %3318 }
 0x2cc   : > { %3360 = vst.msk [vmem:[#allocation3 + $0x38] sm:$0xff] %vm3352_vm2, %v3319_v60  ;;  %v3664_v40 = vld [vmem:[#allocation3 + $0x30] sm:$0xff] }
 0x2cd   : > { %v3698_v0 = vsel %vm3675_vm4, %v3664_v40, 0 }
 0x2cf   : > { %v3608_v20 = vpop.permute.xlu0 %3607 }
 0x2d0   : > { %3649 = vst.msk [vmem:[#allocation3 + $0x38] sm:$0xff] %vm3641_vm3, %v3608_v20 }
 0x2d1   : > { %4208 = vmatpush3.bf16.xpose.msra.mxu0 %v3698_v0 }
 0x2d2   : > { %4220 = vmatprep.subr.msk.bf16.mxu0 %vm3675_vm4, %v3673_v41 }
 0x2d7   : > { %v3665_v1 = vld [vmem:[#allocation3 + $0x38] sm:$0xff] }
 0x2d8   : > { %v3701_v2 = vsel %vm3675_vm4, %v3665_v1, 0 }
 0x2d9   : > { %4210 = vmatpush3.bf16.xpose.msra.mxu0 %v3701_v2 }
 0x2e0   : > { %4212 = vmatmul.mubr.msk.bf16.vlgmr.msra.gmra.mrb[0].mxu0 %vm3675_vm4, %v5339_v29 }
 0x3b3   : > { %v3761_v9 = vpop.f32.mrb[0].mxu0 }
 0x3b4   : > { %v3774_v11 = vsel %vm3773_vm5, %v3761_v9, 0.0  ;;  %v3779_v4 = vmul.f32 %v3761_v9, %v3761_v9  ;;  %v3763_v12 = vpop.f32.mrb[1].mxu0 }
 0x3b5   : > { %v3770_v14 = vcombine.low %v3761_v9, %v3763_v12  ;;  %v3775_v15 = vsel %vm3773_vm5, %v3763_v12, 0.0  ;;  %v3780_v10 = vmul.f32 %v3763_v12, %v3763_v12  ;;  %v3765_v17 = vpop.f32.mrb[2].mxu0 }
 0x3b6   : > { %v3766_v59 = vpop.f32.mrb[3].mxu0  ;;  %v3776_v18 = vadd.f32 %v3775_v15, %v3774_v11  ;;  %v3781_v22 = vsel %vm3773_vm5, %v3779_v4, 0.0 }
 0x3b7   : > { %3772 = vst [vmem:[%s231_s16] sm:$0xff] %v3770_v14  ;;  %v3782_v29 = vsel %vm3773_vm5, %v3780_v10, 0.0 }
 0x3b8   : > { %3777 = vadd.xlane.f32.xlu0 %v3776_v18  ;;  %v3783_v63 = vadd.f32 %v3782_v29, %v3781_v22 }
 0x3ba   : > { %3784 = vadd.xlane.f32.xlu1 %v3783_v63 }
 0x445   : > { %v3778_v5 = vpop.xlane.xlu0 %3777 }
 0x447   : > { %v3785_v21 = vpop.xlane.xlu1 %3784 }
 0x448   : > { %v3787_v7 = vsel %vm3786_vm6, %v3778_v5, %v3785_v21 }
 0x449   : > { %3789 = vst.msk [vmem:[%s235_s21] sm:$0xf] %vm3788_vm7, %v3787_v7 }
 0x44a PF: > { %s16_s18 = sadd.s32 1, %s4569_s18  }
 0x44b   : > { %p13_p4 = scmp.ge.s32.totalorder %s16_s18, 4  }
 0x44d   :  { %15 = sbr.rel (!%p13_p4) target bundleno = 1 (0x1), region = 81 }

// kernel: up_layer_forward.3
= control target key start
LH: loop header
LB: loop body
LE: loop exit
PB: predicated region body
PF: predicated region fallthrough
CT: control target
= control target key end

     0   :  { %s8763_s18 = smov 0   ;;  %s10500_s0 = inlined_call_operand.vmem [shape: bf16[2,16,16,4], index: 0, kind: input, shape index: {}]   ;;  %s10501_s1 = inlined_call_operand.vmem [shape: f32[2,64,4], index: 1, kind: input, shape index: {}]   ;;  %s10502_s2 = inlined_call_operand.vmem [shape: f32[256,64], index: 2, kind: input, shape index: {}]   ;;  %s10503_s3 = inlined_call_operand.vmem [shape: bf16[4,72], index: 3, kind: input, shape index: {}]   ;;  %s10504_s4 = inlined_call_operand.vmem [shape: bf16[2,4,256], index: 4, kind: output, shape index: {0}]   ;;  %s10505_s5 = inlined_call_operand.vmem [shape: f32[2,4,2], index: 5, kind: output, shape index: {1}]  }
   0x1 LB: > { %s7459_s19 = sadd.s32 4294967295, %s8713_s18   ;;  %p7463_p0 = scmp.ge.s32.totalorder %s8713_s18, 1  ;;  %s8713_s18 = sphi %s8763_s18, %s16_s18  }
   0x2   : > { %p200_p1 = scmp.lt.s32.totalorder %s8713_s18, 3 }
   0x4   : > { %p201_p2 = pnand %p7463_p0, %p200_p1 }
   0x6   : > { %204 = sbr.rel (%p201_p2) target bundleno = 1195 (0x4ab), region = 36 }
   0xd   : > { %p237_p3 = scmp.lt.s32.totalorder %s7459_s19, 1  ;;  %v257_v0 = vld [vmem:[%s10502_s2] sm:$0xff]  ;;  %vm297_vm0 = vcmask 523264   ;;  %vm10509_vm1 = vcmask 27648   ;;  %vm622_vm2 = vcmask 24576   ;;  %v8715_v1 = vmov 0  }
   0xe   : > { %8129 = vmatprep.mubr.msk.f32.mxu0 %vm297_vm0, %v257_v0  ;;  %741 = vst.msk [vmem:[#allocation3] sm:$0xf] %vm10509_vm1, %v8715_v1  ;;  %742 = vst.msk [vmem:[#allocation3 + $0x4] sm:$0xf] %vm10509_vm1, %v8715_v1  ;;  %vm629_vm3 = vsmask.f32 256 }
   0xf   : > { %s10809_s19 = smov (!%p237_p3, %s7459_s19), 1  ;;  %620 = vst.msk [vmem:[#allocation2] sm:$0xf] %vm10509_vm1, %v8715_v1  ;;  %621 = vst.msk [vmem:[#allocation2 + $0x4] sm:$0xf] %vm10509_vm1, %v8715_v1  ;;  %v258_v56 = vld [vmem:[%s10502_s2 + $0x8] sm:$0xff] }
  0x10   : > { %623 = vst.msk [vmem:[#allocation2 + $0x8] sm:$0x1] %vm622_vm2, %v8715_v1  ;;  %627 = vst.msk [vmem:[#allocation2 + $0xd4] sm:$0x1] %vm622_vm2, %v8715_v1  ;;  %s8021_s22 = sshll.u32 %s10809_s19, 6  ;;  %s8020_s26 = sshll.u32 %s10809_s19, 7 }
  0x11   : > { %625 = vst.msk [vmem:[#allocation2 + $0xcc] sm:$0xf] %vm10509_vm1, %v8715_v1  ;;  %626 = vst.msk [vmem:[#allocation2 + $0xd0] sm:$0xf] %vm10509_vm1, %v8715_v1  ;;  %s246_s25 = scalar_lea.vmem %s10501_s1, %s8021_s22  ;;  %vm685_vm4 = vsmask.f32 7938  ;;  %s8803_s29 = scalar_lea.vmem %s10500_s0, %s8020_s26 }
  0x12   : > { %743 = vst.msk [vmem:[#allocation3 + $0x8] sm:$0x1] %vm622_vm2, %v8715_v1  ;;  %747 = vst.msk [vmem:[#allocation3 + $0xd4] sm:$0x1] %vm622_vm2, %v8715_v1  ;;  %v289_v2 = vld [vmem:[%s246_s25] sm:$0xff]  ;;  %v290_v3 = vld [vmem:[%s246_s25 + $0x8] sm:$0xff] }
  0x13   : > { %745 = vst.msk [vmem:[#allocation3 + $0xcc] sm:$0xf] %vm10509_vm1, %v8715_v1  ;;  %746 = vst.msk [vmem:[#allocation3 + $0xd0] sm:$0xf] %vm10509_vm1, %v8715_v1  ;;  %v291_v4 = vld [vmem:[%s246_s25 + $0x10] sm:$0xff]  ;;  %v8177_v5 = vpack.c.bf16 %v290_v3, %v289_v2  ;;  %v292_v6 = vld [vmem:[%s246_s25 + $0x18] sm:$0xff] }
  0x14   : > { %v8181_v7 = vpack.c.bf16 %v292_v6, %v291_v4  ;;  %v293_v8 = vld [vmem:[%s246_s25 + $0x20] sm:$0xff]  ;;  %v294_v9 = vld [vmem:[%s246_s25 + $0x28] sm:$0xff]  ;;  %vm8796_vm5 = vmand %vm622_vm2, %vm629_vm3  ;;  %vm888_vm6 = vsmask.f32 4368  ;;  %vm10520_vm8 = vsmask.f32 7424 }
  0x15   : > { %8178 = vmatprep.subr.bf16.mxu0 %v8177_v5  ;;  %v748_v11 = vld [vmem:[#allocation3] sm:$0x1]  ;;  %vm8809_vm7 = vmand %vm622_vm2, %vm685_vm4  ;;  %v8185_v15 = vpack.c.bf16 %v294_v9, %v293_v8  ;;  %v295_v16 = vld [vmem:[%s246_s25 + $0x30] sm:$0xff]  ;;  %s8716_s7 = smov 4   ;;  %s8717_s16 = smov 8   ;;  %vm10513_vm11 = vcmask 1046528  }
  0x16   : > { %8180 = vmatpush3.bf16.msra.mxu0 %v8177_v5  ;;  %v749_v12 = vsel %vm8796_vm5, 0, %v748_v11  ;;  %v631_v13 = vld [vmem:[#allocation2] sm:$0x1]  ;;  %v296_v19 = vld [vmem:[%s246_s25 + $0x38] sm:$0xff]  ;;  %v858_v25 = vld [vmem:[%s8803_s29 + $0x8] sm:$0xf] }
  0x17   : > { %8182 = vmatprep.subr.bf16.mxu0 %v8181_v7  ;;  %750 = vst [vmem:[#allocation3] sm:$0x1] %v749_v12  ;;  %v632_v17 = vsel %vm8796_vm5, 0, %v631_v13  ;;  %v687_v18 = vld [vmem:[#allocation2 + $0x8] sm:$0x1]  ;;  %v908_v27 = vshrl.u32 %v858_v25, 16  ;;  %v8189_v31 = vpack.c.bf16 %v296_v19, %v295_v16  ;;  %vm8831_vm9 = vmor %vm629_vm3, %vm888_vm6 }
  0x18   : > { %633 = vst [vmem:[#allocation2] sm:$0x1] %v632_v17  ;;  %v688_v20 = vsel %vm8809_vm7, 0, %v687_v18  ;;  %v637_v21 = vld [vmem:[#allocation2 + $0x18] sm:$0x1]  ;;  %v911_v28 = vshll.u32 %v858_v25, 16  ;;  %vm8837_vm10 = vmand %vm10509_vm1, %vm685_vm4 }
  0x19   : > { %v693_v22 = vld [vmem:[#allocation2 + $0x20] sm:$0x1]  ;;  %689 = vst [vmem:[#allocation2 + $0x8] sm:$0x1] %v688_v20  ;;  %v638_v23 = vsel %vm8796_vm5, 0, %v637_v21  ;;  %v910_v35 = vrot.slane %v908_v27, 7 }
  0x1a   : > { %v694_v24 = vsel %vm8809_vm7, 0, %v693_v22  ;;  %v859_v26 = vld [vmem:[%s8803_s29 + $0xc] sm:$0xf]  ;;  %8184 = vmatpush3.bf16.msra.mxu0 %v8181_v7  ;;  %639 = vst [vmem:[#allocation2 + $0x18] sm:$0x1] %v638_v23  ;;  %v259_v59 = vld [vmem:[%s10502_s2 + $0x10] sm:$0xff] }
  0x1b   : > { %695 = vst [vmem:[#allocation2 + $0x20] sm:$0x1] %v694_v24  ;;  %v916_v29 = vshrl.u32 %v859_v26, 16  ;;  %v919_v30 = vshll.u32 %v859_v26, 16  ;;  %8186 = vmatprep.subr.bf16.mxu0 %v8185_v15  ;;  %v643_v32 = vld [vmem:[#allocation2 + $0x30] sm:$0x1]  ;;  %v913_v47 = vor.u32 %v911_v28, %v910_v35 }
  0x1c   : > { %v699_v33 = vld [vmem:[#allocation2 + $0x38] sm:$0x1]  ;;  %v644_v37 = vsel %vm8796_vm5, 0, %v643_v32  ;;  %v863_v39 = vld [vmem:[%s8803_s29 + $0x1c] sm:$0xf]  ;;  %v914_v48 = vrot.slane %v910_v35, 4 }
  0x1d   : > { %v862_v34 = vld [vmem:[%s8803_s29 + $0x18] sm:$0xf]  ;;  %v918_v36 = vrot.slane %v916_v29, 7  ;;  %v700_v38 = vsel %vm8809_vm7, 0, %v699_v33  ;;  %645 = vst [vmem:[#allocation2 + $0x30] sm:$0x1] %v644_v37 }
  0x1e   : > { %701 = vst [vmem:[#allocation2 + $0x38] sm:$0x1] %v700_v38  ;;  %v942_v41 = vshrl.u32 %v862_v34, 16  ;;  %v945_v42 = vshll.u32 %v862_v34, 16  ;;  %v950_v43 = vshrl.u32 %v863_v39, 16  ;;  %v953_v44 = vshll.u32 %v863_v39, 16  ;;  %8188 = vmatpush3.bf16.msra.mxu0 %v8185_v15 }
  0x1f   : > { %v649_v45 = vld [vmem:[#allocation2 + $0x48] sm:$0x1]  ;;  %v8227_v46 = vld [vmem:[#allocation3] sm:$0xff]   ;;  %v921_v49 = vor.u32 %v919_v30, %v918_v36  ;;  %v923_v50 = vrot.slane %v918_v36, 4  ;;  %8190 = vmatprep.subr.bf16.mxu0 %v8189_v31  ;;  %v8228_v51 = vld [vmem:[#allocation2] sm:$0xff]   ;;  %s8718_s27 = smov 12  }
  0x20   : > { %v944_v53 = vrot.slane %v942_v41, 7  ;;  %v952_v54 = vrot.slane %v950_v43, 7  ;;  %v650_v55 = vsel %vm8796_vm5, 0, %v649_v45  ;;  %2111 = vrot.lane.b32.xlu0 %v8227_v46, %s8716_s7  ;;  %v8229_v57 = vld [vmem:[#allocation2 + $0x8] ss:$0 sps:$4 sm:$0x11]  }
  0x21   : > { %v922_v58 = vsel %vm8831_vm9, %v914_v48, %v921_v49  ;;  %651 = vst [vmem:[#allocation2 + $0x48] sm:$0x1] %v650_v55  ;;  %v2354_v60 = vshrl.u32 %v8228_v51, 16  ;;  %v2356_v61 = vshll.u32 %v8228_v51, 16  ;;  %v1220_v62 = vld [vmem:[#allocation2 + $0x18] sm:$0xf] }
  0x22   : > { %1223 = vst.msk [vmem:[#allocation2 + $0x1c] sm:$0xf] %vm10509_vm1, %v922_v58  ;;  %v1224_v63 = vld [vmem:[#allocation2 + $0x20] sm:$0x1]  ;;  %v947_v0 = vor.u32 %v945_v42, %v944_v53  ;;  %v955_v1 = vor.u32 %v953_v44, %v952_v54  ;;  %8192 = vmatpush3.bf16.msra.mxu0 %v8189_v31  ;;  %v2361_v2 = vshll.u32 %v8229_v57, 16  ;;  %v1221_v3 = vsel %vm8837_vm10, %v913_v47, %v1220_v62  ;;  %v260_v15 = vld [vmem:[%s10502_s2 + $0x18] sm:$0xff] }
  0x23   : > { %v1225_v4 = vsel %vm8796_vm5, %v923_v50, %v1224_v63  ;;  %v948_v5 = vrot.slane %v944_v53, 4  ;;  %v705_v6 = vld [vmem:[#allocation2 + $0x50] sm:$0x1]  ;;  %v866_v7 = vld [vmem:[%s8803_s29 + $0x28] sm:$0xf]  ;;  %v2358_v8 = vrot.slane %v2356_v61, 1 }
  0x24   : > { %1222 = vst [vmem:[#allocation2 + $0x18] sm:$0xf] %v1221_v3  ;;  %1226 = vst [vmem:[#allocation2 + $0x20] sm:$0x1] %v1225_v4  ;;  %v957_v9 = vrot.slane %v952_v54, 4  ;;  %v706_v11 = vsel %vm8809_vm7, 0, %v705_v6 }
  0x25   : > { %v867_v12 = vld [vmem:[%s8803_s29 + $0x2c] sm:$0xf]  ;;  %v976_v13 = vshrl.u32 %v866_v7, 16  ;;  %v2363_v16 = vrot.slane %v2361_v2, 1  ;;  %v956_v17 = vsel %vm8831_vm9, %v948_v5, %v955_v1  ;;  %v1234_v18 = vld [vmem:[#allocation2 + $0x30] sm:$0xf]  ;;  %8130 = vmatmul.mubr.msk.f32.vlgmr.msra.gmra.mrb[0].mxu0 %vm297_vm0, %v258_v56  ;;  %v2359_v21 = vor.u32 %v2358_v8, %v2354_v60 }
  0x26   : > { %v1238_v19 = vld [vmem:[#allocation2 + $0x38] sm:$0x1]  ;;  %707 = vst [vmem:[#allocation2 + $0x50] sm:$0x1] %v706_v11  ;;  %v979_v20 = vshll.u32 %v866_v7, 16  ;;  %v1235_v22 = vsel %vm8837_vm10, %v947_v0, %v1234_v18  ;;  %8132 = vmatprep.mubr.msk.f32.mxu0 %vm297_vm0, %v259_v59  ;;  %v984_v27 = vshrl.u32 %v867_v12, 16 }
  0x27   : > { %1237 = vst.msk [vmem:[#allocation2 + $0x34] sm:$0xf] %vm10509_vm1, %v956_v17  ;;  %v1239_v23 = vsel %vm8796_vm5, %v957_v9, %v1238_v19  ;;  %v978_v24 = vrot.slane %v976_v13, 7  ;;  %v634_v25 = vld [vmem:[#allocation2 + $0xc] sm:$0x1]  ;;  %v987_v28 = vshll.u32 %v867_v12, 16  ;;  %v2364_v33 = vsel %vm10520_vm8, %v2359_v21, %v2363_v16 }
  0x28   : > { %v690_v26 = vld [vmem:[#allocation2 + $0x14] sm:$0x1]  ;;  %1236 = vst [vmem:[#allocation2 + $0x30] sm:$0xf] %v1235_v22  ;;  %1240 = vst [vmem:[#allocation2 + $0x38] sm:$0x1] %v1239_v23  ;;  %2545 = vrot.lane.b32.xlu0 %v2364_v33, %s8717_s16 }
  0x29   : > { %v635_v29 = vsel %vm8796_vm5, 0, %v634_v25  ;;  %v691_v30 = vsel %vm8809_vm7, 0, %v690_v26  ;;  %v856_v31 = vld [vmem:[%s8803_s29] sm:$0xf]  ;;  %v981_v34 = vor.u32 %v979_v20, %v978_v24  ;;  %v1248_v35 = vld [vmem:[#allocation2 + $0x48] sm:$0xf]  ;;  %8133 = vmatmul.mubr.msk.f32.gmra.mrb[2].mxu0 %vm297_vm0, %v260_v15 }
  0x2a   : > { %v261_v32 = vld [vmem:[%s10502_s2 + $0x20] sm:$0xff]  ;;  %636 = vst [vmem:[#allocation2 + $0xc] sm:$0x1] %v635_v29  ;;  %692 = vst [vmem:[#allocation2 + $0x14] sm:$0x1] %v691_v30  ;;  %v891_v37 = vshrl.u32 %v856_v31, 16 }
  0x2b   : > { %v857_v36 = vld [vmem:[%s8803_s29 + $0x4] sm:$0xf]  ;;  %v262_v38 = vld [vmem:[%s10502_s2 + $0x28] sm:$0xff]  ;;  %v982_v39 = vrot.slane %v978_v24, 4  ;;  %v986_v41 = vrot.slane %v984_v27, 7  ;;  %v894_v42 = vshll.u32 %v856_v31, 16  ;;  %v1249_v44 = vsel %vm8837_vm10, %v981_v34, %v1248_v35  ;;  %8135 = vmatprep.mubr.msk.f32.mxu0 %vm297_vm0, %v261_v32 }
  0x2c   : > { %v263_v43 = vld [vmem:[%s10502_s2 + $0x30] sm:$0xff]  ;;  %v893_v45 = vrot.slane %v891_v37, 7  ;;  %v899_v46 = vshrl.u32 %v857_v36, 16  ;;  %v902_v47 = vshll.u32 %v857_v36, 16  ;;  %v655_v48 = vld [vmem:[#allocation2 + $0x60] sm:$0x1] }
  0x2d   : > { %v8230_v49 = vld [vmem:[#allocation2 + $0x18] sm:$0xff]   ;;  %v989_v50 = vor.u32 %v987_v28, %v986_v41  ;;  %v991_v51 = vrot.slane %v986_v41, 4  ;;  %1250 = vst [vmem:[#allocation2 + $0x48] sm:$0xf] %v1249_v44  ;;  %v711_v53 = vld [vmem:[#allocation2 + $0x68] sm:$0x1]  ;;  %8136 = vmatmul.mubr.msk.f32.gmra.mrb[4].mxu0 %vm297_vm0, %v262_v38 }
  0x2e   : > { %v8231_v54 = vld [vmem:[#allocation2 + $0x20] ss:$0 sps:$4 sm:$0x11]   ;;  %v1252_v55 = vld [vmem:[#allocation2 + $0x50] sm:$0x1]  ;;  %v897_v56 = vrot.slane %v893_v45, 4  ;;  %v896_v2 = vor.u32 %v894_v42, %v893_v45  ;;  %8138 = vmatprep.mubr.msk.f32.mxu0 %vm297_vm0, %v263_v43 }
  0x2f   : > { %v264_v57 = vld [vmem:[%s10502_s2 + $0x38] sm:$0xff]  ;;  %v2378_v58 = vshrl.u32 %v8230_v49, 16  ;;  %v2380_v59 = vshll.u32 %v8230_v49, 16  ;;  %v990_v60 = vsel %vm8831_vm9, %v982_v39, %v989_v50  ;;  %v1253_v61 = vsel %vm8796_vm5, %v991_v51, %v1252_v55  ;;  %v265_v63 = vld [vmem:[%s10502_s2 + $0x40] sm:$0xff]  ;;  %v8232_v1 = vld [vmem:[#allocation2 + $0x30] sm:$0xff]   ;;  %s8719_s28 = smov 16  }
  0x30   : > { %v870_v62 = vld [vmem:[%s8803_s29 + $0x38] sm:$0xf]  ;;  %v2385_v0 = vshll.u32 %v8231_v54, 16  ;;  %1251 = vst.msk [vmem:[#allocation2 + $0x4c] sm:$0xf] %vm10509_vm1, %v990_v60  ;;  %v901_v5 = vrot.slane %v899_v46, 7 }
  0x31   : > { %1254 = vst [vmem:[#allocation2 + $0x50] sm:$0x1] %v1253_v61  ;;  %v2382_v3 = vrot.slane %v2380_v59, 1  ;;  %v8233_v4 = vld [vmem:[#allocation2 + $0x38] ss:$0 sps:$4 sm:$0x11]   ;;  %8139 = vmatmul.mubr.msk.f32.gmra.mrb[6].mxu0 %vm297_vm0, %v264_v57 }
  0x32   : > { %v656_v6 = vsel %vm8796_vm5, 0, %v655_v48  ;;  %v2387_v7 = vrot.slane %v2385_v0, 1  ;;  %v2402_v8 = vshrl.u32 %v8232_v1, 16  ;;  %v2404_v9 = vshll.u32 %v8232_v1, 16  ;;  %v1213_v11 = vld [vmem:[#allocation2 + $0xc] sm:$0xf]  ;;  %8141 = vmatprep.mubr.msk.f32.mxu0 %vm297_vm0, %v265_v63 }
  0x33   : > { %657 = vst [vmem:[#allocation2 + $0x60] sm:$0x1] %v656_v6  ;;  %v712_v12 = vsel %vm8809_vm7, 0, %v711_v53  ;;  %v2383_v13 = vor.u32 %v2382_v3, %v2378_v58  ;;  %v2409_v15 = vshll.u32 %v8233_v4, 16  ;;  %v904_v16 = vor.u32 %v902_v47, %v901_v5  ;;  %v1217_v18 = vld [vmem:[#allocation2 + $0x14] sm:$0x1] }
  0x34   : > { %v906_v17 = vrot.slane %v901_v5, 4  ;;  %713 = vst [vmem:[#allocation2 + $0x68] sm:$0x1] %v712_v12  ;;  %v871_v19 = vld [vmem:[%s8803_s29 + $0x3c] sm:$0xf]  ;;  %v2406_v20 = vrot.slane %v2404_v9, 1  ;;  %v1214_v21 = vsel %vm8837_vm10, %v896_v2, %v1213_v11 }
  0x35   : > { %v1010_v22 = vshrl.u32 %v870_v62, 16  ;;  %v1013_v23 = vshll.u32 %v870_v62, 16  ;;  %v266_v24 = vld [vmem:[%s10502_s2 + $0x48] sm:$0xff]  ;;  %v2388_v25 = vsel %vm10520_vm8, %v2383_v13, %v2387_v7  ;;  %v2411_v26 = vrot.slane %v2409_v15, 1  ;;  %1215 = vst [vmem:[#allocation2 + $0xc] sm:$0xf] %v1214_v21 }
  0x36   : > { %v905_v27 = vsel %vm8831_vm9, %v897_v56, %v904_v16  ;;  %v1218_v28 = vsel %vm8796_vm5, %v906_v17, %v1217_v18  ;;  %v640_v29 = vld [vmem:[#allocation2 + $0x24] sm:$0x1]  ;;  %v696_v30 = vld [vmem:[#allocation2 + $0x2c] sm:$0x1]  ;;  %v267_v31 = vld [vmem:[%s10502_s2 + $0x50] sm:$0xff]  ;;  %2549 = vrot.lane.b32.xlu0 %v2388_v25, %s8717_s16  ;;  %v2407_v32 = vor.u32 %v2406_v20, %v2402_v8  ;;  %v1018_v34 = vshrl.u32 %v871_v19, 16  ;;  %8142 = vmatmul.mubr.msk.f32.gmra.mrb[8].mxu0 %vm297_vm0, %v266_v24 }
  0x37   : > { %1216 = vst.msk [vmem:[#allocation2 + $0x10] sm:$0xf] %vm10509_vm1, %v905_v27  ;;  %1219 = vst [vmem:[#allocation2 + $0x14] sm:$0x1] %v1218_v28  ;;  %v1012_v33 = vrot.slane %v1010_v22, 7  ;;  %v1021_v35 = vshll.u32 %v871_v19, 16  ;;  %8144 = vmatprep.mubr.msk.f32.mxu0 %vm297_vm0, %v267_v31 }
  0x38   : > { %v860_v36 = vld [vmem:[%s8803_s29 + $0x10] sm:$0xf]  ;;  %v268_v37 = vld [vmem:[%s10502_s2 + $0x58] sm:$0xff]  ;;  %v8234_v38 = vld [vmem:[#allocation2 + $0x48] sm:$0xff]   ;;  %v641_v39 = vsel %vm8796_vm5, 0, %v640_v29  ;;  %v2412_v42 = vsel %vm10520_vm8, %v2407_v32, %v2411_v26  ;;  %v1020_v46 = vrot.slane %v1018_v34, 7 }
  0x39   : > { %v269_v41 = vld [vmem:[%s10502_s2 + $0x60] sm:$0xff]  ;;  %v8235_v43 = vld [vmem:[#allocation2 + $0x50] ss:$0 sps:$4 sm:$0x11]   ;;  %v1015_v44 = vor.u32 %v1013_v23, %v1012_v33  ;;  %v1016_v45 = vrot.slane %v1012_v33, 4  ;;  %v2426_v47 = vshrl.u32 %v8234_v38, 16 }
  0x3a   : > { %642 = vst [vmem:[#allocation2 + $0x24] sm:$0x1] %v641_v39  ;;  %v2428_v48 = vshll.u32 %v8234_v38, 16  ;;  %v1262_v49 = vld [vmem:[#allocation2 + $0x60] sm:$0xf]  ;;  %v697_v50 = vsel %vm8809_vm7, 0, %v696_v30  ;;  %2553 = vrot.lane.b32.xlu0 %v2412_v42, %s8717_s16  ;;  %v1023_v54 = vor.u32 %v1021_v35, %v1020_v46  ;;  %8145 = vmatmul.mubr.msk.f32.gmra.mrb[10].mxu0 %vm297_vm0, %v268_v37 }
  0x3b   : > { %v925_v51 = vshrl.u32 %v860_v36, 16  ;;  %v2433_v53 = vshll.u32 %v8235_v43, 16  ;;  %v1025_v55 = vrot.slane %v1020_v46, 4  ;;  %v1263_v56 = vsel %vm8837_vm10, %v1015_v44, %v1262_v49  ;;  %v1266_v57 = vld [vmem:[#allocation2 + $0x68] sm:$0x1]  ;;  %v271_v1 = vld [vmem:[%s10502_s2 + $0x70] sm:$0xff]  ;;  %8147 = vmatprep.mubr.msk.f32.mxu0 %vm297_vm0, %v269_v41 }
  0x3c   : > { %698 = vst [vmem:[#allocation2 + $0x2c] sm:$0x1] %v697_v50  ;;  %v861_v58 = vld [vmem:[%s8803_s29 + $0x14] sm:$0xf]  ;;  %v270_v59 = vld [vmem:[%s10502_s2 + $0x68] sm:$0xff]  ;;  %v2430_v60 = vrot.slane %v2428_v48, 1  ;;  %v1024_v3 = vsel %vm8831_vm9, %v1016_v45, %v1023_v54 }
  0x3d   : > { %1264 = vst [vmem:[#allocation2 + $0x60] sm:$0xf] %v1263_v56  ;;  %v927_v61 = vrot.slane %v925_v51, 7  ;;  %v928_v62 = vshll.u32 %v860_v36, 16  ;;  %v933_v63 = vshrl.u32 %v861_v58, 16  ;;  %v2435_v2 = vrot.slane %v2433_v53, 1 }
  0x3e   : > { %v661_v0 = vld [vmem:[#allocation2 + $0x78] sm:$0x1]  ;;  %v1267_v4 = vsel %vm8796_vm5, %v1025_v55, %v1266_v57  ;;  %v936_v5 = vshll.u32 %v861_v58, 16  ;;  %v717_v6 = vld [vmem:[#allocation2 + $0x80] sm:$0x1]  ;;  %v2431_v7 = vor.u32 %v2430_v60, %v2426_v47  ;;  %v8236_v8 = vld [vmem:[#allocation2 + $0xc] sm:$0xff]   ;;  %8148 = vmatmul.mubr.msk.f32.gmra.mrb[12].mxu0 %vm297_vm0, %v270_v59 }
  0x3f   : > { %1265 = vst.msk [vmem:[#allocation2 + $0x64] sm:$0xf] %vm10509_vm1, %v1024_v3  ;;  %1268 = vst [vmem:[#allocation2 + $0x68] sm:$0x1] %v1267_v4  ;;  %v930_v9 = vor.u32 %v928_v62, %v927_v61  ;;  %v931_v11 = vrot.slane %v927_v61, 4  ;;  %v935_v13 = vrot.slane %v933_v63, 7  ;;  %8150 = vmatprep.mubr.msk.f32.mxu0 %vm297_vm0, %v271_v1 }
  0x40   : > { %v8237_v12 = vld [vmem:[#allocation2 + $0x14] ss:$0 sps:$4 sm:$0x11]   ;;  %v662_v15 = vsel %vm8796_vm5, 0, %v661_v0  ;;  %v718_v16 = vsel %vm8809_vm7, 0, %v717_v6  ;;  %v272_v17 = vld [vmem:[%s10502_s2 + $0x78] sm:$0xff]  ;;  %v2436_v18 = vsel %vm10520_vm8, %v2431_v7, %v2435_v2 }
  0x41   : > { %v2366_v19 = vshrl.u32 %v8236_v8, 16  ;;  %v2368_v20 = vshll.u32 %v8236_v8, 16  ;;  %v1227_v21 = vld [vmem:[#allocation2 + $0x24] sm:$0xf]  ;;  %663 = vst [vmem:[#allocation2 + $0x78] sm:$0x1] %v662_v15  ;;  %2557 = vrot.lane.b32.xlu0 %v2436_v18, %s8717_s16  ;;  %v938_v25 = vor.u32 %v936_v5, %v935_v13 }
  0x42   : > { %719 = vst [vmem:[#allocation2 + $0x80] sm:$0x1] %v718_v16  ;;  %v874_v22 = vld [vmem:[%s8803_s29 + $0x48] sm:$0xf]  ;;  %v273_v23 = vld [vmem:[%s10502_s2 + $0x80] sm:$0xff]  ;;  %v2373_v24 = vshll.u32 %v8237_v12, 16  ;;  %v1228_v27 = vsel %vm8837_vm10, %v930_v9, %v1227_v21  ;;  %8151 = vmatmul.mubr.msk.f32.gmra.mrb[14].mxu0 %vm297_vm0, %v272_v17 }
  0x43   : > { %v940_v26 = vrot.slane %v935_v13, 4  ;;  %v875_v28 = vld [vmem:[%s8803_s29 + $0x4c] sm:$0xf]  ;;  %v646_v29 = vld [vmem:[#allocation2 + $0x3c] sm:$0x1]  ;;  %v2370_v30 = vrot.slane %v2368_v20, 1  ;;  %v939_v36 = vsel %vm8831_vm9, %v931_v11, %v938_v25  ;;  %8153 = vmatprep.mubr.msk.f32.mxu0 %vm297_vm0, %v273_v23 }
  0x44   : > { %1229 = vst [vmem:[#allocation2 + $0x24] sm:$0xf] %v1228_v27  ;;  %v1231_v31 = vld [vmem:[#allocation2 + $0x2c] sm:$0x1]  ;;  %v1044_v32 = vshrl.u32 %v874_v22, 16  ;;  %v1047_v33 = vshll.u32 %v874_v22, 16 }
  0x45   : > { %v1052_v34 = vshrl.u32 %v875_v28, 16  ;;  %v2375_v35 = vrot.slane %v2373_v24, 1  ;;  %v1232_v37 = vsel %vm8796_vm5, %v940_v26, %v1231_v31  ;;  %v1055_v38 = vshll.u32 %v875_v28, 16  ;;  %v702_v39 = vld [vmem:[#allocation2 + $0x44] sm:$0x1]  ;;  %v274_v41 = vld [vmem:[%s10502_s2 + $0x88] sm:$0xff] }
  0x46   : > { %v2371_v42 = vor.u32 %v2370_v30, %v2366_v19  ;;  %1230 = vst.msk [vmem:[#allocation2 + $0x28] sm:$0xf] %vm10509_vm1, %v939_v36  ;;  %1233 = vst [vmem:[#allocation2 + $0x2c] sm:$0x1] %v1232_v37  ;;  %v1046_v43 = vrot.slane %v1044_v32, 7  ;;  %v647_v45 = vsel %vm8796_vm5, 0, %v646_v29  ;;  %8154 = vmatmul.mubr.msk.f32.gmra.mrb[16].mxu0 %vm297_vm0, %v274_v41 }
  0x47   : > { %v1054_v44 = vrot.slane %v1052_v34, 7  ;;  %v864_v46 = vld [vmem:[%s8803_s29 + $0x20] sm:$0xf]  ;;  %v8990_v47 = vld [vmem:[#allocation3] sm:$0xff]   ;;  %v275_v48 = vld [vmem:[%s10502_s2 + $0x90] sm:$0xff]  ;;  %v703_v50 = vsel %vm8809_vm7, 0, %v702_v39 }
  0x48   : > { %v8238_v49 = vld [vmem:[#allocation2 + $0x60] sm:$0xff]   ;;  %648 = vst [vmem:[#allocation2 + $0x3c] sm:$0x1] %v647_v45  ;;  %v2376_v51 = vsel %vm10520_vm8, %v2371_v42, %v2375_v35  ;;  %v8239_v53 = vld [vmem:[#allocation2 + $0x68] ss:$0 sps:$4 sm:$0x11]   ;;  %v1049_v54 = vor.u32 %v1047_v33, %v1046_v43  ;;  %8156 = vmatprep.mubr.msk.f32.mxu0 %vm297_vm0, %v275_v48 }
  0x49   : > { %v1050_v55 = vrot.slane %v1046_v43, 4  ;;  %v1057_v56 = vor.u32 %v1055_v38, %v1054_v44  ;;  %704 = vst [vmem:[#allocation2 + $0x44] sm:$0x1] %v703_v50  ;;  %v865_v57 = vld [vmem:[%s8803_s29 + $0x24] sm:$0xf]  ;;  %2547 = vrot.lane.b32.xlu1 %v2376_v51, %s8717_s16  ;;  %v2450_v58 = vshrl.u32 %v8238_v49, 16 }
  0x4a   : > { %v2452_v59 = vshll.u32 %v8238_v49, 16  ;;  %v1059_v60 = vrot.slane %v1054_v44, 4  ;;  %v1276_v61 = vld [vmem:[#allocation2 + $0x78] sm:$0xf]  ;;  %v959_v62 = vshrl.u32 %v864_v46, 16  ;;  %v2457_v0 = vshll.u32 %v8239_v53, 16 }
  0x4b   : > { %v276_v63 = vld [vmem:[%s10502_s2 + $0x98] sm:$0xff]  ;;  %v1058_v1 = vsel %vm8831_vm9, %v1050_v55, %v1057_v56  ;;  %v1277_v2 = vsel %vm8837_vm10, %v1049_v54, %v1276_v61  ;;  %v1280_v3 = vld [vmem:[#allocation2 + $0x80] sm:$0x1]  ;;  %v962_v4 = vshll.u32 %v864_v46, 16  ;;  %v667_v5 = vld [vmem:[#allocation2 + $0x90] sm:$0x1] }
  0x4c   : > { %v277_v6 = vld [vmem:[%s10502_s2 + $0xa0] sm:$0xff]  ;;  %v2454_v7 = vrot.slane %v2452_v59, 1  ;;  %1278 = vst [vmem:[#allocation2 + $0x78] sm:$0xf] %v1277_v2  ;;  %1279 = vst.msk [vmem:[#allocation2 + $0x7c] sm:$0xf] %vm10509_vm1, %v1058_v1  ;;  %v1281_v8 = vsel %vm8796_vm5, %v1059_v60, %v1280_v3  ;;  %8157 = vmatmul.mubr.msk.f32.gmra.mrb[18].mxu0 %vm297_vm0, %v276_v63 }
  0x4d   : > { %v961_v9 = vrot.slane %v959_v62, 7  ;;  %v967_v11 = vshrl.u32 %v865_v57, 16  ;;  %v2459_v12 = vrot.slane %v2457_v0, 1  ;;  %1282 = vst [vmem:[#allocation2 + $0x80] sm:$0x1] %v1281_v8  ;;  %v970_v13 = vshll.u32 %v865_v57, 16  ;;  %8159 = vmatprep.mubr.msk.f32.mxu0 %vm297_vm0, %v277_v6 }
  0x4e   : > { %v668_v15 = vsel %vm8796_vm5, 0, %v667_v5  ;;  %v723_v16 = vld [vmem:[#allocation2 + $0x98] sm:$0x1]  ;;  %v2789_v17 = vshll.u32 %v8990_v47, 16  ;;  %v2455_v18 = vor.u32 %v2454_v7, %v2450_v58  ;;  %v8240_v19 = vld [vmem:[#allocation2 + $0x24] sm:$0xff]   ;;  %v279_v37 = vld [vmem:[%s10502_s2 + $0xb0] sm:$0xff] }
  0x4f   : > { %v964_v20 = vor.u32 %v962_v4, %v961_v9  ;;  %v965_v21 = vrot.slane %v961_v9, 4  ;;  %669 = vst [vmem:[#allocation2 + $0x90] sm:$0x1] %v668_v15  ;;  %v278_v22 = vld [vmem:[%s10502_s2 + $0xa8] sm:$0xff]  ;;  %v969_v24 = vrot.slane %v967_v11, 7  ;;  %v2390_v27 = vshrl.u32 %v8240_v19, 16 }
  0x50   : > { %v8241_v23 = vld [vmem:[#allocation2 + $0x2c] ss:$0 sps:$4 sm:$0x11]   ;;  %v1241_v25 = vld [vmem:[#allocation2 + $0x3c] sm:$0xf]  ;;  %v2460_v26 = vsel %vm10520_vm8, %v2455_v18, %v2459_v12  ;;  %v2392_v28 = vshll.u32 %v8240_v19, 16  ;;  %8160 = vmatmul.mubr.msk.f32.gmra.mrb[20].mxu0 %vm297_vm0, %v278_v22 }
  0x51   : > { %v1242_v29 = vsel %vm8837_vm10, %v964_v20, %v1241_v25  ;;  %v1245_v30 = vld [vmem:[#allocation2 + $0x44] sm:$0x1]  ;;  %v878_v31 = vld [vmem:[%s8803_s29 + $0x58] sm:$0xf]  ;;  %2561 = vrot.lane.b32.xlu0 %v2460_v26, %s8717_s16  ;;  %v2397_v32 = vshll.u32 %v8241_v23, 16  ;;  %v972_v33 = vor.u32 %v970_v13, %v969_v24  ;;  %v974_v34 = vrot.slane %v969_v24, 4  ;;  %8162 = vmatprep.mubr.msk.f32.mxu0 %vm297_vm0, %v279_v37 }
  0x52   : > { %1243 = vst [vmem:[#allocation2 + $0x3c] sm:$0xf] %v1242_v29  ;;  %v724_v35 = vsel %vm8809_vm7, 0, %v723_v16  ;;  %v879_v36 = vld [vmem:[%s8803_s29 + $0x5c] sm:$0xf]  ;;  %v2394_v38 = vrot.slane %v2392_v28, 1 }
  0x53   : > { %725 = vst [vmem:[#allocation2 + $0x98] sm:$0x1] %v724_v35  ;;  %v1078_v39 = vshrl.u32 %v878_v31, 16  ;;  %v1081_v41 = vshll.u32 %v878_v31, 16  ;;  %v1086_v42 = vshrl.u32 %v879_v36, 16  ;;  %v2399_v44 = vrot.slane %v2397_v32, 1 }
  0x54   : > { %v652_v43 = vld [vmem:[#allocation2 + $0x54] sm:$0x1]  ;;  %v8242_v45 = vld [vmem:[#allocation2 + $0x78] sm:$0xff]   ;;  %v973_v46 = vsel %vm8831_vm9, %v965_v21, %v972_v33  ;;  %v1246_v48 = vsel %vm8796_vm5, %v974_v34, %v1245_v30  ;;  %v2395_v50 = vor.u32 %v2394_v38, %v2390_v27  ;;  %v8243_v51 = vld [vmem:[#allocation2 + $0x80] ss:$0 sps:$4 sm:$0x11]  }
  0x55   : > { %v280_v49 = vld [vmem:[%s10502_s2 + $0xb8] sm:$0xff]  ;;  %1244 = vst.msk [vmem:[#allocation2 + $0x40] sm:$0xf] %vm10509_vm1, %v973_v46  ;;  %1247 = vst [vmem:[#allocation2 + $0x44] sm:$0x1] %v1246_v48  ;;  %v1080_v53 = vrot.slane %v1078_v39, 7 }
  0x56   : > { %v281_v54 = vld [vmem:[%s10502_s2 + $0xc0] sm:$0xff]  ;;  %v2474_v55 = vshrl.u32 %v8242_v45, 16  ;;  %v2476_v56 = vshll.u32 %v8242_v45, 16  ;;  %v1088_v57 = vrot.slane %v1086_v42, 7  ;;  %v1089_v58 = vshll.u32 %v879_v36, 16  ;;  %8163 = vmatmul.mubr.msk.f32.gmra.mrb[22].mxu0 %vm297_vm0, %v280_v49  ;;  %v282_v12 = vld [vmem:[%s10502_s2 + $0xc8] sm:$0xff] }
  0x57   : > { %v1290_v59 = vld [vmem:[#allocation2 + $0x90] sm:$0xf]  ;;  %v2400_v60 = vsel %vm10520_vm8, %v2395_v50, %v2399_v44  ;;  %v2481_v61 = vshll.u32 %v8243_v51, 16  ;;  %v1083_v62 = vor.u32 %v1081_v41, %v1080_v53  ;;  %v1084_v63 = vrot.slane %v1080_v53, 4  ;;  %v708_v0 = vld [vmem:[#allocation2 + $0x5c] sm:$0x1]  ;;  %8165 = vmatprep.mubr.msk.f32.mxu0 %vm297_vm0, %v281_v54 }
  0x58   : > { %v868_v1 = vld [vmem:[%s8803_s29 + $0x30] sm:$0xf]  ;;  %2551 = vrot.lane.b32.xlu1 %v2400_v60, %s8717_s16  ;;  %v2478_v2 = vrot.slane %v2476_v56, 1  ;;  %v1091_v3 = vor.u32 %v1089_v58, %v1088_v57  ;;  %v1093_v4 = vrot.slane %v1088_v57, 4  ;;  %v653_v5 = vsel %vm8796_vm5, 0, %v652_v43  ;;  %v284_v41 = vld [vmem:[%s10502_s2 + $0xd8] sm:$0xff] }
  0x59   : > { %v869_v6 = vld [vmem:[%s8803_s29 + $0x34] sm:$0xf]  ;;  %v2483_v7 = vrot.slane %v2481_v61, 1  ;;  %v1291_v8 = vsel %vm8837_vm10, %v1083_v62, %v1290_v59  ;;  %654 = vst [vmem:[#allocation2 + $0x54] sm:$0x1] %v653_v5  ;;  %v709_v9 = vsel %vm8809_vm7, 0, %v708_v0 }
  0x5a   : > { %v993_v11 = vshrl.u32 %v868_v1, 16  ;;  %v2479_v13 = vor.u32 %v2478_v2, %v2474_v55  ;;  %v1092_v15 = vsel %vm8831_vm9, %v1084_v63, %v1091_v3  ;;  %1292 = vst [vmem:[#allocation2 + $0x90] sm:$0xf] %v1291_v8  ;;  %v1294_v16 = vld [vmem:[#allocation2 + $0x98] sm:$0x1]  ;;  %v996_v18 = vshll.u32 %v868_v1, 16  ;;  %8166 = vmatmul.mubr.msk.f32.gmra.mrb[24].mxu0 %vm297_vm0, %v282_v12 }
  0x5b   : > { %710 = vst [vmem:[#allocation2 + $0x5c] sm:$0x1] %v709_v9  ;;  %v1001_v19 = vshrl.u32 %v869_v6, 16  ;;  %v673_v20 = vld [vmem:[#allocation2 + $0xa8] sm:$0x1]  ;;  %v1295_v21 = vsel %vm8796_vm5, %v1093_v4, %v1294_v16  ;;  %v1004_v23 = vshll.u32 %v869_v6, 16 }
  0x5c   : > { %1293 = vst.msk [vmem:[#allocation2 + $0x94] sm:$0xf] %vm10509_vm1, %v1092_v15  ;;  %v995_v22 = vrot.slane %v993_v11, 7  ;;  %v674_v24 = vsel %vm8796_vm5, 0, %v673_v20  ;;  %v729_v25 = vld [vmem:[#allocation2 + $0xb0] sm:$0x1]  ;;  %v2484_v27 = vsel %vm10520_vm8, %v2479_v13, %v2483_v7 }
  0x5d   : > { %v283_v26 = vld [vmem:[%s10502_s2 + $0xd0] sm:$0xff]  ;;  %v8244_v28 = vld [vmem:[#allocation2 + $0x3c] sm:$0xff]   ;;  %1296 = vst [vmem:[#allocation2 + $0x98] sm:$0x1] %v1295_v21  ;;  %v1003_v29 = vrot.slane %v1001_v19, 7  ;;  %2565 = vrot.lane.b32.xlu0 %v2484_v27, %s8717_s16  ;;  %v730_v33 = vsel %vm8809_vm7, 0, %v729_v25 }
  0x5e   : > { %675 = vst [vmem:[#allocation2 + $0xa8] sm:$0x1] %v674_v24  ;;  %v8245_v30 = vld [vmem:[#allocation2 + $0x44] ss:$0 sps:$4 sm:$0x11]   ;;  %v998_v31 = vor.u32 %v996_v18, %v995_v22  ;;  %v999_v32 = vrot.slane %v995_v22, 4  ;;  %8168 = vmatprep.mubr.msk.f32.mxu0 %vm297_vm0, %v283_v26 }
  0x5f   : > { %v2787_v34 = vshrl.u32 %v8990_v47, 16  ;;  %v2414_v35 = vshrl.u32 %v8244_v28, 16  ;;  %v2416_v36 = vshll.u32 %v8244_v28, 16  ;;  %v1006_v37 = vor.u32 %v1004_v23, %v1003_v29  ;;  %731 = vst [vmem:[#allocation2 + $0xb0] sm:$0x1] %v730_v33  ;;  %8169 = vmatmul.mubr.msk.f32.gmra.mrb[26].mxu0 %vm297_vm0, %v284_v41  ;;  %v285_v25 = vld [vmem:[%s10502_s2 + $0xe0] sm:$0xff] }
  0x60   : > { %v1008_v38 = vrot.slane %v1003_v29, 4  ;;  %v882_v39 = vld [vmem:[%s8803_s29 + $0x68] sm:$0xf]  ;;  %v2421_v42 = vshll.u32 %v8245_v30, 16  ;;  %v883_v43 = vld [vmem:[%s8803_s29 + $0x6c] sm:$0xf]  ;;  %8171 = vmatprep.mubr.msk.f32.mxu0 %vm297_vm0, %v285_v25 }
  0x61   : > { %v1112_v44 = vshrl.u32 %v882_v39, 16  ;;  %v1115_v45 = vshll.u32 %v882_v39, 16  ;;  %v9088_v46 = vrot.slane %v2789_v17, 1  ;;  %v2418_v48 = vrot.slane %v2416_v36, 1  ;;  %v1255_v50 = vld [vmem:[#allocation2 + $0x54] sm:$0xf] }
  0x62   : > { %v1007_v49 = vsel %vm8831_vm9, %v999_v32, %v1006_v37  ;;  %v1120_v51 = vshrl.u32 %v883_v43, 16  ;;  %v1123_v53 = vshll.u32 %v883_v43, 16  ;;  %v2423_v54 = vrot.slane %v2421_v42, 1  ;;  %v1259_v56 = vld [vmem:[#allocation2 + $0x5c] sm:$0x1]  ;;  %v286_v30 = vld [vmem:[%s10502_s2 + $0xe8] sm:$0xff] }
  0x63   : > { %v1256_v55 = vsel %vm8837_vm10, %v998_v31, %v1255_v50  ;;  %1258 = vst.msk [vmem:[#allocation2 + $0x58] sm:$0xf] %vm10509_vm1, %v1007_v49  ;;  %v1114_v57 = vrot.slane %v1112_v44, 7  ;;  %v2419_v58 = vor.u32 %v2418_v48, %v2414_v35  ;;  %v8246_v17 = vld [vmem:[#allocation2 + $0x90] sm:$0xff]   ;;  %v1260_v59 = vsel %vm8796_vm5, %v1008_v38, %v1259_v56  ;;  %v658_v61 = vld [vmem:[#allocation2 + $0x6c] sm:$0x1]  ;;  %8172 = vmatmul.mubr.msk.f32.gmra.mrb[28].mxu0 %vm297_vm0, %v286_v30 }
  0x64   : > { %1257 = vst [vmem:[#allocation2 + $0x54] sm:$0xf] %v1256_v55  ;;  %v1122_v60 = vrot.slane %v1120_v51, 7  ;;  %v8247_v62 = vld [vmem:[#allocation2 + $0x98] ss:$0 sps:$4 sm:$0x11]  }
  0x65   : > { %1261 = vst [vmem:[#allocation2 + $0x5c] sm:$0x1] %v1260_v59  ;;  %v1117_v63 = vor.u32 %v1115_v45, %v1114_v57  ;;  %v1118_v0 = vrot.slane %v1114_v57, 4  ;;  %v2424_v1 = vsel %vm10520_vm8, %v2419_v58, %v2423_v54  ;;  %v2498_v2 = vshrl.u32 %v8246_v17, 16  ;;  %v1304_v5 = vld [vmem:[#allocation2 + $0xa8] sm:$0xf] }
  0x66   : > { %v2500_v3 = vshll.u32 %v8246_v17, 16  ;;  %v1125_v4 = vor.u32 %v1123_v53, %v1122_v60  ;;  %v714_v6 = vld [vmem:[#allocation2 + $0x74] sm:$0x1]  ;;  %2555 = vrot.lane.b32.xlu1 %v2424_v1, %s8717_s16  ;;  %v2505_v7 = vshll.u32 %v8247_v62, 16  ;;  %v1127_v8 = vrot.slane %v1122_v60, 4  ;;  %s8721_s30 = smov 24  }
  0x67   : > { %v1305_v9 = vsel %vm8837_vm10, %v1117_v63, %v1304_v5  ;;  %v1308_v11 = vld [vmem:[#allocation2 + $0xb0] sm:$0x1]  ;;  %v659_v12 = vsel %vm8796_vm5, 0, %v658_v61  ;;  %v715_v16 = vsel %vm8809_vm7, 0, %v714_v6  ;;  %v872_v18 = vld [vmem:[%s8803_s29 + $0x40] sm:$0xf] }
  0x68   : > { %v2502_v13 = vrot.slane %v2500_v3, 1  ;;  %v1126_v15 = vsel %vm8831_vm9, %v1118_v0, %v1125_v4  ;;  %1306 = vst [vmem:[#allocation2 + $0xa8] sm:$0xf] %v1305_v9  ;;  %660 = vst [vmem:[#allocation2 + $0x6c] sm:$0x1] %v659_v12  ;;  %v2507_v20 = vrot.slane %v2505_v7, 1  ;;  %v1309_v21 = vsel %vm8796_vm5, %v1127_v8, %v1308_v11 }
  0x69   : > { %v873_v19 = vld [vmem:[%s8803_s29 + $0x44] sm:$0xf]  ;;  %1307 = vst.msk [vmem:[#allocation2 + $0xac] sm:$0xf] %vm10509_vm1, %v1126_v15  ;;  %716 = vst [vmem:[#allocation2 + $0x74] sm:$0x1] %v715_v16  ;;  %v2792_v9 = vor.u32 %v9088_v46, %v2787_v34 }
  0x6a   : > { %v1027_v22 = vshrl.u32 %v872_v18, 16  ;;  %v1030_v23 = vshll.u32 %v872_v18, 16  ;;  %v802_v24 = vld [vmem:[#allocation3 + $0x8] sm:$0x1]  ;;  %v2503_v26 = vor.u32 %v2502_v13, %v2498_v2  ;;  %1310 = vst [vmem:[#allocation2 + $0xb0] sm:$0x1] %v1309_v21 }
  0x6b   : > { %v1035_v27 = vshrl.u32 %v873_v19, 16  ;;  %v1038_v28 = vshll.u32 %v873_v19, 16  ;;  %v803_v29 = vsel %vm8809_vm7, 0, %v802_v24  ;;  %v8248_v31 = vld [vmem:[#allocation2 + $0x54] sm:$0xff]   ;;  %v664_v45 = vld [vmem:[#allocation2 + $0x84] sm:$0x1] }
  0x6c   : > { %v1029_v32 = vrot.slane %v1027_v22, 7  ;;  %804 = vst [vmem:[#allocation3 + $0x8] sm:$0x1] %v803_v29  ;;  %v2508_v33 = vsel %vm10520_vm8, %v2503_v26, %v2507_v20  ;;  %v8249_v35 = vld [vmem:[#allocation2 + $0x5c] ss:$0 sps:$4 sm:$0x11]  }
  0x6d   : > { %v1037_v36 = vrot.slane %v1035_v27, 7  ;;  %2569 = vrot.lane.b32.xlu0 %v2508_v33, %s8717_s16  ;;  %v2438_v37 = vshrl.u32 %v8248_v31, 16  ;;  %v2440_v38 = vshll.u32 %v8248_v31, 16  ;;  %v2445_v42 = vshll.u32 %v8249_v35, 16  ;;  %v720_v48 = vld [vmem:[#allocation2 + $0x8c] sm:$0x1] }
  0x6e   : > { %v1032_v39 = vor.u32 %v1030_v23, %v1029_v32  ;;  %v1033_v41 = vrot.slane %v1029_v32, 4  ;;  %v665_v51 = vsel %vm8796_vm5, 0, %v664_v45  ;;  %v721_v60 = vsel %vm8809_vm7, 0, %v720_v48  ;;  %v876_v63 = vld [vmem:[%s8803_s29 + $0x50] sm:$0xf]  ;;  %s8722_s6 = smov 32  }
  0x6f   : > { %v1040_v43 = vor.u32 %v1038_v28, %v1037_v36  ;;  %v1042_v44 = vrot.slane %v1037_v36, 4  ;;  %v2442_v49 = vrot.slane %v2440_v38, 1  ;;  %v1269_v50 = vld [vmem:[#allocation2 + $0x6c] sm:$0xf]  ;;  %v2447_v53 = vrot.slane %v2445_v42, 1  ;;  %s8723_s8 = smov 40  }
  0x70   : > { %v8250_v54 = vld [vmem:[#allocation2 + $0xa8] sm:$0xff]   ;;  %v1270_v56 = vsel %vm8837_vm10, %v1032_v39, %v1269_v50  ;;  %v1273_v57 = vld [vmem:[#allocation2 + $0x74] sm:$0x1]  ;;  %666 = vst [vmem:[#allocation2 + $0x84] sm:$0x1] %v665_v51  ;;  %v1061_v5 = vshrl.u32 %v876_v63, 16 }
  0x71   : > { %v1041_v55 = vsel %vm8831_vm9, %v1033_v41, %v1040_v43  ;;  %v2443_v58 = vor.u32 %v2442_v49, %v2438_v37  ;;  %v8251_v17 = vld [vmem:[#allocation2 + $0xb0] ss:$0 sps:$4 sm:$0x11]   ;;  %1271 = vst [vmem:[#allocation2 + $0x6c] sm:$0xf] %v1270_v56  ;;  %v1274_v59 = vsel %vm8796_vm5, %v1042_v44, %v1273_v57  ;;  %v2522_v61 = vshrl.u32 %v8250_v54, 16 }
  0x72   : > { %1272 = vst.msk [vmem:[#allocation2 + $0x70] sm:$0xf] %vm10509_vm1, %v1041_v55  ;;  %v2524_v62 = vshll.u32 %v8250_v54, 16  ;;  %1275 = vst [vmem:[#allocation2 + $0x74] sm:$0x1] %v1274_v59  ;;  %v2529_v1 = vshll.u32 %v8251_v17, 16 }
  0x73   : > { %722 = vst [vmem:[#allocation2 + $0x8c] sm:$0x1] %v721_v60  ;;  %v2448_v0 = vsel %vm10520_vm8, %v2443_v58, %v2447_v53  ;;  %v8255_v2 = vld [vmem:[#allocation3 + $0x8] ss:$0 sps:$4 sm:$0x11]   ;;  %v1064_v6 = vshll.u32 %v876_v63, 16 }
  0x74   : > { %v877_v3 = vld [vmem:[%s8803_s29 + $0x54] sm:$0xf]  ;;  %2559 = vrot.lane.b32.xlu1 %v2448_v0, %s8717_s16  ;;  %v2526_v4 = vrot.slane %v2524_v62, 1  ;;  %v2531_v8 = vrot.slane %v2529_v1, 1  ;;  %v2794_v11 = vshll.u32 %v8255_v2, 16  ;;  %v1063_v15 = vrot.slane %v1061_v5, 7 }
  0x75   : > { %v1069_v7 = vshrl.u32 %v877_v3, 16  ;;  %v1072_v12 = vshll.u32 %v877_v3, 16  ;;  %v8258_v18 = vld [vmem:[#allocation2] sm:$0xfe]   ;;  %v670_v32 = vld [vmem:[#allocation2 + $0x9c] sm:$0x1] }
  0x76   : > { %v2527_v13 = vor.u32 %v2526_v4, %v2522_v61  ;;  %v2796_v19 = vrot.slane %v2794_v11, 1  ;;  %v8259_v21 = vld [vmem:[#allocation2 + $0x8] ss:$0 sps:$4 sm:$0x11]   ;;  %v1066_v24 = vor.u32 %v1064_v6, %v1063_v15  ;;  %v1067_v25 = vrot.slane %v1063_v15, 4  ;;  %s8724_s9 = smov 48  }
  0x77   : > { %v1071_v16 = vrot.slane %v1069_v7, 7  ;;  %v1283_v20 = vld [vmem:[#allocation2 + $0x84] sm:$0xf]  ;;  %v3220_v36 = vrot.slane %v8258_v18, 1  ;;  %v3221_v37 = vrot.slane %v8259_v21, 1  ;;  %v671_v41 = vsel %vm8796_vm5, 0, %v670_v32 }
  0x78   : > { %v2532_v22 = vsel %vm10520_vm8, %v2527_v13, %v2531_v8  ;;  %v2797_v34 = vsel %vm10520_vm8, %v2792_v9, %v2796_v19  ;;  %v1284_v30 = vsel %vm8837_vm10, %v1066_v24, %v1283_v20  ;;  %v726_v38 = vld [vmem:[#allocation2 + $0xa4] sm:$0x1]  ;;  %v880_v43 = vld [vmem:[%s8803_s29 + $0x60] sm:$0xf]  ;;  %672 = vst [vmem:[#allocation2 + $0x9c] sm:$0x1] %v671_v41 }
  0x79   : > { %v8252_v23 = vld [vmem:[#allocation2 + $0x6c] sm:$0xff]   ;;  %v1074_v26 = vor.u32 %v1072_v12, %v1071_v16  ;;  %2573 = vrot.lane.b32.xlu0 %v2532_v22, %s8717_s16  ;;  %v8253_v47 = vld [vmem:[#allocation2 + $0x74] ss:$0 sps:$4 sm:$0x11]   ;;  %v1076_v46 = vrot.slane %v1071_v16, 4  ;;  %v727_v42 = vsel %vm8809_vm7, 0, %v726_v38  ;;  %v3222_v51 = vsel %vm10513_vm11, %v3220_v36, %v3221_v37 }
  0x7a   : > { %v2462_v27 = vshrl.u32 %v8252_v23, 16  ;;  %v2464_v28 = vshll.u32 %v8252_v23, 16  ;;  %v1287_v31 = vld [vmem:[#allocation2 + $0x8c] sm:$0x1]  ;;  %v2469_v33 = vshll.u32 %v8253_v47, 16  ;;  %v1095_v48 = vshrl.u32 %v880_v43, 16 }
  0x7b   : > { %v1075_v29 = vsel %vm8831_vm9, %v1067_v25, %v1074_v26  ;;  %1285 = vst [vmem:[#allocation2 + $0x84] sm:$0xf] %v1284_v30  ;;  %v1288_v35 = vsel %vm8796_vm5, %v1076_v46, %v1287_v31  ;;  %728 = vst [vmem:[#allocation2 + $0xa4] sm:$0x1] %v727_v42  ;;  %v881_v45 = vld [vmem:[%s8803_s29 + $0x64] sm:$0xf] }
  0x7c   : > { %1286 = vst.msk [vmem:[#allocation2 + $0x88] sm:$0xf] %vm10509_vm1, %v1075_v29  ;;  %v2466_v39 = vrot.slane %v2464_v28, 1  ;;  %1289 = vst [vmem:[#allocation2 + $0x8c] sm:$0x1] %v1288_v35  ;;  %v2471_v44 = vrot.slane %v2469_v33, 1 }
  0x7d   : > { %2978 = vrot.lane.b32.xlu0 %v2797_v34, %s8718_s27  ;;  %v1098_v49 = vshll.u32 %v880_v43, 16  ;;  %v1103_v53 = vshrl.u32 %v881_v45, 16  ;;  %v1106_v54 = vshll.u32 %v881_v45, 16  ;;  %v1097_v55 = vrot.slane %v1095_v48, 7  ;;  %v8262_v56 = vld [vmem:[#allocation2 + $0x18] sm:$0xfe]  }
  0x7e   : > { %v2467_v50 = vor.u32 %v2466_v39, %v2462_v27  ;;  %v8263_v17 = vld [vmem:[#allocation2 + $0x20] ss:$0 sps:$4 sm:$0x11]   ;;  %v676_v59 = vld [vmem:[#allocation2 + $0xb4] sm:$0x1]  ;;  %v3226_v62 = vrot.slane %v8262_v56, 1 }
  0x7f   : > { %v1105_v58 = vrot.slane %v1103_v53, 7  ;;  %v1100_v60 = vor.u32 %v1098_v49, %v1097_v55  ;;  %v1101_v61 = vrot.slane %v1097_v55, 4  ;;  %v677_v63 = vsel %vm8796_vm5, 0, %v676_v59  ;;  %v732_v0 = vld [vmem:[#allocation2 + $0xbc] sm:$0x1]  ;;  %s8725_s10 = smov 56  }
  0x80   : > { %v2472_v57 = vsel %vm10520_vm8, %v2467_v50, %v2471_v44  ;;  %678 = vst [vmem:[#allocation2 + $0xb4] sm:$0x1] %v677_v63  ;;  %v3227_v5 = vrot.slane %v8263_v17, 1  ;;  %v1297_v9 = vld [vmem:[#allocation2 + $0x9c] sm:$0xf]  ;;  %v733_v21 = vsel %vm8809_vm7, 0, %v732_v0 }
  0x81   : > { %2563 = vrot.lane.b32.xlu1 %v2472_v57, %s8717_s16  ;;  %3268 = vrot.lane.b32.xlu0 %v3222_v51, %s8719_s28  ;;  %v1108_v2 = vor.u32 %v1106_v54, %v1105_v58  ;;  %v1110_v3 = vrot.slane %v1105_v58, 4  ;;  %v1298_v13 = vsel %vm8837_vm10, %v1100_v60, %v1297_v9  ;;  %v884_v18 = vld [vmem:[%s8803_s29 + $0x70] sm:$0xf]  ;;  %v885_v19 = vld [vmem:[%s8803_s29 + $0x74] sm:$0xf]  ;;  %vm10512_vm12 = vcmask 31744  }
  0x82   : > { %v1301_v11 = vld [vmem:[#allocation2 + $0xa4] sm:$0x1]  ;;  %v3228_v16 = vsel %vm10513_vm11, %v3226_v62, %v3227_v5  ;;  %1299 = vst [vmem:[#allocation2 + $0x9c] sm:$0xf] %v1298_v13  ;;  %v1129_v22 = vshrl.u32 %v884_v18, 16  ;;  %v1132_v23 = vshll.u32 %v884_v18, 16 }
  0x83   : > { %v8256_v1 = vld [vmem:[#allocation2 + $0x84] sm:$0xff]   ;;  %v8257_v4 = vld [vmem:[#allocation2 + $0x8c] ss:$0 sps:$4 sm:$0x11]   ;;  %v1109_v8 = vsel %vm8831_vm9, %v1101_v61, %v1108_v2  ;;  %v1302_v15 = vsel %vm8796_vm5, %v1110_v3, %v1301_v11  ;;  %734 = vst [vmem:[#allocation2 + $0xbc] sm:$0x1] %v733_v21 }
  0x84   : > { %v2486_v6 = vshrl.u32 %v8256_v1, 16  ;;  %v2488_v7 = vshll.u32 %v8256_v1, 16  ;;  %v2493_v12 = vshll.u32 %v8257_v4, 16  ;;  %1300 = vst.msk [vmem:[#allocation2 + $0xa0] sm:$0xf] %vm10509_vm1, %v1109_v8  ;;  %v1137_v25 = vshrl.u32 %v885_v19, 16 }
  0x85   : > { %1303 = vst [vmem:[#allocation2 + $0xa4] sm:$0x1] %v1302_v15  ;;  %3272 = vrot.lane.b32.xlu0 %v3228_v16, %s8719_s28  ;;  %v1140_v26 = vshll.u32 %v885_v19, 16  ;;  %v1131_v34 = vrot.slane %v1129_v22, 7  ;;  %v8266_v46 = vld [vmem:[#allocation2 + $0x30] sm:$0xfe]  }
  0x86   : > { %v2490_v20 = vrot.slane %v2488_v7, 1  ;;  %v2495_v24 = vrot.slane %v2493_v12, 1  ;;  %v1139_v27 = vrot.slane %v1137_v25, 7  ;;  %v8267_v29 = vld [vmem:[#allocation2 + $0x38] ss:$0 sps:$4 sm:$0x11]  }
  0x87   : > { %v1311_v28 = vld [vmem:[#allocation2 + $0xb4] sm:$0xf]  ;;  %v1134_v31 = vor.u32 %v1132_v23, %v1131_v34  ;;  %v1135_v32 = vrot.slane %v1131_v34, 4  ;;  %v3232_v33 = vrot.slane %v8266_v46, 1  ;;  %v3233_v37 = vrot.slane %v8267_v29, 1  ;;  %v9194_v2 = vld [vmem:[#allocation2 + $0xc] sm:$0xff]  }
  0x88   : > { %v2491_v47 = vor.u32 %v2490_v20, %v2486_v6  ;;  %v1142_v35 = vor.u32 %v1140_v26, %v1139_v27  ;;  %v1144_v36 = vrot.slane %v1139_v27, 4  ;;  %v8270_v51 = vld [vmem:[#allocation2 + $0x48] sm:$0xfe]   ;;  %v8271_v54 = vld [vmem:[#allocation2 + $0x50] ss:$0 sps:$4 sm:$0x11]  }
  0x89   : > { %v1312_v38 = vsel %vm8837_vm10, %v1134_v31, %v1311_v28  ;;  %v3234_v42 = vsel %vm10513_vm11, %v3232_v33, %v3233_v37  ;;  %v3238_v56 = vrot.slane %v8270_v51, 1  ;;  %v8268_v58 = vld [vmem:[#allocation2 + $0xc] sm:$0xfe]   ;;  %v3239_v17 = vrot.slane %v8271_v54, 1  ;;  %v8274_v63 = vld [vmem:[#allocation2 + $0x60] sm:$0xfe]  }
  0x8a   : > { %v2496_v30 = vsel %vm10520_vm8, %v2491_v47, %v2495_v24  ;;  %v1143_v41 = vsel %vm8831_vm9, %v1135_v32, %v1142_v35  ;;  %1313 = vst [vmem:[#allocation2 + $0xb4] sm:$0xf] %v1312_v38  ;;  %v1315_v44 = vld [vmem:[#allocation2 + $0xbc] sm:$0x1]  ;;  %3276 = vrot.lane.b32.xlu0 %v3234_v42, %s8719_s28  ;;  %v3223_v1 = vrot.slane %v8268_v58, 1  ;;  %v3244_v6 = vrot.slane %v8274_v63, 1 }
  0x8b   : > { %2567 = vrot.lane.b32.xlu1 %v2496_v30, %s8717_s16  ;;  %v8260_v39 = vld [vmem:[#allocation2 + $0x9c] sm:$0xff]   ;;  %1314 = vst.msk [vmem:[#allocation2 + $0xb8] sm:$0xf] %vm10509_vm1, %v1143_v41  ;;  %v1316_v49 = vsel %vm8796_vm5, %v1144_v36, %v1315_v44  ;;  %v8269_v61 = vld [vmem:[#allocation2 + $0x14] ss:$0 sps:$4 sm:$0x11]   ;;  %v3240_v62 = vsel %vm10513_vm11, %v3238_v56, %v3239_v17 }
  0x8c   : > { %v8261_v43 = vld [vmem:[#allocation2 + $0xa4] ss:$0 sps:$4 sm:$0x11]   ;;  %v2510_v45 = vshrl.u32 %v8260_v39, 16  ;;  %v2512_v48 = vshll.u32 %v8260_v39, 16  ;;  %v3224_v8 = vrot.slane %v8269_v61, 1 }
  0x8d   : > { %v2517_v50 = vshll.u32 %v8261_v43, 16  ;;  %1317 = vst [vmem:[#allocation2 + $0xbc] sm:$0x1] %v1316_v49  ;;  %v8275_v5 = vld [vmem:[#allocation2 + $0x68] ss:$0 sps:$4 sm:$0x11]  }
  0x8e   : > { %v2514_v53 = vrot.slane %v2512_v48, 1  ;;  %3280 = vrot.lane.b32.xlu0 %v3240_v62, %s8719_s28  ;;  %v8272_v11 = vld [vmem:[#allocation2 + $0x24] sm:$0xfe]   ;;  %v3245_v12 = vrot.slane %v8275_v5, 1  ;;  %v8276_v19 = vld [vmem:[#allocation2 + $0x3c] sm:$0xfe]   ;;  %v3225_v46 = vsel %vm10513_vm11, %v3223_v1, %v3224_v8 }
  0x8f   : > { %v2519_v55 = vrot.slane %v2517_v50, 1  ;;  %v8273_v15 = vld [vmem:[#allocation2 + $0x2c] ss:$0 sps:$4 sm:$0x11]   ;;  %v8278_v20 = vld [vmem:[#allocation2 + $0x78] sm:$0xfe]  }
  0x90   : > { %v2515_v57 = vor.u32 %v2514_v53, %v2510_v45  ;;  %v3246_v18 = vsel %vm10513_vm11, %v3244_v6, %v3245_v12  ;;  %v8279_v21 = vld [vmem:[#allocation2 + $0x80] ss:$0 sps:$4 sm:$0x11]   ;;  %v4155_v22 = vshll.u32 %v9194_v2, 16  ;;  %v3250_v24 = vrot.slane %v8278_v20, 1  ;;  %v9205_v33 = vld [vmem:[#allocation2 + $0x6c] sm:$0xff]  }
  0x91   : > { %v3229_v25 = vrot.slane %v8272_v11, 1  ;;  %v3230_v26 = vrot.slane %v8273_v15, 1  ;;  %v8277_v47 = vld [vmem:[#allocation2 + $0x44] ss:$0 sps:$4 sm:$0x11]   ;;  %v3251_v34 = vrot.slane %v8279_v21, 1 }
  0x92   : > { %v2520_v59 = vsel %vm10520_vm8, %v2515_v57, %v2519_v55  ;;  %v8264_v60 = vld [vmem:[#allocation2 + $0xb4] sm:$0xff]   ;;  %3284 = vrot.lane.b32.xlu0 %v3246_v18, %s8719_s28  ;;  %v4153_v29 = vshrl.u32 %v9194_v2, 16  ;;  %v4157_v30 = vrot.slane %v4155_v22, 1  ;;  %v3235_v31 = vrot.slane %v8276_v19, 1  ;;  %v8284_v42 = vld [vmem:[#allocation2 + $0x6c] sm:$0xfe]  }
  0x93   : > { %2571 = vrot.lane.b32.xlu1 %v2520_v59, %s8717_s16  ;;  %v2534_v3 = vshrl.u32 %v8264_v60, 16  ;;  %v2536_v4 = vshll.u32 %v8264_v60, 16  ;;  %v3252_v27 = vsel %vm10513_vm11, %v3250_v24, %v3251_v34  ;;  %v8282_v28 = vld [vmem:[#allocation2 + $0x90] sm:$0xfe]   ;;  %v3236_v35 = vrot.slane %v8277_v47, 1  ;;  %v9214_v51 = vld [vmem:[#allocation2 + $0x18] sm:$0xff]  }
  0x94   : > { %v8265_v0 = vld [vmem:[#allocation2 + $0xbc] ss:$0 sps:$4 sm:$0x11]   ;;  %v8283_v32 = vld [vmem:[#allocation2 + $0x98] ss:$0 sps:$4 sm:$0x11]   ;;  %v3231_v38 = vsel %vm10513_vm11, %v3229_v25, %v3230_v26  ;;  %v4158_v22 = vor.u32 %v4157_v30, %v4153_v29 }
  0x95   : > { %v2541_v7 = vshll.u32 %v8265_v0, 16  ;;  %v2538_v9 = vrot.slane %v2536_v4, 1  ;;  %v8280_v36 = vld [vmem:[#allocation2 + $0x54] sm:$0xfe]   ;;  %v3256_v37 = vrot.slane %v8282_v28, 1  ;;  %v3257_v41 = vrot.slane %v8283_v32, 1 }
  0x96   : > { %3288 = vrot.lane.b32.xlu0 %v3252_v27, %s8719_s28  ;;  %v8281_v39 = vld [vmem:[#allocation2 + $0x5c] ss:$0 sps:$4 sm:$0x11]   ;;  %v8285_v44 = vld [vmem:[#allocation2 + $0x74] ss:$0 sps:$4 sm:$0x11]   ;;  %v3237_v50 = vsel %vm10513_vm11, %v3235_v31, %v3236_v35 }
  0x97   : > { %v2543_v13 = vrot.slane %v2541_v7, 1  ;;  %v2539_v16 = vor.u32 %v2538_v9, %v2534_v3  ;;  %v3258_v43 = vsel %vm10513_vm11, %v3256_v37, %v3257_v41  ;;  %v8286_v45 = vld [vmem:[#allocation2 + $0xa8] sm:$0xfe]   ;;  %v8287_v48 = vld [vmem:[#allocation2 + $0xb0] ss:$0 sps:$4 sm:$0x11]  }
  0x98   : > { %v4249_v49 = vshrl.u32 %v9205_v33, 16  ;;  %v3241_v53 = vrot.slane %v8280_v36, 1  ;;  %v3242_v54 = vrot.slane %v8281_v39, 1  ;;  %v3262_v55 = vrot.slane %v8286_v45, 1  ;;  %v8288_v59 = vld [vmem:[#allocation2 + $0x84] sm:$0xfe]   ;;  %v2112_v39 = vpop.permute.xlu0 %2111 }
  0x99   : > { %v2544_v23 = vsel %vm10520_vm8, %v2539_v16, %v2543_v13  ;;  %v3263_v56 = vrot.slane %v8287_v48, 1  ;;  %v8289_v57 = vld [vmem:[#allocation2 + $0x8c] ss:$0 sps:$4 sm:$0x11]   ;;  %v4251_v58 = vshll.u32 %v9205_v33, 16  ;;  %v3247_v61 = vrot.slane %v8284_v42, 1 }
  0x9a   : > { %2575 = vrot.lane.b32.xlu1 %v2544_v23, %s8717_s16  ;;  %3292 = vrot.lane.b32.xlu0 %v3258_v43, %s8719_s28  ;;  %v8290_v60 = vld [vmem:[#allocation3] sm:$0xfe]   ;;  %v8291_v62 = vld [vmem:[#allocation3 + $0x8] ss:$0 sps:$4 sm:$0x11]   ;;  %v3243_v63 = vsel %vm10513_vm11, %v3241_v53, %v3242_v54  ;;  %v3248_v0 = vrot.slane %v8285_v44, 1 }
  0x9b   : > { %v3264_v17 = vsel %vm10513_vm11, %v3262_v55, %v3263_v56  ;;  %v3509_v1 = vrot.slane %v8290_v60, 1  ;;  %v3510_v2 = vrot.slane %v8291_v62, 1  ;;  %v8292_v3 = vld [vmem:[#allocation2 + $0x9c] sm:$0xfe]   ;;  %v4253_v4 = vrot.slane %v4251_v58, 1  ;;  %v8294_v7 = vld [vmem:[#allocation2 + $0xc] sm:$0xff]  }
  0x9c   : > { %v5953_v5 = vshrl.u32 %v9214_v51, 16  ;;  %v5955_v6 = vshll.u32 %v9214_v51, 16  ;;  %v3253_v8 = vrot.slane %v8288_v59, 1  ;;  %v3254_v9 = vrot.slane %v8289_v57, 1  ;;  %s8720_s16 = smov 20   ;;  %v8312_v26 = vld [vmem:[#allocation2 + $0x18] sm:$0xff]   ;;  %v2546_v57 = vpop.permute.xlu0 %2545 }
  0x9d   : > { %v3511_v11 = vsel %vm10513_vm11, %v3509_v1, %v3510_v2  ;;  %v3249_v12 = vsel %vm10513_vm11, %v3247_v61, %v3248_v0  ;;  %v8293_v13 = vld [vmem:[#allocation2 + $0xa4] ss:$0 sps:$4 sm:$0x11]   ;;  %v3259_v15 = vrot.slane %v8292_v3, 1  ;;  %v8295_v16 = vld [vmem:[#allocation2 + $0xb4] sm:$0xfe]   ;;  %v4254_v53 = vor.u32 %v4253_v4, %v4249_v49 }
  0x9e   : > { %3270 = vrot.lane.b32.xlu1 %v3225_v46, %s8719_s28  ;;  %3296 = vrot.lane.b32.xlu0 %v3264_v17, %s8719_s28  ;;  %v8296_v18 = vld [vmem:[#allocation2 + $0xbc] ss:$0 sps:$4 sm:$0x11]   ;;  %v8298_v19 = vld [vmem:[#allocation2 + $0x14] ss:$0 sps:$4 sm:$0x11]   ;;  %v3255_v20 = vsel %vm10513_vm11, %v3253_v8, %v3254_v9 }
  0x9f   : > { %v3260_v21 = vrot.slane %v8293_v13, 1  ;;  %v4160_v23 = vshll.u32 %v8298_v19, 16  ;;  %v8300_v24 = vld [vmem:[#allocation2 + $0xc] sm:$0xfe]   ;;  %v3265_v47 = vrot.slane %v8295_v16, 1  ;;  %v3266_v31 = vrot.slane %v8296_v18, 1 }
  0xa0   : > { %v8301_v25 = vld [vmem:[#allocation2 + $0x14] ss:$0 sps:$4 sm:$0x11]   ;;  %v5018_v46 = vrot.slane %v8300_v24, 1  ;;  %v5957_v36 = vrot.slane %v5955_v6, 1  ;;  %v4167_v37 = vshll.u32 %v8312_v26, 16 }
  0xa1   : > { %v4162_v34 = vrot.slane %v4160_v23, 1  ;;  %v5019_v27 = vrot.slane %v8301_v25, 1  ;;  %v3261_v28 = vsel %vm10513_vm11, %v3259_v15, %v3260_v21  ;;  %v8303_v35 = vld [vmem:[#allocation2 + $0x74] ss:$0 sps:$4 sm:$0x11]   ;;  %v3267_v41 = vsel %vm10513_vm11, %v3265_v47, %v3266_v31  ;;  %v8299_v43 = vld [vmem:[#allocation2 + $0x6c] sm:$0xff]  }
  0xa2   : > { %3274 = vrot.lane.b32.xlu1 %v3231_v38, %s8719_s28  ;;  %3557 = vrot.lane.b32.xlu0 %v3511_v11, %s8720_s16  ;;  %v4256_v30 = vshll.u32 %v8303_v35, 16  ;;  %v8304_v38 = vld [vmem:[#allocation2 + $0x18] sm:$0xff]   ;;  %vm10510_vm13 = vcmask 64544   ;;  %v8305_v44 = vld [vmem:[#allocation2 + $0x6c] sm:$0xfe]   ;;  %v5958_v56 = vor.u32 %v5957_v36, %v5953_v5  ;;  %v4165_v17 = vshrl.u32 %v8312_v26, 16 }
  0xa3   : > { %v4163_v32 = vsel %vm10520_vm8, %v4158_v22, %v4162_v34  ;;  %v5020_v29 = vsel %vm10513_vm11, %v5018_v46, %v5019_v27  ;;  %v8306_v45 = vld [vmem:[#allocation2 + $0x74] ss:$0 sps:$4 sm:$0x11]   ;;  %v8310_v48 = vld [vmem:[#allocation2 + $0x20] ss:$0 sps:$4 sm:$0x11]  }
  0xa4   : > { %v4258_v42 = vrot.slane %v4256_v30, 1  ;;  %v8307_v51 = vld [vmem:[#allocation2 + $0x18] sm:$0xff]   ;;  %v5960_v54 = vshll.u32 %v8310_v48, 16  ;;  %v8313_v55 = vld [vmem:[#allocation2 + $0x20] ss:$0 sps:$4 sm:$0x11]  }
  0xa5   : > { %v4169_v59 = vrot.slane %v4167_v37, 1  ;;  %v4172_v60 = vshll.u32 %v8313_v55, 16  ;;  %v8314_v61 = vld [vmem:[#allocation2 + $0x78] sm:$0xff]   ;;  %v5042_v49 = vrot.slane %v8305_v44, 1  ;;  %v5043_v62 = vrot.slane %v8306_v45, 1  ;;  %v8330_v24 = vld [vmem:[#allocation2 + $0x24] sm:$0xff]  }
  0xa6   : > { %3278 = vrot.lane.b32.xlu1 %v3237_v50, %s8719_s28  ;;  %3734 = vrot.lane.b32.xlu0 %v8294_v7, %s8721_s30  ;;  %v8327_v50 = vld [vmem:[#allocation2] sm:$0xff]   ;;  %v5962_v58 = vrot.slane %v5960_v54, 1  ;;  %v4259_v33 = vsel %vm10520_vm8, %v4254_v53, %v4258_v42  ;;  %v6051_v5 = vshll.u32 %v8314_v61, 16  ;;  %v8318_v6 = vld [vmem:[#allocation2 + $0x78] sm:$0xff]   ;;  %vm10511_vm14 = vcmask 97344   ;;  %s8726_s11 = smov 64  }
  0xa7   : > { %1983 = vst.msk [vmem:[#allocation4] sm:$0xff] %vm10512_vm12, %v8327_v50  ;;  %v8317_v0 = vld [vmem:[#allocation2 + $0x20] ss:$0 sps:$4 sm:$0x11]   ;;  %v4170_v2 = vor.u32 %v4169_v59, %v4165_v17  ;;  %v4174_v3 = vrot.slane %v4172_v60, 1  ;;  %v5044_v9 = vsel %vm10513_vm11, %v5042_v49, %v5043_v62  ;;  %v8308_v18 = vld [vmem:[#allocation2 + $0x78] sm:$0xff]  }
  0xa8   : > { %2160 = vst.msk [vmem:[#allocation4] sm:$0xff] %vm10510_vm13, %v2112_v39  ;;  %v5963_v1 = vsel %vm10520_vm8, %v5958_v56, %v5962_v58  ;;  %v8315_v4 = vld [vmem:[#allocation2 + $0x80] ss:$0 sps:$4 sm:$0x11]   ;;  %v9249_v8 = vpop.permute.xlu0 %2549  ;;  %v8320_v13 = vld [vmem:[#allocation2 + $0x18] sm:$0xfe]  }
  0xa9   : > { %v8319_v7 = vld [vmem:[#allocation2 + $0x80] ss:$0 sps:$4 sm:$0x11]   ;;  %v4175_v15 = vsel %vm10520_vm8, %v4170_v2, %v4174_v3  ;;  %v6049_v19 = vshrl.u32 %v8314_v61, 16  ;;  %v4263_v21 = vshll.u32 %v8318_v6, 16  ;;  %2594 = vst.msk [vmem:[#allocation4] sm:$0xff] %vm10511_vm14, %v2546_v57 }
  0xaa   : > { %3282 = vrot.lane.b32.xlu1 %v3243_v63, %s8719_s28  ;;  %4344 = vrot.lane.b32.xlu0 %v4163_v32, %s8722_s6  ;;  %v8316_v63 = vld [vmem:[#allocation2 + $0x18] sm:$0xfe]   ;;  %v8321_v16 = vld [vmem:[#allocation2 + $0x20] ss:$0 sps:$4 sm:$0x11]   ;;  %v6056_v22 = vshll.u32 %v8315_v4, 16 }
  0xab   : > { %v6818_v11 = vrot.slane %v8316_v63, 1  ;;  %v4268_v23 = vshll.u32 %v8319_v7, 16  ;;  %v5021_v47 = vrot.slane %v8320_v13, 1  ;;  %v5022_v34 = vrot.slane %v8321_v16, 1  ;;  %v8311_v46 = vld [vmem:[#allocation2 + $0x78] sm:$0xff]   ;;  %v8333_v36 = vld [vmem:[#allocation2 + $0x24] sm:$0xff]  }
  0xac   : > { %v9257_v25 = vpop.permute.xlu0 %2553  ;;  %v4261_v27 = vshrl.u32 %v8318_v6, 16  ;;  %v6058_v32 = vrot.slane %v6056_v22, 1  ;;  %v5967_v30 = vshll.u32 %v8330_v24, 16  ;;  %v8324_v39 = vld [vmem:[#allocation2 + $0x24] sm:$0xff]   ;;  %v5965_v42 = vshrl.u32 %v8330_v24, 16  ;;  %s8727_s17 = smov 28  }
  0xad   : > { %v4270_v35 = vrot.slane %v4268_v23, 1  ;;  %v5023_v37 = vsel %vm10513_vm11, %v5021_v47, %v5022_v34  ;;  %v8334_v50 = vld [vmem:[#allocation2 + $0x2c] ss:$0 sps:$4 sm:$0x11]   ;;  %v4179_v53 = vshll.u32 %v8333_v36, 16  ;;  %v8335_v55 = vld [vmem:[#allocation2 + $0x84] sm:$0xff]  }
  0xae   : > { %3286 = vrot.lane.b32.xlu1 %v3249_v12, %s8719_s28  ;;  %5066 = vrot.lane.b32.xlu0 %v5020_v29, %s8723_s8  ;;  %v6819_v12 = vrot.slane %v8317_v0, 1  ;;  %v8322_v29 = vld [vmem:[#allocation2 + $0x78] sm:$0xfe]   ;;  %v5969_v48 = vrot.slane %v5967_v30, 1  ;;  %v8328_v59 = vld [vmem:[#allocation2 + $0x24] sm:$0xff]   ;;  %v4177_v49 = vshrl.u32 %v8333_v36, 16 }
  0xaf   : > { %v6842_v54 = vrot.slane %v8322_v29, 1  ;;  %v8325_v58 = vld [vmem:[#allocation2 + $0x78] sm:$0xfe]   ;;  %v8326_v17 = vld [vmem:[#allocation2 + $0x80] ss:$0 sps:$4 sm:$0x11]  }
  0xb0   : > { %v6820_v26 = vsel %vm10513_vm11, %v6818_v11, %v6819_v12  ;;  %v5970_v60 = vor.u32 %v5969_v48, %v5965_v42  ;;  %v4181_v62 = vrot.slane %v4179_v53, 1  ;;  %v4184_v63 = vshll.u32 %v8334_v50, 16  ;;  %v8337_v4 = vld [vmem:[#allocation2 + $0x24] sm:$0xfe]   ;;  %s8728_s20 = smov 44   ;;  %s8729_s21 = smov 52  }
  0xb1   : > { %v6063_v0 = vshll.u32 %v8335_v55, 16  ;;  %v5045_v2 = vrot.slane %v8325_v58, 1  ;;  %v5046_v3 = vrot.slane %v8326_v17, 1  ;;  %v8336_v11 = vld [vmem:[#allocation2 + $0x8c] ss:$0 sps:$4 sm:$0x11]  }
  0xb2   : > { %3290 = vrot.lane.b32.xlu1 %v3255_v20, %s8719_s28  ;;  %5533 = vrot.lane.b32.xlu0 %v8304_v38, %s8724_s9  ;;  %v6053_v20 = vrot.slane %v6051_v5, 1  ;;  %v8323_v38 = vld [vmem:[#allocation2 + $0x80] ss:$0 sps:$4 sm:$0x11]   ;;  %v4182_v7 = vor.u32 %v4181_v62, %v4177_v49  ;;  %v6061_v12 = vshrl.u32 %v8335_v55, 16  ;;  %v6068_v47 = vshll.u32 %v8336_v11, 16 }
  0xb3   : > { %v6843_v57 = vrot.slane %v8323_v38, 1  ;;  %v8338_v5 = vld [vmem:[#allocation2 + $0x2c] ss:$0 sps:$4 sm:$0x11]   ;;  %v6065_v13 = vrot.slane %v6063_v0, 1  ;;  %v8353_v55 = vld [vmem:[#allocation2 + $0x30] sm:$0xff]  }
  0xb4   : > { %v6054_v31 = vor.u32 %v6053_v20, %v6049_v19  ;;  %v8341_v19 = vld [vmem:[#allocation2 + $0x24] sm:$0xfe]   ;;  %v8342_v22 = vld [vmem:[#allocation2 + $0x2c] ss:$0 sps:$4 sm:$0x11]   ;;  %v6822_v24 = vrot.slane %v8338_v5, 1 }
  0xb5   : > { %v8329_v20 = vld [vmem:[#allocation2 + $0x84] sm:$0xff]   ;;  %v6066_v30 = vor.u32 %v6065_v13, %v6061_v12  ;;  %v6070_v36 = vrot.slane %v6068_v47, 1  ;;  %v8344_v53 = vld [vmem:[#allocation2 + $0x8c] ss:$0 sps:$4 sm:$0x11]   ;;  %v8345_v58 = vld [vmem:[#allocation2 + $0x30] sm:$0xff]  }
  0xb6   : > { %3294 = vrot.lane.b32.xlu1 %v3261_v28, %s8719_s28  ;;  %3736 = vrot.lane.b32.xlu0 %v8307_v51, %s8721_s30  ;;  %v4265_v28 = vrot.slane %v4263_v21, 1  ;;  %v6059_v44 = vsel %vm10520_vm8, %v6054_v31, %v6058_v32  ;;  %v6821_v21 = vrot.slane %v8337_v4, 1  ;;  %v5025_v31 = vrot.slane %v8342_v22, 1  ;;  %v8346_v11 = vld [vmem:[#allocation2 + $0x84] sm:$0xfe]   ;;  %v8348_v13 = vld [vmem:[#allocation2 + $0x30] sm:$0xff]  }
  0xb7   : > { %v4191_v4 = vshll.u32 %v8353_v55, 16  ;;  %v8347_v12 = vld [vmem:[#allocation2 + $0x8c] ss:$0 sps:$4 sm:$0x11]   ;;  %vm10517_vm15 = vcmask 130144   ;;  %vm10518_vm2 = vcmask 162944  }
  0xb8   : > { %v4266_v45 = vor.u32 %v4265_v28, %v4261_v27  ;;  %v5024_v28 = vrot.slane %v8341_v19, 1  ;;  %v6823_v29 = vsel %vm10513_vm11, %v6821_v21, %v6822_v24  ;;  %v9311_v19 = vld [vmem:[#allocation2 + $0x90] sm:$0xff]   ;;  %vm10507_vm3 = vcmask 228544   ;;  %s8730_s22 = smov 36   ;;  %s8731_s23 = smov 68  }
  0xb9   : > { %v4193_v22 = vrot.slane %v4191_v4, 1  ;;  %s8732_s24 = smov 60   ;;  %vm10506_vm4 = vcmask 261344   ;;  %vm10514_vm6 = vcmask 294144   ;;  %s8022_s25 = sshll.u32 %s10809_s19, 2 }
  0xba   : > { %3298 = vrot.lane.b32.xlu1 %v3267_v41, %s8719_s28  ;;  %6144 = vrot.lane.b32.xlu0 %v5963_v1, %s8725_s10  ;;  %v8331_v41 = vld [vmem:[#allocation2 + $0x2c] ss:$0 sps:$4 sm:$0x11]   ;;  %v4271_v56 = vsel %vm10520_vm8, %v4266_v45, %v4270_v35  ;;  %v6844_v1 = vsel %vm10513_vm11, %v6842_v54, %v6843_v57  ;;  %v8350_v35 = vld [vmem:[#allocation2 + $0x30] sm:$0xff]   ;;  %v8343_v45 = vld [vmem:[#allocation2 + $0x84] sm:$0xfe]   ;;  %s251_s28 = scalar_lea.vmem %s10504_s4, %s8022_s25 }
  0xbb   : > { %v5972_v51 = vshll.u32 %v8331_v41, 16  ;;  %v9289_v38 = vpop.permute.xlu1 %2547  ;;  %v5979_v50 = vshll.u32 %v8350_v35, 16  ;;  %v8351_v54 = vld [vmem:[#allocation2 + $0x38] ss:$0 sps:$4 sm:$0x11]   ;;  %v5977_v49 = vshrl.u32 %v8350_v35, 16 }
  0xbc   : > { %v6845_v5 = vrot.slane %v8343_v45, 1  ;;  %v8359_v35 = vld [vmem:[#allocation2 + $0x90] sm:$0xff]  }
  0xbe   : > { %3750 = vrot.lane.b32.xlu1 %v8299_v43, %s8721_s30  ;;  %4346 = vrot.lane.b32.xlu0 %v4175_v15, %s8722_s6  ;;  %v9264_v43 = vpop.permute.xlu0 %2557  ;;  %v8339_v15 = vld [vmem:[#allocation2 + $0x84] sm:$0xff]  }
  0xbf   : > { %10530 = vst [vmem:[#allocation5_spill] sm:$0xff] %v9264_v43  ;;  %v4275_v34 = vshll.u32 %v8339_v15, 16  ;;  %v4273_v27 = vshrl.u32 %v8339_v15, 16 }
  0xc2   : > { %4360 = vrot.lane.b32.xlu1 %v4259_v33, %s8722_s6  ;;  %6866 = vrot.lane.b32.xlu0 %v6820_v26, %s8726_s11  ;;  %v5974_v33 = vrot.slane %v5972_v51, 1  ;;  %v8340_v26 = vld [vmem:[#allocation2 + $0x8c] ss:$0 sps:$4 sm:$0x11]   ;;  %v5026_v51 = vsel %vm10513_vm11, %v5024_v28, %v5025_v31  ;;  %v5048_v28 = vrot.slane %v8346_v11, 1  ;;  %v5049_v31 = vrot.slane %v8347_v12, 1 }
  0xc3   : > { %v9271_v61 = vpop.permute.xlu0 %2561  ;;  %v4280_v41 = vshll.u32 %v8340_v26, 16  ;;  %v757_v26 = vld [vmem:[#allocation3 + $0x24] sm:$0x1]  ;;  %v8363_v11 = vld [vmem:[#allocation2 + $0x90] sm:$0xfe]  }
  0xc4   : > { %10531 = vst [vmem:[#allocation6_spill] sm:$0xff] %v9271_v61  ;;  %v5975_v6 = vsel %vm10520_vm8, %v5970_v60, %v5974_v33  ;;  %v754_v60 = vld [vmem:[#allocation3 + $0x18] sm:$0x1]  ;;  %v5050_v45 = vsel %vm10513_vm11, %v5048_v28, %v5049_v31  ;;  %v8364_v12 = vld [vmem:[#allocation2 + $0x98] ss:$0 sps:$4 sm:$0x11]  }
  0xc5   : > { %v4282_v33 = vrot.slane %v4280_v41, 1  ;;  %v8358_v41 = vld [vmem:[#allocation2 + $0x38] ss:$0 sps:$4 sm:$0x11]   ;;  %v6849_v31 = vrot.slane %v8364_v12, 1 }
  0xc6   : > { %5082 = vrot.lane.b32.xlu1 %v5044_v9, %s8723_s8  ;;  %5068 = vrot.lane.b32.xlu0 %v5023_v37, %s8723_s8  ;;  %v4186_v9 = vrot.slane %v4184_v63, 1  ;;  %v4277_v37 = vrot.slane %v4275_v34, 1  ;;  %v755_v63 = vsel %vm8796_vm5, 0, %v754_v60  ;;  %v758_v34 = vsel %vm8796_vm5, 0, %v757_v26 }
  0xc7   : > { %756 = vst [vmem:[#allocation3 + $0x18] sm:$0x1] %v755_v63  ;;  %759 = vst [vmem:[#allocation3 + $0x24] sm:$0x1] %v758_v34  ;;  %v6073_v60 = vshrl.u32 %v9311_v19, 16  ;;  %v6848_v34 = vrot.slane %v8363_v11, 1 }
  0xc8   : > { %v4187_v23 = vsel %vm10520_vm8, %v4182_v7, %v4186_v9  ;;  %v4278_v57 = vor.u32 %v4277_v37, %v4273_v27  ;;  %v6846_v9 = vrot.slane %v8344_v53, 1  ;;  %v8349_v53 = vld [vmem:[#allocation2 + $0x90] sm:$0xff]  }
  0xc9   : > { %v8361_v63 = vld [vmem:[#allocation2 + $0x30] sm:$0xfe]  }
  0xca   : > { %5549 = vrot.lane.b32.xlu1 %v8308_v18, %s8724_s9  ;;  %5535 = vrot.lane.b32.xlu0 %v8324_v39, %s8724_s9  ;;  %v5047_v18 = vsel %vm10513_vm11, %v5045_v2, %v5046_v3  ;;  %v805_v39 = vld [vmem:[#allocation3 + $0x14] sm:$0x1]  ;;  %v9306_v0 = vpop.permute.xlu1 %2551  ;;  %v5984_v2 = vshll.u32 %v8351_v54, 16  ;;  %v8354_v3 = vld [vmem:[#allocation2 + $0x38] ss:$0 sps:$4 sm:$0x11]   ;;  %v4283_v7 = vsel %vm10520_vm8, %v4278_v57, %v4282_v33  ;;  %v6847_v27 = vsel %vm10513_vm11, %v6845_v5, %v6846_v9 }
  0xcb   : > { %v806_v42 = vsel %vm8809_vm7, 0, %v805_v39  ;;  %v5027_v5 = vrot.slane %v8361_v63, 1 }
  0xcc   : > { %807 = vst [vmem:[#allocation3 + $0x14] sm:$0x1] %v806_v42  ;;  %v5986_v21 = vrot.slane %v5984_v2, 1  ;;  %v6075_v42 = vshll.u32 %v9311_v19, 16 }
  0xcd   : > { %v8362_v2 = vld [vmem:[#allocation2 + $0x38] ss:$0 sps:$4 sm:$0x11]  }
  0xce   : > { %3752 = vrot.lane.b32.xlu1 %v8311_v46, %s8721_s30  ;;  %3738 = vrot.lane.b32.xlu0 %v8328_v59, %s8721_s30  ;;  %v8332_v46 = vld [vmem:[#allocation2 + $0x84] sm:$0xff]   ;;  %v808_v59 = vld [vmem:[#allocation3 + $0x20] sm:$0x1]  ;;  %v6077_v33 = vrot.slane %v6075_v42, 1  ;;  %v5028_v9 = vrot.slane %v8362_v2, 1 }
  0xcf   : > { %v9278_v16 = vpop.permute.xlu0 %2565  ;;  %v809_v62 = vsel %vm8809_vm7, 0, %v808_v59  ;;  %v6825_v59 = vrot.slane %v8358_v41, 1 }
  0xd0   : > { %10532 = vst [vmem:[#allocation7_spill] sm:$0xff] %v9278_v16  ;;  %810 = vst [vmem:[#allocation3 + $0x20] sm:$0x1] %v809_v62  ;;  %v4285_v62 = vshrl.u32 %v8359_v35, 16  ;;  %v6078_v19 = vor.u32 %v6077_v33, %v6073_v60  ;;  %v5029_v26 = vsel %vm10513_vm11, %v5027_v5, %v5028_v9  ;;  %v287_v5 = vld [vmem:[%s10502_s2 + $0xf0] sm:$0xff] }
  0xd1   : > { %8174 = vmatprep.mubr.msk.f32.mxu0 %vm297_vm0, %v287_v5 }
  0xd2   : > { %6160 = vrot.lane.b32.xlu1 %v6059_v44, %s8725_s10  ;;  %6146 = vrot.lane.b32.xlu0 %v5975_v6, %s8725_s10  ;;  %v751_v44 = vld [vmem:[#allocation3 + $0xc] sm:$0x1] }
  0xd3   : > { %v752_v48 = vsel %vm8796_vm5, 0, %v751_v44  ;;  %v8360_v44 = vld [vmem:[#allocation2 + $0x98] ss:$0 sps:$4 sm:$0x11]  }
  0xd4   : > { %753 = vst [vmem:[#allocation3 + $0xc] sm:$0x1] %v752_v48  ;;  %v4287_v48 = vshll.u32 %v8359_v35, 16  ;;  %v4292_v4 = vshll.u32 %v8360_v44, 16  ;;  %v8366_v35 = vld [vmem:[#allocation2 + $0x90] sm:$0xfe]  }
  0xd5   : > { %v8365_v44 = vld [vmem:[#allocation2 + $0x3c] sm:$0xff]  }
  0xd6   : > { %4362 = vrot.lane.b32.xlu1 %v4271_v56, %s8722_s6  ;;  %4348 = vrot.lane.b32.xlu0 %v4187_v23, %s8722_s6  ;;  %v6071_v56 = vsel %vm10520_vm8, %v6066_v30, %v6070_v36  ;;  %v4196_v23 = vshll.u32 %v8354_v3, 16  ;;  %v8357_v30 = vld [vmem:[#allocation2 + $0x30] sm:$0xfe]  }
  0xd7   : > { %v8352_v3 = vld [vmem:[#allocation2 + $0x90] sm:$0xff]  }
  0xd8   : > { %v9317_v47 = vpop.permute.xlu1 %2555  ;;  %v4198_v39 = vrot.slane %v4196_v23, 1 }
  0xda   : > { %6882 = vrot.lane.b32.xlu1 %v6844_v1, %s8726_s11  ;;  %6868 = vrot.lane.b32.xlu0 %v6823_v29, %s8726_s11  ;;  %v5981_v1 = vrot.slane %v5979_v50, 1  ;;  %v8356_v29 = vld [vmem:[#allocation2 + $0x98] ss:$0 sps:$4 sm:$0x11]   ;;  %v814_v50 = vld [vmem:[#allocation3 + $0x38] sm:$0x1] }
  0xdb   : > { %v1742_v11 = vld [vmem:[#allocation3 + $0xc] sm:$0xf] }
  0xdc   : > { %v5982_v15 = vor.u32 %v5981_v1, %v5977_v49  ;;  %v6080_v49 = vshll.u32 %v8356_v29, 16  ;;  %v4289_v1 = vrot.slane %v4287_v48, 1 }
  0xde   : > { %5084 = vrot.lane.b32.xlu1 %v5047_v18, %s8723_s8  ;;  %5070 = vrot.lane.b32.xlu0 %v5026_v51, %s8723_s8  ;;  %v4189_v18 = vshrl.u32 %v8353_v55, 16  ;;  %v5987_v36 = vsel %vm10520_vm8, %v5982_v15, %v5986_v21  ;;  %v760_v51 = vld [vmem:[#allocation3 + $0x30] sm:$0x1]  ;;  %v815_v55 = vsel %vm8809_vm7, 0, %v814_v50  ;;  %v817_v15 = vld [vmem:[#allocation3 + $0x44] sm:$0x1]  ;;  %v4290_v28 = vor.u32 %v4289_v1, %v4285_v62 }
  0xdf   : > { %v9285_v32 = vpop.permute.xlu0 %2569  ;;  %816 = vst [vmem:[#allocation3 + $0x38] sm:$0x1] %v815_v55  ;;  %v818_v21 = vsel %vm8809_vm7, 0, %v817_v15  ;;  %v766_v50 = vld [vmem:[#allocation3 + $0x48] sm:$0x1]  ;;  %v6850_v62 = vsel %vm10513_vm11, %v6848_v34, %v6849_v31 }
  0xe0   : > { %10533 = vst [vmem:[#allocation8_spill] sm:$0xff] %v9285_v32  ;;  %v4194_v37 = vor.u32 %v4193_v22, %v4189_v18  ;;  %v763_v18 = vld [vmem:[#allocation3 + $0x3c] sm:$0x1]  ;;  %v4294_v22 = vrot.slane %v4292_v4, 1  ;;  %819 = vst [vmem:[#allocation3 + $0x44] sm:$0x1] %v818_v21 }
  0xe1   : > { %v764_v23 = vsel %vm8796_vm5, 0, %v763_v18  ;;  %v823_v4 = vld [vmem:[#allocation3 + $0x5c] sm:$0x1] }
  0xe2   : > { %5551 = vrot.lane.b32.xlu1 %v8329_v20, %s8724_s9  ;;  %5537 = vrot.lane.b32.xlu0 %v8345_v58, %s8724_s9  ;;  %v811_v20 = vld [vmem:[#allocation3 + $0x2c] sm:$0x1]  ;;  %v4199_v57 = vsel %vm10520_vm8, %v4194_v37, %v4198_v39  ;;  %v6824_v58 = vrot.slane %v8357_v30, 1  ;;  %765 = vst [vmem:[#allocation3 + $0x3c] sm:$0x1] %v764_v23  ;;  %v824_v31 = vsel %vm8809_vm7, 0, %v823_v4 }
  0xe3   : > { %v812_v24 = vsel %vm8809_vm7, 0, %v811_v20  ;;  %v6082_v20 = vrot.slane %v6080_v49, 1  ;;  %v8367_v37 = vld [vmem:[#allocation2 + $0x98] ss:$0 sps:$4 sm:$0x11]   ;;  %v4295_v49 = vsel %vm10520_vm8, %v4290_v28, %v4294_v22 }
  0xe4   : > { %813 = vst [vmem:[#allocation3 + $0x2c] sm:$0x1] %v812_v24  ;;  %v820_v39 = vld [vmem:[#allocation3 + $0x50] sm:$0x1]  ;;  %825 = vst [vmem:[#allocation3 + $0x5c] sm:$0x1] %v824_v31 }
  0xe5   : > { %v821_v48 = vsel %vm8809_vm7, 0, %v820_v39 }
  0xe6   : > { %3754 = vrot.lane.b32.xlu1 %v8332_v46, %s8721_s30  ;;  %3740 = vrot.lane.b32.xlu0 %v8348_v13, %s8721_s30  ;;  %v9328_v54 = vpop.permute.xlu1 %2559  ;;  %822 = vst [vmem:[#allocation3 + $0x50] sm:$0x1] %v821_v48  ;;  %v1749_v48 = vld [vmem:[#allocation3 + $0x18] sm:$0xf] }
  0xea   : > { %6162 = vrot.lane.b32.xlu1 %v6071_v56, %s8725_s10  ;;  %6148 = vrot.lane.b32.xlu0 %v5987_v36, %s8725_s10  ;;  %v761_v56 = vsel %vm8796_vm5, 0, %v760_v51  ;;  %v6083_v36 = vsel %vm10520_vm8, %v6078_v19, %v6082_v20  ;;  %v288_v19 = vld [vmem:[%s10502_s2 + $0xf8] sm:$0xff] }
  0xeb   : > { %v9299_v17 = vpop.permute.xlu0 %2573  ;;  %762 = vst [vmem:[#allocation3 + $0x30] sm:$0x1] %v761_v56  ;;  %8175 = vmatmul.mubr.msk.f32.gmra.mrb[30].mxu0 %vm297_vm0, %v288_v19  ;;  %v1760_v5 = vld [vmem:[#allocation3 + $0x2c] sm:$0x1]  ;;  %vm10508_vm0 = vcmask 195744  }
  0xec   : > { %10534 = vst [vmem:[#allocation9_spill] sm:$0xff] %v9299_v17 }
  0xee   : > { %4364 = vrot.lane.b32.xlu1 %v4283_v7, %s8722_s6  ;;  %4350 = vrot.lane.b32.xlu0 %v4199_v57, %s8722_s6  ;;  %v6826_v7 = vsel %vm10513_vm11, %v6824_v58, %v6825_v59  ;;  %v5052_v57 = vrot.slane %v8367_v37, 1  ;;  %v767_v58 = vsel %vm8796_vm5, 0, %v766_v50 }
  0xef   : > { %v2979_v6 = vpop.permute.xlu0 %2978  ;;  %768 = vst [vmem:[#allocation3 + $0x48] sm:$0x1] %v767_v58 }
  0xf0   : > { %3027 = vst.msk [vmem:[#allocation4] sm:$0xff] %vm10517_vm15, %v2979_v6 }
  0xf2   : > { %6884 = vrot.lane.b32.xlu1 %v6847_v27, %s8726_s11  ;;  %6870 = vrot.lane.b32.xlu0 %v6826_v7, %s8726_s11 }
  0xf3   : > { %v3269_v46 = vpop.permute.xlu0 %3268  ;;  %v9343_v13 = vpop.permute.xlu1 %2563 }
  0xf4   : > { %3317 = vst.msk [vmem:[#allocation4] sm:$0xff] %vm10518_vm2, %v3269_v46 }
  0xf6   : > { %5086 = vrot.lane.b32.xlu1 %v5050_v45, %s8723_s8  ;;  %5072 = vrot.lane.b32.xlu0 %v5029_v26, %s8723_s8  ;;  %v5051_v45 = vrot.slane %v8366_v35, 1 }
  0xf7   : > { %v9339_v6 = vpop.permute.xlu0 %3272 }
  0xf8   : > { %v8131_v24 = vpop.f32.mrb[0].mxu0 }
  0xf9   : > { %v8024_v46 = vpack.c.bf16 %v8131_v24, %v8131_v24  ;;  %v460_v27 = vpop.f32.mrb[1].mxu0 }
  0xfa   : > { %5553 = vrot.lane.b32.xlu1 %v8349_v53, %s8724_s9  ;;  %v8023_v30 = vpack.c.bf16 %v460_v27, %v460_v27  ;;  %v1746_v53 = vld [vmem:[#allocation3 + $0x14] sm:$0x1]  ;;  %5539 = vrot.lane.b32.xlu0 %v8365_v44, %s8724_s9 }
  0xfb   : > { %v1430_v41 = vshrl.u32 %v8024_v46, 16  ;;  %v1433_v51 = vshll.u32 %v8024_v46, 16 }
  0xfc   : > { %v9352_v29 = vpop.permute.xlu0 %3276  ;;  %v1422_v55 = vshrl.u32 %v8023_v30, 16  ;;  %v8134_v56 = vpop.f32.mrb[2].mxu0  ;;  %v1425_v1 = vshll.u32 %v8023_v30, 16 }
  0xfd   : > { %10535 = vst [vmem:[#allocation10_spill] sm:$0xff] %v9352_v29  ;;  %v9355_v42 = vpop.permute.xlu1 %2567  ;;  %v1432_v59 = vrot.slane %v1430_v41, 7  ;;  %v8026_v60 = vpack.c.bf16 %v8134_v56, %v8134_v56  ;;  %v470_v33 = vpop.f32.mrb[3].mxu0  ;;  %v769_v41 = vld [vmem:[#allocation3 + $0x54] sm:$0x1] }
  0xfe   : > { %3756 = vrot.lane.b32.xlu1 %v8352_v3, %s8721_s30  ;;  %v1424_v63 = vrot.slane %v1422_v55, 7  ;;  %v8025_v2 = vpack.c.bf16 %v470_v33, %v470_v33  ;;  %v9366_v3 = vsel %vm10513_vm11, %v5051_v45, %v5052_v57 }
  0xff   : > { %v1435_v7 = vor.u32 %v1433_v51, %v1432_v59  ;;  %v1437_v9 = vrot.slane %v1432_v59, 4  ;;  %v1447_v12 = vshrl.u32 %v8026_v60, 16  ;;  %v1450_v15 = vshll.u32 %v8026_v60, 16 }
 0x100   : > { %v9372_v18 = vpop.permute.xlu0 %3280  ;;  %v1427_v20 = vor.u32 %v1425_v1, %v1424_v63  ;;  %v1428_v21 = vrot.slane %v1424_v63, 4  ;;  %v1439_v22 = vshrl.u32 %v8025_v2, 16  ;;  %v1442_v23 = vshll.u32 %v8025_v2, 16  ;;  %v8137_v24 = vpop.f32.mrb[4].mxu0 }
 0x101   : > { %10536 = vst [vmem:[#allocation11_spill] sm:$0xff] %v9372_v18  ;;  %v1747_v26 = vsel %vm8796_vm5, %v1437_v9, %v1746_v53  ;;  %v1449_v34 = vrot.slane %v1447_v12, 7  ;;  %v8028_v46 = vpack.c.bf16 %v8137_v24, %v8137_v24  ;;  %v480_v27 = vpop.f32.mrb[5].mxu0  ;;  %v770_v63 = vsel %vm8796_vm5, 0, %v769_v41  ;;  %v772_v41 = vld [vmem:[#allocation3 + $0x60] sm:$0x1] }
 0x102   : > { %6164 = vrot.lane.b32.xlu1 %v6083_v36, %s8725_s10  ;;  %1748 = vst [vmem:[#allocation3 + $0x14] sm:$0x1] %v1747_v26  ;;  %v1436_v35 = vsel %vm8831_vm9, %v1428_v21, %v1435_v7  ;;  %v1743_v30 = vsel %vm8837_vm10, %v1427_v20, %v1742_v11  ;;  %v1753_v36 = vld [vmem:[#allocation3 + $0x20] sm:$0x1]  ;;  %v1441_v37 = vrot.slane %v1439_v22, 7  ;;  %v8027_v39 = vpack.c.bf16 %v480_v27, %v480_v27  ;;  %v8369_v22 = vld [vmem:[#allocation2 + $0x9c] sm:$0xff]  }
 0x103   : > { %1744 = vst [vmem:[#allocation3 + $0xc] sm:$0xf] %v1743_v30  ;;  %1745 = vst.msk [vmem:[#allocation3 + $0x10] sm:$0xf] %vm10509_vm1, %v1436_v35  ;;  %v1452_v44 = vor.u32 %v1450_v15, %v1449_v34  ;;  %v1454_v45 = vrot.slane %v1449_v34, 4  ;;  %v1464_v50 = vshrl.u32 %v8028_v46, 16 }
 0x104   : > { %v1467_v51 = vshll.u32 %v8028_v46, 16  ;;  %v1444_v53 = vor.u32 %v1442_v23, %v1441_v37  ;;  %v1445_v55 = vrot.slane %v1441_v37, 4  ;;  %v1456_v56 = vshrl.u32 %v8027_v39, 16  ;;  %v8140_v58 = vpop.f32.mrb[6].mxu0  ;;  %v9396_v1 = vpop.permute.xlu0 %3284  ;;  %771 = vst [vmem:[#allocation3 + $0x54] sm:$0x1] %v770_v63 }
 0x105   : > { %v9382_v28 = vpop.permute.xlu1 %2571  ;;  %v1459_v57 = vshll.u32 %v8027_v39, 16  ;;  %v1754_v59 = vsel %vm8796_vm5, %v1454_v45, %v1753_v36  ;;  %v1466_v60 = vrot.slane %v1464_v50, 7  ;;  %v8030_v33 = vpack.c.bf16 %v8140_v58, %v8140_v58  ;;  %10538 = vst [vmem:[#allocation13_spill] sm:$0xff] %v9396_v1  ;;  %v826_v11 = vld [vmem:[#allocation3 + $0x68] sm:$0x1] }
 0x106   : > { %4366 = vrot.lane.b32.xlu1 %v4295_v49, %s8722_s6  ;;  %10537 = vst [vmem:[#allocation12_spill] sm:$0xff] %v9382_v28  ;;  %v490_v49 = vpop.f32.mrb[7].mxu0  ;;  %1755 = vst [vmem:[#allocation3 + $0x20] sm:$0x1] %v1754_v59  ;;  %v1453_v2 = vsel %vm8831_vm9, %v1445_v55, %v1452_v44  ;;  %v1750_v4 = vsel %vm8837_vm10, %v1444_v53, %v1749_v48  ;;  %v1458_v7 = vrot.slane %v1456_v56, 7  ;;  %v827_v39 = vsel %vm8809_vm7, 0, %v826_v11 }
 0x107   : > { %v8029_v9 = vpack.c.bf16 %v490_v49, %v490_v49  ;;  %1751 = vst [vmem:[#allocation3 + $0x18] sm:$0xf] %v1750_v4  ;;  %1752 = vst.msk [vmem:[#allocation3 + $0x1c] sm:$0xf] %vm10509_vm1, %v1453_v2  ;;  %v1471_v12 = vrot.slane %v1466_v60, 4  ;;  %v1481_v19 = vshrl.u32 %v8030_v33, 16 }
 0x108   : > { %v1756_v15 = vld [vmem:[#allocation3 + $0x24] sm:$0xf]  ;;  %v1484_v20 = vshll.u32 %v8030_v33, 16  ;;  %v1461_v23 = vor.u32 %v1459_v57, %v1458_v7  ;;  %v1462_v24 = vrot.slane %v1458_v7, 4  ;;  %v1767_v26 = vld [vmem:[#allocation3 + $0x38] sm:$0x1]  ;;  %v9415_v55 = vpop.permute.xlu0 %3288 }
 0x109   : > { %v1473_v34 = vshrl.u32 %v8029_v9, 16  ;;  %v1476_v46 = vshll.u32 %v8029_v9, 16  ;;  %v8143_v27 = vpop.f32.mrb[8].mxu0  ;;  %v1761_v31 = vsel %vm8796_vm5, %v1471_v12, %v1760_v5  ;;  %v1483_v35 = vrot.slane %v1481_v19, 7  ;;  %v1763_v30 = vld [vmem:[#allocation3 + $0x30] sm:$0xf] }
 0x10a   : > { %6886 = vrot.lane.b32.xlu1 %v6850_v62, %s8726_s11  ;;  %v1469_v62 = vor.u32 %v1467_v51, %v1466_v60  ;;  %v8032_v36 = vpack.c.bf16 %v8143_v27, %v8143_v27  ;;  %v500_v37 = vpop.f32.mrb[9].mxu0  ;;  %v8462_v44 = vld [vmem:[#allocation2 + $0xc] sm:$0xff]   ;;  %1762 = vst [vmem:[#allocation3 + $0x2c] sm:$0x1] %v1761_v31  ;;  %v1757_v48 = vsel %vm8837_vm10, %v1461_v23, %v1756_v15  ;;  %v8368_v53 = vld [vmem:[#allocation3 + $0xc] sm:$0xff]   ;;  %10540 = vst [vmem:[#allocation15_spill] sm:$0xff] %v9415_v55 }
 0x10b   : > { %v1475_v50 = vrot.slane %v1473_v34, 7  ;;  %v8031_v51 = vpack.c.bf16 %v500_v37, %v500_v37  ;;  %828 = vst [vmem:[#allocation3 + $0x68] sm:$0x1] %v827_v39  ;;  %1758 = vst [vmem:[#allocation3 + $0x24] sm:$0xf] %v1757_v48  ;;  %v1488_v56 = vrot.slane %v1483_v35, 4  ;;  %2113 = vrot.lane.b32.xlu0 %v8368_v53, %s8716_s7 }
 0x10c   : > { %v9403_v21 = vpop.permute.xlu1 %2575  ;;  %v1470_v45 = vsel %vm8831_vm9, %v1462_v24, %v1469_v62  ;;  %v1498_v57 = vshrl.u32 %v8032_v36, 16  ;;  %v1501_v58 = vshll.u32 %v8032_v36, 16  ;;  %1984 = vst.msk [vmem:[#allocation4 + $0x8] sm:$0xff] %vm10512_vm12, %v8462_v44  ;;  %v1774_v49 = vld [vmem:[#allocation3 + $0x44] sm:$0x1]  ;;  %v8370_v12 = vld [vmem:[#allocation3 + $0xc] sm:$0xff]  }
 0x10d   : > { %10539 = vst [vmem:[#allocation14_spill] sm:$0xff] %v9403_v21  ;;  %1759 = vst.msk [vmem:[#allocation3 + $0x28] sm:$0xf] %vm10509_vm1, %v1470_v45  ;;  %v1478_v60 = vor.u32 %v1476_v46, %v1475_v50  ;;  %v1479_v33 = vrot.slane %v1475_v50, 4  ;;  %v1490_v63 = vshrl.u32 %v8031_v51, 16  ;;  %v1493_v2 = vshll.u32 %v8031_v51, 16 }
 0x10e   : > { %5088 = vrot.lane.b32.xlu1 %v9366_v3, %s8723_s8  ;;  %v1486_v3 = vor.u32 %v1484_v20, %v1483_v35  ;;  %v8146_v4 = vpop.f32.mrb[10].mxu0  ;;  %v1768_v5 = vsel %vm8796_vm5, %v1488_v56, %v1767_v26  ;;  %v1500_v7 = vrot.slane %v1498_v57, 7  ;;  %v1770_v9 = vld [vmem:[#allocation3 + $0x3c] sm:$0xf]  ;;  %v773_v15 = vsel %vm8796_vm5, 0, %v772_v41  ;;  %v9434_v35 = vpop.permute.xlu0 %3292 }
 0x10f   : > { %v8034_v11 = vpack.c.bf16 %v8146_v4, %v8146_v4  ;;  %v510_v62 = vpop.f32.mrb[11].mxu0  ;;  %1769 = vst [vmem:[#allocation3 + $0x38] sm:$0x1] %v1768_v5  ;;  %v1764_v20 = vsel %vm8837_vm10, %v1478_v60, %v1763_v30  ;;  %v1492_v23 = vrot.slane %v1490_v63, 7  ;;  %v8371_v26 = vld [vmem:[#allocation3 + $0x18] sm:$0xff]   ;;  %10541 = vst [vmem:[#allocation16_spill] sm:$0xff] %v9434_v35  ;;  %3911 = vrot.lane.b32.xlu0 %v8370_v12, %s8727_s17 }
 0x110   : > { %v9418_v59 = vpop.permute.xlu1 %3270  ;;  %v1487_v19 = vsel %vm8831_vm9, %v1479_v33, %v1486_v3  ;;  %v8033_v24 = vpack.c.bf16 %v510_v62, %v510_v62  ;;  %774 = vst [vmem:[#allocation3 + $0x60] sm:$0x1] %v773_v15  ;;  %1765 = vst [vmem:[#allocation3 + $0x30] sm:$0xf] %v1764_v20  ;;  %v1503_v34 = vor.u32 %v1501_v58, %v1500_v7  ;;  %v1781_v39 = vld [vmem:[#allocation3 + $0x50] sm:$0x1] }
 0x111   : > { %1766 = vst.msk [vmem:[#allocation3 + $0x34] sm:$0xf] %vm10509_vm1, %v1487_v19  ;;  %v1515_v46 = vshrl.u32 %v8034_v11, 16  ;;  %v1518_v27 = vshll.u32 %v8034_v11, 16  ;;  %v1495_v36 = vor.u32 %v1493_v2, %v1492_v23  ;;  %v1496_v37 = vrot.slane %v1492_v23, 4  ;;  %v8149_v30 = vpop.f32.mrb[12].mxu0 }
 0x112   : > { %5555 = vrot.lane.b32.xlu1 %v8369_v22, %s8724_s9  ;;  %v1505_v22 = vrot.slane %v1500_v7, 4  ;;  %v1507_v41 = vshrl.u32 %v8033_v24, 16  ;;  %v1510_v48 = vshll.u32 %v8033_v24, 16  ;;  %v8036_v50 = vpack.c.bf16 %v8149_v30, %v8149_v30  ;;  %v520_v51 = vpop.f32.mrb[13].mxu0  ;;  %v1777_v57 = vld [vmem:[#allocation3 + $0x48] sm:$0xf]  ;;  %v9451_v7 = vpop.permute.xlu0 %3296 }
 0x113   : > { %v1517_v45 = vrot.slane %v1515_v46, 7  ;;  %v1504_v53 = vsel %vm8831_vm9, %v1496_v37, %v1503_v34  ;;  %v1771_v3 = vsel %vm8837_vm10, %v1495_v36, %v1770_v9  ;;  %v8035_v58 = vpack.c.bf16 %v520_v51, %v520_v51  ;;  %v9444_v60 = vld [vmem:[#allocation3 + $0xc] sm:$0xfe]   ;;  %10542 = vst [vmem:[#allocation17_spill] sm:$0xff] %v9451_v7  ;;  %v1788_v62 = vld [vmem:[#allocation3 + $0x5c] sm:$0x1] }
 0x114   : > { %v9432_v31 = vpop.permute.xlu1 %3274  ;;  %v1775_v44 = vsel %vm8796_vm5, %v1505_v22, %v1774_v49  ;;  %v1509_v56 = vrot.slane %v1507_v41, 7  ;;  %1772 = vst [vmem:[#allocation3 + $0x3c] sm:$0xf] %v1771_v3  ;;  %1773 = vst.msk [vmem:[#allocation3 + $0x40] sm:$0xf] %vm10509_vm1, %v1504_v53  ;;  %v1532_v63 = vshrl.u32 %v8036_v50, 16 }
 0x115   : > { %1776 = vst [vmem:[#allocation3 + $0x44] sm:$0x1] %v1775_v44  ;;  %v1520_v33 = vor.u32 %v1518_v27, %v1517_v45  ;;  %v1522_v49 = vrot.slane %v1517_v45, 4  ;;  %v1535_v2 = vshll.u32 %v8036_v50, 16  ;;  %v9449_v5 = vld [vmem:[#allocation3 + $0xc] sm:$0xff]   ;;  %v1524_v12 = vshrl.u32 %v8035_v58, 16 }
 0x116   : > { %2115 = vrot.lane.b32.xlu1 %v8371_v26, %s8716_s7  ;;  %v1512_v9 = vor.u32 %v1510_v48, %v1509_v56  ;;  %v1513_v11 = vrot.slane %v1509_v56, 4  ;;  %v1527_v15 = vshll.u32 %v8035_v58, 16  ;;  %v8152_v19 = vpop.f32.mrb[14].mxu0  ;;  %v1534_v23 = vrot.slane %v1532_v63, 7  ;;  %v1784_v24 = vld [vmem:[#allocation3 + $0x54] sm:$0xf] }
 0x117   : > { %v1782_v20 = vsel %vm8796_vm5, %v1522_v49, %v1781_v39  ;;  %v8038_v26 = vpack.c.bf16 %v8152_v19, %v8152_v19  ;;  %v530_v34 = vpop.f32.mrb[15].mxu0  ;;  %v8373_v22 = vld [vmem:[#allocation3 + $0x14] ss:$0 sps:$4 sm:$0x11]   ;;  %v5307_v46 = vrot.slane %v9444_v60, 1  ;;  %v1526_v37 = vrot.slane %v1524_v12, 7 }
 0x118   : > { %v9447_v4 = vpop.permute.xlu1 %3278  ;;  %1783 = vst [vmem:[#allocation3 + $0x50] sm:$0x1] %v1782_v20  ;;  %v1521_v27 = vsel %vm8831_vm9, %v1513_v11, %v1520_v33  ;;  %v1778_v36 = vsel %vm8837_vm10, %v1512_v9, %v1777_v57  ;;  %v8037_v41 = vpack.c.bf16 %v530_v34, %v530_v34  ;;  %v8375_v30 = vld [vmem:[#allocation3 + $0x14] ss:$0 sps:$4 sm:$0x11]   ;;  %v1537_v39 = vor.u32 %v1535_v2, %v1534_v23  ;;  %v3558_v57 = vpop.permute.xlu0 %3557  ;;  %v8411_v7 = vld [vmem:[#allocation3 + $0x18] sm:$0xff]  }
 0x119   : > { %1779 = vst [vmem:[#allocation3 + $0x48] sm:$0xf] %v1778_v36  ;;  %1780 = vst.msk [vmem:[#allocation3 + $0x4c] sm:$0xf] %vm10509_vm1, %v1521_v27  ;;  %v1539_v44 = vrot.slane %v1534_v23, 4  ;;  %v1549_v45 = vshrl.u32 %v8038_v26, 16  ;;  %v1529_v51 = vor.u32 %v1527_v15, %v1526_v37 }
 0x11a   : > { %v1552_v48 = vshll.u32 %v8038_v26, 16  ;;  %v1530_v53 = vrot.slane %v1526_v37, 4  ;;  %v1795_v3 = vld [vmem:[#allocation3 + $0x68] sm:$0x1]  ;;  %v1541_v56 = vshrl.u32 %v8037_v41, 16  ;;  %v1544_v58 = vshll.u32 %v8037_v41, 16 }
 0x11b   : > { %v8155_v60 = vpop.f32.mrb[16].mxu0  ;;  %v829_v33 = vld [vmem:[#allocation3 + $0x74] sm:$0x1]  ;;  %v1789_v49 = vsel %vm8796_vm5, %v1539_v44, %v1788_v62  ;;  %v1551_v63 = vrot.slane %v1549_v45, 7  ;;  %v1791_v9 = vld [vmem:[#allocation3 + $0x60] sm:$0xf]  ;;  %v1785_v19 = vsel %vm8837_vm10, %v1529_v51, %v1784_v24 }
 0x11c   : > { %v9461_v50 = vpop.permute.xlu1 %3282  ;;  %v5308_v11 = vrot.slane %v8373_v22, 1  ;;  %v2799_v2 = vshrl.u32 %v9449_v5, 16  ;;  %v540_v12 = vpop.f32.mrb[17].mxu0  ;;  %3606 = vst.msk [vmem:[#allocation4] sm:$0xff] %vm10508_vm0, %v3558_v57  ;;  %1790 = vst [vmem:[#allocation3 + $0x5c] sm:$0x1] %v1789_v49  ;;  %v1538_v15 = vsel %vm8831_vm9, %v1530_v53, %v1537_v39 }
 0x11d   : > { %v1543_v20 = vrot.slane %v1541_v56, 7  ;;  %v2801_v23 = vshll.u32 %v9449_v5, 16  ;;  %v8376_v26 = vld [vmem:[#allocation3 + $0xc] sm:$0xfe]   ;;  %v775_v62 = vld [vmem:[#allocation3 + $0x6c] sm:$0x1]  ;;  %v1554_v34 = vor.u32 %v1552_v48, %v1551_v63  ;;  %v3735_v51 = vpop.permute.xlu0 %3734 }
 0x11e   : > { %1786 = vst [vmem:[#allocation3 + $0x54] sm:$0xf] %v1785_v19  ;;  %1787 = vst.msk [vmem:[#allocation3 + $0x58] sm:$0xf] %vm10509_vm1, %v1538_v15  ;;  %v1556_v22 = vrot.slane %v1551_v63, 4  ;;  %v5309_v27 = vsel %vm10513_vm11, %v5307_v46, %v5308_v11  ;;  %v2806_v36 = vshll.u32 %v8375_v30, 16  ;;  %v8040_v63 = vpack.c.bf16 %v8155_v60, %v8155_v60 }
 0x11f   : > { %v8377_v37 = vld [vmem:[#allocation3 + $0x14] ss:$0 sps:$4 sm:$0x11]   ;;  %v1546_v39 = vor.u32 %v1544_v58, %v1543_v20  ;;  %v1547_v44 = vrot.slane %v1543_v20, 4  ;;  %5355 = vrot.lane.b32.xlu0 %v5309_v27, %s8728_s20  ;;  %v2803_v24 = vrot.slane %v2801_v23, 1  ;;  %v3512_v5 = vrot.slane %v8376_v26, 1 }
 0x120   : > { %v9474_v41 = vpop.permute.xlu1 %3286  ;;  %v8380_v45 = vld [vmem:[#allocation3 + $0x24] sm:$0xff]   ;;  %v1796_v53 = vsel %vm8796_vm5, %v1556_v22, %v1795_v3  ;;  %v2808_v48 = vrot.slane %v2806_v36, 1  ;;  %v3513_v56 = vrot.slane %v8377_v37, 1  ;;  %v830_v46 = vsel %vm8809_vm7, 0, %v829_v33  ;;  %v9481_v30 = vld [vmem:[#allocation3 + $0xc] sm:$0xff]   ;;  %3783 = vst.msk [vmem:[#allocation4] sm:$0xff] %vm10507_vm3, %v3735_v51 }
 0x121   : > { %1797 = vst [vmem:[#allocation3 + $0x68] sm:$0x1] %v1796_v53  ;;  %v1555_v58 = vsel %vm8831_vm9, %v1547_v44, %v1554_v34  ;;  %v1792_v57 = vsel %vm8837_vm10, %v1546_v39, %v1791_v9  ;;  %v2804_v49 = vor.u32 %v2803_v24, %v2799_v2  ;;  %831 = vst [vmem:[#allocation3 + $0x74] sm:$0x1] %v830_v46  ;;  %v776_v33 = vsel %vm8796_vm5, 0, %v775_v62  ;;  %v8379_v60 = vld [vmem:[#allocation3 + $0x18] sm:$0xff]   ;;  %v9497_v36 = vpop.permute.xlu0 %4344 }
 0x122   : > { %1793 = vst [vmem:[#allocation3 + $0x60] sm:$0xf] %v1792_v57  ;;  %1794 = vst.msk [vmem:[#allocation3 + $0x64] sm:$0xf] %vm10509_vm1, %v1555_v58  ;;  %v3514_v3 = vsel %vm10513_vm11, %v3512_v5, %v3513_v56  ;;  %v8039_v11 = vpack.c.bf16 %v540_v12, %v540_v12  ;;  %v1566_v9 = vshrl.u32 %v8040_v63, 16  ;;  %v1569_v2 = vshll.u32 %v8040_v63, 16 }
 0x123   : > { %v8381_v15 = vld [vmem:[#allocation3 + $0x2c] ss:$0 sps:$4 sm:$0x11]   ;;  %v2809_v20 = vsel %vm10520_vm8, %v2804_v49, %v2808_v48  ;;  %3559 = vrot.lane.b32.xlu0 %v3514_v3, %s8720_s16  ;;  %777 = vst [vmem:[#allocation3 + $0x6c] sm:$0x1] %v776_v33  ;;  %v8386_v23 = vld [vmem:[#allocation3 + $0x3c] sm:$0xff]  }
 0x124   : > { %v9492_v19 = vpop.permute.xlu1 %3290  ;;  %v8158_v26 = vpop.f32.mrb[18].mxu0  ;;  %2980 = vrot.lane.b32.xlu1 %v2809_v20, %s8718_s27  ;;  %v8378_v34 = vld [vmem:[#allocation3 + $0x24] sm:$0xff]   ;;  %v1558_v22 = vshrl.u32 %v8039_v11, 16  ;;  %v1561_v27 = vshll.u32 %v8039_v11, 16  ;;  %v2825_v62 = vshll.u32 %v8380_v45, 16  ;;  %v2830_v12 = vshll.u32 %v8381_v15, 16 }
 0x125   : > { %10543 = vst [vmem:[#allocation18_spill] sm:$0xff] %v9492_v19  ;;  %v1568_v37 = vrot.slane %v1566_v9, 7  ;;  %v2823_v39 = vshrl.u32 %v8380_v45, 16  ;;  %v4586_v51 = vshrl.u32 %v9481_v30, 16  ;;  %v4588_v53 = vshll.u32 %v9481_v30, 16  ;;  %v8382_v58 = vld [vmem:[#allocation3 + $0x18] sm:$0xff]   ;;  %v9505_v11 = vpop.permute.xlu0 %5066 }
 0x126   : > { %v1560_v44 = vrot.slane %v1558_v22, 7  ;;  %v2827_v24 = vrot.slane %v2825_v62, 1  ;;  %v2832_v46 = vrot.slane %v2830_v12, 1  ;;  %v832_v57 = vld [vmem:[#allocation3 + $0x80] sm:$0x1]  ;;  %v2849_v20 = vshll.u32 %v8386_v23, 16 }
 0x127   : > { %v1571_v48 = vor.u32 %v1569_v2, %v1568_v37  ;;  %v1573_v56 = vrot.slane %v1568_v37, 4  ;;  %5711 = vrot.lane.b32.xlu0 %v8379_v60, %s8729_s21  ;;  %v8385_v33 = vld [vmem:[#allocation3 + $0x14] ss:$0 sps:$4 sm:$0x11]   ;;  %v4590_v15 = vrot.slane %v4588_v53, 1  ;;  %v8042_v9 = vpack.c.bf16 %v8158_v26, %v8158_v26 }
 0x128   : > { %v9499_v5 = vpop.permute.xlu1 %3294  ;;  %2117 = vrot.lane.b32.xlu1 %v8378_v34, %s8716_s7  ;;  %v1802_v49 = vld [vmem:[#allocation3 + $0x74] sm:$0x1]  ;;  %v1563_v45 = vor.u32 %v1561_v27, %v1560_v44  ;;  %v1564_v63 = vrot.slane %v1560_v44, 4  ;;  %v2828_v3 = vor.u32 %v2827_v24, %v2823_v39  ;;  %v4593_v22 = vshll.u32 %v8385_v33, 16  ;;  %v778_v12 = vld [vmem:[#allocation3 + $0x78] sm:$0x1] }
 0x129   : > { %10544 = vst [vmem:[#allocation19_spill] sm:$0xff] %v9499_v5  ;;  %v1803_v30 = vsel %vm8796_vm5, %v1573_v56, %v1802_v49  ;;  %v2847_v27 = vshrl.u32 %v8386_v23, 16  ;;  %v4591_v26 = vor.u32 %v4590_v15, %v4586_v51  ;;  %v8387_v39 = vld [vmem:[#allocation3 + $0x44] ss:$0 sps:$4 sm:$0x11]   ;;  %v2851_v44 = vrot.slane %v2849_v20, 1 }
 0x12a   : > { %1804 = vst [vmem:[#allocation3 + $0x74] sm:$0x1] %v1803_v30  ;;  %v1572_v2 = vsel %vm8831_vm9, %v1564_v63, %v1571_v48  ;;  %v1798_v60 = vld [vmem:[#allocation3 + $0x6c] sm:$0xf]  ;;  %v2833_v34 = vsel %vm10520_vm8, %v2828_v3, %v2832_v46  ;;  %v8383_v24 = vld [vmem:[#allocation3 + $0x3c] sm:$0xff]   ;;  %v4595_v53 = vrot.slane %v4593_v22, 1  ;;  %v9521_v48 = vpop.permute.xlu0 %5533 }
 0x12b   : > { %v1799_v37 = vsel %vm8837_vm10, %v1563_v45, %v1798_v60  ;;  %1801 = vst.msk [vmem:[#allocation3 + $0x70] sm:$0xf] %vm10509_vm1, %v1572_v2  ;;  %3913 = vrot.lane.b32.xlu0 %v8382_v58, %s8727_s17  ;;  %v833_v23 = vsel %vm8809_vm7, 0, %v832_v57  ;;  %v2852_v56 = vor.u32 %v2851_v44, %v2847_v27  ;;  %v2854_v46 = vshll.u32 %v8387_v39, 16  ;;  %v8388_v49 = vld [vmem:[#allocation3 + $0x18] sm:$0xfe]  }
 0x12c   : > { %v9512_v62 = vpop.permute.xlu1 %3298  ;;  %1800 = vst [vmem:[#allocation3 + $0x6c] sm:$0xf] %v1799_v37  ;;  %2984 = vrot.lane.b32.xlu1 %v2833_v34, %s8718_s27  ;;  %v8389_v45 = vld [vmem:[#allocation3 + $0x20] ss:$0 sps:$4 sm:$0x11]   ;;  %v4596_v58 = vsel %vm10520_vm8, %v4591_v26, %v4595_v53  ;;  %v1583_v51 = vshrl.u32 %v8042_v9, 16 }
 0x12d   : > { %10545 = vst [vmem:[#allocation20_spill] sm:$0xff] %v9512_v62  ;;  %834 = vst [vmem:[#allocation3 + $0x80] sm:$0x1] %v833_v23  ;;  %v1586_v63 = vshll.u32 %v8042_v9, 16  ;;  %v2856_v33 = vrot.slane %v2854_v46, 1  ;;  %v7107_v30 = vrot.slane %v8388_v49, 1 }
 0x12e   : > { %v7108_v15 = vrot.slane %v8389_v45, 1  ;;  %v550_v57 = vpop.f32.mrb[19].mxu0  ;;  %v779_v20 = vsel %vm8796_vm5, 0, %v778_v12  ;;  %v1585_v2 = vrot.slane %v1583_v51, 7  ;;  %v8393_v34 = vld [vmem:[#allocation3 + $0x54] sm:$0xff]   ;;  %v9530_v22 = vpop.permute.xlu0 %3736  ;;  %v4598_v32 = vshrl.u32 %v8411_v7, 16 }
 0x12f   : > { %4777 = vrot.lane.b32.xlu0 %v4596_v58, %s8730_s22  ;;  %780 = vst [vmem:[#allocation3 + $0x78] sm:$0x1] %v779_v20  ;;  %v8041_v60 = vpack.c.bf16 %v550_v57, %v550_v57  ;;  %v2857_v9 = vsel %vm10520_vm8, %v2852_v56, %v2856_v33  ;;  %v8391_v27 = vld [vmem:[#allocation3 + $0x18] sm:$0xfe]   ;;  %v2873_v58 = vshll.u32 %v8393_v34, 16 }
 0x130   : > { %v9524_v3 = vpop.permute.xlu1 %3750  ;;  %2121 = vrot.lane.b32.xlu1 %v8383_v24, %s8716_s7  ;;  %v7109_v37 = vsel %vm10513_vm11, %v7107_v30, %v7108_v15  ;;  %v1590_v26 = vrot.slane %v1585_v2, 4  ;;  %v8392_v53 = vld [vmem:[#allocation3 + $0x20] ss:$0 sps:$4 sm:$0x11]   ;;  %v5310_v12 = vrot.slane %v8391_v27, 1  ;;  %v8390_v24 = vld [vmem:[#allocation3 + $0x54] sm:$0xff]   ;;  %v1588_v46 = vor.u32 %v1586_v63, %v1585_v2 }
 0x131   : > { %10546 = vst [vmem:[#allocation21_spill] sm:$0xff] %v9524_v3  ;;  %v1575_v39 = vshrl.u32 %v8041_v60, 16  ;;  %v1578_v44 = vshll.u32 %v8041_v60, 16  ;;  %v5311_v56 = vrot.slane %v8392_v53, 1  ;;  %v2871_v15 = vshrl.u32 %v8393_v34, 16 }
 0x132   : > { %v9538_v51 = vpop.permute.xlu0 %6144  ;;  %v8394_v30 = vld [vmem:[#allocation3 + $0x5c] ss:$0 sps:$4 sm:$0x11]   ;;  %v2875_v27 = vrot.slane %v2873_v58, 1  ;;  %v8397_v58 = vld [vmem:[#allocation3 + $0x60] sm:$0xfe]  }
 0x133   : > { %7155 = vrot.lane.b32.xlu0 %v7109_v37, %s8731_s23  ;;  %v1577_v45 = vrot.slane %v1575_v39, 7  ;;  %v5312_v60 = vsel %vm10513_vm11, %v5310_v12, %v5311_v56  ;;  %v2878_v2 = vshll.u32 %v8394_v30, 16  ;;  %v8395_v37 = vld [vmem:[#allocation3 + $0x18] sm:$0xfe]   ;;  %v8409_v17 = vld [vmem:[#allocation3 + $0x6c] sm:$0xfe]  }
 0x134   : > { %v9534_v23 = vpop.permute.xlu1 %4360  ;;  %2988 = vrot.lane.b32.xlu1 %v2857_v9, %s8718_s27  ;;  %v1809_v49 = vld [vmem:[#allocation3 + $0x80] sm:$0x1]  ;;  %v2876_v39 = vor.u32 %v2875_v27, %v2871_v15  ;;  %v3533_v15 = vrot.slane %v8397_v58, 1  ;;  %v8410_v35 = vld [vmem:[#allocation3 + $0x74] ss:$0 sps:$4 sm:$0x11]  }
 0x135   : > { %10547 = vst [vmem:[#allocation22_spill] sm:$0xff] %v9534_v23  ;;  %v1810_v33 = vsel %vm8796_vm5, %v1590_v26, %v1809_v49  ;;  %v1580_v57 = vor.u32 %v1578_v44, %v1577_v45  ;;  %v1581_v20 = vrot.slane %v1577_v45, 4  ;;  %v8396_v44 = vld [vmem:[#allocation3 + $0x20] ss:$0 sps:$4 sm:$0x11]   ;;  %v2880_v12 = vrot.slane %v2878_v2, 1 }
 0x136   : > { %1811 = vst [vmem:[#allocation3 + $0x80] sm:$0x1] %v1810_v33  ;;  %v1805_v63 = vld [vmem:[#allocation3 + $0x78] sm:$0xf]  ;;  %v9551_v53 = vpop.permute.xlu0 %4346  ;;  %v3515_v49 = vrot.slane %v8395_v37, 1  ;;  %v3516_v56 = vrot.slane %v8396_v44, 1 }
 0x137   : > { %5357 = vrot.lane.b32.xlu0 %v5312_v60, %s8728_s20  ;;  %v1589_v26 = vsel %vm8831_vm9, %v1581_v20, %v1588_v46  ;;  %v1806_v34 = vsel %vm8837_vm10, %v1580_v57, %v1805_v63  ;;  %v8403_v45 = vld [vmem:[#allocation3 + $0x18] sm:$0xff]   ;;  %v8398_v33 = vld [vmem:[#allocation3 + $0x68] ss:$0 sps:$4 sm:$0x11]   ;;  %v2881_v46 = vsel %vm10520_vm8, %v2876_v39, %v2880_v12 }
 0x138   : > { %v9543_v9 = vpop.permute.xlu1 %5082  ;;  %2125 = vrot.lane.b32.xlu1 %v8390_v24, %s8716_s7  ;;  %1807 = vst [vmem:[#allocation3 + $0x78] sm:$0xf] %v1806_v34  ;;  %1808 = vst.msk [vmem:[#allocation3 + $0x7c] sm:$0xf] %vm10509_vm1, %v1589_v26  ;;  %v3517_v30 = vsel %vm10513_vm11, %v3515_v49, %v3516_v56  ;;  %v3534_v57 = vrot.slane %v8398_v33, 1  ;;  %v8399_v63 = vld [vmem:[#allocation3 + $0x24] sm:$0xff]  }
 0x139   : > { %10548 = vst [vmem:[#allocation23_spill] sm:$0xff] %v9543_v9  ;;  %v8404_v2 = vld [vmem:[#allocation3 + $0x20] ss:$0 sps:$4 sm:$0x11]   ;;  %v2813_v37 = vshll.u32 %v8403_v45, 16  ;;  %v8407_v26 = vld [vmem:[#allocation3 + $0x18] sm:$0xff]  }
 0x13a   : > { %v9559_v20 = vpop.permute.xlu0 %6866  ;;  %v3535_v27 = vsel %vm10513_vm11, %v3533_v15, %v3534_v57  ;;  %v8400_v34 = vld [vmem:[#allocation3 + $0x6c] sm:$0xff]   ;;  %v8401_v44 = vld [vmem:[#allocation3 + $0x24] sm:$0xff]   ;;  %v2818_v49 = vshll.u32 %v8404_v2, 16  ;;  %v2811_v58 = vshrl.u32 %v8403_v45, 16  ;;  %v6386_v57 = vshrl.u32 %v8407_v26, 16 }
 0x13b   : > { %3561 = vrot.lane.b32.xlu0 %v3517_v30, %s8720_s16  ;;  %v2815_v12 = vrot.slane %v2813_v37, 1  ;;  %v8405_v56 = vld [vmem:[#allocation3 + $0x6c] sm:$0xfe]   ;;  %v8406_v33 = vld [vmem:[#allocation3 + $0x74] ss:$0 sps:$4 sm:$0x11]  }
 0x13c   : > { %v9554_v24 = vpop.permute.xlu1 %5549  ;;  %2992 = vrot.lane.b32.xlu1 %v2881_v46, %s8718_s27  ;;  %v2820_v30 = vrot.slane %v2818_v49, 1  ;;  %v5331_v15 = vrot.slane %v8405_v56, 1  ;;  %v6388_v62 = vshll.u32 %v8407_v26, 16  ;;  %v8408_v5 = vld [vmem:[#allocation3 + $0x20] ss:$0 sps:$4 sm:$0x11]  }
 0x13d   : > { %10549 = vst [vmem:[#allocation24_spill] sm:$0xff] %v9554_v24  ;;  %v2816_v21 = vor.u32 %v2815_v12, %v2811_v58  ;;  %v835_v45 = vld [vmem:[#allocation3 + $0x8c] sm:$0x1]  ;;  %v6393_v37 = vshll.u32 %v8408_v5, 16  ;;  %v781_v56 = vld [vmem:[#allocation3 + $0x84] sm:$0x1] }
 0x13e   : > { %v9566_v39 = vpop.permute.xlu0 %5068  ;;  %v6390_v2 = vrot.slane %v6388_v62, 1  ;;  %v8412_v58 = vld [vmem:[#allocation3 + $0x20] ss:$0 sps:$4 sm:$0x11]   ;;  %v3536_v62 = vrot.slane %v8409_v17, 1  ;;  %v3537_v5 = vrot.slane %v8410_v35, 1 }
 0x13f   : > { %5713 = vrot.lane.b32.xlu0 %v8399_v63, %s8729_s21  ;;  %v5332_v63 = vrot.slane %v8406_v33, 1  ;;  %v2821_v26 = vsel %vm10520_vm8, %v2816_v21, %v2820_v30  ;;  %v6395_v12 = vrot.slane %v6393_v37, 1  ;;  %v4605_v33 = vshll.u32 %v8412_v58, 16  ;;  %v8419_v37 = vld [vmem:[#allocation3 + $0x6c] sm:$0xff]   ;;  %v8417_v19 = vld [vmem:[#allocation3 + $0x24] sm:$0xfe]  }
 0x140   : > { %v9562_v60 = vpop.permute.xlu1 %3752  ;;  %3573 = vrot.lane.b32.xlu1 %v3535_v27, %s8720_s16  ;;  %v8402_v27 = vld [vmem:[#allocation3 + $0x6c] sm:$0xff]   ;;  %v836_v24 = vsel %vm8809_vm7, 0, %v835_v45  ;;  %v8414_v45 = vld [vmem:[#allocation3 + $0x24] sm:$0xfe]   ;;  %v2895_v58 = vshrl.u32 %v8419_v37, 16 }
 0x141   : > { %v5333_v21 = vsel %vm10513_vm11, %v5331_v15, %v5332_v63  ;;  %837 = vst [vmem:[#allocation3 + $0x8c] sm:$0x1] %v836_v24  ;;  %v4607_v35 = vrot.slane %v4605_v33, 1  ;;  %v8415_v63 = vld [vmem:[#allocation3 + $0x2c] ss:$0 sps:$4 sm:$0x11]   ;;  %v3538_v33 = vsel %vm10513_vm11, %v3536_v62, %v3537_v5 }
 0x142   : > { %v9572_v28 = vpop.permute.xlu0 %5535  ;;  %v8438_v18 = vld [vmem:[#allocation3 + $0x2c] ss:$0 sps:$4 sm:$0x11]  }
 0x143   : > { %3915 = vrot.lane.b32.xlu0 %v8401_v44, %s8727_s17  ;;  %v4600_v44 = vshll.u32 %v8411_v7, 16 }
 0x144   : > { %v9569_v46 = vpop.permute.xlu1 %6160  ;;  %2129 = vrot.lane.b32.xlu1 %v8400_v34, %s8716_s7  ;;  %v6391_v34 = vor.u32 %v6390_v2, %v6386_v57  ;;  %v782_v2 = vsel %vm8796_vm5, 0, %v781_v56 }
 0x145   : > { %10550 = vst [vmem:[#allocation25_spill] sm:$0xff] %v9569_v46  ;;  %v8161_v46 = vpop.f32.mrb[20].mxu0  ;;  %v4602_v30 = vrot.slane %v4600_v44, 1  ;;  %783 = vst [vmem:[#allocation3 + $0x84] sm:$0x1] %v782_v2  ;;  %v7111_v2 = vrot.slane %v8415_v63, 1 }
 0x146   : > { %v9579_v55 = vpop.permute.xlu0 %3738  ;;  %v8044_v57 = vpack.c.bf16 %v8161_v46, %v8161_v46  ;;  %v6396_v17 = vsel %vm10520_vm8, %v6391_v34, %v6395_v12  ;;  %v2897_v34 = vshll.u32 %v8419_v37, 16  ;;  %v8423_v12 = vld [vmem:[#allocation3 + $0x6c] sm:$0xff]   ;;  %v5313_v63 = vrot.slane %v8417_v19, 1 }
 0x147   : > { %2982 = vrot.lane.b32.xlu0 %v2821_v26, %s8718_s27  ;;  %v4603_v24 = vor.u32 %v4602_v30, %v4598_v32  ;;  %v8413_v32 = vld [vmem:[#allocation3 + $0x78] sm:$0xff]   ;;  %v8418_v37 = vld [vmem:[#allocation3 + $0x2c] ss:$0 sps:$4 sm:$0x11]  }
 0x148   : > { %v9575_v49 = vpop.permute.xlu1 %4362  ;;  %3927 = vrot.lane.b32.xlu1 %v8402_v27, %s8727_s17  ;;  %v560_v27 = vpop.f32.mrb[21].mxu0  ;;  %v1600_v46 = vshrl.u32 %v8044_v57, 16  ;;  %v1603_v15 = vshll.u32 %v8044_v57, 16  ;;  %v2899_v57 = vrot.slane %v2897_v34, 1  ;;  %v1816_v23 = vld [vmem:[#allocation3 + $0x8c] sm:$0x1] }
 0x149   : > { %v8043_v7 = vpack.c.bf16 %v560_v27, %v560_v27 }
 0x14a   : > { %v9591_v26 = vpop.permute.xlu0 %6146  ;;  %v1602_v27 = vrot.slane %v1600_v46, 7  ;;  %v4682_v46 = vshrl.u32 %v8423_v12, 16 }
 0x14b   : > { %6577 = vrot.lane.b32.xlu0 %v6396_v17, %s8732_s24  ;;  %v1592_v56 = vshrl.u32 %v8043_v7, 16  ;;  %v1595_v44 = vshll.u32 %v8043_v7, 16  ;;  %v4608_v17 = vsel %vm10520_vm8, %v4603_v24, %v4607_v35 }
 0x14c   : > { %v9584_v9 = vpop.permute.xlu1 %6882  ;;  %5371 = vrot.lane.b32.xlu1 %v5333_v21, %s8728_s20  ;;  %v1605_v7 = vor.u32 %v1603_v15, %v1602_v27  ;;  %v1812_v24 = vld [vmem:[#allocation3 + $0x84] sm:$0xf] }
 0x14d   : > { %10551 = vst [vmem:[#allocation26_spill] sm:$0xff] %v9584_v9  ;;  %v7110_v9 = vrot.slane %v8414_v45, 1  ;;  %v1594_v30 = vrot.slane %v1592_v56, 7  ;;  %v1607_v45 = vrot.slane %v1602_v27, 4  ;;  %v5314_v56 = vrot.slane %v8418_v37, 1 }
 0x14e   : > { %v9599_v16 = vpop.permute.xlu0 %4348  ;;  %v8420_v27 = vld [vmem:[#allocation3 + $0x74] ss:$0 sps:$4 sm:$0x11]  }
 0x14f   : > { %4779 = vrot.lane.b32.xlu0 %v4608_v17, %s8730_s22  ;;  %v1597_v3 = vor.u32 %v1595_v44, %v1594_v30  ;;  %v1598_v62 = vrot.slane %v1594_v30, 4  ;;  %v1817_v35 = vsel %vm8796_vm5, %v1607_v45, %v1816_v23  ;;  %v7112_v44 = vsel %vm10513_vm11, %v7110_v9, %v7111_v2  ;;  %v8421_v23 = vld [vmem:[#allocation3 + $0x24] sm:$0xfe]   ;;  %v8424_v37 = vld [vmem:[#allocation3 + $0x74] ss:$0 sps:$4 sm:$0x11]  }
 0x150   : > { %v9594_v21 = vpop.permute.xlu1 %5084  ;;  %3575 = vrot.lane.b32.xlu1 %v3538_v33, %s8720_s16  ;;  %1818 = vst [vmem:[#allocation3 + $0x8c] sm:$0x1] %v1817_v35  ;;  %v8416_v33 = vld [vmem:[#allocation3 + $0x78] sm:$0xff]   ;;  %v4684_v17 = vshll.u32 %v8423_v12, 16  ;;  %v2902_v19 = vshll.u32 %v8420_v27, 16  ;;  %v3518_v2 = vrot.slane %v8421_v23, 1 }
 0x151   : > { %10552 = vst [vmem:[#allocation27_spill] sm:$0xff] %v9594_v21  ;;  %v1606_v15 = vsel %vm8831_vm9, %v1598_v62, %v1605_v7  ;;  %v1813_v34 = vsel %vm8837_vm10, %v1597_v3, %v1812_v24  ;;  %v2900_v7 = vor.u32 %v2899_v57, %v2895_v58  ;;  %v5315_v3 = vsel %vm10513_vm11, %v5313_v63, %v5314_v56  ;;  %v8426_v58 = vld [vmem:[#allocation3 + $0x78] sm:$0xfe]   ;;  %v8427_v56 = vld [vmem:[#allocation3 + $0x80] ss:$0 sps:$4 sm:$0x11]  }
 0x152   : > { %v9612_v30 = vpop.permute.xlu0 %6868  ;;  %1814 = vst [vmem:[#allocation3 + $0x84] sm:$0xf] %v1813_v34  ;;  %1815 = vst.msk [vmem:[#allocation3 + $0x88] sm:$0xf] %vm10509_vm1, %v1606_v15  ;;  %v2904_v9 = vrot.slane %v2902_v19, 1  ;;  %v4686_v35 = vrot.slane %v4684_v17, 1 }
 0x153   : > { %7157 = vrot.lane.b32.xlu0 %v7112_v44, %s8731_s23  ;;  %v4689_v24 = vshll.u32 %v8424_v37, 16  ;;  %v8425_v27 = vld [vmem:[#allocation3 + $0x30] sm:$0xff]   ;;  %v7131_v19 = vrot.slane %v8426_v58, 1  ;;  %v8429_v17 = vld [vmem:[#allocation3 + $0x78] sm:$0xfe]  }
 0x154   : > { %v9602_v5 = vpop.permute.xlu1 %5551  ;;  %5727 = vrot.lane.b32.xlu1 %v8413_v32, %s8729_s21  ;;  %v8422_v32 = vld [vmem:[#allocation3 + $0x2c] ss:$0 sps:$4 sm:$0x11]   ;;  %v2905_v34 = vsel %vm10520_vm8, %v2900_v7, %v2904_v9  ;;  %v4687_v44 = vor.u32 %v4686_v35, %v4682_v46  ;;  %v7132_v46 = vrot.slane %v8427_v56, 1  ;;  %v5334_v9 = vrot.slane %v8429_v17, 1 }
 0x155   : > { %10553 = vst [vmem:[#allocation28_spill] sm:$0xff] %v9602_v5  ;;  %v3519_v12 = vrot.slane %v8422_v32, 1  ;;  %v4691_v63 = vrot.slane %v4689_v24, 1  ;;  %v8434_v32 = vld [vmem:[#allocation3 + $0x24] sm:$0xff]   ;;  %v8432_v24 = vld [vmem:[#allocation3 + $0x78] sm:$0xfe]  }
 0x156   : > { %v9620_v62 = vpop.permute.xlu0 %5070  ;;  %v6400_v35 = vshll.u32 %v8434_v32, 16  ;;  %v6398_v56 = vshrl.u32 %v8434_v32, 16  ;;  %v8444_v5 = vld [vmem:[#allocation3 + $0x38] ss:$0 sps:$4 sm:$0x11]  }
 0x157   : > { %5359 = vrot.lane.b32.xlu0 %v5315_v3, %s8728_s20  ;;  %v3520_v57 = vsel %vm10513_vm11, %v3518_v2, %v3519_v12  ;;  %v4692_v7 = vsel %vm10520_vm8, %v4687_v44, %v4691_v63  ;;  %v8430_v3 = vld [vmem:[#allocation3 + $0x80] ss:$0 sps:$4 sm:$0x11]   ;;  %v8428_v12 = vld [vmem:[#allocation3 + $0x30] sm:$0xff]   ;;  %v3539_v44 = vrot.slane %v8432_v24, 1  ;;  %v4617_v24 = vshll.u32 %v8438_v18, 16 }
 0x158   : > { %v9616_v45 = vpop.permute.xlu1 %3754  ;;  %3929 = vrot.lane.b32.xlu1 %v8416_v33, %s8727_s17  ;;  %v5335_v37 = vrot.slane %v8430_v3, 1  ;;  %v8435_v63 = vld [vmem:[#allocation3 + $0x2c] ss:$0 sps:$4 sm:$0x11]   ;;  %v6402_v17 = vrot.slane %v6400_v35, 1 }
 0x159   : > { %10554 = vst [vmem:[#allocation29_spill] sm:$0xff] %v9616_v45  ;;  %v6405_v45 = vshll.u32 %v8435_v63, 16 }
 0x15a   : > { %v9628_v33 = vpop.permute.xlu0 %5537  ;;  %v6403_v61 = vor.u32 %v6402_v17, %v6398_v56  ;;  %v9657_v56 = vld [vmem:[#allocation3 + $0x78] sm:$0xff]  }
 0x15b   : > { %3563 = vrot.lane.b32.xlu0 %v3520_v57, %s8720_s16  ;;  %v8437_v57 = vld [vmem:[#allocation3 + $0x24] sm:$0xff]   ;;  %v6407_v32 = vrot.slane %v6405_v45, 1 }
 0x15c   : > { %v9623_v15 = vpop.permute.xlu1 %6162  ;;  %2996 = vrot.lane.b32.xlu1 %v2905_v34, %s8718_s27  ;;  %v8433_v34 = vld [vmem:[#allocation3 + $0x80] ss:$0 sps:$4 sm:$0x11]  }
 0x15d   : > { %10555 = vst [vmem:[#allocation30_spill] sm:$0xff] %v9623_v15  ;;  %v3540_v3 = vrot.slane %v8433_v34, 1  ;;  %v6408_v45 = vsel %vm10520_vm8, %v6403_v61, %v6407_v32  ;;  %v8441_v15 = vld [vmem:[#allocation3 + $0x38] ss:$0 sps:$4 sm:$0x11]  }
 0x15e   : > { %v9635_v2 = vpop.permute.xlu0 %3740 }
 0x15f   : > { %2119 = vrot.lane.b32.xlu0 %v8425_v27, %s8716_s7  ;;  %v8431_v27 = vld [vmem:[#allocation3 + $0x30] sm:$0xff]  }
 0x160   : > { %v9631_v23 = vpop.permute.xlu1 %4364  ;;  %4793 = vrot.lane.b32.xlu1 %v4692_v7, %s8730_s22 }
 0x161   : > { %10556 = vst [vmem:[#allocation31_spill] sm:$0xff] %v9631_v23  ;;  %v7133_v23 = vsel %vm10513_vm11, %v7131_v19, %v7132_v46  ;;  %v4612_v19 = vshll.u32 %v8437_v57, 16  ;;  %v8164_v46 = vpop.f32.mrb[22].mxu0 }
 0x162   : > { %v9642_v7 = vpop.permute.xlu0 %6148  ;;  %v8046_v43 = vpack.c.bf16 %v8164_v46, %v8164_v46  ;;  %v570_v34 = vpop.f32.mrb[23].mxu0  ;;  %v4619_v46 = vrot.slane %v4617_v24, 1  ;;  %v6482_v24 = vshrl.u32 %v9657_v56, 16 }
 0x163   : > { %10558 = vst [vmem:[#allocation33_spill] sm:$0xff] %v9642_v7  ;;  %5715 = vrot.lane.b32.xlu0 %v8428_v12, %s8729_s21  ;;  %v4614_v35 = vrot.slane %v4612_v19, 1  ;;  %v838_v12 = vld [vmem:[#allocation3 + $0x98] sm:$0x1]  ;;  %v8436_v19 = vld [vmem:[#allocation3 + $0x84] sm:$0xff]  }
 0x164   : > { %v9638_v58 = vpop.permute.xlu1 %6884  ;;  %7171 = vrot.lane.b32.xlu1 %v7133_v23, %s8731_s23  ;;  %v4610_v23 = vshrl.u32 %v8437_v57, 16  ;;  %v8045_v57 = vpack.c.bf16 %v570_v34, %v570_v34  ;;  %v1617_v18 = vshrl.u32 %v8046_v43, 16 }
 0x165   : > { %10557 = vst [vmem:[#allocation32_spill] sm:$0xff] %v9638_v58  ;;  %v5336_v58 = vsel %vm10513_vm11, %v5334_v9, %v5335_v37  ;;  %v839_v9 = vsel %vm8809_vm7, 0, %v838_v12 }
 0x166   : > { %v9650_v63 = vpop.permute.xlu0 %4350  ;;  %v4615_v17 = vor.u32 %v4614_v35, %v4610_v23  ;;  %840 = vst [vmem:[#allocation3 + $0x98] sm:$0x1] %v839_v9  ;;  %v1612_v12 = vshll.u32 %v8045_v57, 16  ;;  %v1619_v34 = vrot.slane %v1617_v18, 7  ;;  %v8447_v9 = vld [vmem:[#allocation3 + $0x30] sm:$0xff]  }
 0x167   : > { %3917 = vrot.lane.b32.xlu0 %v8431_v27, %s8727_s17  ;;  %v1620_v27 = vshll.u32 %v8046_v43, 16  ;;  %v6484_v43 = vshll.u32 %v9657_v56, 16 }
 0x168   : > { %v9645_v1 = vpop.permute.xlu1 %5086  ;;  %5373 = vrot.lane.b32.xlu1 %v5336_v58, %s8728_s20  ;;  %v784_v58 = vld [vmem:[#allocation3 + $0x90] sm:$0x1] }
 0x169   : > { %10559 = vst [vmem:[#allocation34_spill] sm:$0xff] %v9645_v1  ;;  %v3541_v1 = vsel %vm10513_vm11, %v3539_v44, %v3540_v3  ;;  %v785_v44 = vsel %vm8796_vm5, 0, %v784_v58  ;;  %v1609_v3 = vshrl.u32 %v8045_v57, 16  ;;  %v1622_v32 = vor.u32 %v1620_v27, %v1619_v34 }
 0x16a   : > { %786 = vst [vmem:[#allocation3 + $0x90] sm:$0x1] %v785_v44  ;;  %v9668_v58 = vpop.permute.xlu0 %6870  ;;  %v4620_v57 = vsel %vm10520_vm8, %v4615_v17, %v4619_v46  ;;  %v7114_v44 = vrot.slane %v8441_v15, 1  ;;  %v6486_v27 = vrot.slane %v6484_v43, 1 }
 0x16b   : > { %6579 = vrot.lane.b32.xlu0 %v6408_v45, %s8732_s24  ;;  %v1611_v61 = vrot.slane %v1609_v3, 7  ;;  %10562 = vst [vmem:[#allocation37_spill] sm:$0xff] %v9668_v58  ;;  %v8439_v45 = vld [vmem:[#allocation3 + $0x84] sm:$0xff]   ;;  %v8451_v58 = vld [vmem:[#allocation3 + $0x30] sm:$0xff]  }
 0x16c   : > { %v9655_v37 = vpop.permute.xlu1 %5553  ;;  %3577 = vrot.lane.b32.xlu1 %v3541_v1, %s8720_s16  ;;  %v1624_v1 = vrot.slane %v1619_v34, 4  ;;  %v8449_v34 = vld [vmem:[#allocation3 + $0x78] sm:$0xff]   ;;  %v8446_v43 = vld [vmem:[#allocation3 + $0x80] ss:$0 sps:$4 sm:$0x11]   ;;  %v6412_v29 = vshll.u32 %v8451_v58, 16 }
 0x16d   : > { %10560 = vst [vmem:[#allocation35_spill] sm:$0xff] %v9655_v37  ;;  %v8440_v37 = vld [vmem:[#allocation3 + $0x30] sm:$0xfe]   ;;  %v1615_v18 = vrot.slane %v1611_v61, 4  ;;  %v1614_v3 = vor.u32 %v1612_v12, %v1611_v61  ;;  %v8442_v61 = vld [vmem:[#allocation3 + $0x84] sm:$0xff]  }
 0x16e   : > { %v7113_v35 = vrot.slane %v8440_v37, 1  ;;  %v1823_v37 = vld [vmem:[#allocation3 + $0x98] sm:$0x1] }
 0x16f   : > { %4781 = vrot.lane.b32.xlu0 %v4620_v57, %s8730_s22  ;;  %v1623_v56 = vsel %vm8831_vm9, %v1615_v18, %v1622_v32  ;;  %v1824_v17 = vsel %vm8796_vm5, %v1624_v1, %v1823_v37  ;;  %v2837_v57 = vshll.u32 %v8447_v9, 16  ;;  %v9685_v18 = vpop.permute.xlu0 %5072  ;;  %v6489_v1 = vshll.u32 %v8446_v43, 16 }
 0x170   : > { %v9664_v23 = vpop.permute.xlu1 %3756  ;;  %2133 = vrot.lane.b32.xlu1 %v8436_v19, %s8716_s7  ;;  %1822 = vst.msk [vmem:[#allocation3 + $0x94] sm:$0xf] %vm10509_vm1, %v1623_v56  ;;  %v5317_v19 = vrot.slane %v8444_v5, 1  ;;  %1825 = vst [vmem:[#allocation3 + $0x98] sm:$0x1] %v1824_v17  ;;  %v7115_v12 = vsel %vm10513_vm11, %v7113_v35, %v7114_v44  ;;  %v2835_v5 = vshrl.u32 %v8447_v9, 16  ;;  %v6487_v35 = vor.u32 %v6486_v27, %v6482_v24 }
 0x171   : > { %10561 = vst [vmem:[#allocation36_spill] sm:$0xff] %v9664_v23  ;;  %v8443_v23 = vld [vmem:[#allocation3 + $0x30] sm:$0xfe]   ;;  %10564 = vst [vmem:[#allocation39_spill] sm:$0xff] %v9685_v18  ;;  %v2839_v37 = vrot.slane %v2837_v57, 1  ;;  %v4694_v44 = vshrl.u32 %v8449_v34, 16 }
 0x172   : > { %v5316_v15 = vrot.slane %v8443_v23, 1  ;;  %v1819_v46 = vld [vmem:[#allocation3 + $0x90] sm:$0xf]  ;;  %v8448_v23 = vld [vmem:[#allocation3 + $0x38] ss:$0 sps:$4 sm:$0x11]  }
 0x173   : > { %v1820_v32 = vsel %vm8837_vm10, %v1614_v3, %v1819_v46  ;;  %7159 = vrot.lane.b32.xlu0 %v7115_v12, %s8731_s23  ;;  %v4696_v17 = vshll.u32 %v8449_v34, 16  ;;  %v2840_v3 = vor.u32 %v2839_v37, %v2835_v5  ;;  %v2842_v46 = vshll.u32 %v8448_v23, 16  ;;  %v8450_v12 = vld [vmem:[#allocation3 + $0x80] ss:$0 sps:$4 sm:$0x11]  }
 0x174   : > { %v9675_v21 = vpop.permute.xlu1 %6164  ;;  %5729 = vrot.lane.b32.xlu1 %v8439_v45, %s8729_s21  ;;  %1821 = vst [vmem:[#allocation3 + $0x90] sm:$0xf] %v1820_v32  ;;  %v5318_v56 = vsel %vm10513_vm11, %v5316_v15, %v5317_v19  ;;  %v8455_v32 = vld [vmem:[#allocation3 + $0x30] sm:$0xff]   ;;  %v4701_v57 = vshll.u32 %v8450_v12, 16  ;;  %v6410_v18 = vshrl.u32 %v8451_v58, 16  ;;  %v9695_v19 = vpop.permute.xlu0 %5539 }
 0x175   : > { %10563 = vst [vmem:[#allocation38_spill] sm:$0xff] %v9675_v21  ;;  %v6491_v21 = vrot.slane %v6489_v1, 1  ;;  %v4698_v43 = vrot.slane %v4696_v17, 1  ;;  %v2844_v9 = vrot.slane %v2842_v46, 1  ;;  %v4622_v15 = vshrl.u32 %v8455_v32, 16 }
 0x176   : > { %v8452_v34 = vld [vmem:[#allocation3 + $0x38] ss:$0 sps:$4 sm:$0x11]   ;;  %v4703_v1 = vrot.slane %v4701_v57, 1  ;;  %v4624_v23 = vshll.u32 %v8455_v32, 16 }
 0x177   : > { %5361 = vrot.lane.b32.xlu0 %v5318_v56, %s8728_s20  ;;  %v6492_v24 = vsel %vm10520_vm8, %v6487_v35, %v6491_v21  ;;  %v4699_v27 = vor.u32 %v4698_v43, %v4694_v44  ;;  %v6417_v58 = vshll.u32 %v8452_v34, 16  ;;  %v8454_v37 = vld [vmem:[#allocation3 + $0x8c] ss:$0 sps:$4 sm:$0x11]  }
 0x178   : > { %v9687_v45 = vpop.permute.xlu1 %4366  ;;  %3931 = vrot.lane.b32.xlu1 %v8442_v61, %s8727_s17  ;;  %v2845_v61 = vsel %vm10520_vm8, %v2840_v3, %v2844_v9  ;;  %v7135_v17 = vrot.slane %v8454_v37, 1  ;;  %v8456_v46 = vld [vmem:[#allocation3 + $0x38] ss:$0 sps:$4 sm:$0x11]   ;;  %v4626_v12 = vrot.slane %v4624_v23, 1  ;;  %v8463_v3 = vld [vmem:[#allocation3 + $0x48] sm:$0xff]  }
 0x179   : > { %10565 = vst [vmem:[#allocation40_spill] sm:$0xff] %v9687_v45  ;;  %v6414_v45 = vrot.slane %v6412_v29, 1  ;;  %v8453_v29 = vld [vmem:[#allocation3 + $0x84] sm:$0xfe]   ;;  %v4704_v21 = vsel %vm10520_vm8, %v4699_v27, %v4703_v1  ;;  %v6419_v35 = vrot.slane %v6417_v58, 1  ;;  %v4629_v32 = vshll.u32 %v8456_v46, 16 }
 0x17a   : > { %v7134_v44 = vrot.slane %v8453_v29, 1  ;;  %v8457_v9 = vld [vmem:[#allocation3 + $0x84] sm:$0xfe]   ;;  %v8458_v57 = vld [vmem:[#allocation3 + $0x8c] ss:$0 sps:$4 sm:$0x11]  }
 0x17b   : > { %2986 = vrot.lane.b32.xlu0 %v2845_v61, %s8718_s27  ;;  %v6415_v5 = vor.u32 %v6414_v45, %v6410_v18  ;;  %v4627_v45 = vor.u32 %v4626_v12, %v4622_v15  ;;  %v4631_v34 = vrot.slane %v4629_v32, 1  ;;  %v5337_v61 = vrot.slane %v8457_v9, 1  ;;  %v8460_v15 = vld [vmem:[#allocation3 + $0x84] sm:$0xfe]   ;;  %v8167_v37 = vpop.f32.mrb[24].mxu0 }
 0x17c   : > { %v9692_v7 = vpop.permute.xlu1 %6886  ;;  %6593 = vrot.lane.b32.xlu1 %v6492_v24, %s8732_s24  ;;  %v2859_v24 = vshrl.u32 %v8463_v3, 16  ;;  %v7136_v27 = vsel %vm10513_vm11, %v7134_v44, %v7135_v17  ;;  %v5338_v1 = vrot.slane %v8458_v57, 1  ;;  %v8461_v29 = vld [vmem:[#allocation3 + $0x8c] ss:$0 sps:$4 sm:$0x11]   ;;  %v3542_v17 = vrot.slane %v8460_v15, 1 }
 0x17d   : > { %v6420_v43 = vsel %vm10520_vm8, %v6415_v5, %v6419_v35  ;;  %v2114_v18 = vpop.permute.xlu0 %2113  ;;  %v2861_v5 = vshll.u32 %v8463_v3, 16  ;;  %v4632_v58 = vsel %vm10520_vm8, %v4627_v45, %v4631_v34  ;;  %v8048_v35 = vpack.c.bf16 %v8167_v37, %v8167_v37  ;;  %v841_v32 = vld [vmem:[#allocation3 + $0xa4] sm:$0x1]  ;;  %v8465_v37 = vld [vmem:[#allocation3 + $0x90] sm:$0xff]  }
 0x17e   : > { %2161 = vst.msk [vmem:[#allocation4 + $0x8] sm:$0xff] %vm10510_vm13, %v2114_v18  ;;  %v5339_v44 = vsel %vm10513_vm11, %v5337_v61, %v5338_v1  ;;  %v3543_v46 = vrot.slane %v8461_v29, 1  ;;  %v842_v57 = vsel %vm8809_vm7, 0, %v841_v32 }
 0x17f   : > { %6581 = vrot.lane.b32.xlu0 %v6420_v43, %s8732_s24  ;;  %2595 = vst.msk [vmem:[#allocation4 + $0x8] sm:$0xff] %vm10511_vm14, %v9289_v38  ;;  %v8464_v38 = vld [vmem:[#allocation3 + $0x50] ss:$0 sps:$4 sm:$0x11]   ;;  %v2863_v12 = vrot.slane %v2861_v5, 1  ;;  %v1634_v3 = vshrl.u32 %v8048_v35, 16 }
 0x180   : > { %v9700_v56 = vpop.permute.xlu1 %5088  ;;  %4795 = vrot.lane.b32.xlu1 %v4704_v21, %s8730_s22  ;;  %v8459_v21 = vld [vmem:[#allocation3 + $0x48] sm:$0xff]   ;;  %v1637_v9 = vshll.u32 %v8048_v35, 16  ;;  %v2866_v45 = vshll.u32 %v8464_v38, 16  ;;  %v3544_v61 = vsel %vm10513_vm11, %v3542_v17, %v3543_v46  ;;  %843 = vst [vmem:[#allocation3 + $0xa4] sm:$0x1] %v842_v57  ;;  %v580_v5 = vpop.f32.mrb[25].mxu0 }
 0x181   : > { %v3912_v43 = vpop.permute.xlu0 %3911  ;;  %v2864_v18 = vor.u32 %v2863_v12, %v2859_v24  ;;  %v1636_v1 = vrot.slane %v1634_v3, 7  ;;  %v8047_v29 = vpack.c.bf16 %v580_v5, %v580_v5  ;;  %v8170_v46 = vpop.f32.mrb[26].mxu0  ;;  %v844_v38 = vld [vmem:[#allocation3 + $0xb0] sm:$0x1]  ;;  %v8467_v12 = vld [vmem:[#allocation3 + $0x60] sm:$0xff]  }
 0x182   : > { %3960 = vst.msk [vmem:[#allocation4] sm:$0xff] %vm10506_vm4, %v3912_v43  ;;  %v2868_v15 = vrot.slane %v2866_v45, 1  ;;  %v845_v43 = vsel %vm8809_vm7, 0, %v844_v38  ;;  %v8050_v32 = vpack.c.bf16 %v8170_v46, %v8170_v46  ;;  %v590_v3 = vpop.f32.mrb[27].mxu0  ;;  %v790_v45 = vld [vmem:[#allocation3 + $0xa8] sm:$0x1] }
 0x183   : > { %4783 = vrot.lane.b32.xlu0 %v4632_v58, %s8730_s22  ;;  %v787_v58 = vld [vmem:[#allocation3 + $0x9c] sm:$0x1]  ;;  %v1641_v35 = vrot.slane %v1636_v1, 4  ;;  %v1629_v17 = vshll.u32 %v8047_v29, 16  ;;  %846 = vst [vmem:[#allocation3 + $0xb0] sm:$0x1] %v845_v43 }
 0x184   : > { %7173 = vrot.lane.b32.xlu1 %v7136_v27, %s8731_s23  ;;  %v9711_v23 = vpop.permute.xlu1 %5555  ;;  %v8466_v27 = vld [vmem:[#allocation2 + $0x18] sm:$0xff]   ;;  %v788_v24 = vsel %vm8796_vm5, 0, %v787_v58  ;;  %v1651_v5 = vshrl.u32 %v8050_v32, 16  ;;  %v1654_v58 = vshll.u32 %v8050_v32, 16  ;;  %4393 = vst.msk [vmem:[#allocation4] sm:$0xff] %vm10514_vm6, %v9497_v36 }
 0x185   : > { %10566 = vst [vmem:[#allocation41_spill] sm:$0xff] %v9711_v23  ;;  %1985 = vst.msk [vmem:[#allocation4 + $0x10] sm:$0xff] %vm10512_vm12, %v8466_v27  ;;  %v8468_v27 = vld [vmem:[#allocation3 + $0x90] sm:$0xff]   ;;  %v8472_v23 = vld [vmem:[#allocation3 + $0x8c] ss:$0 sps:$4 sm:$0x11]  }
 0x186   : > { %789 = vst [vmem:[#allocation3 + $0x9c] sm:$0x1] %v788_v24  ;;  %v8470_v24 = vld [vmem:[#allocation3 + $0x68] ss:$0 sps:$4 sm:$0x11]  }
 0x187   : > { %2123 = vrot.lane.b32.xlu0 %v8459_v21, %s8716_s7  ;;  %v2869_v21 = vsel %vm10520_vm8, %v2864_v18, %v2868_v15  ;;  %v1639_v18 = vor.u32 %v1637_v9, %v1636_v1  ;;  %v8469_v15 = vld [vmem:[#allocation3 + $0x60] sm:$0xff]  }
 0x188   : > { %5375 = vrot.lane.b32.xlu1 %v5339_v44, %s8728_s20  ;;  %v2116_v34 = vpop.permute.xlu1 %2115  ;;  %v1626_v44 = vshrl.u32 %v8047_v29, 16  ;;  %v1830_v29 = vld [vmem:[#allocation3 + $0xa4] sm:$0x1]  ;;  %v2883_v43 = vshrl.u32 %v8469_v15, 16 }
 0x189   : > { %2162 = vst.msk [vmem:[#allocation4 + $0x10] sm:$0xff] %vm10510_vm13, %v2116_v34  ;;  %v8049_v34 = vpack.c.bf16 %v590_v3, %v590_v3  ;;  %v8471_v9 = vld [vmem:[#allocation3 + $0x84] sm:$0xff]   ;;  %v1831_v1 = vsel %vm8796_vm5, %v1641_v35, %v1830_v29  ;;  %v2885_v3 = vshll.u32 %v8469_v15, 16 }
 0x18a   : > { %2596 = vst.msk [vmem:[#allocation4 + $0x10] sm:$0xff] %vm10511_vm14, %v9249_v8  ;;  %v1628_v57 = vrot.slane %v1626_v44, 7  ;;  %v791_v8 = vsel %vm8796_vm5, 0, %v790_v45  ;;  %v1653_v44 = vrot.slane %v1651_v5, 7  ;;  %v8473_v45 = vld [vmem:[#allocation2 + $0x24] sm:$0xff]  }
 0x18b   : > { %2990 = vrot.lane.b32.xlu0 %v2869_v21, %s8718_s27  ;;  %792 = vst [vmem:[#allocation3 + $0xa8] sm:$0x1] %v791_v8  ;;  %v1643_v38 = vshrl.u32 %v8049_v34, 16  ;;  %1832 = vst [vmem:[#allocation3 + $0xa4] sm:$0x1] %v1831_v1  ;;  %v2887_v5 = vrot.slane %v2885_v3, 1 }
 0x18c   : > { %3579 = vrot.lane.b32.xlu1 %v3544_v61, %s8720_s16  ;;  %v1631_v21 = vor.u32 %v1629_v17, %v1628_v57  ;;  %v1632_v46 = vrot.slane %v1628_v57, 4  ;;  %v2890_v57 = vshll.u32 %v8470_v24, 16  ;;  %v1656_v35 = vor.u32 %v1654_v58, %v1653_v44  ;;  %1986 = vst.msk [vmem:[#allocation4 + $0x18] sm:$0xff] %vm10512_vm12, %v8473_v45  ;;  %v8475_v45 = vld [vmem:[#allocation3 + $0x84] sm:$0xff]  }
 0x18d   : > { %v1826_v8 = vld [vmem:[#allocation3 + $0x9c] sm:$0xf]  ;;  %v1645_v17 = vrot.slane %v1643_v38, 7  ;;  %v2888_v24 = vor.u32 %v2887_v5, %v2883_v43  ;;  %v2919_v38 = vshrl.u32 %v8471_v9, 16  ;;  %v6496_v5 = vshll.u32 %v8475_v45, 16 }
 0x18e   : > { %v1640_v32 = vsel %vm8831_vm9, %v1632_v46, %v1639_v18  ;;  %v2892_v46 = vrot.slane %v2890_v57, 1  ;;  %v8474_v57 = vld [vmem:[#allocation3 + $0x78] sm:$0xff]  }
 0x18f   : > { %2127 = vrot.lane.b32.xlu0 %v8467_v12, %s8716_s7  ;;  %1829 = vst.msk [vmem:[#allocation3 + $0xa0] sm:$0xf] %vm10509_vm1, %v1640_v32  ;;  %v1658_v12 = vrot.slane %v1653_v44, 4  ;;  %v1649_v18 = vrot.slane %v1645_v17, 4 }
 0x190   : > { %5731 = vrot.lane.b32.xlu1 %v8465_v37, %s8729_s21  ;;  %v1646_v37 = vshll.u32 %v8049_v34, 16  ;;  %v1827_v34 = vsel %vm8837_vm10, %v1631_v21, %v1826_v8  ;;  %v2921_v21 = vshll.u32 %v8471_v9, 16  ;;  %v2893_v9 = vsel %vm10520_vm8, %v2888_v24, %v2892_v46  ;;  %v8477_v8 = vld [vmem:[#allocation3 + $0x78] sm:$0xff]   ;;  %v8479_v24 = vld [vmem:[#allocation3 + $0x84] sm:$0xff]  }
 0x191   : > { %v9736_v61 = vpop.permute.xlu0 %5355  ;;  %1828 = vst [vmem:[#allocation3 + $0x9c] sm:$0xf] %v1827_v34  ;;  %v1657_v44 = vsel %vm8831_vm9, %v1649_v18, %v1656_v35  ;;  %v6494_v34 = vshrl.u32 %v8475_v45, 16  ;;  %v6498_v18 = vrot.slane %v6496_v5, 1 }
 0x192   : > { %v1648_v1 = vor.u32 %v1646_v37, %v1645_v17  ;;  %v1833_v3 = vld [vmem:[#allocation3 + $0xa8] sm:$0xf]  ;;  %v2926_v37 = vshll.u32 %v8472_v23, 16  ;;  %1836 = vst.msk [vmem:[#allocation3 + $0xac] sm:$0xf] %vm10509_vm1, %v1657_v44  ;;  %v2923_v43 = vrot.slane %v2921_v21, 1 }
 0x193   : > { %2994 = vrot.lane.b32.xlu0 %v2893_v9, %s8718_s27  ;;  %v6499_v44 = vor.u32 %v6498_v18, %v6494_v34  ;;  %v4708_v9 = vshll.u32 %v8479_v24, 16  ;;  %v8484_v18 = vld [vmem:[#allocation3 + $0x98] ss:$0 sps:$4 sm:$0x11]  }
 0x194   : > { %3933 = vrot.lane.b32.xlu1 %v8468_v27, %s8727_s17  ;;  %v1837_v27 = vld [vmem:[#allocation3 + $0xb0] sm:$0x1]  ;;  %v1834_v32 = vsel %vm8837_vm10, %v1648_v1, %v1833_v3  ;;  %v2928_v17 = vrot.slane %v2926_v37, 1  ;;  %v2924_v35 = vor.u32 %v2923_v43, %v2919_v38  ;;  %v4706_v37 = vshrl.u32 %v8479_v24, 16 }
 0x195   : > { %v3560_v29 = vpop.permute.xlu0 %3559  ;;  %v1838_v58 = vsel %vm8796_vm5, %v1658_v12, %v1837_v27  ;;  %1835 = vst [vmem:[#allocation3 + $0xa8] sm:$0xf] %v1834_v32  ;;  %v8476_v12 = vld [vmem:[#allocation3 + $0x8c] ss:$0 sps:$4 sm:$0x11]  }
 0x196   : > { %v2981_v15 = vpop.permute.xlu1 %2980  ;;  %1839 = vst [vmem:[#allocation3 + $0xb0] sm:$0x1] %v1838_v58  ;;  %v2929_v1 = vsel %vm10520_vm8, %v2924_v35, %v2928_v17  ;;  %v6501_v46 = vshll.u32 %v8476_v12, 16  ;;  %v8478_v27 = vld [vmem:[#allocation3 + $0x80] ss:$0 sps:$4 sm:$0x11]  }
 0x197   : > { %3028 = vst.msk [vmem:[#allocation4 + $0x8] sm:$0xff] %vm10517_vm15, %v2981_v15  ;;  %v2909_v15 = vshll.u32 %v8477_v8, 16  ;;  %2131 = vrot.lane.b32.xlu0 %v8474_v57, %s8716_s7  ;;  %v8481_v58 = vld [vmem:[#allocation2 + $0x3c] sm:$0xff]   ;;  %v2914_v3 = vshll.u32 %v8478_v27, 16  ;;  %v8173_v17 = vpop.f32.mrb[28].mxu0  ;;  %v4710_v57 = vrot.slane %v4708_v9, 1 }
 0x198   : > { %3318 = vst.msk [vmem:[#allocation4 + $0x8] sm:$0xff] %vm10518_vm2, %v9418_v59  ;;  %3000 = vrot.lane.b32.xlu1 %v2929_v1, %s8718_s27  ;;  %v8480_v32 = vld [vmem:[#allocation3 + $0x8c] ss:$0 sps:$4 sm:$0x11]   ;;  %v8052_v12 = vpack.c.bf16 %v8173_v17, %v8173_v17  ;;  %v8482_v1 = vld [vmem:[#allocation3 + $0x90] sm:$0xff]  }
 0x199   : > { %3607 = vst.msk [vmem:[#allocation4 + $0x8] sm:$0xff] %vm10508_vm0, %v3560_v29  ;;  %v9760_v59 = vpop.permute.xlu0 %5711  ;;  %v2907_v29 = vshrl.u32 %v8477_v8, 16  ;;  %v2911_v21 = vrot.slane %v2909_v15, 1  ;;  %v2916_v8 = vrot.slane %v2914_v3, 1  ;;  %v4713_v34 = vshll.u32 %v8480_v32, 16 }
 0x19a   : > { %3784 = vst.msk [vmem:[#allocation4 + $0x8] sm:$0xff] %vm10507_vm3, %v9530_v22  ;;  %v2118_v23 = vpop.permute.xlu1 %2117  ;;  %v7138_v3 = vrot.slane %v8484_v18, 1  ;;  %vm5114_vm3 = vcmask 359744   ;;  %vm5403_vm0 = vcmask 392544  }
 0x19b   : > { %2163 = vst.msk [vmem:[#allocation4 + $0x18] sm:$0xff] %vm10510_vm13, %v2118_v23  ;;  %v2912_v45 = vor.u32 %v2911_v21, %v2907_v29  ;;  %v4711_v29 = vor.u32 %v4710_v57, %v4706_v37  ;;  %v4715_v15 = vrot.slane %v4713_v34, 1  ;;  %v600_v21 = vpop.f32.mrb[29].mxu0  ;;  %v793_v37 = vld [vmem:[#allocation3 + $0xb4] sm:$0x1] }
 0x19c   : > { %2597 = vst.msk [vmem:[#allocation4 + $0x18] sm:$0xff] %vm10511_vm14, %v9306_v0  ;;  %v6503_v0 = vrot.slane %v6501_v46, 1  ;;  %v847_v46 = vld [vmem:[#allocation3 + $0xbc] sm:$0x1]  ;;  %v794_v9 = vsel %vm8796_vm5, 0, %v793_v37 }
 0x19d   : > { %v3914_v22 = vpop.permute.xlu0 %3913  ;;  %1988 = vst.msk [vmem:[#allocation4 + $0x28] sm:$0xff] %vm10512_vm12, %v8481_v58  ;;  %v2917_v5 = vsel %vm10520_vm8, %v2912_v45, %v2916_v8  ;;  %v848_v24 = vsel %vm8809_vm7, 0, %v847_v46  ;;  %v8485_v58 = vld [vmem:[#allocation3 + $0x90] sm:$0xff]   ;;  %v8489_v45 = vld [vmem:[#allocation2 + $0x54] sm:$0xff]   ;;  %795 = vst [vmem:[#allocation3 + $0xb4] sm:$0x1] %v794_v9 }
 0x19e   : > { %v2985_v38 = vpop.permute.xlu1 %2984  ;;  %3961 = vst.msk [vmem:[#allocation4 + $0x8] sm:$0xff] %vm10506_vm4, %v3914_v22  ;;  %v6504_v43 = vsel %vm10520_vm8, %v6499_v44, %v6503_v0  ;;  %2998 = vrot.lane.b32.xlu0 %v2917_v5, %s8718_s27  ;;  %v1668_v22 = vshrl.u32 %v8052_v12, 16  ;;  %v4716_v0 = vsel %vm10520_vm8, %v4711_v29, %v4715_v15  ;;  %849 = vst [vmem:[#allocation3 + $0xbc] sm:$0x1] %v848_v24  ;;  %vm4825_vm4 = vcmask 326944  }
 0x19f   : > { %3030 = vst.msk [vmem:[#allocation4 + $0x18] sm:$0xff] %vm10517_vm15, %v2985_v38  ;;  %6595 = vrot.lane.b32.xlu1 %v6504_v43, %s8732_s24  ;;  %v1671_v38 = vshll.u32 %v8052_v12, 16  ;;  %v8051_v43 = vpack.c.bf16 %v600_v21, %v600_v21  ;;  %v2931_v36 = vshrl.u32 %v8485_v58, 16  ;;  %v2933_v8 = vshll.u32 %v8485_v58, 16  ;;  %v8490_v58 = vld [vmem:[#allocation3 + $0xa8] sm:$0xff]  }
 0x1a0   : > { %3320 = vst.msk [vmem:[#allocation4 + $0x18] sm:$0xff] %vm10518_vm2, %v9432_v31  ;;  %v8483_v31 = vld [vmem:[#allocation3 + $0x90] sm:$0xfe]   ;;  %v1670_v32 = vrot.slane %v1668_v22, 7 }
 0x1a1   : > { %v4778_v23 = vpop.permute.xlu0 %4777  ;;  %v7137_v27 = vrot.slane %v8483_v31, 1  ;;  %4394 = vst.msk [vmem:[#allocation4 + $0x8] sm:$0xff] %vm10514_vm6, %v9551_v53  ;;  %v8486_v17 = vld [vmem:[#allocation3 + $0x98] ss:$0 sps:$4 sm:$0x11]  }
 0x1a2   : > { %v2122_v35 = vpop.permute.xlu1 %2121  ;;  %2135 = vrot.lane.b32.xlu0 %v8482_v1, %s8716_s7  ;;  %4826 = vst.msk [vmem:[#allocation4] sm:$0xff] %vm4825_vm4, %v4778_v23  ;;  %v1675_v34 = vrot.slane %v1670_v32, 4  ;;  %v1660_v23 = vshrl.u32 %v8051_v43, 16  ;;  %v2938_v5 = vshll.u32 %v8486_v17, 16  ;;  %v8487_v31 = vld [vmem:[#allocation3 + $0x90] sm:$0xfe]   ;;  %v1673_v29 = vor.u32 %v1671_v38, %v1670_v32 }
 0x1a3   : > { %2165 = vst.msk [vmem:[#allocation4 + $0x28] sm:$0xff] %vm10510_vm13, %v2122_v35  ;;  %4797 = vrot.lane.b32.xlu1 %v4716_v0, %s8730_s22  ;;  %v7139_v53 = vsel %vm10513_vm11, %v7137_v27, %v7138_v3  ;;  %v2935_v35 = vrot.slane %v2933_v8, 1  ;;  %v8488_v1 = vld [vmem:[#allocation3 + $0x98] ss:$0 sps:$4 sm:$0x11]   ;;  %v8491_v32 = vld [vmem:[#allocation3 + $0x9c] sm:$0xff]  }
 0x1a4   : > { %2599 = vst.msk [vmem:[#allocation4 + $0x28] sm:$0xff] %vm10511_vm14, %v9317_v47  ;;  %v1662_v15 = vrot.slane %v1660_v23, 7  ;;  %v2940_v46 = vrot.slane %v2938_v5, 1  ;;  %v5341_v21 = vrot.slane %v8488_v1, 1  ;;  %v1840_v3 = vld [vmem:[#allocation3 + $0xb4] sm:$0xf] }
 0x1a5   : > { %v9785_v44 = vpop.permute.xlu0 %7155  ;;  %1990 = vst.msk [vmem:[#allocation4 + $0x38] sm:$0xff] %vm10512_vm12, %v8489_v45  ;;  %v1844_v18 = vld [vmem:[#allocation3 + $0xbc] sm:$0x1]  ;;  %v8492_v9 = vld [vmem:[#allocation3 + $0x30] sm:$0xfe]  }
 0x1a6   : > { %v2989_v47 = vpop.permute.xlu1 %2988  ;;  %5115 = vst.msk [vmem:[#allocation4] sm:$0xff] %vm5114_vm3, %v9505_v11  ;;  %v2936_v11 = vor.u32 %v2935_v35, %v2931_v36  ;;  %v1845_v27 = vsel %vm8796_vm5, %v1675_v34, %v1844_v18  ;;  %v1666_v22 = vrot.slane %v1662_v15, 4  ;;  %v8494_v36 = vld [vmem:[#allocation3 + $0x90] sm:$0xff]   ;;  %v8495_v34 = vld [vmem:[#allocation3 + $0x98] ss:$0 sps:$4 sm:$0x11]  }
 0x1a7   : > { %3032 = vst.msk [vmem:[#allocation4 + $0x28] sm:$0xff] %vm10517_vm15, %v2989_v47  ;;  %7175 = vrot.lane.b32.xlu1 %v7139_v53, %s8731_s23  ;;  %1846 = vst [vmem:[#allocation3 + $0xbc] sm:$0x1] %v1845_v27  ;;  %v3521_v53 = vrot.slane %v8492_v9, 1  ;;  %v6506_v23 = vshrl.u32 %v8494_v36, 16  ;;  %v8496_v35 = vld [vmem:[#allocation3 + $0xa8] sm:$0xff]  }
 0x1a8   : > { %3322 = vst.msk [vmem:[#allocation4 + $0x28] sm:$0xff] %vm10518_vm2, %v9447_v4  ;;  %v1663_v4 = vshll.u32 %v8051_v43, 16  ;;  %v2941_v38 = vsel %vm10520_vm8, %v2936_v11, %v2940_v46  ;;  %v8493_v43 = vld [vmem:[#allocation3 + $0x38] ss:$0 sps:$4 sm:$0x11]   ;;  %v8498_v11 = vld [vmem:[#allocation3 + $0x90] sm:$0xff]  }
 0x1a9   : > { %v9804_v57 = vpop.permute.xlu0 %5357  ;;  %5404 = vst.msk [vmem:[#allocation4] sm:$0xff] %vm5403_vm0, %v9736_v61  ;;  %v5340_v61 = vrot.slane %v8487_v31, 1  ;;  %3002 = vrot.lane.b32.xlu0 %v2941_v38, %s8718_s27  ;;  %v3522_v17 = vrot.slane %v8493_v43, 1  ;;  %v8497_v5 = vld [vmem:[#allocation3 + $0xb0] ss:$0 sps:$4 sm:$0x11]  }
 0x1aa   : > { %v2126_v12 = vpop.permute.xlu1 %2125  ;;  %v1665_v24 = vor.u32 %v1663_v4, %v1662_v15  ;;  %v2957_v15 = vshll.u32 %v8496_v35, 16  ;;  %v8500_v38 = vld [vmem:[#allocation2 + $0x6c] sm:$0xff]  }
 0x1ab   : > { %2167 = vst.msk [vmem:[#allocation4 + $0x38] sm:$0xff] %vm10510_vm13, %v2126_v12  ;;  %v5342_v45 = vsel %vm10513_vm11, %v5340_v61, %v5341_v21  ;;  %v6513_v12 = vshll.u32 %v8495_v34, 16  ;;  %v3523_v18 = vsel %vm10513_vm11, %v3521_v53, %v3522_v17  ;;  %v2962_v61 = vshll.u32 %v8497_v5, 16  ;;  %v8499_v21 = vld [vmem:[#allocation3 + $0x98] ss:$0 sps:$4 sm:$0x11]  }
 0x1ac   : > { %2601 = vst.msk [vmem:[#allocation4 + $0x38] sm:$0xff] %vm10511_vm14, %v9328_v54  ;;  %v1674_v54 = vsel %vm8831_vm9, %v1666_v22, %v1673_v29  ;;  %v1841_v37 = vsel %vm8837_vm10, %v1665_v24, %v1840_v3  ;;  %5377 = vrot.lane.b32.xlu1 %v5342_v45, %s8728_s20  ;;  %v2955_v29 = vshrl.u32 %v8496_v35, 16  ;;  %v2959_v22 = vrot.slane %v2957_v15, 1  ;;  %v8502_v34 = vld [vmem:[#allocation3 + $0x90] sm:$0xfe]   ;;  %v8505_v35 = vld [vmem:[#allocation3 + $0x9c] sm:$0xff]  }
 0x1ad   : > { %v9816_v47 = vpop.permute.xlu0 %3561  ;;  %1842 = vst [vmem:[#allocation3 + $0xb4] sm:$0xf] %v1841_v37  ;;  %1843 = vst.msk [vmem:[#allocation3 + $0xb8] sm:$0xf] %vm10509_vm1, %v1674_v54  ;;  %2139 = vrot.lane.b32.xlu0 %v8490_v58, %s8716_s7  ;;  %v6515_v46 = vrot.slane %v6513_v12, 1  ;;  %v4718_v58 = vshrl.u32 %v8498_v11, 16 }
 0x1ae   : > { %v2993_v0 = vpop.permute.xlu1 %2992  ;;  %v2964_v3 = vrot.slane %v2962_v61, 1  ;;  %v2960_v37 = vor.u32 %v2959_v22, %v2955_v29  ;;  %1992 = vst.msk [vmem:[#allocation4 + $0x48] sm:$0xff] %vm10512_vm12, %v8500_v38  ;;  %vm5581_vm1 = vcmask 425344   ;;  %v3545_v5 = vrot.slane %v8502_v34, 1  ;;  %v8504_v15 = vld [vmem:[#allocation2 + $0x3c] sm:$0xff]  }
 0x1af   : > { %3034 = vst.msk [vmem:[#allocation4 + $0x38] sm:$0xff] %vm10517_vm15, %v2993_v0  ;;  %v4720_v0 = vshll.u32 %v8498_v11, 16  ;;  %vm10569_vm12 = vcmask 261344   ;;  %v8508_v22 = vld [vmem:[#allocation2 + $0x44] ss:$0 sps:$4 sm:$0x11]  }
 0x1b0   : > { %3324 = vst.msk [vmem:[#allocation4 + $0x38] sm:$0xff] %vm10518_vm2, %v9461_v50  ;;  %v6508_v50 = vshll.u32 %v8494_v36, 16  ;;  %2137 = vrot.lane.b32.xlu1 %v8491_v32, %s8716_s7  ;;  %v4725_v32 = vshll.u32 %v8499_v21, 16  ;;  %v2965_v36 = vsel %vm10520_vm8, %v2960_v37, %v2964_v3  ;;  %v5996_v3 = vshll.u32 %v8508_v22, 16  ;;  %v8512_v37 = vld [vmem:[#allocation3 + $0x3c] sm:$0xff]  }
 0x1b1   : > { %v9830_v4 = vpop.permute.xlu0 %5713  ;;  %3565 = vrot.lane.b32.xlu0 %v3523_v18, %s8720_s16  ;;  %v4722_v45 = vrot.slane %v4720_v0, 1  ;;  %5582 = vst.msk [vmem:[#allocation4] sm:$0xff] %vm5581_vm1, %v9521_v48  ;;  %v8507_v48 = vld [vmem:[#allocation2 + $0x3c] sm:$0xff]   ;;  %v8520_v22 = vld [vmem:[#allocation2 + $0x44] ss:$0 sps:$4 sm:$0x11]  }
 0x1b2   : > { %v9828_v8 = vpop.permute.xlu1 %3573  ;;  %v6510_v31 = vrot.slane %v6508_v50, 1  ;;  %v4727_v17 = vrot.slane %v4725_v32, 1  ;;  %v8503_v50 = vld [vmem:[#allocation3 + $0x98] ss:$0 sps:$4 sm:$0x11]   ;;  %v5989_v18 = vshrl.u32 %v8507_v48, 16 }
 0x1b3   : > { %v4723_v53 = vor.u32 %v4722_v45, %v4718_v58  ;;  %v3546_v29 = vrot.slane %v8503_v50, 1  ;;  %v6422_v32 = vshrl.u32 %v8512_v37, 16  ;;  %v8516_v50 = vld [vmem:[#allocation2 + $0x3c] sm:$0xff]   ;;  %v8653_v40 = vld [vmem:[#allocation3 + $0xbc] ss:$0 sps:$4 sm:$0x11]  }
 0x1b4   : > { %v6511_v24 = vor.u32 %v6510_v31, %v6506_v23  ;;  %v8501_v23 = vld [vmem:[#allocation3 + $0x3c] sm:$0xff]  }
 0x1b5   : > { %v3916_v27 = vpop.permute.xlu0 %3915  ;;  %3006 = vrot.lane.b32.xlu0 %v2965_v36, %s8718_s27  ;;  %v4728_v12 = vsel %vm10520_vm8, %v4723_v53, %v4727_v17  ;;  %v8514_v36 = vld [vmem:[#allocation3 + $0xb4] sm:$0xff]   ;;  %v8515_v17 = vld [vmem:[#allocation3 + $0xbc] ss:$0 sps:$4 sm:$0x11]  }
 0x1b6   : > { %v2130_v1 = vpop.permute.xlu1 %2129  ;;  %v6516_v54 = vsel %vm10520_vm8, %v6511_v24, %v6515_v46  ;;  %v3547_v46 = vsel %vm10513_vm11, %v3545_v5, %v3546_v29  ;;  %vm10521_vm11 = vcmask 556544   ;;  %v2967_v34 = vshrl.u32 %v8514_v36, 16  ;;  %v8517_v29 = vld [vmem:[#allocation2 + $0x44] ss:$0 sps:$4 sm:$0x11]  }
 0x1b7   : > { %6597 = vrot.lane.b32.xlu1 %v6516_v54, %s8732_s24  ;;  %2169 = vst.msk [vmem:[#allocation4 + $0x48] sm:$0xff] %vm10510_vm13, %v2130_v1  ;;  %vm10567_vm13 = vcmask 195744   ;;  %v8506_v1 = vld [vmem:[#allocation3 + $0xa4] ss:$0 sps:$4 sm:$0x11]   ;;  %v5998_v54 = vrot.slane %v5996_v3, 1 }
 0x1b8   : > { %2603 = vst.msk [vmem:[#allocation4 + $0x48] sm:$0xff] %vm10511_vm14, %v9343_v13  ;;  %v2943_v13 = vshrl.u32 %v8505_v35, 16  ;;  %vm10568_vm14 = vcmask 228544   ;;  %v2950_v24 = vshll.u32 %v8506_v1, 16  ;;  %v2974_v5 = vshll.u32 %v8515_v17, 16  ;;  %v8523_v3 = vld [vmem:[#allocation3 + $0x3c] sm:$0xff]  }
 0x1b9   : > { %v2983_v43 = vpop.permute.xlu0 %2982  ;;  %5717 = vrot.lane.b32.xlu0 %v8501_v23, %s8729_s21 }
 0x1ba   : > { %v9837_v9 = vpop.permute.xlu1 %3927  ;;  %3029 = vst.msk [vmem:[#allocation4 + $0x10] sm:$0xff] %vm10517_vm15, %v2983_v43  ;;  %v2952_v0 = vrot.slane %v2950_v24, 1  ;;  %v6424_v43 = vshll.u32 %v8512_v37, 16  ;;  %v8519_v24 = vld [vmem:[#allocation2 + $0x3c] sm:$0xfe]  }
 0x1bb   : > { %3319 = vst.msk [vmem:[#allocation4 + $0x10] sm:$0xff] %vm10518_vm2, %v9339_v6  ;;  %4799 = vrot.lane.b32.xlu1 %v4728_v12, %s8730_s22  ;;  %v2945_v6 = vshll.u32 %v8505_v35, 16  ;;  %v8511_v35 = vld [vmem:[#allocation3 + $0x9c] sm:$0xff]  }
 0x1bc   : > { %3608 = vst.msk [vmem:[#allocation4 + $0x10] sm:$0xff] %vm10567_vm13, %v9816_v47  ;;  %v5991_v47 = vshll.u32 %v8507_v48, 16  ;;  %vm10516_vm13 = vcmask 458144  }
 0x1bd   : > { %3785 = vst.msk [vmem:[#allocation4 + $0x10] sm:$0xff] %vm10568_vm14, %v9579_v55  ;;  %v6578_v11 = vpop.permute.xlu0 %6577  ;;  %v2947_v61 = vrot.slane %v2945_v6, 1  ;;  %3742 = vrot.lane.b32.xlu0 %v8504_v15, %s8721_s30  ;;  %vm6625_vm14 = vcmask 523744   ;;  %v4201_v15 = vshrl.u32 %v8516_v50, 16 }
 0x1be   : > { %v9854_v31 = vpop.permute.xlu1 %5371  ;;  %3962 = vst.msk [vmem:[#allocation4 + $0x10] sm:$0xff] %vm10569_vm12, %v3916_v27  ;;  %v5993_v55 = vrot.slane %v5991_v47, 1  ;;  %vm10515_vm12 = vcmask 490944   ;;  %v4208_v47 = vshll.u32 %v8517_v29, 16 }
 0x1bf   : > { %4395 = vst.msk [vmem:[#allocation4 + $0x10] sm:$0xff] %vm10514_vm6, %v9599_v16  ;;  %3581 = vrot.lane.b32.xlu1 %v3547_v46, %s8720_s16  ;;  %v2948_v27 = vor.u32 %v2947_v61, %v2943_v13  ;;  %vm10519_vm6 = vcmask 589344   ;;  %v8528_v29 = vld [vmem:[#allocation3 + $0x44] ss:$0 sps:$4 sm:$0x11]  }
 0x1c0   : > { %5760 = vst.msk [vmem:[#allocation4] sm:$0xff] %vm10516_vm13, %v9760_v59  ;;  %v5994_v16 = vor.u32 %v5993_v55, %v5989_v18  ;;  %v8521_v55 = vld [vmem:[#allocation2 + $0x9c] sm:$0xff]  }
 0x1c1   : > { %v4780_v58 = vpop.permute.xlu0 %4779  ;;  %6193 = vst.msk [vmem:[#allocation4] sm:$0xff] %vm10515_vm12, %v9538_v51  ;;  %v2953_v38 = vsel %vm10520_vm8, %v2948_v27, %v2952_v0  ;;  %v8509_v51 = vld [vmem:[#allocation3 + $0xb4] sm:$0xff]   ;;  %v4210_v0 = vrot.slane %v4208_v47, 1 }
 0x1c2   : > { %v9864_v21 = vpop.permute.xlu1 %3575  ;;  %4827 = vst.msk [vmem:[#allocation4 + $0x8] sm:$0xff] %vm4825_vm4, %v4780_v58  ;;  %v5999_v45 = vsel %vm10520_vm8, %v5994_v16, %v5998_v54  ;;  %v6828_v16 = vrot.slane %v8520_v22, 1  ;;  %v6087_v54 = vshll.u32 %v8521_v55, 16  ;;  %v8531_v22 = vld [vmem:[#allocation2 + $0x3c] sm:$0xfe]  }
 0x1c3   : > { %5116 = vst.msk [vmem:[#allocation4 + $0x8] sm:$0xff] %vm5114_vm3, %v9566_v39  ;;  %3004 = vrot.lane.b32.xlu1 %v2953_v38, %s8718_s27  ;;  %6150 = vrot.lane.b32.xlu0 %v5999_v45, %s8725_s10  ;;  %v6085_v38 = vshrl.u32 %v8521_v55, 16  ;;  %v8518_v45 = vld [vmem:[#allocation2 + $0x9c] sm:$0xff]   ;;  %v8539_v55 = vld [vmem:[#allocation2 + $0x84] sm:$0xff]  }
 0x1c4   : > { %6626 = vst.msk [vmem:[#allocation4] sm:$0xff] %vm6625_vm14, %v6578_v11  ;;  %v2976_v11 = vrot.slane %v2974_v5, 1 }
 0x1c5   : > { %5405 = vst.msk [vmem:[#allocation4 + $0x8] sm:$0xff] %vm5403_vm0, %v9804_v57  ;;  %v9886_v39 = vpop.permute.xlu0 %7157  ;;  %v8513_v57 = vld [vmem:[#allocation3 + $0x44] ss:$0 sps:$4 sm:$0x11]  }
 0x1c6   : > { %v9879_v59 = vpop.permute.xlu1 %5727  ;;  %6915 = vst.msk [vmem:[#allocation4] sm:$0xff] %vm10521_vm11, %v9559_v20  ;;  %v8510_v20 = vld [vmem:[#allocation3 + $0x3c] sm:$0xff]   ;;  %v6429_v53 = vshll.u32 %v8513_v57, 16 }
 0x1c7   : > { %5583 = vst.msk [vmem:[#allocation4 + $0x8] sm:$0xff] %vm5581_vm1, %v9572_v28  ;;  %v6426_v28 = vrot.slane %v6424_v43, 1  ;;  %2141 = vrot.lane.b32.xlu1 %v8509_v51, %s8716_s7  ;;  %3919 = vrot.lane.b32.xlu0 %v8510_v20, %s8727_s17  ;;  %v8524_v43 = vld [vmem:[#allocation3 + $0x44] ss:$0 sps:$4 sm:$0x11]  }
 0x1c8   : > { %7204 = vst.msk [vmem:[#allocation4] sm:$0xff] %vm10519_vm6, %v9785_v44  ;;  %v2969_v44 = vshll.u32 %v8514_v36, 16  ;;  %v6431_v13 = vrot.slane %v6429_v53, 1 }
 0x1c9   : > { %5761 = vst.msk [vmem:[#allocation4 + $0x8] sm:$0xff] %vm10516_vm13, %v9830_v4  ;;  %v9897_v4 = vpop.permute.xlu0 %5359  ;;  %v6427_v12 = vor.u32 %v6426_v28, %v6422_v32  ;;  %v4634_v28 = vshrl.u32 %v8523_v3, 16 }
 0x1ca   : > { %6194 = vst.msk [vmem:[#allocation4 + $0x8] sm:$0xff] %vm10515_vm12, %v9591_v26  ;;  %v3930_v23 = vpop.permute.xlu1 %3929  ;;  %v2971_v48 = vrot.slane %v2969_v44, 1  ;;  %v4203_v26 = vshll.u32 %v8516_v50, 16  ;;  %vm10570_vm12 = vcmask 195744   ;;  %v8526_v44 = vld [vmem:[#allocation2 + $0x30] sm:$0xff]  }
 0x1cb   : > { %5733 = vrot.lane.b32.xlu1 %v8511_v35, %s8729_s21  ;;  %v6432_v61 = vsel %vm10520_vm8, %v6427_v12, %v6431_v13  ;;  %vm10571_vm13 = vmmov %vm10570_vm12  ;;  %v8529_v50 = vld [vmem:[#allocation3 + $0x9c] sm:$0xff]  }
 0x1cc   : > { %v2972_v6 = vor.u32 %v2971_v48, %v2967_v34  ;;  %v4205_v18 = vrot.slane %v4203_v26, 1  ;;  %6583 = vrot.lane.b32.xlu0 %v6432_v61, %s8732_s24  ;;  %v8527_v48 = vld [vmem:[#allocation3 + $0x3c] sm:$0xfe]   ;;  %v8533_v61 = vld [vmem:[#allocation2 + $0x9c] sm:$0xff]  }
 0x1cd   : > { %v3564_v46 = vpop.permute.xlu0 %3563  ;;  %v8525_v26 = vld [vmem:[#allocation3 + $0x9c] sm:$0xff]   ;;  %v7116_v13 = vrot.slane %v8527_v48, 1 }
 0x1ce   : > { %v2997_v1 = vpop.permute.xlu1 %2996  ;;  %3609 = vst.msk [vmem:[#allocation4 + $0x18] sm:$0xff] %vm10570_vm12, %v3564_v46  ;;  %v2977_v58 = vsel %vm10520_vm8, %v2972_v6, %v2976_v11  ;;  %v4206_v27 = vor.u32 %v4205_v18, %v4201_v15  ;;  %vm10574_vm12 = vcmask 261344   ;;  %v7117_v11 = vrot.slane %v8528_v29, 1 }
 0x1cf   : > { %3036 = vst.msk [vmem:[#allocation4 + $0x48] sm:$0xff] %vm10517_vm15, %v2997_v1  ;;  %vm10572_vm15 = vcmask 228544   ;;  %3008 = vrot.lane.b32.xlu1 %v2977_v58, %s8718_s27  ;;  %v8530_v1 = vld [vmem:[#allocation3 + $0xa4] ss:$0 sps:$4 sm:$0x11]   ;;  %v6518_v6 = vshrl.u32 %v8529_v50, 16 }
 0x1d0   : > { %3326 = vst.msk [vmem:[#allocation4 + $0x48] sm:$0xff] %vm10518_vm2, %v9474_v41  ;;  %vm10573_vm2 = vmmov %vm10572_vm15  ;;  %v6827_v41 = vrot.slane %v8519_v24, 1  ;;  %v4211_v51 = vsel %vm10520_vm8, %v4206_v27, %v4210_v0  ;;  %v6520_v46 = vshll.u32 %v8529_v50, 16  ;;  %v6525_v24 = vshll.u32 %v8530_v1, 16 }
 0x1d1   : > { %3615 = vst.msk [vmem:[#allocation4 + $0x48] sm:$0xff] %vm10571_vm13, %v9864_v21  ;;  %v8522_v21 = vld [vmem:[#allocation2 + $0xa4] ss:$0 sps:$4 sm:$0x11]   ;;  %v2120_v57 = vpop.permute.xlu0 %2119  ;;  %4352 = vrot.lane.b32.xlu0 %v4211_v51, %s8722_s6  ;;  %vm10577_vm13 = vcmask 31744  }
 0x1d2   : > { %3786 = vst.msk [vmem:[#allocation4 + $0x18] sm:$0xff] %vm10572_vm15, %v9635_v2  ;;  %v9914_v37 = vpop.permute.xlu1 %4793  ;;  %v6089_v2 = vrot.slane %v6087_v54, 1  ;;  %vm10575_vm15 = vcmask 294144   ;;  %v6092_v32 = vshll.u32 %v8522_v21, 16  ;;  %v4299_v21 = vshll.u32 %v8533_v61, 16 }
 0x1d3   : > { %3792 = vst.msk [vmem:[#allocation4 + $0x48] sm:$0xff] %vm10573_vm2, %v9562_v60  ;;  %v4636_v60 = vshll.u32 %v8523_v3, 16  ;;  %vm10576_vm2 = vcmask 1046528   ;;  %3758 = vrot.lane.b32.xlu1 %v8518_v45, %s8721_s30  ;;  %v8532_v58 = vld [vmem:[#allocation2 + $0x44] ss:$0 sps:$4 sm:$0x11]  }
 0x1d4   : > { %3969 = vst.msk [vmem:[#allocation4 + $0x48] sm:$0xff] %vm10574_vm12, %v3930_v23  ;;  %v6829_v36 = vsel %vm10576_vm2, %v6827_v41, %v6828_v16  ;;  %v6090_v20 = vor.u32 %v6089_v2, %v6085_v38  ;;  %v6094_v34 = vrot.slane %v6092_v32, 1  ;;  %v4641_v23 = vshll.u32 %v8524_v43, 16  ;;  %v8534_v51 = vld [vmem:[#allocation2 + $0xa4] ss:$0 sps:$4 sm:$0x11]  }
 0x1d5   : > { %4402 = vst.msk [vmem:[#allocation4 + $0x48] sm:$0xff] %vm10575_vm15, %v9575_v49  ;;  %v4638_v53 = vrot.slane %v4636_v60, 1  ;;  %v9926_v35 = vpop.permute.xlu0 %5715  ;;  %6872 = vrot.lane.b32.xlu0 %v6829_v36, %s8726_s11  ;;  %vm10578_vm12 = vcmask 64544   ;;  %vm10579_vm15 = vcmask 97344   ;;  %vm10580_vm2 = vcmask 261344  }
 0x1d6   : > { %v9923_v17 = vpop.permute.xlu1 %7171  ;;  %v6095_v12 = vsel %vm10520_vm8, %v6090_v20, %v6094_v34  ;;  %v4643_v5 = vrot.slane %v4641_v23, 1  ;;  %1987 = vst.msk [vmem:[#allocation4 + $0x20] sm:$0xff] %vm10577_vm13, %v8526_v44  ;;  %vm10581_vm13 = vcmask 294144   ;;  %v6527_v3 = vrot.slane %v6525_v24, 1  ;;  %v8535_v32 = vld [vmem:[#allocation3 + $0x3c] sm:$0xfe]  }
 0x1d7   : > { %v4639_v49 = vor.u32 %v4638_v53, %v4634_v28  ;;  %2164 = vst.msk [vmem:[#allocation4 + $0x20] sm:$0xff] %vm10578_vm12, %v2120_v57  ;;  %6166 = vrot.lane.b32.xlu1 %v6095_v12, %s8725_s10  ;;  %vm10582_vm12 = vcmask 1046528   ;;  %v5030_v41 = vrot.slane %v8531_v22, 1  ;;  %v5031_v54 = vrot.slane %v8532_v58, 1  ;;  %v8537_v34 = vld [vmem:[#allocation2 + $0x9c] sm:$0xfe]  }
 0x1d8   : > { %2598 = vst.msk [vmem:[#allocation4 + $0x20] sm:$0xff] %vm10579_vm15, %v9257_v25  ;;  %v6522_v25 = vrot.slane %v6520_v46, 1  ;;  %v7118_v0 = vsel %vm10582_vm12, %v7116_v13, %v7117_v11  ;;  %vm10583_vm15 = vcmask 31744   ;;  %v4297_v45 = vshrl.u32 %v8533_v61, 16  ;;  %v10590_v11 = vld [vmem:[#allocation33_spill] sm:$0xff] }
 0x1d9   : > { %v3918_v18 = vpop.permute.xlu0 %3917  ;;  %v4644_v47 = vsel %vm10520_vm8, %v4639_v49, %v4643_v5  ;;  %1994 = vst.msk [vmem:[#allocation4 + $0x58] sm:$0xff] %vm10583_vm15, %v8539_v55  ;;  %v4301_v2 = vrot.slane %v4299_v21, 1  ;;  %v4304_v60 = vshll.u32 %v8534_v51, 16  ;;  %v8536_v36 = vld [vmem:[#allocation3 + $0x44] ss:$0 sps:$4 sm:$0x11]  }
 0x1da   : > { %v9932_v15 = vpop.permute.xlu1 %5373  ;;  %3963 = vst.msk [vmem:[#allocation4 + $0x18] sm:$0xff] %vm10580_vm2, %v3918_v18  ;;  %4785 = vrot.lane.b32.xlu0 %v4644_v47, %s8730_s22  ;;  %v6523_v38 = vor.u32 %v6522_v25, %v6518_v6  ;;  %vm10584_vm2 = vmmov %vm10582_vm12  ;;  %vm10586_vm12 = vcmask 97344   ;;  %v5320_v23 = vrot.slane %v8536_v36, 1  ;;  %v6851_v50 = vrot.slane %v8537_v34, 1  ;;  %v8541_v49 = vld [vmem:[#allocation3 + $0x9c] sm:$0xff]   ;;  %v8553_v6 = vld [vmem:[#allocation2 + $0x48] sm:$0xff]  }
 0x1db   : > { %4396 = vst.msk [vmem:[#allocation4 + $0x18] sm:$0xff] %vm10581_vm13, %v9650_v63  ;;  %3935 = vrot.lane.b32.xlu1 %v8525_v26, %s8727_s17  ;;  %v5032_v57 = vsel %vm10584_vm2, %v5030_v41, %v5031_v54  ;;  %vm10585_vm13 = vcmask 64544   ;;  %v4302_v28 = vor.u32 %v4301_v2, %v4297_v45  ;;  %v4306_v53 = vrot.slane %v4304_v60, 1  ;;  %vm10587_vm15 = vmmov %vm10584_vm2  ;;  %v8540_v26 = vld [vmem:[#allocation2 + $0x48] sm:$0xff]   ;;  %v8543_v47 = vld [vmem:[#allocation3 + $0x3c] sm:$0xfe]  }
 0x1dc   : > { %v6528_v63 = vsel %vm10520_vm8, %v6523_v38, %v6527_v3  ;;  %v4732_v29 = vshll.u32 %v8541_v49, 16  ;;  %vm10588_vm2 = vcmask 458144   ;;  %v8542_v13 = vld [vmem:[#allocation3 + $0xa4] ss:$0 sps:$4 sm:$0x11]   ;;  %v3524_v22 = vrot.slane %v8543_v47, 1 }
 0x1dd   : > { %v6580_v16 = vpop.permute.xlu0 %6579  ;;  %v4307_v44 = vsel %vm10520_vm8, %v4302_v28, %v4306_v53  ;;  %v4737_v18 = vshll.u32 %v8542_v13, 16  ;;  %v8544_v46 = vld [vmem:[#allocation3 + $0x44] ss:$0 sps:$4 sm:$0x11]   ;;  %v8545_v25 = vld [vmem:[#allocation3 + $0x9c] sm:$0xfe]  }
 0x1de   : > { %v9942_v27 = vpop.permute.xlu1 %3577  ;;  %6627 = vst.msk [vmem:[#allocation4 + $0x8] sm:$0xff] %vm6625_vm14, %v6580_v16  ;;  %7161 = vrot.lane.b32.xlu0 %v7118_v0, %s8731_s23  ;;  %v4734_v1 = vrot.slane %v4732_v29, 1  ;;  %v3525_v55 = vrot.slane %v8544_v46, 1  ;;  %v8546_v58 = vld [vmem:[#allocation3 + $0xa4] ss:$0 sps:$4 sm:$0x11]  }
 0x1df   : > { %6916 = vst.msk [vmem:[#allocation4 + $0x8] sm:$0xff] %vm10521_vm11, %v9612_v30  ;;  %6599 = vrot.lane.b32.xlu1 %v6528_v63, %s8732_s24  ;;  %v5319_v30 = vrot.slane %v8535_v32, 1  ;;  %v4739_v24 = vrot.slane %v4737_v18, 1  ;;  %v6003_v3 = vshll.u32 %v8553_v6, 16  ;;  %v7140_v16 = vrot.slane %v8545_v25, 1  ;;  %v8547_v21 = vld [vmem:[#allocation3 + $0x48] sm:$0xff]  }
 0x1e0   : > { %7205 = vst.msk [vmem:[#allocation4 + $0x8] sm:$0xff] %vm10519_vm6, %v9886_v39  ;;  %v8538_v39 = vld [vmem:[#allocation2 + $0xa4] ss:$0 sps:$4 sm:$0x11]   ;;  %v7141_v51 = vrot.slane %v8546_v58, 1  ;;  %v6001_v45 = vshrl.u32 %v8553_v6, 16 }
 0x1e1   : > { %v4782_v20 = vpop.permute.xlu0 %4781  ;;  %v5321_v48 = vsel %vm10587_vm15, %v5319_v30, %v5320_v23  ;;  %v8548_v63 = vld [vmem:[#allocation2 + $0x9c] sm:$0xfe]   ;;  %v6005_v60 = vrot.slane %v6003_v3, 1  ;;  %v8550_v28 = vld [vmem:[#allocation2 + $0x48] sm:$0xff]   ;;  %v8551_v53 = vld [vmem:[#allocation3 + $0x9c] sm:$0xfe]  }
 0x1e2   : > { %v2134_v43 = vpop.permute.xlu1 %2133  ;;  %4828 = vst.msk [vmem:[#allocation4 + $0x10] sm:$0xff] %vm4825_vm4, %v4782_v20  ;;  %5074 = vrot.lane.b32.xlu0 %v5032_v57, %s8723_s8  ;;  %v8549_v57 = vld [vmem:[#allocation2 + $0xa4] ss:$0 sps:$4 sm:$0x11]   ;;  %v10594_v2 = vld [vmem:[#allocation10_spill] sm:$0xff]  ;;  %v5054_v36 = vrot.slane %v8548_v63, 1 }
 0x1e3   : > { %2171 = vst.msk [vmem:[#allocation4 + $0x58] sm:$0xff] %vm10585_vm13, %v2134_v43  ;;  %4368 = vrot.lane.b32.xlu1 %v4307_v44, %s8722_s6  ;;  %vm10589_vm13 = vmmov %vm10587_vm15  ;;  %v5055_v20 = vrot.slane %v8549_v57, 1  ;;  %v8552_v30 = vld [vmem:[#allocation3 + $0xa4] ss:$0 sps:$4 sm:$0x11]   ;;  %v10597_v34 = vld [vmem:[#allocation27_spill] sm:$0xff] }
 0x1e4   : > { %2605 = vst.msk [vmem:[#allocation4 + $0x58] sm:$0xff] %vm10586_vm12, %v9355_v42  ;;  %v6852_v42 = vrot.slane %v8538_v39, 1  ;;  %vm10591_vm12 = vcmask 490944   ;;  %vm10592_vm15 = vmmov %vm10589_vm13  ;;  %v8559_v39 = vld [vmem:[#allocation3 + $0x48] sm:$0xff]   ;;  %v8555_v46 = vld [vmem:[#allocation2 + $0xa8] sm:$0xff]  }
 0x1e5   : > { %5117 = vst.msk [vmem:[#allocation4 + $0x10] sm:$0xff] %vm5114_vm3, %v9620_v62  ;;  %v9971_v5 = vpop.permute.xlu0 %7159  ;;  %v4730_v62 = vshrl.u32 %v8541_v49, 16  ;;  %v3526_v54 = vsel %vm10592_vm15, %v3524_v22, %v3525_v55  ;;  %v5344_v49 = vrot.slane %v8552_v30, 1  ;;  %v8558_v18 = vld [vmem:[#allocation3 + $0xa4] ss:$0 sps:$4 sm:$0x11]  }
 0x1e6   : > { %5406 = vst.msk [vmem:[#allocation4 + $0x10] sm:$0xff] %vm5403_vm0, %v9897_v4  ;;  %v9966_v12 = vpop.permute.xlu1 %5729  ;;  %5363 = vrot.lane.b32.xlu0 %v5321_v48, %s8728_s20  ;;  %v6853_v4 = vsel %vm10589_vm13, %v6851_v50, %v6852_v42  ;;  %vm10595_vm13 = vcmask 162944   ;;  %v5343_v50 = vrot.slane %v8551_v53, 1  ;;  %v10599_v42 = vld [vmem:[#allocation28_spill] sm:$0xff]  ;;  %v8556_v58 = vld [vmem:[#allocation3 + $0x48] sm:$0xff]  }
 0x1e7   : > { %5584 = vst.msk [vmem:[#allocation4 + $0x10] sm:$0xff] %vm5581_vm1, %v9628_v33  ;;  %6888 = vrot.lane.b32.xlu1 %v6853_v4, %s8726_s11  ;;  %v8554_v48 = vld [vmem:[#allocation2 + $0x50] ss:$0 sps:$4 sm:$0x11]   ;;  %v8566_v53 = vld [vmem:[#allocation2 + $0x48] sm:$0xfe]  }
 0x1e8   : > { %5762 = vst.msk [vmem:[#allocation4 + $0x10] sm:$0xff] %vm10588_vm2, %v9926_v35  ;;  %v4735_v35 = vor.u32 %v4734_v1, %v4730_v62  ;;  %vm10593_vm2 = vcmask 130144   ;;  %v10600_v62 = vld [vmem:[#allocation37_spill] sm:$0xff]  ;;  %v6008_v4 = vshll.u32 %v8554_v48, 16  ;;  %v6830_v48 = vrot.slane %v8566_v53, 1  ;;  %v8573_v53 = vld [vmem:[#allocation3 + $0xa8] sm:$0xff]  }
 0x1e9   : > { %6195 = vst.msk [vmem:[#allocation4 + $0x10] sm:$0xff] %vm10591_vm12, %v10590_v11  ;;  %v9983_v61 = vpop.permute.xlu0 %5361  ;;  %vm10596_vm12 = vmmov %vm10592_vm15  ;;  %v6436_v11 = vshll.u32 %v8559_v39, 16  ;;  %v8557_v1 = vld [vmem:[#allocation3 + $0x9c] sm:$0xfe]  }
 0x1ea   : > { %v9980_v33 = vpop.permute.xlu1 %3931  ;;  %5541 = vrot.lane.b32.xlu0 %v8540_v26, %s8724_s9  ;;  %v4740_v41 = vsel %vm10520_vm8, %v4735_v35, %v4739_v24  ;;  %v7142_v43 = vsel %vm10596_vm12, %v7140_v16, %v7141_v51  ;;  %vm10598_vm15 = vmmov %vm10596_vm12  ;;  %v10602_v26 = vld [vmem:[#allocation30_spill] sm:$0xff]  ;;  %v6010_v6 = vrot.slane %v6008_v4, 1  ;;  %v5345_v47 = vsel %vm10596_vm12, %v5343_v50, %v5344_v49  ;;  %v8560_v22 = vld [vmem:[#allocation3 + $0x50] ss:$0 sps:$4 sm:$0x11]   ;;  %v10034_v51 = vpop.f32.mrb[30].mxu0 }
 0x1eb   : > { %4801 = vrot.lane.b32.xlu1 %v4740_v41, %s8730_s22  ;;  %v5056_v44 = vsel %vm10598_vm15, %v5054_v36, %v5055_v20  ;;  %v6434_v35 = vshrl.u32 %v8559_v39, 16  ;;  %v6438_v55 = vrot.slane %v6436_v11, 1  ;;  %v3548_v3 = vrot.slane %v8557_v1, 1  ;;  %v8570_v36 = vld [vmem:[#allocation2 + $0x60] sm:$0xff]   ;;  %v10614_v1 = vld [vmem:[#allocation6_spill] sm:$0xff] }
 0x1ec   : > { %v3549_v41 = vrot.slane %v8558_v18, 1  ;;  %v6441_v16 = vshll.u32 %v8560_v22, 16  ;;  %vm10605_vm15 = vcmask 31744   ;;  %v8567_v49 = vld [vmem:[#allocation2 + $0x50] ss:$0 sps:$4 sm:$0x11]  }
 0x1ed   : > { %v2987_v38 = vpop.permute.xlu0 %2986  ;;  %v6831_v4 = vrot.slane %v8567_v49, 1  ;;  %v8565_v18 = vld [vmem:[#allocation2 + $0xa8] sm:$0xff]   ;;  %v8576_v22 = vld [vmem:[#allocation3 + $0xa8] sm:$0xff]  }
 0x1ee   : > { %v9986_v0 = vpop.permute.xlu1 %6593  ;;  %3031 = vst.msk [vmem:[#allocation4 + $0x20] sm:$0xff] %vm10593_vm2, %v2987_v38  ;;  %3567 = vrot.lane.b32.xlu0 %v3526_v54, %s8720_s16  ;;  %vm10601_vm2 = vcmask 458144   ;;  %v8562_v38 = vld [vmem:[#allocation2 + $0x48] sm:$0xff]   ;;  %v3550_v20 = vsel %vm10596_vm12, %v3548_v3, %v3549_v41  ;;  %v8578_v3 = vld [vmem:[#allocation2 + $0x78] sm:$0xff]  }
 0x1ef   : > { %3321 = vst.msk [vmem:[#allocation4 + $0x20] sm:$0xff] %vm10595_vm13, %v10594_v2  ;;  %7177 = vrot.lane.b32.xlu1 %v7142_v43, %s8731_s23  ;;  %vm10603_vm13 = vcmask 490944  }
 0x1f0   : > { %1989 = vst.msk [vmem:[#allocation4 + $0x30] sm:$0xff] %vm10605_vm15, %v8562_v38  ;;  %vm10611_vm15 = vcmask 162944  }
 0x1f1   : > { %v6582_v23 = vpop.permute.xlu0 %6581 }
 0x1f2   : > { %v4796_v32 = vpop.permute.xlu1 %4795  ;;  %5719 = vrot.lane.b32.xlu0 %v8547_v21, %s8729_s21  ;;  %6628 = vst.msk [vmem:[#allocation4 + $0x10] sm:$0xff] %vm6625_vm14, %v6582_v23  ;;  %v6443_v21 = vrot.slane %v6441_v16, 1  ;;  %v8561_v23 = vld [vmem:[#allocation3 + $0xa8] sm:$0xff]  }
 0x1f3   : > { %4835 = vst.msk [vmem:[#allocation4 + $0x48] sm:$0xff] %vm4825_vm4, %v4796_v32  ;;  %5090 = vrot.lane.b32.xlu1 %v5056_v44, %s8723_s8  ;;  %v10607_v32 = vld [vmem:[#allocation5_spill] sm:$0xff]  ;;  %v10610_v44 = vld [vmem:[#allocation11_spill] sm:$0xff] }
 0x1f4   : > { %5124 = vst.msk [vmem:[#allocation4 + $0x48] sm:$0xff] %vm5114_vm3, %v10597_v34 }
 0x1f5   : > { %5413 = vst.msk [vmem:[#allocation4 + $0x48] sm:$0xff] %vm5403_vm0, %v9932_v15  ;;  %v6006_v15 = vor.u32 %v6005_v60, %v6001_v45  ;;  %v4784_v13 = vpop.permute.xlu0 %4783  ;;  %v6439_v45 = vor.u32 %v6438_v55, %v6434_v35  ;;  %v8568_v60 = vld [vmem:[#allocation2 + $0xa8] sm:$0xff]   ;;  %v6832_v55 = vsel %vm10596_vm12, %v6830_v48, %v6831_v4  ;;  %vm10621_vm12 = vcmask 228544   ;;  %v10626_v48 = vld [vmem:[#allocation18_spill] sm:$0xff] }
 0x1f6   : > { %5591 = vst.msk [vmem:[#allocation4 + $0x48] sm:$0xff] %vm5581_vm1, %v10599_v42  ;;  %v10009_v29 = vpop.permute.xlu1 %7173  ;;  %3744 = vrot.lane.b32.xlu0 %v8550_v28, %s8721_s30  ;;  %v6097_v30 = vshrl.u32 %v8568_v60, 16  ;;  %v8579_v4 = vld [vmem:[#allocation2 + $0x48] sm:$0xfe]  }
 0x1f7   : > { %6917 = vst.msk [vmem:[#allocation4 + $0x10] sm:$0xff] %vm10521_vm11, %v10600_v62  ;;  %5379 = vrot.lane.b32.xlu1 %v5345_v47, %s8728_s20  ;;  %v6011_v24 = vsel %vm10520_vm8, %v6006_v15, %v6010_v6  ;;  %v6444_v34 = vsel %vm10520_vm8, %v6439_v45, %v6443_v21  ;;  %v6099_v62 = vshll.u32 %v8568_v60, 16  ;;  %v8571_v6 = vld [vmem:[#allocation3 + $0x48] sm:$0xff]   ;;  %v8577_v60 = vld [vmem:[#allocation3 + $0xb0] ss:$0 sps:$4 sm:$0x11]  }
 0x1f8   : > { %5769 = vst.msk [vmem:[#allocation4 + $0x48] sm:$0xff] %vm10601_vm2, %v9966_v12  ;;  %v10604_v12 = vld [vmem:[#allocation39_spill] sm:$0xff]  ;;  %vm10606_vm2 = vcmask 64544   ;;  %v4646_v35 = vshrl.u32 %v8571_v6, 16  ;;  %vm10630_vm11 = vcmask 31744  }
 0x1f9   : > { %7206 = vst.msk [vmem:[#allocation4 + $0x10] sm:$0xff] %vm10519_vm6, %v9971_v5  ;;  %v2124_v25 = vpop.permute.xlu0 %2123  ;;  %vm10609_vm6 = vcmask 130144   ;;  %v6101_v11 = vrot.slane %v6099_v62, 1 }
 0x1fa   : > { %6202 = vst.msk [vmem:[#allocation4 + $0x48] sm:$0xff] %vm10603_vm13, %v10602_v26  ;;  %v10022_v5 = vpop.permute.xlu1 %5375  ;;  %6152 = vrot.lane.b32.xlu0 %v6011_v24, %s8725_s10  ;;  %vm10608_vm13 = vcmask 97344   ;;  %v8569_v26 = vld [vmem:[#allocation2 + $0xb0] ss:$0 sps:$4 sm:$0x11]   ;;  %v4648_v24 = vshll.u32 %v8571_v6, 16 }
 0x1fb   : > { %4829 = vst.msk [vmem:[#allocation4 + $0x18] sm:$0xff] %vm4825_vm4, %v4784_v13  ;;  %5557 = vrot.lane.b32.xlu1 %v8555_v46, %s8724_s9  ;;  %v6102_v47 = vor.u32 %v6101_v11, %v6097_v30  ;;  %v8572_v46 = vld [vmem:[#allocation3 + $0x50] ss:$0 sps:$4 sm:$0x11]   ;;  %v10620_v30 = vld [vmem:[#allocation21_spill] sm:$0xff] }
 0x1fc   : > { %5118 = vst.msk [vmem:[#allocation4 + $0x18] sm:$0xff] %vm5114_vm3, %v10604_v12  ;;  %v6104_v12 = vshll.u32 %v8569_v26, 16  ;;  %v4650_v41 = vrot.slane %v4648_v24, 1  ;;  %v4653_v16 = vshll.u32 %v8572_v46, 16  ;;  %v10633_v11 = vld [vmem:[#allocation36_spill] sm:$0xff] }
 0x1fd   : > { %5407 = vst.msk [vmem:[#allocation4 + $0x18] sm:$0xff] %vm5403_vm0, %v9983_v61  ;;  %v8563_v61 = vld [vmem:[#allocation2 + $0x48] sm:$0xff]   ;;  %v2991_v2 = vpop.permute.xlu0 %2990  ;;  %v8580_v26 = vld [vmem:[#allocation2 + $0x50] ss:$0 sps:$4 sm:$0x11]  }
 0x1fe   : > { %5585 = vst.msk [vmem:[#allocation4 + $0x18] sm:$0xff] %vm5581_vm1, %v9695_v19  ;;  %v10032_v54 = vpop.permute.xlu1 %3579  ;;  %v8564_v19 = vld [vmem:[#allocation2 + $0x50] ss:$0 sps:$4 sm:$0x11]   ;;  %3921 = vrot.lane.b32.xlu0 %v8556_v58, %s8727_s17  ;;  %v4213_v63 = vshrl.u32 %v8563_v61, 16  ;;  %v4215_v57 = vshll.u32 %v8563_v61, 16 }
 0x1ff   : > { %2166 = vst.msk [vmem:[#allocation4 + $0x30] sm:$0xff] %vm10606_vm2, %v2124_v25  ;;  %v4220_v43 = vshll.u32 %v8564_v19, 16  ;;  %3583 = vrot.lane.b32.xlu1 %v3550_v20, %s8720_s16  ;;  %vm10612_vm2 = vcmask 31744   ;;  %v6106_v25 = vrot.slane %v6104_v12, 1  ;;  %v8574_v61 = vld [vmem:[#allocation3 + $0x48] sm:$0xfe]   ;;  %v4651_v19 = vor.u32 %v4650_v41, %v4646_v35 }
 0x200   : > { %2600 = vst.msk [vmem:[#allocation4 + $0x30] sm:$0xff] %vm10608_vm13, %v10607_v32  ;;  %v4217_v28 = vrot.slane %v4215_v57, 1  ;;  %v4655_v21 = vrot.slane %v4653_v16, 1  ;;  %v10617_v57 = vld [vmem:[#allocation13_spill] sm:$0xff]  ;;  %v8581_v20 = vld [vmem:[#allocation2 + $0xa8] sm:$0xff]   ;;  %v5034_v12 = vrot.slane %v8580_v26, 1 }
 0x201   : > { %3033 = vst.msk [vmem:[#allocation4 + $0x30] sm:$0xff] %vm10609_vm6, %v2991_v2  ;;  %v4222_v39 = vrot.slane %v4220_v43, 1  ;;  %v2128_v15 = vpop.permute.xlu0 %2127  ;;  %vm10613_vm6 = vcmask 64544   ;;  %v6107_v45 = vsel %vm10520_vm8, %v6102_v47, %v6106_v25  ;;  %v7119_v2 = vrot.slane %v8574_v61, 1  ;;  %v10640_v35 = vld [vmem:[#allocation32_spill] sm:$0xff]  ;;  %v10647_v41 = vld [vmem:[#allocation25_spill] sm:$0xff] }
 0x202   : > { %3323 = vst.msk [vmem:[#allocation4 + $0x30] sm:$0xff] %vm10611_vm15, %v10610_v44  ;;  %v10048_v50 = vpop.permute.xlu1 %5731  ;;  %6585 = vrot.lane.b32.xlu0 %v6444_v34, %s8732_s24  ;;  %v4218_v42 = vor.u32 %v4217_v28, %v4213_v63  ;;  %vm10615_vm15 = vmmov %vm10612_vm2  ;;  %v8575_v63 = vld [vmem:[#allocation3 + $0x50] ss:$0 sps:$4 sm:$0x11]   ;;  %v6530_v43 = vshrl.u32 %v8576_v22, 16  ;;  %v4656_v28 = vsel %vm10520_vm8, %v4651_v19, %v4655_v21  ;;  %v8587_v44 = vld [vmem:[#allocation2 + $0x90] sm:$0xff]  }
 0x203   : > { %1991 = vst.msk [vmem:[#allocation4 + $0x40] sm:$0xff] %vm10612_vm2, %v8570_v36  ;;  %5735 = vrot.lane.b32.xlu1 %v8561_v23, %s8729_s21  ;;  %vm10616_vm2 = vcmask 130144   ;;  %v7120_v32 = vrot.slane %v8575_v63, 1  ;;  %v6532_v36 = vshll.u32 %v8576_v22, 16  ;;  %v6537_v23 = vshll.u32 %v8577_v60, 16  ;;  %v10649_v61 = vld [vmem:[#allocation15_spill] sm:$0xff] }
 0x204   : > { %2168 = vst.msk [vmem:[#allocation4 + $0x40] sm:$0xff] %vm10613_vm6, %v2128_v15  ;;  %v4223_v13 = vsel %vm10520_vm8, %v4218_v42, %v4222_v39  ;;  %vm10618_vm6 = vcmask 162944   ;;  %v4309_v49 = vshrl.u32 %v8581_v20, 16  ;;  %v10624_v42 = vld [vmem:[#allocation22_spill] sm:$0xff]  ;;  %v10628_v15 = vld [vmem:[#allocation7_spill] sm:$0xff]  ;;  %vm10629_vm8 = vcmask 97344  }
 0x205   : > { %2602 = vst.msk [vmem:[#allocation4 + $0x40] sm:$0xff] %vm10608_vm13, %v10614_v1  ;;  %v2995_v38 = vpop.permute.xlu0 %2994  ;;  %vm10619_vm13 = vcmask 195744   ;;  %v6539_v62 = vrot.slane %v6537_v23, 1  ;;  %v8582_v47 = vld [vmem:[#allocation2 + $0xb0] ss:$0 sps:$4 sm:$0x11]  }
 0x206   : > { %4354 = vrot.lane.b32.xlu0 %v4223_v13, %s8722_s6  ;;  %v3934_v58 = vpop.permute.xlu1 %3933  ;;  %1993 = vst.msk [vmem:[#allocation4 + $0x50] sm:$0xff] %vm10615_vm15, %v8578_v3  ;;  %vm10622_vm15 = vcmask 261344   ;;  %v10632_v13 = vld [vmem:[#allocation23_spill] sm:$0xff]  ;;  %v4311_v46 = vshll.u32 %v8581_v20, 16  ;;  %v10652_v63 = vld [vmem:[#allocation26_spill] sm:$0xff] }
 0x207   : > { %3760 = vrot.lane.b32.xlu1 %v8565_v18, %s8721_s30  ;;  %3035 = vst.msk [vmem:[#allocation4 + $0x40] sm:$0xff] %vm10616_vm2, %v2995_v38  ;;  %v5033_v18 = vrot.slane %v8579_v4, 1  ;;  %v8583_v25 = vld [vmem:[#allocation3 + $0x48] sm:$0xfe]  }
 0x208   : > { %3325 = vst.msk [vmem:[#allocation4 + $0x40] sm:$0xff] %vm10618_vm6, %v10617_v57  ;;  %vm10623_vm6 = vcmask 64544   ;;  %v4313_v22 = vrot.slane %v4311_v46, 1  ;;  %v8584_v3 = vld [vmem:[#allocation3 + $0x50] ss:$0 sps:$4 sm:$0x11]  }
 0x209   : > { %3614 = vst.msk [vmem:[#allocation4 + $0x40] sm:$0xff] %vm10619_vm13, %v9828_v8  ;;  %v2132_v39 = vpop.permute.xlu0 %2131  ;;  %v6534_v8 = vrot.slane %v6532_v36, 1  ;;  %vm10625_vm13 = vcmask 294144   ;;  %v5323_v19 = vrot.slane %v8584_v3, 1  ;;  %v8595_v36 = vld [vmem:[#allocation2 + $0xa8] sm:$0xff]   ;;  %v10659_v20 = vld [vmem:[#allocation31_spill] sm:$0xff] }
 0x20a   : > { %6874 = vrot.lane.b32.xlu0 %v6832_v55, %s8726_s11  ;;  %3791 = vst.msk [vmem:[#allocation4 + $0x40] sm:$0xff] %vm10621_vm12, %v10620_v30  ;;  %v3001_v34 = vpop.permute.xlu1 %3000  ;;  %vm10627_vm12 = vcmask 162944   ;;  %v4316_v55 = vshll.u32 %v8582_v47, 16  ;;  %v4314_v16 = vor.u32 %v4313_v22, %v4309_v49  ;;  %v8586_v21 = vld [vmem:[#allocation2 + $0xb0] ss:$0 sps:$4 sm:$0x11]  }
 0x20b   : > { %6168 = vrot.lane.b32.xlu1 %v6107_v45, %s8725_s10  ;;  %3968 = vst.msk [vmem:[#allocation4 + $0x40] sm:$0xff] %vm10622_vm15, %v9837_v9  ;;  %vm10631_vm15 = vcmask 195744   ;;  %v6535_v9 = vor.u32 %v6534_v8, %v6530_v43  ;;  %v5322_v45 = vrot.slane %v8583_v25, 1  ;;  %v8589_v43 = vld [vmem:[#allocation3 + $0xa8] sm:$0xff]  }
 0x20c   : > { %3038 = vst.msk [vmem:[#allocation4 + $0x58] sm:$0xff] %vm10616_vm2, %v3001_v34  ;;  %vm10634_vm2 = vcmask 228544   ;;  %v4318_v38 = vrot.slane %v4316_v55, 1  ;;  %v4742_v30 = vshrl.u32 %v8589_v43, 16  ;;  %v8598_v55 = vld [vmem:[#allocation2 + $0xa8] sm:$0xfe]  }
 0x20d   : > { %2170 = vst.msk [vmem:[#allocation4 + $0x50] sm:$0xff] %vm10623_vm6, %v2132_v39  ;;  %vm10639_vm6 = vmmov %vm10625_vm13  ;;  %v8590_v23 = vld [vmem:[#allocation3 + $0xb0] ss:$0 sps:$4 sm:$0x11]   ;;  %v8596_v39 = vld [vmem:[#allocation2 + $0x9c] sm:$0xff]  }
 0x20e   : > { %4787 = vrot.lane.b32.xlu0 %v4656_v28, %s8730_s22  ;;  %4401 = vst.msk [vmem:[#allocation4 + $0x40] sm:$0xff] %vm10625_vm13, %v10624_v42  ;;  %vm10641_vm13 = vcmask 556544   ;;  %v4749_v49 = vshll.u32 %v8590_v23, 16  ;;  %v8591_v42 = vld [vmem:[#allocation3 + $0x48] sm:$0xfe]  }
 0x20f   : > { %3328 = vst.msk [vmem:[#allocation4 + $0x58] sm:$0xff] %vm10627_vm12, %v10626_v48  ;;  %3937 = vrot.lane.b32.xlu1 %v8573_v53, %s8727_s17  ;;  %v10662_v53 = vld [vmem:[#allocation8_spill] sm:$0xff]  ;;  %v3527_v26 = vrot.slane %v8591_v42, 1  ;;  %v8599_v3 = vld [vmem:[#allocation2 + $0xb0] ss:$0 sps:$4 sm:$0x11]  }
 0x210   : > { %2604 = vst.msk [vmem:[#allocation4 + $0x50] sm:$0xff] %vm10629_vm8, %v10628_v15  ;;  %vm10635_vm8 = vcmask 1046528   ;;  %v8592_v48 = vld [vmem:[#allocation3 + $0x50] ss:$0 sps:$4 sm:$0x11]   ;;  %v4751_v4 = vrot.slane %v4749_v49, 1 }
 0x211   : > { %1995 = vst.msk [vmem:[#allocation4 + $0x60] sm:$0xff] %vm10630_vm11, %v8587_v44  ;;  %v7121_v1 = vsel %vm10635_vm8, %v7119_v2, %v7120_v32  ;;  %v6596_v6 = vpop.permute.xlu1 %6595  ;;  %vm10636_vm11 = vcmask 261344   ;;  %vm10642_vm12 = vmmov %vm10635_vm8  ;;  %vm10645_vm8 = vcmask 589344   ;;  %v10654_v2 = vld [vmem:[#allocation29_spill] sm:$0xff]  ;;  %v10666_v44 = vld [vmem:[#allocation34_spill] sm:$0xff] }
 0x212   : > { %4834 = vst.msk [vmem:[#allocation4 + $0x40] sm:$0xff] %vm4825_vm4, %v9914_v37  ;;  %7163 = vrot.lane.b32.xlu0 %v7121_v1, %s8731_s23  ;;  %v10637_v37 = vld [vmem:[#allocation24_spill] sm:$0xff]  ;;  %v5035_v24 = vsel %vm10642_vm12, %v5033_v18, %v5034_v12  ;;  %vm10651_vm12 = vcmask 195744   ;;  %v10690_v49 = vld [vmem:[#allocation17_spill] sm:$0xff] }
 0x213   : > { %3617 = vst.msk [vmem:[#allocation4 + $0x58] sm:$0xff] %vm10631_vm15, %v10032_v54  ;;  %v10638_v54 = vld [vmem:[#allocation40_spill] sm:$0xff]  ;;  %vm10643_vm15 = vcmask 458144  }
 0x214   : > { %5123 = vst.msk [vmem:[#allocation4 + $0x40] sm:$0xff] %vm5114_vm3, %v10632_v13  ;;  %v7220_v13 = vld [vmem:[#allocation4] sm:$0xff] }
 0x215   : > { %3794 = vst.msk [vmem:[#allocation4 + $0x58] sm:$0xff] %vm10634_vm2, %v10633_v11  ;;  %vm10644_vm2 = vsmask.f32 7424  ;;  %v10670_v11 = vld [vmem:[#allocation38_spill] sm:$0xff] }
 0x216   : > { %5412 = vst.msk [vmem:[#allocation4 + $0x40] sm:$0xff] %vm5403_vm0, %v9854_v31  ;;  %v2999_v31 = vpop.permute.xlu0 %2998  ;;  %5076 = vrot.lane.b32.xlu0 %v5035_v24, %s8723_s8  ;;  %v4319_v57 = vsel %vm10644_vm2, %v4314_v16, %v4318_v38  ;;  %v5057_v16 = vrot.slane %v8598_v55, 1  ;;  %v8603_v38 = vld [vmem:[#allocation2 + $0x54] sm:$0xff]  }
 0x217   : > { %3971 = vst.msk [vmem:[#allocation4 + $0x58] sm:$0xff] %vm10636_vm11, %v3934_v58  ;;  %v6540_v58 = vsel %vm10644_vm2, %v6535_v9, %v6539_v62  ;;  %vm10646_vm11 = vcmask 130144   ;;  %vm10663_vm2 = vcmask 97344   ;;  %v10668_v62 = vld [vmem:[#allocation35_spill] sm:$0xff]  ;;  %v3528_v9 = vrot.slane %v8592_v48, 1 }
 0x218   : > { %6635 = vst.msk [vmem:[#allocation4 + $0x48] sm:$0xff] %vm6625_vm14, %v6596_v6  ;;  %6601 = vrot.lane.b32.xlu1 %v6540_v58, %s8732_s24  ;;  %v8594_v6 = vld [vmem:[#allocation3 + $0xb0] ss:$0 sps:$4 sm:$0x11]   ;;  %v8597_v58 = vld [vmem:[#allocation3 + $0x54] sm:$0xff]  }
 0x219   : > { %5590 = vst.msk [vmem:[#allocation4 + $0x40] sm:$0xff] %vm5581_vm1, %v10637_v37  ;;  %v10674_v37 = vld [vmem:[#allocation16_spill] sm:$0xff] }
 0x21a   : > { %4404 = vst.msk [vmem:[#allocation4 + $0x58] sm:$0xff] %vm10639_vm6, %v10638_v54  ;;  %vm10648_vm6 = vcmask 490944   ;;  %v2136_v32 = vpop.permute.xlu0 %2135 }
 0x21b   : > { %6924 = vst.msk [vmem:[#allocation4 + $0x48] sm:$0xff] %vm10641_vm13, %v10640_v35  ;;  %vm10650_vm13 = vcmask 162944   ;;  %v7144_v35 = vrot.slane %v8594_v6, 1  ;;  %v7222_v6 = vld [vmem:[#allocation4 + $0x10] sm:$0xff] }
 0x21c   : > { %5768 = vst.msk [vmem:[#allocation4 + $0x40] sm:$0xff] %vm10643_vm15, %v9879_v59  ;;  %v8585_v59 = vld [vmem:[#allocation2 + $0xa8] sm:$0xfe]   ;;  %vm10653_vm15 = vcmask 556544   ;;  %4370 = vrot.lane.b32.xlu1 %v4319_v57, %s8722_s6 }
 0x21d   : > { %7213 = vst.msk [vmem:[#allocation4 + $0x48] sm:$0xff] %vm10645_vm8, %v10009_v29  ;;  %v4798_v29 = vpop.permute.xlu1 %4797  ;;  %vm10655_vm8 = vcmask 228544   ;;  %v6854_v60 = vrot.slane %v8585_v59, 1  ;;  %v8600_v59 = vld [vmem:[#allocation2 + $0x54] sm:$0xff]  }
 0x21e   : > { %3037 = vst.msk [vmem:[#allocation4 + $0x50] sm:$0xff] %vm10646_vm11, %v2999_v31  ;;  %vm10656_vm11 = vcmask 589344   ;;  %v3003_v1 = vpop.permute.xlu0 %3002 }
 0x21f   : > { %6201 = vst.msk [vmem:[#allocation4 + $0x40] sm:$0xff] %vm10648_vm6, %v10647_v41  ;;  %vm10657_vm6 = vcmask 261344   ;;  %v10679_v41 = vld [vmem:[#allocation9_spill] sm:$0xff] }
 0x220   : > { %3327 = vst.msk [vmem:[#allocation4 + $0x50] sm:$0xff] %vm10650_vm13, %v10649_v61  ;;  %vm10658_vm13 = vcmask 64544   ;;  %v10682_v61 = vld [vmem:[#allocation12_spill] sm:$0xff] }
 0x221   : > { %6634 = vst.msk [vmem:[#allocation4 + $0x40] sm:$0xff] %vm6625_vm14, %v9986_v0  ;;  %v8588_v0 = vld [vmem:[#allocation2 + $0x54] sm:$0xff]   ;;  %v10141_v34 = vpop.permute.xlu1 %7175 }
 0x222   : > { %3616 = vst.msk [vmem:[#allocation4 + $0x50] sm:$0xff] %vm10651_vm12, %v9942_v27  ;;  %v6855_v27 = vrot.slane %v8586_v21, 1  ;;  %vm10660_vm12 = vcmask 294144   ;;  %v2140_v22 = vpop.permute.xlu0 %2139  ;;  %v8602_v21 = vld [vmem:[#allocation3 + $0xb0] ss:$0 sps:$4 sm:$0x11]  }
 0x223   : > { %6923 = vst.msk [vmem:[#allocation4 + $0x40] sm:$0xff] %vm10653_vm15, %v10652_v63  ;;  %vm10661_vm15 = vcmask 1046528   ;;  %v6013_v63 = vshrl.u32 %v8603_v38, 16 }
 0x224   : > { %3793 = vst.msk [vmem:[#allocation4 + $0x50] sm:$0xff] %vm10655_vm8, %v10654_v2  ;;  %v5324_v28 = vsel %vm10661_vm15, %v5322_v45, %v5323_v19  ;;  %vm10664_vm8 = vmmov %vm10661_vm15  ;;  %vm10671_vm15 = vcmask 490944   ;;  %v7229_v24 = vld [vmem:[#allocation4 + $0x48] sm:$0xff]  ;;  %v5058_v45 = vrot.slane %v8599_v3, 1 }
 0x225   : > { %7212 = vst.msk [vmem:[#allocation4 + $0x40] sm:$0xff] %vm10656_vm11, %v9923_v17  ;;  %v4744_v17 = vshll.u32 %v8589_v43, 16  ;;  %5365 = vrot.lane.b32.xlu0 %v5324_v28, %s8728_s20  ;;  %vm10665_vm11 = vcmask 31744   ;;  %v10159_v47 = vpop.permute.xlu1 %5377  ;;  %v8604_v43 = vld [vmem:[#allocation2 + $0x5c] ss:$0 sps:$4 sm:$0x11]  }
 0x226   : > { %3970 = vst.msk [vmem:[#allocation4 + $0x50] sm:$0xff] %vm10657_vm6, %v9980_v33  ;;  %v6856_v33 = vsel %vm10664_vm8, %v6854_v60, %v6855_v27  ;;  %vm7237_vm6 = vcmask 588800   ;;  %vm10673_vm8 = vcmask 130144   ;;  %v3566_v19 = vpop.permute.xlu0 %3565  ;;  %v6015_v60 = vshll.u32 %v8603_v38, 16  ;;  %v8605_v28 = vld [vmem:[#allocation2 + $0xb4] sm:$0xff]  }
 0x227   : > { %2172 = vst.msk [vmem:[#allocation4 + $0x60] sm:$0xff] %vm10658_vm13, %v2136_v32  ;;  %v4746_v8 = vrot.slane %v4744_v17, 1  ;;  %vm10667_vm13 = vmmov %vm10665_vm11  ;;  %6890 = vrot.lane.b32.xlu1 %v6856_v33, %s8726_s11  ;;  %v7242_v46 = vsel %vm7237_vm6, %v7220_v13, 0  ;;  %v5347_v32 = vrot.slane %v8602_v21, 1  ;;  %v8612_v13 = vld [vmem:[#allocation2 + $0xb4] sm:$0xff]  }
 0x228   : > { %4403 = vst.msk [vmem:[#allocation4 + $0x50] sm:$0xff] %vm10660_vm12, %v10659_v20  ;;  %vm10669_vm12 = vcmask 458144   ;;  %v6020_v20 = vshll.u32 %v8604_v43, 16  ;;  %v8616_v38 = vld [vmem:[#allocation2 + $0x54] sm:$0xfe]  }
 0x229   : > { %2606 = vst.msk [vmem:[#allocation4 + $0x60] sm:$0xff] %vm10663_vm2, %v10662_v53  ;;  %v4747_v15 = vor.u32 %v4746_v8, %v4742_v30  ;;  %5543 = vrot.lane.b32.xlu0 %v8588_v0, %s8724_s9  ;;  %vm10672_vm2 = vsmask.f32 7424  ;;  %v2138_v25 = vpop.permute.xlu1 %2137  ;;  %v6017_v0 = vrot.slane %v6015_v60, 1  ;;  %v8609_v30 = vld [vmem:[#allocation3 + $0x54] sm:$0xff]  }
 0x22a   : > { %4836 = vst.msk [vmem:[#allocation4 + $0x50] sm:$0xff] %vm4825_vm4, %v4798_v29  ;;  %v8601_v29 = vld [vmem:[#allocation3 + $0xa8] sm:$0xfe]   ;;  %v3007_v33 = vpop.permute.xlu0 %3006  ;;  %v8608_v8 = vld [vmem:[#allocation3 + $0xb0] ss:$0 sps:$4 sm:$0x11]  }
 0x22b   : > { %1997 = vst.msk [vmem:[#allocation4 + $0x70] sm:$0xff] %vm10665_vm11, %v8595_v36  ;;  %v4752_v12 = vsel %vm10672_vm2, %v4747_v15, %v4751_v4  ;;  %vm10675_vm11 = vcmask 162944   ;;  %vm10680_vm2 = vcmask 97344   ;;  %v5346_v2 = vrot.slane %v8601_v29, 1  ;;  %v7221_v36 = vld [vmem:[#allocation4 + $0x8] sm:$0xff]  ;;  %v8606_v4 = vld [vmem:[#allocation3 + $0x54] sm:$0xff]  }
 0x22c   : > { %5125 = vst.msk [vmem:[#allocation4 + $0x50] sm:$0xff] %vm5114_vm3, %v10666_v44  ;;  %v7228_v18 = vld [vmem:[#allocation4 + $0x40] sm:$0xff]  ;;  %4803 = vrot.lane.b32.xlu1 %v4752_v12, %s8730_s22  ;;  %v7245_v53 = vsel %vm7237_vm6, %v7221_v36, 0  ;;  %v6018_v23 = vor.u32 %v6017_v0, %v6013_v63  ;;  %v8607_v44 = vld [vmem:[#allocation3 + $0xa8] sm:$0xfe]   ;;  %v7248_v12 = vsel %vm7237_vm6, %v7222_v6, 0 }
 0x22d   : > { %5414 = vst.msk [vmem:[#allocation4 + $0x50] sm:$0xff] %vm5403_vm0, %v10022_v5  ;;  %v8593_v5 = vld [vmem:[#allocation3 + $0xa8] sm:$0xfe]   ;;  %8193 = vmatprep.subr.msk.bf16.mxu1 %vm7237_vm6, %v7228_v18  ;;  %v6598_v27 = vpop.permute.xlu1 %6597  ;;  %v3551_v48 = vrot.slane %v8607_v44, 1  ;;  %v6833_v63 = vrot.slane %v8616_v38, 1  ;;  %v8620_v60 = vld [vmem:[#allocation3 + $0x54] sm:$0xff]  }
 0x22e   : > { %1996 = vst.msk [vmem:[#allocation4 + $0x68] sm:$0xff] %vm10667_vm13, %v8596_v39  ;;  %vm10676_vm13 = vcmask 1046528   ;;  %8096 = vmatpush3.bf16.xpose.msra.mxu1 %v7242_v46  ;;  %v6022_v39 = vrot.slane %v6020_v20, 1  ;;  %v8610_v15 = vld [vmem:[#allocation3 + $0x5c] ss:$0 sps:$4 sm:$0x11]  }
 0x22f   : > { %5592 = vst.msk [vmem:[#allocation4 + $0x50] sm:$0xff] %vm5581_vm1, %v10668_v62  ;;  %v3529_v54 = vsel %vm10676_vm13, %v3527_v26, %v3528_v9  ;;  %8194 = vmatprep.subr.msk.bf16.mxu1 %vm7237_vm6, %v7229_v24  ;;  %v3552_v62 = vrot.slane %v8608_v8, 1  ;;  %v6446_v26 = vshrl.u32 %v8609_v30, 16  ;;  %v6448_v9 = vshll.u32 %v8609_v30, 16  ;;  %v8611_v24 = vld [vmem:[#allocation3 + $0xb4] sm:$0xff]   ;;  %v10706_v20 = vld [vmem:[#allocation14_spill] sm:$0xff] }
 0x230   : > { %5770 = vst.msk [vmem:[#allocation4 + $0x50] sm:$0xff] %vm10669_vm12, %v10048_v50  ;;  %v7143_v50 = vrot.slane %v8593_v5, 1  ;;  %3569 = vrot.lane.b32.xlu0 %v3529_v54, %s8720_s16  ;;  %vm10677_vm12 = vmmov %vm10676_vm13  ;;  %v6453_v5 = vshll.u32 %v8610_v15, 16  ;;  %v8619_v43 = vld [vmem:[#allocation2 + $0xbc] ss:$0 sps:$4 sm:$0x11]  }
 0x231   : > { %6203 = vst.msk [vmem:[#allocation4 + $0x50] sm:$0xff] %vm10671_vm15, %v10670_v11  ;;  %vm10678_vm15 = vcmask 64544   ;;  %vm10684_vm13 = vmmov %vm10677_vm12  ;;  %v4800_v42 = vpop.permute.xlu1 %4799  ;;  %v10694_v11 = vld [vmem:[#allocation41_spill] sm:$0xff]  ;;  %v4658_v36 = vshrl.u32 %v8620_v60, 16 }
 0x232   : > { %3039 = vst.msk [vmem:[#allocation4 + $0x60] sm:$0xff] %vm10673_vm8, %v3003_v1  ;;  %v7145_v31 = vsel %vm10677_vm12, %v7143_v50, %v7144_v35  ;;  %vm10681_vm8 = vmmov %vm10678_vm15  ;;  %v5059_v57 = vsel %vm10684_vm13, %v5057_v16, %v5058_v45  ;;  %vm10685_vm12 = vcmask 195744   ;;  %v6455_v18 = vrot.slane %v6453_v5, 1  ;;  %v8614_v35 = vld [vmem:[#allocation2 + $0x5c] ss:$0 sps:$4 sm:$0x11]  }
 0x233   : > { %3329 = vst.msk [vmem:[#allocation4 + $0x60] sm:$0xff] %vm10675_vm11, %v10674_v37  ;;  %7179 = vrot.lane.b32.xlu1 %v7145_v31, %s8731_s23  ;;  %vm10683_vm11 = vmmov %vm10680_vm2  ;;  %v8615_v16 = vld [vmem:[#allocation2 + $0xb4] sm:$0xff]   ;;  %v10701_v45 = vld [vmem:[#allocation19_spill] sm:$0xff] }
 0x234   : > { %2174 = vst.msk [vmem:[#allocation4 + $0x70] sm:$0xff] %vm10678_vm15, %v2140_v22  ;;  %5721 = vrot.lane.b32.xlu0 %v8597_v58, %s8729_s21  ;;  %vm10686_vm15 = vcmask 556544   ;;  %v8618_v58 = vld [vmem:[#allocation2 + $0xb4] sm:$0xff]  }
 0x235   : > { %2608 = vst.msk [vmem:[#allocation4 + $0x70] sm:$0xff] %vm10680_vm2, %v10679_v41  ;;  %vm10687_vm2 = vmmov %vm10684_vm13  ;;  %vm10691_vm13 = vcmask 162944   ;;  %v3582_v1 = vpop.permute.xlu1 %3581  ;;  %v8621_v30 = vld [vmem:[#allocation3 + $0x5c] ss:$0 sps:$4 sm:$0x11]  }
 0x236   : > { %2173 = vst.msk [vmem:[#allocation4 + $0x68] sm:$0xff] %vm10681_vm8, %v2138_v25  ;;  %v5348_v17 = vsel %vm10687_vm2, %v5346_v2, %v5347_v32  ;;  %8098 = vmatpush3.bf16.xpose.msra.mxu1 %v7245_v53  ;;  %vm10688_vm8 = vcmask 589344   ;;  %vm10695_vm2 = vcmask 195744   ;;  %v4232_v25 = vshll.u32 %v8614_v35, 16 }
 0x237   : > { %2607 = vst.msk [vmem:[#allocation4 + $0x68] sm:$0xff] %vm10683_vm11, %v10682_v61  ;;  %5092 = vrot.lane.b32.xlu1 %v5059_v57, %s8723_s8  ;;  %vm10689_vm11 = vcmask 130144   ;;  %v8617_v61 = vld [vmem:[#allocation2 + $0x5c] ss:$0 sps:$4 sm:$0x11]   ;;  %v6111_v2 = vshll.u32 %v8618_v58, 16 }
 0x238   : > { %3610 = vst.msk [vmem:[#allocation4 + $0x20] sm:$0xff] %vm10685_vm12, %v3566_v19  ;;  %3746 = vrot.lane.b32.xlu0 %v8600_v59, %s8721_s30  ;;  %vm10692_vm12 = vsmask.f32 7424  ;;  %v4234_v29 = vrot.slane %v4232_v25, 1  ;;  %v6109_v19 = vshrl.u32 %v8618_v58, 16  ;;  %v6834_v57 = vrot.slane %v8617_v61, 1 }
 0x239   : > { %6636 = vst.msk [vmem:[#allocation4 + $0x50] sm:$0xff] %vm6625_vm14, %v6598_v27  ;;  %v3005_v31 = vpop.permute.xlu1 %3004  ;;  %v6113_v0 = vrot.slane %v6111_v2, 1  ;;  %v6116_v53 = vshll.u32 %v8619_v43, 16  ;;  %v8630_v58 = vld [vmem:[#allocation2 + $0xbc] ss:$0 sps:$4 sm:$0x11]  }
 0x23a   : > { %6925 = vst.msk [vmem:[#allocation4 + $0x50] sm:$0xff] %vm10686_vm15, %v9692_v7  ;;  %v6023_v7 = vsel %vm10692_vm12, %v6018_v23, %v6022_v39  ;;  %vm10693_vm15 = vcmask 458144   ;;  %vm10699_vm12 = vcmask 130144  }
 0x23b   : > { %7214 = vst.msk [vmem:[#allocation4 + $0x50] sm:$0xff] %vm10688_vm8, %v10141_v34  ;;  %5381 = vrot.lane.b32.xlu1 %v5348_v17, %s8728_s20  ;;  %v5718_v34 = vpop.permute.xlu0 %5717  ;;  %vm10696_vm8 = vcmask 31744   ;;  %v4660_v17 = vshll.u32 %v8620_v60, 16  ;;  %v6114_v39 = vor.u32 %v6113_v0, %v6109_v19  ;;  %v6118_v8 = vrot.slane %v6116_v53, 1  ;;  %v850_v0 = vld [vmem:[#allocation3 + $0xc8] sm:$0x1] }
 0x23c   : > { %3041 = vst.msk [vmem:[#allocation4 + $0x70] sm:$0xff] %vm10689_vm11, %v3007_v33  ;;  %6154 = vrot.lane.b32.xlu0 %v6023_v7, %s8725_s10  ;;  %vm10697_vm11 = vcmask 1046528   ;;  %v8625_v33 = vld [vmem:[#allocation3 + $0xb4] sm:$0xff]   ;;  %v8632_v19 = vld [vmem:[#allocation3 + $0x5c] ss:$0 sps:$4 sm:$0x11]  }
 0x23d   : > { %3331 = vst.msk [vmem:[#allocation4 + $0x70] sm:$0xff] %vm10691_vm13, %v10690_v49  ;;  %v3553_v50 = vsel %vm10697_vm11, %v3551_v48, %v3552_v62  ;;  %vm10698_vm13 = vcmask 228544   ;;  %v2142_v32 = vpop.permute.xlu1 %2141  ;;  %vm10704_vm11 = vcmask 64544   ;;  %v4662_v49 = vrot.slane %v4660_v17, 1  ;;  %v8623_v48 = vld [vmem:[#allocation3 + $0x54] sm:$0xfe]  }
 0x23e   : > { %4837 = vst.msk [vmem:[#allocation4 + $0x58] sm:$0xff] %vm4825_vm4, %v4800_v42  ;;  %v4665_v42 = vshll.u32 %v8621_v30, 16  ;;  %v6542_v7 = vshrl.u32 %v8625_v33, 16  ;;  %v7122_v5 = vrot.slane %v8623_v48, 1  ;;  %v5326_v43 = vrot.slane %v8632_v19, 1  ;;  %v610_v30 = vpop.f32.mrb[31].mxu0 }
 0x23f   : > { %5126 = vst.msk [vmem:[#allocation4 + $0x58] sm:$0xff] %vm5114_vm3, %v9700_v56  ;;  %5559 = vrot.lane.b32.xlu1 %v8605_v28, %s8724_s9  ;;  %v6450_v56 = vrot.slane %v6448_v9, 1  ;;  %v3743_v37 = vpop.permute.xlu0 %3742  ;;  %v8622_v9 = vld [vmem:[#allocation3 + $0xb4] sm:$0xff]   ;;  %v851_v53 = vsel %vm8809_vm7, 0, %v850_v0  ;;  %v796_v17 = vld [vmem:[#allocation3 + $0xc0] sm:$0x1] }
 0x240   : > { %5415 = vst.msk [vmem:[#allocation4 + $0x58] sm:$0xff] %vm5403_vm0, %v10159_v47  ;;  %v8613_v47 = vld [vmem:[#allocation2 + $0x54] sm:$0xff]   ;;  %3923 = vrot.lane.b32.xlu0 %v8606_v4, %s8727_s17  ;;  %v4667_v4 = vrot.slane %v4665_v42, 1  ;;  %852 = vst [vmem:[#allocation3 + $0xc8] sm:$0x1] %v851_v53  ;;  %v8635_v42 = vld [vmem:[#allocation2 + $0x60] sm:$0xff]  }
 0x241   : > { %5763 = vst.msk [vmem:[#allocation4 + $0x18] sm:$0xff] %vm10693_vm15, %v5718_v34  ;;  %v6451_v54 = vor.u32 %v6450_v56, %v6446_v26  ;;  %v4225_v22 = vshrl.u32 %v8613_v47, 16  ;;  %v4227_v55 = vshll.u32 %v8613_v47, 16  ;;  %vm10700_vm15 = vsmask.f32 7424  ;;  %v5734_v44 = vpop.permute.xlu1 %5733  ;;  %v8629_v47 = vld [vmem:[#allocation2 + $0xb4] sm:$0xff]  }
 0x242   : > { %5593 = vst.msk [vmem:[#allocation4 + $0x58] sm:$0xff] %vm5581_vm1, %v10694_v11  ;;  %v7230_v46 = vld [vmem:[#allocation4 + $0x50] sm:$0xff]  ;;  %v4663_v34 = vor.u32 %v4662_v49, %v4658_v36  ;;  %v8624_v26 = vld [vmem:[#allocation3 + $0x5c] ss:$0 sps:$4 sm:$0x11]   ;;  %v6544_v56 = vshll.u32 %v8625_v33, 16  ;;  %v8053_v49 = vpack.c.bf16 %v610_v30, %v610_v30 }
 0x243   : > { %3618 = vst.msk [vmem:[#allocation4 + $0x60] sm:$0xff] %vm10695_vm2, %v3582_v1  ;;  %3585 = vrot.lane.b32.xlu1 %v3553_v50, %s8720_s16  ;;  %8195 = vmatprep.subr.msk.bf16.mxu1 %vm7237_vm6, %v7230_v46  ;;  %v6456_v3 = vsel %vm10700_vm15, %v6451_v54, %v6455_v18  ;;  %v4229_v41 = vrot.slane %v4227_v55, 1  ;;  %vm10702_vm2 = vcmask 162944   ;;  %v6151_v59 = vpop.permute.xlu0 %6150  ;;  %v7123_v1 = vrot.slane %v8624_v26, 1  ;;  %v10714_v50 = vld [vmem:[#allocation20_spill] sm:$0xff] }
 0x244   : > { %1998 = vst.msk [vmem:[#allocation4 + $0x78] sm:$0xff] %vm10696_vm8, %v8612_v13  ;;  %8100 = vmatpush3.bf16.xpose.msra.mxu1 %v7248_v12  ;;  %6587 = vrot.lane.b32.xlu0 %v6456_v3, %s8732_s24  ;;  %vm10703_vm8 = vcmask 490944   ;;  %v8626_v13 = vld [vmem:[#allocation3 + $0xbc] ss:$0 sps:$4 sm:$0x11]   ;;  %v4321_v3 = vshrl.u32 %v8629_v47, 16 }
 0x245   : > { %3787 = vst.msk [vmem:[#allocation4 + $0x20] sm:$0xff] %vm10698_vm13, %v3743_v37  ;;  %v4230_v21 = vor.u32 %v4229_v41, %v4225_v22  ;;  %vm10705_vm13 = vmmov %vm10700_vm15  ;;  %vm10708_vm15 = vcmask 261344   ;;  %v3009_v11 = vpop.permute.xlu1 %3008  ;;  %v6549_v18 = vshll.u32 %v8626_v13, 16  ;;  %v8627_v12 = vld [vmem:[#allocation2 + $0x54] sm:$0xfe]   ;;  %v6546_v37 = vrot.slane %v6544_v56, 1 }
 0x246   : > { %3040 = vst.msk [vmem:[#allocation4 + $0x68] sm:$0xff] %vm10699_vm12, %v3005_v31  ;;  %vm10707_vm12 = vcmask 97344   ;;  %v8628_v54 = vld [vmem:[#allocation2 + $0x5c] ss:$0 sps:$4 sm:$0x11]   ;;  %v8054_v22 = vpack.c.bf16 %v10034_v51, %v10034_v51  ;;  %v4323_v41 = vshll.u32 %v8629_v47, 16 }
 0x247   : > { %3330 = vst.msk [vmem:[#allocation4 + $0x68] sm:$0xff] %vm10702_vm2, %v10701_v45  ;;  %5737 = vrot.lane.b32.xlu1 %v8611_v24, %s8729_s21  ;;  %v4235_v27 = vsel %vm10705_vm13, %v4230_v21, %v4234_v29  ;;  %v3920_v28 = vpop.permute.xlu0 %3919  ;;  %vm10709_vm2 = vcmask 1046528   ;;  %v6551_v35 = vrot.slane %v6549_v18, 1  ;;  %v5036_v24 = vrot.slane %v8627_v12, 1  ;;  %v8631_v29 = vld [vmem:[#allocation3 + $0x54] sm:$0xfe]  }
 0x248   : > { %6196 = vst.msk [vmem:[#allocation4 + $0x18] sm:$0xff] %vm10703_vm8, %v6151_v59  ;;  %4356 = vrot.lane.b32.xlu0 %v4235_v27, %s8722_s6  ;;  %v6835_v23 = vsel %vm10709_vm2, %v6833_v63, %v6834_v57  ;;  %vm10710_vm8 = vcmask 458144   ;;  %vm10716_vm2 = vcmask 294144   ;;  %v6547_v31 = vor.u32 %v6546_v37, %v6542_v7  ;;  %v8634_v27 = vld [vmem:[#allocation2 + $0xbc] ss:$0 sps:$4 sm:$0x11]  }
 0x249   : > { %2175 = vst.msk [vmem:[#allocation4 + $0x78] sm:$0xff] %vm10704_vm11, %v2142_v32  ;;  %vm10711_vm11 = vmmov %vm10705_vm13  ;;  %vm10712_vm13 = vcmask 130144   ;;  %v3759_v55 = vpop.permute.xlu1 %3758  ;;  %v5037_v25 = vrot.slane %v8628_v54, 1  ;;  %v4325_v45 = vrot.slane %v4323_v41, 1  ;;  %v4328_v59 = vshll.u32 %v8630_v58, 16  ;;  %v8636_v7 = vld [vmem:[#allocation3 + $0xb4] sm:$0xff]  }
 0x24a   : > { %2609 = vst.msk [vmem:[#allocation4 + $0x78] sm:$0xff] %vm10707_vm12, %v10706_v20  ;;  %v6119_v62 = vsel %vm10711_vm11, %v6114_v39, %v6118_v8  ;;  %vm10713_vm12 = vmmov %vm10711_vm11  ;;  %vm10718_vm11 = vcmask 1046528   ;;  %v1685_v21 = vshrl.u32 %v8054_v22, 16  ;;  %v5325_v60 = vrot.slane %v8631_v29, 1  ;;  %v8633_v32 = vld [vmem:[#allocation2 + $0xb4] sm:$0xfe]  }
 0x24b   : > { %3762 = vrot.lane.b32.xlu1 %v8615_v16, %s8721_s30  ;;  %3964 = vst.msk [vmem:[#allocation4 + $0x20] sm:$0xff] %vm10708_vm15, %v3920_v28  ;;  %v6584_v15 = vpop.permute.xlu0 %6583  ;;  %v4668_v6 = vsel %vm10713_vm12, %v4663_v34, %v4667_v4  ;;  %vm10715_vm15 = vcmask 162944   ;;  %v7124_v16 = vsel %vm10718_vm11, %v7122_v5, %v7123_v1  ;;  %v4326_v57 = vor.u32 %v4325_v45, %v4321_v3  ;;  %v8638_v18 = vld [vmem:[#allocation3 + $0x54] sm:$0xfe]  }
 0x24c   : > { %5771 = vst.msk [vmem:[#allocation4 + $0x58] sm:$0xff] %vm10710_vm8, %v5734_v44  ;;  %6876 = vrot.lane.b32.xlu0 %v6835_v23, %s8726_s11  ;;  %vm10717_vm8 = vcmask 228544   ;;  %v4330_v2 = vrot.slane %v4328_v59, 1  ;;  %v6857_v28 = vrot.slane %v8633_v32, 1  ;;  %v6858_v33 = vrot.slane %v8634_v27, 1  ;;  %v8645_v32 = vld [vmem:[#allocation2 + $0x60] sm:$0xff]  }
 0x24d   : > { %6629 = vst.msk [vmem:[#allocation4 + $0x18] sm:$0xff] %vm6625_vm14, %v6584_v15  ;;  %v6167_v63 = vpop.permute.xlu1 %6166  ;;  %v1687_v23 = vrot.slane %v1685_v21, 7  ;;  %v797_v39 = vsel %vm8796_vm5, 0, %v796_v17  ;;  %v1688_v8 = vshll.u32 %v8054_v22, 16  ;;  %v1677_v4 = vshrl.u32 %v8053_v49, 16  ;;  %v8642_v21 = vld [vmem:[#allocation3 + $0x60] sm:$0xff]  }
 0x24e   : > { %3042 = vst.msk [vmem:[#allocation4 + $0x78] sm:$0xff] %vm10712_vm13, %v3009_v11  ;;  %vm10719_vm13 = vmmov %vm10713_vm12  ;;  %vm10720_vm12 = vcmask 556544   ;;  %v1680_v26 = vshll.u32 %v8053_v49, 16  ;;  %v4754_v5 = vshrl.u32 %v8636_v7, 16  ;;  %v4756_v13 = vshll.u32 %v8636_v7, 16 }
 0x24f   : > { %6170 = vrot.lane.b32.xlu1 %v6119_v62, %s8725_s10  ;;  %3332 = vst.msk [vmem:[#allocation4 + $0x78] sm:$0xff] %vm10715_vm15, %v10714_v50  ;;  %v4353_v46 = vpop.permute.xlu0 %4352  ;;  %v6552_v38 = vsel %vm10719_vm13, %v6547_v31, %v6551_v35  ;;  %vm10721_vm15 = vmmov %vm10718_vm11  ;;  %vm10724_vm11 = vcmask 261344   ;;  %v1692_v15 = vrot.slane %v1687_v23, 4  ;;  %v1690_v11 = vor.u32 %v1688_v8, %v1687_v23  ;;  %v8639_v47 = vld [vmem:[#allocation3 + $0x5c] ss:$0 sps:$4 sm:$0x11]  }
 0x250   : > { %4789 = vrot.lane.b32.xlu0 %v4668_v6, %s8730_s22  ;;  %4397 = vst.msk [vmem:[#allocation4 + $0x20] sm:$0xff] %vm10716_vm2, %v4353_v46  ;;  %v5038_v51 = vsel %vm10721_vm15, %v5036_v24, %v5037_v25  ;;  %vm10722_vm2 = vcmask 490944   ;;  %798 = vst [vmem:[#allocation3 + $0xc0] sm:$0x1] %v797_v39  ;;  %v1679_v56 = vrot.slane %v1677_v4, 7  ;;  %v4758_v12 = vrot.slane %v4756_v13, 1 }
 0x251   : > { %3795 = vst.msk [vmem:[#allocation4 + $0x60] sm:$0xff] %vm10717_vm8, %v3759_v55  ;;  %vm10723_vm8 = vmmov %vm10719_vm13  ;;  %v3936_v44 = vpop.permute.xlu1 %3935  ;;  %v1851_v50 = vld [vmem:[#allocation3 + $0xc8] sm:$0x1]  ;;  %v3530_v24 = vrot.slane %v8638_v18, 1  ;;  %v3531_v25 = vrot.slane %v8639_v47, 1  ;;  %v8654_v13 = vld [vmem:[#allocation3 + $0x60] sm:$0xff]  }
 0x252   : > { %6204 = vst.msk [vmem:[#allocation4 + $0x58] sm:$0xff] %vm10722_vm2, %v6167_v63  ;;  %v4331_v36 = vsel %vm10723_vm8, %v4326_v57, %v4330_v2  ;;  %vm10725_vm13 = vmmov %vm10721_vm15  ;;  %vm10727_vm15 = vcmask 589344   ;;  %v1682_v46 = vor.u32 %v1680_v26, %v1679_v56  ;;  %v1683_v37 = vrot.slane %v1679_v56, 4  ;;  %v8643_v63 = vld [vmem:[#allocation2 + $0xb4] sm:$0xfe]  }
 0x253   : > { %3939 = vrot.lane.b32.xlu1 %v8622_v9, %s8727_s17  ;;  %v6873_v61 = vpop.permute.xlu0 %6872  ;;  %3972 = vst.msk [vmem:[#allocation4 + $0x60] sm:$0xff] %vm10724_vm11, %v3936_v44  ;;  %v5327_v48 = vsel %vm10725_vm13, %v5325_v60, %v5326_v43  ;;  %v8637_v9 = vld [vmem:[#allocation3 + $0xbc] ss:$0 sps:$4 sm:$0x11]   ;;  %v1852_v22 = vsel %vm8796_vm5, %v1692_v15, %v1851_v50  ;;  %v4759_v31 = vor.u32 %v4758_v12, %v4754_v5  ;;  %vm10728_vm2 = vcmask 27648  }
 0x254   : > { %7165 = vrot.lane.b32.xlu0 %v7124_v16, %s8731_s23  ;;  %6918 = vst.msk [vmem:[#allocation4 + $0x18] sm:$0xff] %vm10720_vm12, %v6873_v61  ;;  %vm10726_vm12 = vmmov %vm10725_vm13  ;;  %v4761_v6 = vshll.u32 %v8637_v9, 16  ;;  %v1691_v58 = vsel %vm8831_vm9, %v1683_v37, %v1690_v11  ;;  %v8640_v16 = vld [vmem:[#allocation3 + $0xb4] sm:$0xfe]   ;;  %v8648_v61 = vld [vmem:[#allocation2 + $0x60] sm:$0xff]   ;;  %vm10729_vm11 = vcmask 294144  }
 0x255   : > { %v6859_v62 = vsel %vm10726_vm12, %v6857_v28, %v6858_v33  ;;  %v6600_v1 = vpop.permute.xlu1 %6599  ;;  %1853 = vst [vmem:[#allocation3 + $0xc8] sm:$0x1] %v1852_v22  ;;  %1850 = vst.msk [vmem:[#allocation3 + $0xc4] sm:$0xf] %vm10728_vm2, %v1691_v58  ;;  %v7146_v29 = vrot.slane %v8640_v16, 1  ;;  %v6025_v2 = vshrl.u32 %v8648_v61, 16 }
 0x256   : > { %6637 = vst.msk [vmem:[#allocation4 + $0x58] sm:$0xff] %vm6625_vm14, %v6600_v1  ;;  %v4763_v54 = vrot.slane %v4761_v6, 1  ;;  %vm10730_vm13 = vmmov %vm10726_vm12  ;;  %v8644_v57 = vld [vmem:[#allocation2 + $0xbc] ss:$0 sps:$4 sm:$0x11]   ;;  %v5060_v27 = vrot.slane %v8643_v63, 1 }
 0x257   : > { %6603 = vrot.lane.b32.xlu1 %v6552_v38, %s8732_s24  ;;  %v4786_v20 = vpop.permute.xlu0 %4785  ;;  %v1847_v55 = vld [vmem:[#allocation3 + $0xc0] sm:$0xf]  ;;  %v8641_v38 = vld [vmem:[#allocation3 + $0xbc] ss:$0 sps:$4 sm:$0x11]   ;;  %v3532_v59 = vsel %vm10730_vm13, %v3530_v24, %v3531_v25  ;;  %v5061_v0 = vrot.slane %v8644_v57, 1  ;;  %vm10732_vm2 = vmmov %vm10726_vm12 }
 0x258   : > { %5078 = vrot.lane.b32.xlu0 %v5038_v51, %s8723_s8  ;;  %4830 = vst.msk [vmem:[#allocation4 + $0x20] sm:$0xff] %vm4825_vm4, %v4786_v20  ;;  %v1848_v3 = vsel %vm8837_vm10, %v1682_v46, %v1847_v55  ;;  %v4764_v45 = vsel %vm10723_vm8, %v4759_v31, %v4763_v54  ;;  %v7147_v51 = vrot.slane %v8641_v38, 1  ;;  %v8646_v20 = vld [vmem:[#allocation3 + $0xb4] sm:$0xfe]   ;;  %v6027_v53 = vshll.u32 %v8648_v61, 16  ;;  %v8651_v31 = vld [vmem:[#allocation3 + $0x60] sm:$0xff]  }
 0x259   : > { %v4369_v41 = vpop.permute.xlu1 %4368  ;;  %1849 = vst [vmem:[#allocation3 + $0xc0] sm:$0xf] %v1848_v3  ;;  %v8647_v28 = vld [vmem:[#allocation3 + $0xbc] ss:$0 sps:$4 sm:$0x11]   ;;  %v5062_v30 = vsel %vm10732_vm2, %v5060_v27, %v5061_v0  ;;  %v5349_v17 = vrot.slane %v8646_v20, 1 }
 0x25a   : > { %4405 = vst.msk [vmem:[#allocation4 + $0x60] sm:$0xff] %vm10729_vm11, %v4369_v41  ;;  %v7148_v43 = vsel %vm10726_vm12, %v7146_v29, %v7147_v51  ;;  %v5350_v33 = vrot.slane %v8647_v28, 1  ;;  %v8649_v23 = vld [vmem:[#allocation2 + $0x68] ss:$0 sps:$4 sm:$0x11]   ;;  %v6029_v39 = vrot.slane %v6027_v53, 1  ;;  %vm10734_vm11 = vmmov %vm10732_vm2 }
 0x25b   : > { %4372 = vrot.lane.b32.xlu1 %v4331_v36, %s8722_s6  ;;  %v7162_v34 = vpop.permute.xlu0 %7161  ;;  %v679_v8 = vld [vmem:[#allocation2 + $0xc0] sm:$0x1]  ;;  %v886_v49 = vld [vmem:[%s8803_s29 + $0x78] sm:$0xf]  ;;  %vm10733_vm8 = vcmask 195744   ;;  %vm10735_vm13 = vcmask 589344  }
 0x25c   : > { %5367 = vrot.lane.b32.xlu0 %v5327_v48, %s8728_s20  ;;  %7207 = vst.msk [vmem:[#allocation4 + $0x18] sm:$0xff] %vm10727_vm15, %v7162_v34  ;;  %vm10731_vm15 = vcmask 556544   ;;  %v6030_v48 = vor.u32 %v6029_v39, %v6025_v2  ;;  %v680_v15 = vsel %vm8796_vm5, 0, %v679_v8  ;;  %v1146_v34 = vshrl.u32 %v886_v49, 16  ;;  %v10296_v18 = vld [vmem:[#allocation3 + $0xb4] sm:$0xfe]  }
 0x25d   : > { %v6889_v60 = vpop.permute.xlu1 %6888  ;;  %681 = vst [vmem:[#allocation2 + $0xc0] sm:$0x1] %v680_v15  ;;  %v1149_v4 = vshll.u32 %v886_v49, 16  ;;  %v5351_v11 = vsel %vm10734_vm11, %v5349_v17, %v5350_v33  ;;  %vm10736_vm12 = vsmask.f32 7424  ;;  %v6460_v24 = vshll.u32 %v8654_v13, 16 }
 0x25e   : > { %6926 = vst.msk [vmem:[#allocation4 + $0x58] sm:$0xff] %vm10731_vm15, %v6889_v60  ;;  %v1148_v56 = vrot.slane %v1146_v34, 7  ;;  %vm10737_vm15 = vcmask 458144   ;;  %v8655_v54 = vld [vmem:[#allocation3 + $0x68] ss:$0 sps:$4 sm:$0x11]  }
 0x25f   : > { %6892 = vrot.lane.b32.xlu1 %v6859_v62, %s8726_s11  ;;  %v5075_v35 = vpop.permute.xlu0 %5074  ;;  %v6032_v62 = vshll.u32 %v8649_v23, 16  ;;  %v3554_v25 = vrot.slane %v10296_v18, 1  ;;  %vm10738_vm2 = vcmask 27648   ;;  %v6462_v41 = vrot.slane %v6460_v24, 1  ;;  %v8657_v61 = vld [vmem:[#allocation2 + $0x60] sm:$0xff]   ;;  %v8664_v23 = vld [vmem:[#allocation3 + $0x60] sm:$0xff]  }
 0x260   : > { %5545 = vrot.lane.b32.xlu0 %v8635_v42, %s8724_s9  ;;  %5119 = vst.msk [vmem:[#allocation4 + $0x20] sm:$0xff] %vm5114_vm3, %v5075_v35  ;;  %v887_v42 = vld [vmem:[%s8803_s29 + $0x7c] sm:$0xf]  ;;  %v1151_v50 = vor.u32 %v1149_v4, %v1148_v56  ;;  %v1152_v46 = vrot.slane %v1148_v56, 4  ;;  %v6458_v35 = vshrl.u32 %v8654_v13, 16  ;;  %v6465_v16 = vshll.u32 %v8655_v54, 16 }
 0x261   : > { %v4802_v44 = vpop.permute.xlu1 %4801  ;;  %v1154_v26 = vshrl.u32 %v887_v42, 16  ;;  %v1157_v9 = vshll.u32 %v887_v42, 16  ;;  %v6034_v5 = vrot.slane %v6032_v62, 1  ;;  %v8658_v51 = vld [vmem:[#allocation2 + $0x68] ss:$0 sps:$4 sm:$0x11]  }
 0x262   : > { %4838 = vst.msk [vmem:[#allocation4 + $0x60] sm:$0xff] %vm4825_vm4, %v4802_v44  ;;  %v6467_v29 = vrot.slane %v6465_v16, 1  ;;  %v8660_v27 = vld [vmem:[#allocation2 + $0x60] sm:$0xfe]   ;;  %v735_v0 = vld [vmem:[#allocation2 + $0xc8] sm:$0x1] }
 0x263   : > { %4805 = vrot.lane.b32.xlu1 %v4764_v45, %s8730_s22  ;;  %v5364_v19 = vpop.permute.xlu0 %5363  ;;  %v10294_v6 = vrot.slane %v1154_v26, 7  ;;  %v6035_v12 = vsel %vm10736_vm12, %v6030_v48, %v6034_v5  ;;  %v7223_v38 = vld [vmem:[#allocation4 + $0x18] sm:$0xff]  ;;  %v736_v20 = vsel %vm8809_vm7, 0, %v735_v0  ;;  %v3555_v39 = vrot.slane %v8653_v40, 1  ;;  %v8656_v18 = vld [vmem:[#allocation3 + $0xc0] sm:$0xff]  }
 0x264   : > { %3571 = vrot.lane.b32.xlu0 %v3532_v59, %s8720_s16  ;;  %5408 = vst.msk [vmem:[#allocation4 + $0x20] sm:$0xff] %vm5403_vm0, %v5364_v19  ;;  %v1318_v58 = vld [vmem:[#allocation2 + $0xc0] sm:$0xf]  ;;  %v6463_v59 = vor.u32 %v6462_v41, %v6458_v35  ;;  %v4237_v19 = vshrl.u32 %v8657_v61, 16  ;;  %v7251_v2 = vsel %vm7237_vm6, %v7223_v38, 0  ;;  %v4670_v62 = vshrl.u32 %v8664_v23, 16 }
 0x265   : > { %v7178_v1 = vpop.permute.xlu1 %7177  ;;  %v1159_v37 = vor.u32 %v1157_v9, %v10294_v6  ;;  %v1319_v45 = vsel %vm8837_vm10, %v1151_v50, %v1318_v58  ;;  %vm10740_vm10 = vmmov %vm10736_vm12  ;;  %737 = vst [vmem:[#allocation2 + $0xc8] sm:$0x1] %v736_v20  ;;  %v8665_v49 = vld [vmem:[#allocation3 + $0x68] ss:$0 sps:$4 sm:$0x11]   ;;  %vm10744_vm12 = vcmask 1046528  }
 0x266   : > { %7215 = vst.msk [vmem:[#allocation4 + $0x58] sm:$0xff] %vm10735_vm13, %v7178_v1  ;;  %1320 = vst [vmem:[#allocation2 + $0xc0] sm:$0xf] %v1319_v45  ;;  %v6468_v52 = vsel %vm10740_vm10, %v6463_v59, %v6467_v29  ;;  %vm10743_vm13 = vcmask 261344   ;;  %v4672_v15 = vshll.u32 %v8664_v23, 16  ;;  %v4677_v34 = vshll.u32 %v8665_v49, 16 }
 0x267   : > { %7181 = vrot.lane.b32.xlu1 %v7148_v43, %s8731_s23  ;;  %v5542_v36 = vpop.permute.xlu0 %5541  ;;  %v1160_v22 = vsel %vm8831_vm9, %v1152_v46, %v1159_v37  ;;  %vm10739_vm9 = vcmask 228544   ;;  %v4244_v43 = vshll.u32 %v8658_v51, 16  ;;  %vm10742_vm11 = vmmov %vm10740_vm10  ;;  %v8667_v1 = vld [vmem:[#allocation3 + $0x60] sm:$0xfe]  }
 0x268   : > { %5723 = vrot.lane.b32.xlu0 %v8642_v21, %s8729_s21  ;;  %5586 = vst.msk [vmem:[#allocation4 + $0x20] sm:$0xff] %vm5581_vm1, %v5542_v36  ;;  %v4239_v21 = vshll.u32 %v8657_v61, 16  ;;  %v8661_v36 = vld [vmem:[#allocation2 + $0x68] ss:$0 sps:$4 sm:$0x11]   ;;  %v4674_v5 = vrot.slane %v4672_v15, 1 }
 0x269   : > { %v5091_v55 = vpop.permute.xlu1 %5090  ;;  %1321 = vst.msk [vmem:[#allocation2 + $0xc4] sm:$0xf] %vm10738_vm2, %v1160_v22  ;;  %v4246_v53 = vrot.slane %v4244_v43, 1  ;;  %v6837_v33 = vrot.slane %v8661_v36, 1  ;;  %v4679_v13 = vrot.slane %v4677_v34, 1  ;;  %vm10746_vm2 = vmmov %vm10744_vm12  ;;  %v7125_v35 = vrot.slane %v8667_v1, 1 }
 0x26a   : > { %5127 = vst.msk [vmem:[#allocation4 + $0x60] sm:$0xff] %vm5114_vm3, %v5091_v55  ;;  %v3556_v56 = vsel %vm10746_vm2, %v3554_v25, %v3555_v39  ;;  %v8671_v55 = vld [vmem:[#allocation2 + $0x60] sm:$0xfe]   ;;  %v8670_v40 = vld [vmem:[#allocation3 + $0xc8] ss:$0 sps:$4 sm:$0x11]  }
 0x26b   : > { %5094 = vrot.lane.b32.xlu1 %v5062_v30, %s8723_s8  ;;  %v3568_v7 = vpop.permute.xlu0 %3567  ;;  %v6836_v30 = vrot.slane %v8660_v27, 1  ;;  %v5039_v61 = vrot.slane %v8671_v55, 1  ;;  %v8689_v1 = vld [vmem:[#allocation3 + $0x6c] sm:$0xff]  }
 0x26c   : > { %3748 = vrot.lane.b32.xlu0 %v8645_v32, %s8721_s30  ;;  %3611 = vst.msk [vmem:[#allocation4 + $0x28] sm:$0xff] %vm10733_vm8, %v3568_v7  ;;  %v4241_v32 = vrot.slane %v4239_v21, 1  ;;  %vm10741_vm8 = vcmask 490944   ;;  %v1161_v7 = vrot.slane %v10294_v6, 4 }
 0x26d   : > { %v5380_v63 = vpop.permute.xlu1 %5379  ;;  %v7231_v57 = vld [vmem:[#allocation4 + $0x58] sm:$0xff]  ;;  %v6838_v48 = vsel %vm10744_vm12, %v6836_v30, %v6837_v33  ;;  %vm10751_vm12 = vcmask 556544  }
 0x26e   : > { %5416 = vst.msk [vmem:[#allocation4 + $0x60] sm:$0xff] %vm5403_vm0, %v5380_v63  ;;  %8196 = vmatprep.subr.msk.bf16.mxu1 %vm7237_vm6, %v7231_v57  ;;  %v4242_v28 = vor.u32 %v4241_v32, %v4237_v19  ;;  %v8676_v32 = vld [vmem:[#allocation3 + $0x68] ss:$0 sps:$4 sm:$0x11]   ;;  %v8679_v33 = vld [vmem:[#allocation2 + $0x6c] sm:$0xff]  }
 0x26f   : > { %5383 = vrot.lane.b32.xlu1 %v5351_v11, %s8728_s20  ;;  %v5720_v47 = vpop.permute.xlu0 %5719  ;;  %8102 = vmatpush3.bf16.xpose.msra.mxu1 %v7251_v2  ;;  %v1322_v11 = vld [vmem:[#allocation2 + $0xc8] sm:$0x1]  ;;  %v5329_v36 = vrot.slane %v8676_v32, 1 }
 0x270   : > { %6156 = vrot.lane.b32.xlu0 %v6035_v12, %s8725_s10  ;;  %5764 = vst.msk [vmem:[#allocation4 + $0x20] sm:$0xff] %vm10737_vm15, %v5720_v47  ;;  %v4247_v44 = vsel %vm10742_vm11, %v4242_v28, %v4246_v53  ;;  %v8650_v42 = vld [vmem:[#allocation2 + $0xc0] sm:$0xff]   ;;  %vm10745_vm15 = vcmask 195744   ;;  %v1323_v6 = vsel %vm8796_vm5, %v1161_v7, %v1322_v11  ;;  %v4675_v12 = vor.u32 %v4674_v5, %v4670_v62 }
 0x271   : > { %v5558_v17 = vpop.permute.xlu1 %5557  ;;  %v8662_v26 = vld [vmem:[#allocation2 + $0xc0] sm:$0xff]   ;;  %1324 = vst [vmem:[#allocation2 + $0xc8] sm:$0x1] %v1323_v6  ;;  %vm10749_vm11 = vcmask 228544   ;;  %v6561_v53 = vshll.u32 %v8670_v40, 16 }
 0x272   : > { %5594 = vst.msk [vmem:[#allocation4 + $0x60] sm:$0xff] %vm5581_vm1, %v5558_v17  ;;  %v8668_v47 = vld [vmem:[#allocation3 + $0x68] ss:$0 sps:$4 sm:$0x11]   ;;  %v6123_v46 = vshll.u32 %v8662_v26, 16  ;;  %v4680_v37 = vsel %vm10740_vm10, %v4675_v12, %v4679_v13  ;;  %v6121_v25 = vshrl.u32 %v8662_v26, 16 }
 0x273   : > { %v3745_v3 = vpop.permute.xlu0 %3744  ;;  %5561 = vrot.lane.b32.xlu1 %v8650_v42, %s8724_s9  ;;  %v7126_v24 = vrot.slane %v8668_v47, 1  ;;  %v8659_v22 = vld [vmem:[#allocation2 + $0xc0] sm:$0xff]  }
 0x274   : > { %3925 = vrot.lane.b32.xlu0 %v8651_v31, %s8727_s17  ;;  %3788 = vst.msk [vmem:[#allocation4 + $0x28] sm:$0xff] %vm10739_vm9, %v3745_v3  ;;  %vm10747_vm9 = vcmask 458144   ;;  %v8672_v31 = vld [vmem:[#allocation2 + $0x68] ss:$0 sps:$4 sm:$0x11]   ;;  %v8669_v3 = vld [vmem:[#allocation3 + $0xc0] sm:$0xff]  }
 0x275   : > { %v3584_v4 = vpop.permute.xlu1 %3583  ;;  %v6125_v41 = vrot.slane %v6123_v46, 1  ;;  %v5040_v45 = vrot.slane %v8672_v31, 1  ;;  %v8673_v59 = vld [vmem:[#allocation2 + $0xc0] sm:$0xff]   ;;  %v6556_v19 = vshll.u32 %v8669_v3, 16  ;;  %v6554_v20 = vshrl.u32 %v8669_v3, 16 }
 0x276   : > { %3619 = vst.msk [vmem:[#allocation4 + $0x68] sm:$0xff] %vm10745_vm15, %v3584_v4  ;;  %vm10752_vm15 = vmmov %vm10746_vm2  ;;  %v4335_v43 = vshll.u32 %v8673_v59, 16  ;;  %v4333_v30 = vshrl.u32 %v8673_v59, 16  ;;  %v8677_v62 = vld [vmem:[#allocation2 + $0xc0] sm:$0xfe]   ;;  %v6563_v4 = vrot.slane %v6561_v53, 1 }
 0x277   : > { %v6153_v60 = vpop.permute.xlu0 %6152  ;;  %3587 = vrot.lane.b32.xlu1 %v3556_v56, %s8720_s16  ;;  %v5041_v51 = vsel %vm10752_vm15, %v5039_v61, %v5040_v45  ;;  %v6126_v57 = vor.u32 %v6125_v41, %v6121_v25  ;;  %v6558_v28 = vrot.slane %v6556_v19, 1  ;;  %v8681_v11 = vld [vmem:[#allocation3 + $0xc8] ss:$0 sps:$4 sm:$0x11]   ;;  %v6860_v12 = vrot.slane %v8677_v62, 1 }
 0x278   : > { %6589 = vrot.lane.b32.xlu0 %v6468_v52, %s8732_s24  ;;  %6197 = vst.msk [vmem:[#allocation4 + $0x20] sm:$0xff] %vm10741_vm8, %v6153_v60  ;;  %vm10748_vm8 = vcmask 294144   ;;  %v8663_v29 = vld [vmem:[#allocation2 + $0xc8] ss:$0 sps:$4 sm:$0x11]   ;;  %v4337_v49 = vrot.slane %v4335_v43, 1 }
 0x279   : > { %v5736_v50 = vpop.permute.xlu1 %5735  ;;  %v8674_v63 = vld [vmem:[#allocation2 + $0xc8] ss:$0 sps:$4 sm:$0x11]   ;;  %v6128_v2 = vshll.u32 %v8663_v29, 16  ;;  %v8675_v60 = vld [vmem:[#allocation3 + $0x60] sm:$0xfe]   ;;  %v6559_v34 = vor.u32 %v6558_v28, %v6554_v20 }
 0x27a   : > { %5772 = vst.msk [vmem:[#allocation4 + $0x60] sm:$0xff] %vm10747_vm9, %v5736_v50  ;;  %v5328_v0 = vrot.slane %v8675_v60, 1  ;;  %vm10754_vm9 = vmmov %vm10740_vm10  ;;  %vm10755_vm10 = vcmask 261344   ;;  %v4340_v42 = vshll.u32 %v8674_v63, 16  ;;  %v4338_v5 = vor.u32 %v4337_v49, %v4333_v30  ;;  %v8682_v50 = vld [vmem:[#allocation3 + $0x6c] sm:$0xff]  }
 0x27b   : > { %v3922_v8 = vpop.permute.xlu0 %3921  ;;  %5739 = vrot.lane.b32.xlu1 %v8656_v18, %s8729_s21  ;;  %v6130_v27 = vrot.slane %v6128_v2, 1  ;;  %v8678_v7 = vld [vmem:[#allocation2 + $0xc8] ss:$0 sps:$4 sm:$0x11]   ;;  %vm10760_vm15 = vmmov %vm10754_vm9  ;;  %v6472_v31 = vshll.u32 %v8689_v1, 16  ;;  %v6470_v41 = vshrl.u32 %v8689_v1, 16 }
 0x27c   : > { %4358 = vrot.lane.b32.xlu0 %v4247_v44, %s8722_s6  ;;  %3965 = vst.msk [vmem:[#allocation4 + $0x28] sm:$0xff] %vm10743_vm13, %v3922_v8  ;;  %vm10750_vm13 = vmmov %vm10746_vm2  ;;  %vm10753_vm2 = vcmask 490944   ;;  %v8666_v8 = vld [vmem:[#allocation3 + $0xc0] sm:$0xff]   ;;  %v4342_v13 = vrot.slane %v4340_v42, 1  ;;  %v8687_v2 = vld [vmem:[#allocation2 + $0xc0] sm:$0xfe]  }
 0x27d   : > { %v3761_v58 = vpop.permute.xlu1 %3760  ;;  %v7127_v16 = vsel %vm10750_vm13, %v7125_v35, %v7126_v24  ;;  %v6131_v23 = vsel %vm10754_vm9, %v6126_v57, %v6130_v27  ;;  %v6861_v35 = vrot.slane %v8678_v7, 1  ;;  %v8686_v18 = vld [vmem:[#allocation2 + $0x74] ss:$0 sps:$4 sm:$0x11]   ;;  %v8683_v45 = vld [vmem:[#allocation3 + $0xc0] sm:$0xfe]  }
 0x27e   : > { %3796 = vst.msk [vmem:[#allocation4 + $0x68] sm:$0xff] %vm10749_vm11, %v3761_v58  ;;  %vm10757_vm11 = vcmask 589344   ;;  %v4773_v58 = vshll.u32 %v8681_v11, 16  ;;  %v6044_v3 = vshll.u32 %v8686_v18, 16  ;;  %v7149_v43 = vrot.slane %v8683_v45, 1 }
 0x27f   : > { %v6586_v9 = vpop.permute.xlu0 %6585  ;;  %3764 = vrot.lane.b32.xlu1 %v8659_v22, %s8721_s30  ;;  %v4343_v22 = vsel %vm10760_vm15, %v4338_v5, %v4342_v13  ;;  %v8690_v29 = vld [vmem:[#allocation3 + $0x74] ss:$0 sps:$4 sm:$0x11]   ;;  %v8688_v27 = vld [vmem:[#allocation2 + $0xc8] ss:$0 sps:$4 sm:$0x11]   ;;  %s255_s30 = scalar_lea.vmem %s10505_s5, %s8022_s25 }
 0x280   : > { %6878 = vrot.lane.b32.xlu0 %v6838_v48, %s8726_s11  ;;  %6630 = vst.msk [vmem:[#allocation4 + $0x20] sm:$0xff] %vm6625_vm14, %v6586_v9  ;;  %v8680_v48 = vld [vmem:[#allocation3 + $0xc0] sm:$0xff]   ;;  %v8685_v9 = vld [vmem:[#allocation2 + $0x6c] sm:$0xff]   ;;  %v6046_v40 = vrot.slane %v6044_v3, 1  ;;  %v6477_v63 = vshll.u32 %v8690_v29, 16  ;;  %v4775_v57 = vrot.slane %v4773_v58, 1 }
 0x281   : > { %v6169_v21 = vpop.permute.xlu1 %6168  ;;  %v4766_v56 = vshrl.u32 %v8680_v48, 16  ;;  %v4768_v6 = vshll.u32 %v8680_v48, 16  ;;  %v6037_v46 = vshrl.u32 %v8685_v9, 16  ;;  %v8693_v28 = vld [vmem:[#allocation2 + $0x6c] sm:$0xfe]  }
 0x282   : > { %6205 = vst.msk [vmem:[#allocation4 + $0x60] sm:$0xff] %vm10753_vm2, %v6169_v21  ;;  %vm10761_vm2 = vcmask 556544   ;;  %v8694_v53 = vld [vmem:[#allocation2 + $0x74] ss:$0 sps:$4 sm:$0x11]  }
 0x283   : > { %v4355_v54 = vpop.permute.xlu0 %4354  ;;  %6172 = vrot.lane.b32.xlu1 %v6131_v23, %s8725_s10  ;;  %v4770_v25 = vrot.slane %v4768_v6, 1  ;;  %v8696_v7 = vld [vmem:[#allocation3 + $0x6c] sm:$0xfe]   ;;  %v799_v48 = vld [vmem:[#allocation3 + $0xcc] sm:$0x1] }
 0x284   : > { %4791 = vrot.lane.b32.xlu0 %v4680_v37, %s8730_s22  ;;  %4398 = vst.msk [vmem:[#allocation4 + $0x28] sm:$0xff] %vm10748_vm8, %v4355_v54  ;;  %vm10756_vm8 = vmmov %vm10750_vm13  ;;  %v6039_v37 = vshll.u32 %v8685_v9, 16  ;;  %v8692_v9 = vld [vmem:[#allocation3 + $0xc8] ss:$0 sps:$4 sm:$0x11]   ;;  %v7128_v5 = vrot.slane %v8696_v7, 1 }
 0x285   : > { %v3938_v17 = vpop.permute.xlu1 %3937  ;;  %v5330_v39 = vsel %vm10756_vm8, %v5328_v0, %v5329_v36  ;;  %vm10758_vm13 = vmmov %vm10754_vm9  ;;  %v4771_v32 = vor.u32 %v4770_v25, %v4766_v56  ;;  %v6479_v0 = vrot.slane %v6477_v63, 1  ;;  %v738_v13 = vld [vmem:[#allocation2 + $0xd4] sm:$0x1]  ;;  %v853_v6 = vld [vmem:[#allocation3 + $0xd4] sm:$0x1]  ;;  %v5353_v18 = vrot.slane %v8692_v9, 1 }
 0x286   : > { %3973 = vst.msk [vmem:[#allocation4 + $0x68] sm:$0xff] %vm10755_vm10, %v3938_v17  ;;  %v6564_v54 = vsel %vm10758_vm13, %v6559_v34, %v6563_v4  ;;  %v6041_v55 = vrot.slane %v6039_v37, 1  ;;  %vm10762_vm9 = vmmov %vm10756_vm8  ;;  %vm10764_vm8 = vcmask 195744   ;;  %v682_v17 = vld [vmem:[#allocation2 + $0xcc] sm:$0x1]  ;;  %v800_v34 = vsel %vm8796_vm5, 0, %v799_v48 }
 0x287   : > { %v6875_v38 = vpop.permute.xlu0 %6874  ;;  %3941 = vrot.lane.b32.xlu1 %v8666_v8, %s8727_s17  ;;  %v6862_v19 = vsel %vm10762_vm9, %v6860_v12, %v6861_v35  ;;  %vm10763_vm10 = vmmov %vm10758_vm13  ;;  %v683_v8 = vsel %vm8796_vm5, 0, %v682_v17  ;;  %v5064_v4 = vrot.slane %v8688_v27, 1  ;;  %801 = vst [vmem:[#allocation3 + $0xcc] sm:$0x1] %v800_v34  ;;  %v739_v56 = vsel %vm8809_vm7, 0, %v738_v13 }
 0x288   : > { %7167 = vrot.lane.b32.xlu0 %v7127_v16, %s8731_s23  ;;  %6919 = vst.msk [vmem:[#allocation4 + $0x20] sm:$0xff] %vm10751_vm12, %v6875_v38  ;;  %vm10759_vm12 = vcmask 294144   ;;  %v8684_v16 = vld [vmem:[#allocation3 + $0xc8] ss:$0 sps:$4 sm:$0x11]   ;;  %v6042_v61 = vor.u32 %v6041_v55, %v6037_v46  ;;  %vm10766_vm13 = vmmov %vm10763_vm10  ;;  %vm10770_vm5 = vcmask 228544  }
 0x289   : > { %v7150_v20 = vrot.slane %v8684_v16, 1  ;;  %v4776_v49 = vsel %vm10766_vm13, %v4771_v32, %v4775_v57  ;;  %684 = vst [vmem:[#allocation2 + $0xcc] sm:$0x1] %v683_v8  ;;  %vm10768_vm15 = vmmov %vm10762_vm9  ;;  %vm10775_vm13 = vcmask 261344  }
 0x28a   : > { %v6602_v15 = vpop.permute.xlu1 %6601  ;;  %v6047_v21 = vsel %vm10763_vm10, %v6042_v61, %v6046_v40  ;;  %740 = vst [vmem:[#allocation2 + $0xd4] sm:$0x1] %v739_v56 }
 0x28b   : > { %v4788_v52 = vpop.permute.xlu0 %4787  ;;  %6638 = vst.msk [vmem:[#allocation4 + $0x60] sm:$0xff] %vm6625_vm14, %v6602_v15  ;;  %6605 = vrot.lane.b32.xlu1 %v6564_v54, %s8732_s24  ;;  %v8697_v15 = vld [vmem:[#allocation3 + $0x74] ss:$0 sps:$4 sm:$0x11]   ;;  %v7151_v12 = vsel %vm10762_vm9, %v7149_v43, %v7150_v20 }
 0x28c   : > { %5080 = vrot.lane.b32.xlu0 %v5041_v51, %s8723_s8  ;;  %4831 = vst.msk [vmem:[#allocation4 + $0x28] sm:$0xff] %vm4825_vm4, %v4788_v52  ;;  %v6474_v51 = vrot.slane %v6472_v31, 1  ;;  %v7129_v1 = vrot.slane %v8697_v15, 1  ;;  %v10428_v15 = vld [vmem:[%s10503_s3] sm:$0x3] }
 0x28d   : > { %8111 = vmatprep.mubr.msk.bf16.mxu1 %vm7237_vm6, %v10428_v15 }
 0x28e   : > { %v4371_v47 = vpop.permute.xlu1 %4370  ;;  %v6475_v60 = vor.u32 %v6474_v51, %v6470_v41  ;;  %v8701_v25 = vld [vmem:[#allocation3 + $0xcc] sm:$0xff]  }
 0x28f   : > { %v7164_v44 = vpop.permute.xlu0 %7163  ;;  %4406 = vst.msk [vmem:[#allocation4 + $0x68] sm:$0xff] %vm10759_vm12, %v4371_v47  ;;  %4374 = vrot.lane.b32.xlu1 %v4343_v22, %s8722_s6  ;;  %vm10767_vm12 = vcmask 589344   ;;  %v854_v47 = vsel %vm8809_vm7, 0, %v853_v6  ;;  %vm10773_vm7 = vcmask 490944  }
 0x290   : > { %5369 = vrot.lane.b32.xlu0 %v5330_v39, %s8728_s20  ;;  %7208 = vst.msk [vmem:[#allocation4 + $0x20] sm:$0xff] %vm10757_vm11, %v7164_v44  ;;  %vm10765_vm11 = vmmov %vm10763_vm10  ;;  %v6839_v39 = vrot.slane %v8693_v28, 1  ;;  %v6840_v44 = vrot.slane %v8694_v53, 1  ;;  %v8699_v14 = vld [vmem:[#allocation2 + $0xcc] sm:$0xff]  }
 0x291   : > { %v6480_v30 = vsel %vm10765_vm11, %v6475_v60, %v6479_v0  ;;  %855 = vst [vmem:[#allocation3 + $0xd4] sm:$0x1] %v854_v47  ;;  %vm10771_vm10 = vmmov %vm10762_vm9  ;;  %v6135_v55 = vshll.u32 %v8699_v14, 16  ;;  %v8700_v58 = vld [vmem:[#allocation2 + $0xd4] ss:$0 sps:$4 sm:$0x11]  }
 0x292   : > { %v6841_v62 = vsel %vm10768_vm15, %v6839_v39, %v6840_v44  ;;  %v8695_v16 = vld [vmem:[#allocation2 + $0xcc] sm:$0xff]   ;;  %v6133_v61 = vshrl.u32 %v8699_v14, 16  ;;  %v6140_v40 = vshll.u32 %v8700_v58, 16  ;;  %v8704_v20 = vld [vmem:[#allocation2 + $0xd4] ss:$0 sps:$4 sm:$0x11]  }
 0x293   : > { %v5077_v26 = vpop.permute.xlu0 %5076  ;;  %6894 = vrot.lane.b32.xlu1 %v6862_v19, %s8726_s11  ;;  %v6137_v45 = vrot.slane %v6135_v55, 1  ;;  %v8698_v19 = vld [vmem:[#allocation3 + $0xcc] sm:$0xff]  }
 0x294   : > { %5547 = vrot.lane.b32.xlu0 %v8679_v33, %s8724_s9  ;;  %5120 = vst.msk [vmem:[#allocation4 + $0x28] sm:$0xff] %vm5114_vm3, %v5077_v26  ;;  %v5063_v33 = vrot.slane %v8687_v2, 1  ;;  %v8691_v26 = vld [vmem:[#allocation3 + $0xc0] sm:$0xfe]   ;;  %v6142_v57 = vrot.slane %v6140_v40, 1 }
 0x295   : > { %v6138_v63 = vor.u32 %v6137_v45, %v6133_v61 }
 0x296   : > { %v5065_v46 = vsel %vm10771_vm10, %v5063_v33, %v5064_v4 }
 0x297   : > { %v5366_v24 = vpop.permute.xlu0 %5365  ;;  %4807 = vrot.lane.b32.xlu1 %v4776_v49, %s8730_s22 }
 0x298   : > { %5725 = vrot.lane.b32.xlu0 %v8682_v50, %s8729_s21  ;;  %5409 = vst.msk [vmem:[#allocation4 + $0x28] sm:$0xff] %vm5403_vm0, %v5366_v24  ;;  %v7224_v50 = vld [vmem:[#allocation4 + $0x20] sm:$0xff]  ;;  %v5352_v24 = vrot.slane %v8691_v26, 1  ;;  %v8706_v39 = vld [vmem:[#allocation3 + $0xd4] ss:$0 sps:$4 sm:$0x11]  }
 0x299   : > { %v6891_v38 = vpop.permute.xlu1 %6890  ;;  %v7254_v22 = vsel %vm7237_vm6, %v7224_v50, 0  ;;  %v7153_v7 = vrot.slane %v8706_v39, 1 }
 0x29a   : > { %6927 = vst.msk [vmem:[#allocation4 + $0x60] sm:$0xff] %vm10761_vm2, %v6891_v38  ;;  %vm10769_vm2 = vcmask 458144   ;;  %v8702_v38 = vld [vmem:[#allocation3 + $0xd4] ss:$0 sps:$4 sm:$0x11]  }
 0x29b   : > { %v5544_v59 = vpop.permute.xlu0 %5543  ;;  %7183 = vrot.lane.b32.xlu1 %v7151_v12, %s8731_s23  ;;  %vm10777_vm15 = vmmov %vm10769_vm2 }
 0x29c   : > { %5587 = vst.msk [vmem:[#allocation4 + $0x28] sm:$0xff] %vm5581_vm1, %v5544_v59  ;;  %6158 = vrot.lane.b32.xlu0 %v6047_v21, %s8725_s10  ;;  %v6568_v59 = vshll.u32 %v8701_v25, 16  ;;  %v6566_v21 = vshrl.u32 %v8701_v25, 16 }
 0x29e   : > { %v4804_v52 = vpop.permute.xlu1 %4803  ;;  %v6570_v2 = vrot.slane %v6568_v59, 1 }
 0x29f   : > { %4839 = vst.msk [vmem:[#allocation4 + $0x68] sm:$0xff] %vm4825_vm4, %v4804_v52  ;;  %5096 = vrot.lane.b32.xlu1 %v5065_v46, %s8723_s8  ;;  %v6573_v52 = vshll.u32 %v8702_v38, 16 }
 0x2a0   : > { %6591 = vrot.lane.b32.xlu0 %v6480_v30, %s8732_s24  ;;  %v6571_v27 = vor.u32 %v6570_v2, %v6566_v21  ;;  %v8705_v30 = vld [vmem:[#allocation3 + $0xcc] sm:$0xfe]  }
 0x2a1   : > { %v6575_v0 = vrot.slane %v6573_v52, 1 }
 0x2a2   : > { %v3570_v36 = vpop.permute.xlu0 %3569 }
 0x2a3   : > { %3612 = vst.msk [vmem:[#allocation4 + $0x30] sm:$0xff] %vm10764_vm8, %v3570_v36  ;;  %vm10772_vm8 = vmmov %vm10762_vm9  ;;  %v8703_v36 = vld [vmem:[#allocation2 + $0xcc] sm:$0xfe]   ;;  %vm10779_vm9 = vcmask 294144  }
 0x2a4   : > { %6880 = vrot.lane.b32.xlu0 %v6841_v62, %s8726_s11  ;;  %v7130_v37 = vsel %vm10772_vm8, %v7128_v5, %v7129_v1  ;;  %vm10774_vm11 = vmmov %vm10772_vm8  ;;  %v6863_v33 = vrot.slane %v8703_v36, 1  ;;  %vm10781_vm8 = vcmask 556544  }
 0x2a5   : > { %v7180_v23 = vpop.permute.xlu1 %7179  ;;  %v5354_v41 = vsel %vm10774_vm11, %v5352_v24, %v5353_v18 }
 0x2a6   : > { %7216 = vst.msk [vmem:[#allocation4 + $0x60] sm:$0xff] %vm10767_vm12, %v7180_v23  ;;  %v5722_v42 = vpop.permute.xlu0 %5721  ;;  %5385 = vrot.lane.b32.xlu1 %v5354_v41, %s8728_s20  ;;  %vm10776_vm12 = vcmask 195744   ;;  %v6864_v23 = vrot.slane %v8704_v20, 1 }
 0x2a7   : > { %5765 = vst.msk [vmem:[#allocation4 + $0x28] sm:$0xff] %vm10769_vm2, %v5722_v42  ;;  %vm10778_vm2 = vsmask.f32 7424  ;;  %v7152_v42 = vrot.slane %v8705_v30, 1 }
 0x2a8   : > { %7169 = vrot.lane.b32.xlu0 %v7130_v37, %s8731_s23  ;;  %v6143_v43 = vsel %vm10778_vm2, %v6138_v63, %v6142_v57  ;;  %vm10780_vm10 = vmmov %vm10778_vm2  ;;  %v6865_v49 = vsel %vm10774_vm11, %v6863_v33, %v6864_v23 }
 0x2a9   : > { %v5093_v11 = vpop.permute.xlu1 %5092  ;;  %v6576_v17 = vsel %vm10780_vm10, %v6571_v27, %v6575_v0  ;;  %vm10784_vm2 = vmmov %vm10779_vm9 }
 0x2aa   : > { %5128 = vst.msk [vmem:[#allocation4 + $0x68] sm:$0xff] %vm5114_vm3, %v5093_v11  ;;  %v3747_v10 = vpop.permute.xlu0 %3746  ;;  %5563 = vrot.lane.b32.xlu1 %v8695_v16, %s8724_s9 }
 0x2ab   : > { %3789 = vst.msk [vmem:[#allocation4 + $0x30] sm:$0xff] %vm10770_vm5, %v3747_v10 }
 0x2ad   : > { %v5382_v54 = vpop.permute.xlu1 %5381  ;;  %v7232_v35 = vld [vmem:[#allocation4 + $0x60] sm:$0xff] }
 0x2ae   : > { %5417 = vst.msk [vmem:[#allocation4 + $0x68] sm:$0xff] %vm5403_vm0, %v5382_v54  ;;  %8197 = vmatprep.subr.msk.bf16.mxu1 %vm7237_vm6, %v7232_v35  ;;  %v6155_v31 = vpop.permute.xlu0 %6154  ;;  %5741 = vrot.lane.b32.xlu1 %v8698_v19, %s8729_s21 }
 0x2af   : > { %8104 = vmatpush3.bf16.xpose.msra.mxu1 %v7254_v22  ;;  %6198 = vst.msk [vmem:[#allocation4 + $0x28] sm:$0xff] %vm10773_vm7, %v6155_v31 }
 0x2b1   : > { %v5560_v3 = vpop.permute.xlu1 %5559 }
 0x2b2   : > { %5595 = vst.msk [vmem:[#allocation4 + $0x68] sm:$0xff] %vm5581_vm1, %v5560_v3  ;;  %v3924_v29 = vpop.permute.xlu0 %3923  ;;  %6174 = vrot.lane.b32.xlu1 %v6143_v43, %s8725_s10 }
 0x2b3   : > { %3966 = vst.msk [vmem:[#allocation4 + $0x30] sm:$0xff] %vm10775_vm13, %v3924_v29 }
 0x2b5   : > { %v3586_v51 = vpop.permute.xlu1 %3585 }
 0x2b6   : > { %3620 = vst.msk [vmem:[#allocation4 + $0x70] sm:$0xff] %vm10776_vm12, %v3586_v51  ;;  %v6588_v60 = vpop.permute.xlu0 %6587  ;;  %6607 = vrot.lane.b32.xlu1 %v6576_v17, %s8732_s24  ;;  %vm10782_vm12 = vmmov %vm10774_vm11  ;;  %vm10790_vm11 = vcmask 490944  }
 0x2b7   : > { %6631 = vst.msk [vmem:[#allocation4 + $0x28] sm:$0xff] %vm6625_vm14, %v6588_v60  ;;  %v7154_v34 = vsel %vm10782_vm12, %v7152_v42, %v7153_v7  ;;  %vm10791_vm12 = vmmov %vm10784_vm2 }
 0x2b9   : > { %v5738_v32 = vpop.permute.xlu1 %5737 }
 0x2ba   : > { %5773 = vst.msk [vmem:[#allocation4 + $0x68] sm:$0xff] %vm10777_vm15, %v5738_v32  ;;  %v4357_v28 = vpop.permute.xlu0 %4356  ;;  %6896 = vrot.lane.b32.xlu1 %v6865_v49, %s8726_s11  ;;  %vm10783_vm15 = vcmask 589344  }
 0x2bb   : > { %4399 = vst.msk [vmem:[#allocation4 + $0x30] sm:$0xff] %vm10779_vm9, %v4357_v28  ;;  %vm10785_vm9 = vmmov %vm10781_vm8 }
 0x2bc   : > { %vm10787_vm10 = vmmov %vm10783_vm15 }
 0x2bd   : > { %v3763_v53 = vpop.permute.xlu1 %3762 }
 0x2be   : > { %3797 = vst.msk [vmem:[#allocation4 + $0x70] sm:$0xff] %vm10770_vm5, %v3763_v53  ;;  %v6877_v44 = vpop.permute.xlu0 %6876  ;;  %7185 = vrot.lane.b32.xlu1 %v7154_v34, %s8731_s23  ;;  %vm10786_vm5 = vcmask 195744  }
 0x2bf   : > { %6920 = vst.msk [vmem:[#allocation4 + $0x28] sm:$0xff] %vm10781_vm8, %v6877_v44  ;;  %vm10788_vm8 = vcmask 458144  }
 0x2c1   : > { %v6171_v8 = vpop.permute.xlu1 %6170 }
 0x2c2   : > { %6206 = vst.msk [vmem:[#allocation4 + $0x68] sm:$0xff] %vm10773_vm7, %v6171_v8  ;;  %v4790_v48 = vpop.permute.xlu0 %4789  ;;  %vm10789_vm7 = vcmask 228544  }
 0x2c3   : > { %4832 = vst.msk [vmem:[#allocation4 + $0x30] sm:$0xff] %vm4825_vm4, %v4790_v48 }
 0x2c5   : > { %v3940_v62 = vpop.permute.xlu1 %3939 }
 0x2c6   : > { %3974 = vst.msk [vmem:[#allocation4 + $0x70] sm:$0xff] %vm10775_vm13, %v3940_v62  ;;  %v7166_v4 = vpop.permute.xlu0 %7165 }
 0x2c7   : > { %7209 = vst.msk [vmem:[#allocation4 + $0x28] sm:$0xff] %vm10783_vm15, %v7166_v4  ;;  %vm10792_vm15 = vmmov %vm10785_vm9 }
 0x2c9   : > { %v6604_v26 = vpop.permute.xlu1 %6603 }
 0x2ca   : > { %6639 = vst.msk [vmem:[#allocation4 + $0x68] sm:$0xff] %vm6625_vm14, %v6604_v26  ;;  %v5079_v9 = vpop.permute.xlu0 %5078 }
 0x2cb   : > { %5121 = vst.msk [vmem:[#allocation4 + $0x30] sm:$0xff] %vm5114_vm3, %v5079_v9 }
 0x2cd   : > { %v4373_v5 = vpop.permute.xlu1 %4372 }
 0x2ce   : > { %4407 = vst.msk [vmem:[#allocation4 + $0x70] sm:$0xff] %vm10784_vm2, %v4373_v5  ;;  %v5368_v13 = vpop.permute.xlu0 %5367  ;;  %v7225_v46 = vld [vmem:[#allocation4 + $0x28] sm:$0xff]  ;;  %vm10793_vm2 = vmmov %vm10786_vm5 }
 0x2cf   : > { %5410 = vst.msk [vmem:[#allocation4 + $0x30] sm:$0xff] %vm5403_vm0, %v5368_v13  ;;  %v7257_v35 = vsel %vm7237_vm6, %v7225_v46, 0 }
 0x2d1   : > { %v6893_v11 = vpop.permute.xlu1 %6892 }
 0x2d2   : > { %6928 = vst.msk [vmem:[#allocation4 + $0x68] sm:$0xff] %vm10785_vm9, %v6893_v11  ;;  %v5546_v1 = vpop.permute.xlu0 %5545  ;;  %vm10794_vm9 = vmmov %vm10788_vm8 }
 0x2d3   : > { %5588 = vst.msk [vmem:[#allocation4 + $0x30] sm:$0xff] %vm5581_vm1, %v5546_v1 }
 0x2d5   : > { %v4806_v56 = vpop.permute.xlu1 %4805 }
 0x2d6   : > { %v3572_v6 = vpop.permute.xlu0 %3571  ;;  %4840 = vst.msk [vmem:[#allocation4 + $0x70] sm:$0xff] %vm4825_vm4, %v4806_v56 }
 0x2d7   : > { %3613 = vst.msk [vmem:[#allocation4 + $0x38] sm:$0xff] %vm10786_vm5, %v3572_v6  ;;  %vm10795_vm5 = vmmov %vm10787_vm10 }
 0x2d9   : > { %v7182_v12 = vpop.permute.xlu1 %7181 }
 0x2da   : > { %v5724_v10 = vpop.permute.xlu0 %5723  ;;  %7217 = vst.msk [vmem:[#allocation4 + $0x68] sm:$0xff] %vm10787_vm10, %v7182_v12  ;;  %vm10796_vm10 = vmmov %vm10789_vm7 }
 0x2db   : > { %5766 = vst.msk [vmem:[#allocation4 + $0x30] sm:$0xff] %vm10788_vm8, %v5724_v10  ;;  %vm10797_vm8 = vmmov %vm10790_vm11 }
 0x2dd   : > { %v5095_v47 = vpop.permute.xlu1 %5094 }
 0x2de   : > { %v3749_v50 = vpop.permute.xlu0 %3748  ;;  %5129 = vst.msk [vmem:[#allocation4 + $0x70] sm:$0xff] %vm5114_vm3, %v5095_v47 }
 0x2df   : > { %3790 = vst.msk [vmem:[#allocation4 + $0x38] sm:$0xff] %vm10789_vm7, %v3749_v50  ;;  %vm10798_vm7 = vmmov %vm10775_vm13 }
 0x2e1   : > { %v5384_v37 = vpop.permute.xlu1 %5383  ;;  %v7233_v54 = vld [vmem:[#allocation4 + $0x68] sm:$0xff] }
 0x2e2   : > { %5418 = vst.msk [vmem:[#allocation4 + $0x70] sm:$0xff] %vm5403_vm0, %v5384_v37  ;;  %8198 = vmatprep.subr.msk.bf16.mxu1 %vm7237_vm6, %v7233_v54  ;;  %v6157_v24 = vpop.permute.xlu0 %6156 }
 0x2e3   : > { %8106 = vmatpush3.bf16.xpose.msra.mxu1 %v7257_v35  ;;  %6199 = vst.msk [vmem:[#allocation4 + $0x30] sm:$0xff] %vm10790_vm11, %v6157_v24  ;;  %vm10799_vm11 = vmmov %vm10794_vm9 }
 0x2e5   : > { %v5562_v55 = vpop.permute.xlu1 %5561 }
 0x2e6   : > { %v3926_v18 = vpop.permute.xlu0 %3925  ;;  %5596 = vst.msk [vmem:[#allocation4 + $0x70] sm:$0xff] %vm5581_vm1, %v5562_v55 }
 0x2e7   : > { %3967 = vst.msk [vmem:[#allocation4 + $0x38] sm:$0xff] %vm10775_vm13, %v3926_v18  ;;  %vm10800_vm13 = vmmov %vm10791_vm12 }
 0x2e9   : > { %v3588_v25 = vpop.permute.xlu1 %3587 }
 0x2ea   : > { %v6590_v14 = vpop.permute.xlu0 %6589  ;;  %3621 = vst.msk [vmem:[#allocation4 + $0x78] sm:$0xff] %vm10793_vm2, %v3588_v25  ;;  %vm10802_vm2 = vmmov %vm10792_vm15 }
 0x2eb   : > { %6632 = vst.msk [vmem:[#allocation4 + $0x30] sm:$0xff] %vm6625_vm14, %v6590_v14 }
 0x2ed   : > { %v5740_v3 = vpop.permute.xlu1 %5739 }
 0x2ee   : > { %v4359_v22 = vpop.permute.xlu0 %4358  ;;  %5774 = vst.msk [vmem:[#allocation4 + $0x70] sm:$0xff] %vm10794_vm9, %v5740_v3  ;;  %vm10803_vm9 = vmmov %vm10795_vm5 }
 0x2ef   : > { %4400 = vst.msk [vmem:[#allocation4 + $0x38] sm:$0xff] %vm10791_vm12, %v4359_v22  ;;  %vm10801_vm12 = vmmov %vm10797_vm8 }
 0x2f1   : > { %v3765_v16 = vpop.permute.xlu1 %3764 }
 0x2f2   : > { %v6879_v31 = vpop.permute.xlu0 %6878  ;;  %3798 = vst.msk [vmem:[#allocation4 + $0x78] sm:$0xff] %vm10796_vm10, %v3765_v16  ;;  %vm10805_vm10 = vmmov %vm10797_vm8 }
 0x2f3   : > { %6921 = vst.msk [vmem:[#allocation4 + $0x30] sm:$0xff] %vm10792_vm15, %v6879_v31 }
 0x2f5   : > { %v6173_v61 = vpop.permute.xlu1 %6172 }
 0x2f6   : > { %v4792_v58 = vpop.permute.xlu0 %4791  ;;  %6207 = vst.msk [vmem:[#allocation4 + $0x70] sm:$0xff] %vm10797_vm8, %v6173_v61 }
 0x2f7   : > { %4833 = vst.msk [vmem:[#allocation4 + $0x38] sm:$0xff] %vm4825_vm4, %v4792_v58 }
 0x2f9   : > { %v3942_v40 = vpop.permute.xlu1 %3941 }
 0x2fa   : > { %v7168_v41 = vpop.permute.xlu0 %7167  ;;  %3975 = vst.msk [vmem:[#allocation4 + $0x78] sm:$0xff] %vm10798_vm7, %v3942_v40 }
 0x2fb   : > { %7210 = vst.msk [vmem:[#allocation4 + $0x30] sm:$0xff] %vm10795_vm5, %v7168_v41 }
 0x2fd   : > { %v6606_v29 = vpop.permute.xlu1 %6605 }
 0x2fe   : > { %v5081_v38 = vpop.permute.xlu0 %5080  ;;  %6640 = vst.msk [vmem:[#allocation4 + $0x70] sm:$0xff] %vm6625_vm14, %v6606_v29 }
 0x2ff   : > { %5122 = vst.msk [vmem:[#allocation4 + $0x38] sm:$0xff] %vm5114_vm3, %v5081_v38 }
 0x301   : > { %v4375_v19 = vpop.permute.xlu1 %4374 }
 0x302   : > { %v5370_v45 = vpop.permute.xlu0 %5369  ;;  %4408 = vst.msk [vmem:[#allocation4 + $0x78] sm:$0xff] %vm10800_vm13, %v4375_v19  ;;  %v7226_v27 = vld [vmem:[#allocation4 + $0x30] sm:$0xff] }
 0x303   : > { %5411 = vst.msk [vmem:[#allocation4 + $0x38] sm:$0xff] %vm5403_vm0, %v5370_v45  ;;  %v7260_v20 = vsel %vm7237_vm6, %v7226_v27, 0 }
 0x305   : > { %v6895_v63 = vpop.permute.xlu1 %6894 }
 0x306   : > { %v5548_v59 = vpop.permute.xlu0 %5547  ;;  %6929 = vst.msk [vmem:[#allocation4 + $0x70] sm:$0xff] %vm10792_vm15, %v6895_v63 }
 0x307   : > { %5589 = vst.msk [vmem:[#allocation4 + $0x38] sm:$0xff] %vm5581_vm1, %v5548_v59 }
 0x309   : > { %v4808_v2 = vpop.permute.xlu1 %4807 }
 0x30a   : > { %v5726_v51 = vpop.permute.xlu0 %5725  ;;  %4841 = vst.msk [vmem:[#allocation4 + $0x78] sm:$0xff] %vm4825_vm4, %v4808_v2  ;;  %vm10804_vm4 = vmmov %vm10799_vm11 }
 0x30b   : > { %5767 = vst.msk [vmem:[#allocation4 + $0x38] sm:$0xff] %vm10799_vm11, %v5726_v51 }
 0x30d   : > { %v7184_v60 = vpop.permute.xlu1 %7183 }
 0x30e   : > { %v6159_v21 = vpop.permute.xlu0 %6158  ;;  %7218 = vst.msk [vmem:[#allocation4 + $0x70] sm:$0xff] %vm10803_vm9, %v7184_v60 }
 0x30f   : > { %6200 = vst.msk [vmem:[#allocation4 + $0x38] sm:$0xff] %vm10801_vm12, %v6159_v21 }
 0x311   : > { %v5097_v43 = vpop.permute.xlu1 %5096 }
 0x312   : > { %v6592_v57 = vpop.permute.xlu0 %6591  ;;  %5130 = vst.msk [vmem:[#allocation4 + $0x78] sm:$0xff] %vm5114_vm3, %v5097_v43  ;;  %vm10807_vm3 = vmmov %vm10795_vm5 }
 0x313   : > { %6633 = vst.msk [vmem:[#allocation4 + $0x38] sm:$0xff] %vm6625_vm14, %v6592_v57 }
 0x315   : > { %v7234_v36 = vld [vmem:[#allocation4 + $0x70] sm:$0xff] }
 0x316   : > { %v6881_v52 = vpop.permute.xlu0 %6880  ;;  %8199 = vmatprep.subr.msk.bf16.mxu1 %vm7237_vm6, %v7234_v36 }
 0x317   : > { %6922 = vst.msk [vmem:[#allocation4 + $0x38] sm:$0xff] %vm10802_vm2, %v6881_v52  ;;  %8108 = vmatpush3.bf16.xpose.msra.mxu1 %v7260_v20 }
 0x318   : > { %v5386_v0 = vpop.permute.xlu1 %5385 }
 0x319   : > { %5419 = vst.msk [vmem:[#allocation4 + $0x78] sm:$0xff] %vm5403_vm0, %v5386_v0  ;;  %vm10806_vm0 = vmmov %vm10802_vm2 }
 0x31a   : > { %v7170_v32 = vpop.permute.xlu0 %7169 }
 0x31b   : > { %7211 = vst.msk [vmem:[#allocation4 + $0x38] sm:$0xff] %vm10795_vm5, %v7170_v32 }
 0x31c   : > { %v5564_v28 = vpop.permute.xlu1 %5563 }
 0x31d   : > { %5597 = vst.msk [vmem:[#allocation4 + $0x78] sm:$0xff] %vm5581_vm1, %v5564_v28  ;;  %vm7344_vm1 = vcmask 1043456  }
 0x320   : > { %v5742_v53 = vpop.permute.xlu1 %5741 }
 0x321   : > { %5775 = vst.msk [vmem:[#allocation4 + $0x78] sm:$0xff] %vm10804_vm4, %v5742_v53 }
 0x322   : > { %v7227_v39 = vld [vmem:[#allocation4 + $0x38] sm:$0xff] }
 0x323   : > { %v7263_v8 = vsel %vm7237_vm6, %v7227_v39, 0 }
 0x324   : > { %v6175_v30 = vpop.permute.xlu1 %6174 }
 0x325   : > { %6208 = vst.msk [vmem:[#allocation4 + $0x78] sm:$0xff] %vm10805_vm10, %v6175_v30 }
 0x328   : > { %v6608_v17 = vpop.permute.xlu1 %6607 }
 0x329   : > { %6641 = vst.msk [vmem:[#allocation4 + $0x78] sm:$0xff] %vm6625_vm14, %v6608_v17  ;;  %vm7357_vm14 = vcmask 7168  }
 0x32c   : > { %v6897_v33 = vpop.permute.xlu1 %6896 }
 0x32d   : > { %6930 = vst.msk [vmem:[#allocation4 + $0x78] sm:$0xff] %vm10806_vm0, %v6897_v33 }
 0x330   : > { %v7186_v23 = vpop.permute.xlu1 %7185 }
 0x331   : > { %7219 = vst.msk [vmem:[#allocation4 + $0x78] sm:$0xff] %vm10807_vm3, %v7186_v23 }
 0x338   : > { %v7235_v44 = vld [vmem:[#allocation4 + $0x78] sm:$0xff] }
 0x339   : > { %8200 = vmatprep.subr.msk.bf16.mxu1 %vm7237_vm6, %v7235_v44 }
 0x33a   : > { %8110 = vmatpush3.bf16.xpose.msra.mxu1 %v7263_v8 }
 0x341   : > { %8112 = vmatmul.mubr.msk.bf16.vlgmr.msra.gmra.mrb[0].mxu1 %vm7237_vm6, %v10428_v15  ;;  %vm7359_vm6 = vcmask 11264  }
 0x414   : > { %v7323_v49 = vpop.f32.mrb[0].mxu1 }
 0x415   : > { %v7345_v42 = vsel %vm7344_vm1, %v7323_v49, 0.0  ;;  %v7350_v7 = vmul.f32 %v7323_v49, %v7323_v49  ;;  %v7325_v48 = vpop.f32.mrb[1].mxu1 }
 0x416   : > { %v8016_v62 = vpack.c.bf16 %v7325_v48, %v7323_v49  ;;  %v7346_v34 = vsel %vm7344_vm1, %v7325_v48, 0.0  ;;  %v7351_v4 = vmul.f32 %v7325_v48, %v7325_v48  ;;  %v7327_v26 = vpop.f32.mrb[2].mxu1 }
 0x417   : > { %v7328_v9 = vpop.f32.mrb[3].mxu1  ;;  %v7347_v5 = vadd.f32 %v7346_v34, %v7345_v42  ;;  %v7352_v13 = vsel %vm7344_vm1, %v7350_v7, 0.0 }
 0x418   : > { %8017 = vst.sshfl [vmem:[%s251_s28] sm:$0x33 pattern:$0x76325410] %v8016_v62  ;;  %v7353_v11 = vsel %vm7344_vm1, %v7351_v4, 0.0 }
 0x419   : > { %7348 = vadd.xlane.f32.xlu0 %v7347_v5  ;;  %v7354_v15 = vadd.f32 %v7353_v11, %v7352_v13 }
 0x41b   : > { %7355 = vadd.xlane.f32.xlu1 %v7354_v15 }
 0x4a6   : > { %v7349_v1 = vpop.xlane.xlu0 %7348 }
 0x4a8   : > { %v7356_v56 = vpop.xlane.xlu1 %7355 }
 0x4a9   : > { %v7358_v6 = vsel %vm7357_vm14, %v7349_v1, %v7356_v56 }
 0x4aa   : > { %7360 = vst.msk [vmem:[%s255_s30] sm:$0xf] %vm7359_vm6, %v7358_v6 }
 0x4ab PF: > { %s16_s18 = sadd.s32 1, %s8713_s18  }
 0x4ac   : > { %p13_p4 = scmp.ge.s32.totalorder %s16_s18, 4  }
 0x4ae   :  { %15 = sbr.rel (!%p13_p4) target bundleno = 1 (0x1), region = 87 }

</bundles_post_ra>
